<compile_context>
chip_gen: v7x
topology: tpu7x:2x2x1
jax: 0.10.0
libtpu: 0.0.40
codegen_flags: <defaults>
</compile_context>

<pallas_src>
import functools

import jax
import jax.numpy as jnp
from jax.experimental import pallas as pl
from jax.experimental.pallas import tpu as pltpu

EPS = 1e-5  # PyTorch BatchNorm1d default eps


def occnet_kernel(pts_ref, gam_ref, bet_ref,
                  fcp_w_ref, fcp_b_ref,
                  f0w_ref, f0b_ref, f1w_ref, f1b_ref,
                  fow_ref, fob_ref,
                  out_ref, *, n_batch, n_pts, p_dim):
    """Entire decoder: fc_p -> 5x CResnetBlockConv1d -> CBN -> relu -> fc_out."""
    bt = n_batch * n_pts
    inv_n = 1.0 / bt

    def mm(a, b):
        # bf16 MXU inputs, f32 accumulation (weights already bf16 from wrapper).
        return jnp.dot(a.astype(jnp.bfloat16), b,
                       preferred_element_type=jnp.float32)

    def cbn_relu(x, idx):
        # CBatchNorm1d (batch_norm, affine=False) with training-mode batch
        # stats over all B*T rows, computed in a single pass, then the
        # conditional affine (precomputed gamma/beta) + fused ReLU.
        s1 = jnp.sum(x, axis=0, keepdims=True)          # (1, H)
        s2 = jnp.sum(x * x, axis=0, keepdims=True)      # (1, H)
        mean = s1 * inv_n
        var = s2 * inv_n - mean * mean                  # biased variance
        xn = (x - mean) * jax.lax.rsqrt(var + EPS)
        gamma = gam_ref[idx]                            # (B, H) f32
        beta = bet_ref[idx]                             # (B, H) f32
        chunks = []
        for b in range(n_batch):                        # pure VPU broadcast
            xb = xn[b * n_pts:(b + 1) * n_pts, :]       # static (T, H) slice
            chunks.append(jnp.maximum(
                gamma[b:b + 1, :] * xb + beta[b:b + 1, :], 0.0))
        return chunks[0] if n_batch == 1 else jnp.concatenate(chunks, axis=0)

    # fc_p: (B*T, 3) @ (3, H) expressed as p_dim rank-1 VPU FMAs
    # (avoids a ~6%-utilized padded-K MXU call and the p_dim zero padding).
    pts = pts_ref[...]                                  # (B*T, p_dim)
    w_p = fcp_w_ref[...]                                # (p_dim, H)
    net = pts[:, 0:1] * w_p[0:1, :]
    for k in range(1, p_dim):
        net = net + pts[:, k:k + 1] * w_p[k:k + 1, :]
    net = net + fcp_b_ref[...]

    n_blocks = f0w_ref.shape[0]
    for blk in range(n_blocks):
        h = cbn_relu(net, 2 * blk)                      # bn_0 + relu
        h = mm(h, f0w_ref[blk]) + f0b_ref[blk]          # fc_0
        h = cbn_relu(h, 2 * blk + 1)                    # bn_1 + relu
        net = net + mm(h, f1w_ref[blk]) + f1b_ref[blk]  # fc_1 + identity shortcut

    h = cbn_relu(net, 2 * n_blocks)                     # final CBN + relu
    # fc_out, padded to a lane-dense 128-wide output (unmasked stores).
    out_ref[...] = mm(h, fow_ref[...]) + fob_ref[...]


def occnet_decoder(points, feats, params):
    """points: (B, T, p_dim), feats: (B, c_dim) -> (B, T, out_dim)."""
    B, T, P = points.shape
    hidden = params["fcp_w"].shape[1]
    out_dim = params["fow"].shape[1]
    n_blocks = params["f0w"].shape[0]
    BT = B * T
    assert T % 8 == 0 and hidden % 128 == 0, "need sublane/lane aligned shapes"

    f32, bf16 = jnp.float32, jnp.bfloat16
    pts_flat = points.reshape(BT, P).astype(f32)

    # Hoist the conditional gamma/beta projections (depend only on feats and
    # the conv_gamma/conv_beta weights) out of the kernel: (n_cbn, B, hidden).
    feats32 = feats.astype(f32)
    gammas = (jnp.einsum("bc,nch->nbh", feats32, params["gw"])
              + params["gb"]).astype(f32)
    betas = (jnp.einsum("bc,nch->nbh", feats32, params["bw"])
             + params["bb"]).astype(f32)

    # Lane-dense fc_out: pad the output channels up to a multiple of 128 and
    # slice the real columns outside the kernel.
    out_pad = max(128, ((out_dim + 127) // 128) * 128)
    fow_p = jnp.pad(params["fow"], ((0, 0), (0, out_pad - out_dim)))
    fob_p = jnp.pad(params["fob"], ((0, 0), (0, out_pad - out_dim)))

    inputs = [
        pts_flat, gammas, betas,
        params["fcp_w"].astype(f32), params["fcp_b"].astype(f32),
        params["f0w"].astype(bf16), params["f0b"].astype(f32),
        params["f1w"].astype(bf16), params["f1b"].astype(f32),
        fow_p.astype(bf16), fob_p.astype(f32),
    ]

    def full_spec(a):
        nd = a.ndim
        return pl.BlockSpec(a.shape, lambda i, nd=nd: (0,) * nd)

    # Size scoped VMEM from the actual footprint (double-buffered I/O plus
    # activation temporaries); cap at 48 MiB to leave headroom on v7x (64 MiB).
    nbytes = lambda a: a.size * a.dtype.itemsize
    vmem_limit = 2 * (sum(nbytes(a) for a in inputs) + BT * out_pad * 4)
    vmem_limit += 16 * BT * hidden * 4
    vmem_limit = int(min(max(vmem_limit, 16 << 20), 48 << 20))

    kernel = functools.partial(occnet_kernel, n_batch=B, n_pts=T, p_dim=P)
    out_flat = pl.pallas_call(
        kernel,
        grid=(1,),
        in_specs=[full_spec(a) for a in inputs],
        out_specs=pl.BlockSpec((BT, out_pad), lambda i: (0, 0)),
        out_shape=jax.ShapeDtypeStruct((BT, out_pad), jnp.float32),
        compiler_params=pltpu.CompilerParams(
            dimension_semantics=("arbitrary",),
            vmem_limit_bytes=vmem_limit),
    )(*inputs)
    return out_flat[:, :out_dim].reshape(B, T, out_dim)


def init_params(key, p_dim=3, c_dim=32, hidden=128, out_dim=1, n_blocks=5):
    """Deterministic synthetic parameters (weights already in (in, out) layout)."""
    n_cbn = 2 * n_blocks + 1
    ks = jax.random.split(key, 10)

    def rnd(k, shape, scale):
        return scale * jax.random.normal(k, shape, dtype=jnp.float32)

    s = 1.0 / (hidden ** 0.5)
    return dict(
        fcp_w=rnd(ks[0], (p_dim, hidden), 0.5),
        fcp_b=rnd(ks[1], (1, hidden), 0.1),
        gw=rnd(ks[2], (n_cbn, c_dim, hidden), 0.1),
        gb=jnp.ones((n_cbn, 1, hidden), jnp.float32),
        bw=rnd(ks[3], (n_cbn, c_dim, hidden), 0.1),
        bb=jnp.zeros((n_cbn, 1, hidden), jnp.float32),
        f0w=rnd(ks[4], (n_blocks, hidden, hidden), s),
        f0b=rnd(ks[5], (n_blocks, 1, hidden), 0.1),
        f1w=rnd(ks[6], (n_blocks, hidden, hidden), s),
        f1b=rnd(ks[7], (n_blocks, 1, hidden), 0.1),
        fow=rnd(ks[8], (hidden, out_dim), s),
        fob=rnd(ks[9], (1, out_dim), 0.1),
    )


def occnet_reference(points, feats, params):
    """Pure-JAX f32 reference mirroring the PyTorch forward (for validation)."""
    B, T, P = points.shape
    dot = functools.partial(jnp.dot, precision=jax.lax.Precision.HIGHEST)
    x = points.reshape(B * T, P)

    def cbn_relu(h, idx):
        gamma = dot(feats, params["gw"][idx]) + params["gb"][idx]   # (B, H)
        beta = dot(feats, params["bw"][idx]) + params["bb"][idx]    # (B, H)
        mean = h.mean(axis=0, keepdims=True)
        var = ((h - mean) ** 2).mean(axis=0, keepdims=True)
        hn = ((h - mean) / jnp.sqrt(var + EPS)).reshape(B, T, -1)
        out = gamma[:, None, :] * hn + beta[:, None, :]
        return jnp.maximum(out.reshape(B * T, -1), 0.0)

    net = dot(x, params["fcp_w"]) + params["fcp_b"]
    nb = params["f0w"].shape[0]
    for blk in range(nb):
        h = cbn_relu(net, 2 * blk)
        h = dot(h, params["f0w"][blk]) + params["f0b"][blk]
        h = cbn_relu(h, 2 * blk + 1)
        net = net + dot(h, params["f1w"][blk]) + params["f1b"][blk]
    h = cbn_relu(net, 2 * nb)
    out = dot(h, params["fow"]) + params["fob"]
    return out.reshape(B, T, -1)


if __name__ == "__main__":
    B, T, P, C_DIM, HIDDEN, OUT = 2, 128, 3, 32, 128, 1

    key = jax.random.PRNGKey(0)
    kp, kf, kw = jax.random.split(key, 3)
    points = jax.random.normal(kp, (B, T, P), dtype=jnp.float32)   # point coords
    feats = jax.random.normal(kf, (B, C_DIM), dtype=jnp.float32)   # conditioning
    params = init_params(kw, p_dim=P, c_dim=C_DIM, hidden=HIDDEN, out_dim=OUT)

    out = jax.block_until_ready(occnet_decoder(points, feats, params))
    assert out.shape == (B, T, OUT), out.shape

    ref = occnet_reference(points, feats, params)
    max_err = float(jnp.max(jnp.abs(out - ref)))
    # Tolerance sized for bf16 MXU matmul inputs (f32 accumulate) across the
    # 11-layer residual chain; the f32 reference uses Precision.HIGHEST.
    if not bool(jnp.allclose(out, ref, atol=1e-1, rtol=1e-1)):
        raise AssertionError(f"kernel/reference mismatch, max abs err {max_err}")

    print("KERNEL_OK")
</pallas_src>

<mosaic_0001>
module attributes {stable_mosaic.version = 11 : i64} {
  func.func @occnet_kernel(%arg0: i32, %arg1: memref<256x3xf32, #tpu.memory_space<vmem>>, %arg2: memref<11x2x128xf32, #tpu.memory_space<vmem>>, %arg3: memref<11x2x128xf32, #tpu.memory_space<vmem>>, %arg4: memref<3x128xf32, #tpu.memory_space<vmem>>, %arg5: memref<1x128xf32, #tpu.memory_space<vmem>>, %arg6: memref<5x128x128xbf16, #tpu.memory_space<vmem>>, %arg7: memref<5x1x128xf32, #tpu.memory_space<vmem>>, %arg8: memref<5x128x128xbf16, #tpu.memory_space<vmem>>, %arg9: memref<5x1x128xf32, #tpu.memory_space<vmem>>, %arg10: memref<128x128xbf16, #tpu.memory_space<vmem>>, %arg11: memref<1x128xf32, #tpu.memory_space<vmem>>, %arg12: memref<256x128xf32, #tpu.memory_space<vmem>>) attributes {dimension_semantics = [#tpu.dimension_semantics<arbitrary>], iteration_bounds = array<i64: 1>, scalar_prefetch = 0 : i64, scratch_operands = 0 : i64, tpu.core_type = #tpu.core_type<tc>, window_params = [{pipeline_mode = #tpu.pipeline_mode<synchronous>, transform_indices = @transform_0, window_bounds = array<i64: 256, 3>}, {pipeline_mode = #tpu.pipeline_mode<synchronous>, transform_indices = @transform_1, window_bounds = array<i64: 11, 2, 128>}, {pipeline_mode = #tpu.pipeline_mode<synchronous>, transform_indices = @transform_2, window_bounds = array<i64: 11, 2, 128>}, {pipeline_mode = #tpu.pipeline_mode<synchronous>, transform_indices = @transform_3, window_bounds = array<i64: 3, 128>}, {pipeline_mode = #tpu.pipeline_mode<synchronous>, transform_indices = @transform_4, window_bounds = array<i64: 1, 128>}, {pipeline_mode = #tpu.pipeline_mode<synchronous>, transform_indices = @transform_5, window_bounds = array<i64: 5, 128, 128>}, {pipeline_mode = #tpu.pipeline_mode<synchronous>, transform_indices = @transform_6, window_bounds = array<i64: 5, 1, 128>}, {pipeline_mode = #tpu.pipeline_mode<synchronous>, transform_indices = @transform_7, window_bounds = array<i64: 5, 128, 128>}, {pipeline_mode = #tpu.pipeline_mode<synchronous>, transform_indices = @transform_8, window_bounds = array<i64: 5, 1, 128>}, {pipeline_mode = #tpu.pipeline_mode<synchronous>, transform_indices = @transform_9, window_bounds = array<i64: 128, 128>}, {pipeline_mode = #tpu.pipeline_mode<synchronous>, transform_indices = @transform_10, window_bounds = array<i64: 1, 128>}, {pipeline_mode = #tpu.pipeline_mode<synchronous>, transform_indices = @transform_11, window_bounds = array<i64: 256, 128>}]} {
    %c0 = arith.constant 0 : index
    %c0_0 = arith.constant 0 : index
    %0 = vector.load %arg1[%c0, %c0_0] : memref<256x3xf32, #tpu.memory_space<vmem>>, vector<256x3xf32>
    %c0_1 = arith.constant 0 : index
    %c0_2 = arith.constant 0 : index
    %1 = vector.load %arg4[%c0_1, %c0_2] : memref<3x128xf32, #tpu.memory_space<vmem>>, vector<3x128xf32>
    %2 = vector.extract_strided_slice %0 {offsets = [0, 0], sizes = [256, 1], strides = [1, 1]} : vector<256x3xf32> to vector<256x1xf32>
    %3 = vector.extract_strided_slice %1 {offsets = [0, 0], sizes = [1, 128], strides = [1, 1]} : vector<3x128xf32> to vector<1x128xf32>
    %4 = vector.broadcast %2 : vector<256x1xf32> to vector<256x128xf32>
    %5 = vector.broadcast %3 : vector<1x128xf32> to vector<256x128xf32>
    %6 = arith.mulf %4, %5 : vector<256x128xf32>
    %7 = vector.extract_strided_slice %0 {offsets = [0, 1], sizes = [256, 1], strides = [1, 1]} : vector<256x3xf32> to vector<256x1xf32>
    %8 = vector.extract_strided_slice %1 {offsets = [1, 0], sizes = [1, 128], strides = [1, 1]} : vector<3x128xf32> to vector<1x128xf32>
    %9 = vector.broadcast %7 : vector<256x1xf32> to vector<256x128xf32>
    %10 = vector.broadcast %8 : vector<1x128xf32> to vector<256x128xf32>
    %11 = arith.mulf %9, %10 : vector<256x128xf32>
    %12 = arith.addf %6, %11 : vector<256x128xf32>
    %13 = vector.extract_strided_slice %0 {offsets = [0, 2], sizes = [256, 1], strides = [1, 1]} : vector<256x3xf32> to vector<256x1xf32>
    %14 = vector.extract_strided_slice %1 {offsets = [2, 0], sizes = [1, 128], strides = [1, 1]} : vector<3x128xf32> to vector<1x128xf32>
    %15 = vector.broadcast %13 : vector<256x1xf32> to vector<256x128xf32>
    %16 = vector.broadcast %14 : vector<1x128xf32> to vector<256x128xf32>
    %17 = arith.mulf %15, %16 : vector<256x128xf32>
    %18 = arith.addf %12, %17 : vector<256x128xf32>
    %c0_3 = arith.constant 0 : index
    %c0_4 = arith.constant 0 : index
    %19 = vector.load %arg5[%c0_3, %c0_4] : memref<1x128xf32, #tpu.memory_space<vmem>>, vector<1x128xf32>
    %20 = vector.broadcast %19 : vector<1x128xf32> to vector<256x128xf32>
    %21 = arith.addf %18, %20 : vector<256x128xf32>
    %cst = arith.constant dense<0.000000e+00> : vector<128xf32>
    %22 = vector.multi_reduction <add>, %21, %cst [0] : vector<256x128xf32> to vector<128xf32>
    %23 = vector.shape_cast %22 : vector<128xf32> to vector<1x128xf32>
    %24 = arith.mulf %21, %21 : vector<256x128xf32>
    %cst_5 = arith.constant dense<0.000000e+00> : vector<128xf32>
    %25 = vector.multi_reduction <add>, %24, %cst_5 [0] : vector<256x128xf32> to vector<128xf32>
    %26 = vector.shape_cast %25 : vector<128xf32> to vector<1x128xf32>
    %cst_6 = arith.constant 3.906250e-03 : f32
    %27 = vector.broadcast %cst_6 : f32 to vector<1x128xf32>
    %28 = arith.mulf %23, %27 : vector<1x128xf32>
    %cst_7 = arith.constant 3.906250e-03 : f32
    %29 = vector.broadcast %cst_7 : f32 to vector<1x128xf32>
    %30 = arith.mulf %26, %29 : vector<1x128xf32>
    %31 = arith.mulf %28, %28 : vector<1x128xf32>
    %32 = arith.subf %30, %31 : vector<1x128xf32>
    %33 = vector.broadcast %28 : vector<1x128xf32> to vector<256x128xf32>
    %34 = arith.subf %21, %33 : vector<256x128xf32>
    %cst_8 = arith.constant 9.99999974E-6 : f32
    %35 = vector.broadcast %cst_8 : f32 to vector<1x128xf32>
    %36 = arith.addf %32, %35 : vector<1x128xf32>
    %37 = math.rsqrt %36 : vector<1x128xf32>
    %38 = vector.broadcast %37 : vector<1x128xf32> to vector<256x128xf32>
    %39 = arith.mulf %34, %38 : vector<256x128xf32>
    %c0_9 = arith.constant 0 : index
    %c0_10 = arith.constant 0 : index
    %c0_11 = arith.constant 0 : index
    %40 = vector.load %arg2[%c0_9, %c0_10, %c0_11] : memref<11x2x128xf32, #tpu.memory_space<vmem>>, vector<1x2x128xf32>
    %41 = vector.shape_cast %40 : vector<1x2x128xf32> to vector<2x128xf32>
    %c0_12 = arith.constant 0 : index
    %c0_13 = arith.constant 0 : index
    %c0_14 = arith.constant 0 : index
    %42 = vector.load %arg3[%c0_12, %c0_13, %c0_14] : memref<11x2x128xf32, #tpu.memory_space<vmem>>, vector<1x2x128xf32>
    %43 = vector.shape_cast %42 : vector<1x2x128xf32> to vector<2x128xf32>
    %44 = vector.extract_strided_slice %39 {offsets = [0, 0], sizes = [128, 128], strides = [1, 1]} : vector<256x128xf32> to vector<128x128xf32>
    %45 = vector.extract_strided_slice %41 {offsets = [0, 0], sizes = [1, 128], strides = [1, 1]} : vector<2x128xf32> to vector<1x128xf32>
    %46 = vector.broadcast %45 : vector<1x128xf32> to vector<128x128xf32>
    %47 = arith.mulf %46, %44 : vector<128x128xf32>
    %48 = vector.extract_strided_slice %43 {offsets = [0, 0], sizes = [1, 128], strides = [1, 1]} : vector<2x128xf32> to vector<1x128xf32>
    %49 = vector.broadcast %48 : vector<1x128xf32> to vector<128x128xf32>
    %50 = arith.addf %47, %49 : vector<128x128xf32>
    %cst_15 = arith.constant 0.000000e+00 : f32
    %51 = vector.broadcast %cst_15 : f32 to vector<128x128xf32>
    %52 = arith.maximumf %50, %51 : vector<128x128xf32>
    %53 = vector.extract_strided_slice %39 {offsets = [128, 0], sizes = [128, 128], strides = [1, 1]} : vector<256x128xf32> to vector<128x128xf32>
    %54 = vector.extract_strided_slice %41 {offsets = [1, 0], sizes = [1, 128], strides = [1, 1]} : vector<2x128xf32> to vector<1x128xf32>
    %55 = vector.broadcast %54 : vector<1x128xf32> to vector<128x128xf32>
    %56 = arith.mulf %55, %53 : vector<128x128xf32>
    %57 = vector.extract_strided_slice %43 {offsets = [1, 0], sizes = [1, 128], strides = [1, 1]} : vector<2x128xf32> to vector<1x128xf32>
    %58 = vector.broadcast %57 : vector<1x128xf32> to vector<128x128xf32>
    %59 = arith.addf %56, %58 : vector<128x128xf32>
    %cst_16 = arith.constant 0.000000e+00 : f32
    %60 = vector.broadcast %cst_16 : f32 to vector<128x128xf32>
    %61 = arith.maximumf %59, %60 : vector<128x128xf32>
    %62 = tpu.concatenate %52, %61 in 0 : vector<128x128xf32>, vector<128x128xf32> -> vector<256x128xf32>
    %c0_17 = arith.constant 0 : index
    %c0_18 = arith.constant 0 : index
    %c0_19 = arith.constant 0 : index
    %63 = vector.load %arg6[%c0_17, %c0_18, %c0_19] : memref<5x128x128xbf16, #tpu.memory_space<vmem>>, vector<1x128x128xbf16>
    %64 = vector.shape_cast %63 : vector<1x128x128xbf16> to vector<128x128xbf16>
    %65 = arith.truncf %62 : vector<256x128xf32> to vector<256x128xbf16>
    %cst_20 = arith.constant dense<0.000000e+00> : vector<256x128xf32>
    %66 = tpu.matmul %65, %64, %cst_20 {dimension_numbers = #tpu.dot_dimension_numbers<[1], [0], [0], [1], [0, 0, 1, 1], [], []>} : vector<256x128xbf16>, vector<128x128xbf16>, vector<256x128xf32> -> vector<256x128xf32>
    %c0_21 = arith.constant 0 : index
    %c0_22 = arith.constant 0 : index
    %c0_23 = arith.constant 0 : index
    %67 = vector.load %arg7[%c0_21, %c0_22, %c0_23] : memref<5x1x128xf32, #tpu.memory_space<vmem>>, vector<1x1x128xf32>
    %68 = vector.shape_cast %67 : vector<1x1x128xf32> to vector<1x128xf32>
    %69 = vector.broadcast %68 : vector<1x128xf32> to vector<256x128xf32>
    %70 = arith.addf %66, %69 : vector<256x128xf32>
    %cst_24 = arith.constant dense<0.000000e+00> : vector<128xf32>
    %71 = vector.multi_reduction <add>, %70, %cst_24 [0] : vector<256x128xf32> to vector<128xf32>
    %72 = vector.shape_cast %71 : vector<128xf32> to vector<1x128xf32>
    %73 = arith.mulf %70, %70 : vector<256x128xf32>
    %cst_25 = arith.constant dense<0.000000e+00> : vector<128xf32>
    %74 = vector.multi_reduction <add>, %73, %cst_25 [0] : vector<256x128xf32> to vector<128xf32>
    %75 = vector.shape_cast %74 : vector<128xf32> to vector<1x128xf32>
    %cst_26 = arith.constant 3.906250e-03 : f32
    %76 = vector.broadcast %cst_26 : f32 to vector<1x128xf32>
    %77 = arith.mulf %72, %76 : vector<1x128xf32>
    %cst_27 = arith.constant 3.906250e-03 : f32
    %78 = vector.broadcast %cst_27 : f32 to vector<1x128xf32>
    %79 = arith.mulf %75, %78 : vector<1x128xf32>
    %80 = arith.mulf %77, %77 : vector<1x128xf32>
    %81 = arith.subf %79, %80 : vector<1x128xf32>
    %82 = vector.broadcast %77 : vector<1x128xf32> to vector<256x128xf32>
    %83 = arith.subf %70, %82 : vector<256x128xf32>
    %cst_28 = arith.constant 9.99999974E-6 : f32
    %84 = vector.broadcast %cst_28 : f32 to vector<1x128xf32>
    %85 = arith.addf %81, %84 : vector<1x128xf32>
    %86 = math.rsqrt %85 : vector<1x128xf32>
    %87 = vector.broadcast %86 : vector<1x128xf32> to vector<256x128xf32>
    %88 = arith.mulf %83, %87 : vector<256x128xf32>
    %c1 = arith.constant 1 : index
    %c0_29 = arith.constant 0 : index
    %c0_30 = arith.constant 0 : index
    %89 = vector.load %arg2[%c1, %c0_29, %c0_30] : memref<11x2x128xf32, #tpu.memory_space<vmem>>, vector<1x2x128xf32>
    %90 = vector.shape_cast %89 : vector<1x2x128xf32> to vector<2x128xf32>
    %c1_31 = arith.constant 1 : index
    %c0_32 = arith.constant 0 : index
    %c0_33 = arith.constant 0 : index
    %91 = vector.load %arg3[%c1_31, %c0_32, %c0_33] : memref<11x2x128xf32, #tpu.memory_space<vmem>>, vector<1x2x128xf32>
    %92 = vector.shape_cast %91 : vector<1x2x128xf32> to vector<2x128xf32>
    %93 = vector.extract_strided_slice %88 {offsets = [0, 0], sizes = [128, 128], strides = [1, 1]} : vector<256x128xf32> to vector<128x128xf32>
    %94 = vector.extract_strided_slice %90 {offsets = [0, 0], sizes = [1, 128], strides = [1, 1]} : vector<2x128xf32> to vector<1x128xf32>
    %95 = vector.broadcast %94 : vector<1x128xf32> to vector<128x128xf32>
    %96 = arith.mulf %95, %93 : vector<128x128xf32>
    %97 = vector.extract_strided_slice %92 {offsets = [0, 0], sizes = [1, 128], strides = [1, 1]} : vector<2x128xf32> to vector<1x128xf32>
    %98 = vector.broadcast %97 : vector<1x128xf32> to vector<128x128xf32>
    %99 = arith.addf %96, %98 : vector<128x128xf32>
    %cst_34 = arith.constant 0.000000e+00 : f32
    %100 = vector.broadcast %cst_34 : f32 to vector<128x128xf32>
    %101 = arith.maximumf %99, %100 : vector<128x128xf32>
    %102 = vector.extract_strided_slice %88 {offsets = [128, 0], sizes = [128, 128], strides = [1, 1]} : vector<256x128xf32> to vector<128x128xf32>
    %103 = vector.extract_strided_slice %90 {offsets = [1, 0], sizes = [1, 128], strides = [1, 1]} : vector<2x128xf32> to vector<1x128xf32>
    %104 = vector.broadcast %103 : vector<1x128xf32> to vector<128x128xf32>
    %105 = arith.mulf %104, %102 : vector<128x128xf32>
    %106 = vector.extract_strided_slice %92 {offsets = [1, 0], sizes = [1, 128], strides = [1, 1]} : vector<2x128xf32> to vector<1x128xf32>
    %107 = vector.broadcast %106 : vector<1x128xf32> to vector<128x128xf32>
    %108 = arith.addf %105, %107 : vector<128x128xf32>
    %cst_35 = arith.constant 0.000000e+00 : f32
    %109 = vector.broadcast %cst_35 : f32 to vector<128x128xf32>
    %110 = arith.maximumf %108, %109 : vector<128x128xf32>
    %111 = tpu.concatenate %101, %110 in 0 : vector<128x128xf32>, vector<128x128xf32> -> vector<256x128xf32>
    %c0_36 = arith.constant 0 : index
    %c0_37 = arith.constant 0 : index
    %c0_38 = arith.constant 0 : index
    %112 = vector.load %arg8[%c0_36, %c0_37, %c0_38] : memref<5x128x128xbf16, #tpu.memory_space<vmem>>, vector<1x128x128xbf16>
    %113 = vector.shape_cast %112 : vector<1x128x128xbf16> to vector<128x128xbf16>
    %114 = arith.truncf %111 : vector<256x128xf32> to vector<256x128xbf16>
    %cst_39 = arith.constant dense<0.000000e+00> : vector<256x128xf32>
    %115 = tpu.matmul %114, %113, %cst_39 {dimension_numbers = #tpu.dot_dimension_numbers<[1], [0], [0], [1], [0, 0, 1, 1], [], []>} : vector<256x128xbf16>, vector<128x128xbf16>, vector<256x128xf32> -> vector<256x128xf32>
    %116 = arith.addf %21, %115 : vector<256x128xf32>
    %c0_40 = arith.constant 0 : index
    %c0_41 = arith.constant 0 : index
    %c0_42 = arith.constant 0 : index
    %117 = vector.load %arg9[%c0_40, %c0_41, %c0_42] : memref<5x1x128xf32, #tpu.memory_space<vmem>>, vector<1x1x128xf32>
    %118 = vector.shape_cast %117 : vector<1x1x128xf32> to vector<1x128xf32>
    %119 = vector.broadcast %118 : vector<1x128xf32> to vector<256x128xf32>
    %120 = arith.addf %116, %119 : vector<256x128xf32>
    %cst_43 = arith.constant dense<0.000000e+00> : vector<128xf32>
    %121 = vector.multi_reduction <add>, %120, %cst_43 [0] : vector<256x128xf32> to vector<128xf32>
    %122 = vector.shape_cast %121 : vector<128xf32> to vector<1x128xf32>
    %123 = arith.mulf %120, %120 : vector<256x128xf32>
    %cst_44 = arith.constant dense<0.000000e+00> : vector<128xf32>
    %124 = vector.multi_reduction <add>, %123, %cst_44 [0] : vector<256x128xf32> to vector<128xf32>
    %125 = vector.shape_cast %124 : vector<128xf32> to vector<1x128xf32>
    %cst_45 = arith.constant 3.906250e-03 : f32
    %126 = vector.broadcast %cst_45 : f32 to vector<1x128xf32>
    %127 = arith.mulf %122, %126 : vector<1x128xf32>
    %cst_46 = arith.constant 3.906250e-03 : f32
    %128 = vector.broadcast %cst_46 : f32 to vector<1x128xf32>
    %129 = arith.mulf %125, %128 : vector<1x128xf32>
    %130 = arith.mulf %127, %127 : vector<1x128xf32>
    %131 = arith.subf %129, %130 : vector<1x128xf32>
    %132 = vector.broadcast %127 : vector<1x128xf32> to vector<256x128xf32>
    %133 = arith.subf %120, %132 : vector<256x128xf32>
    %cst_47 = arith.constant 9.99999974E-6 : f32
    %134 = vector.broadcast %cst_47 : f32 to vector<1x128xf32>
    %135 = arith.addf %131, %134 : vector<1x128xf32>
    %136 = math.rsqrt %135 : vector<1x128xf32>
    %137 = vector.broadcast %136 : vector<1x128xf32> to vector<256x128xf32>
    %138 = arith.mulf %133, %137 : vector<256x128xf32>
    %c2 = arith.constant 2 : index
    %c0_48 = arith.constant 0 : index
    %c0_49 = arith.constant 0 : index
    %139 = vector.load %arg2[%c2, %c0_48, %c0_49] : memref<11x2x128xf32, #tpu.memory_space<vmem>>, vector<1x2x128xf32>
    %140 = vector.shape_cast %139 : vector<1x2x128xf32> to vector<2x128xf32>
    %c2_50 = arith.constant 2 : index
    %c0_51 = arith.constant 0 : index
    %c0_52 = arith.constant 0 : index
    %141 = vector.load %arg3[%c2_50, %c0_51, %c0_52] : memref<11x2x128xf32, #tpu.memory_space<vmem>>, vector<1x2x128xf32>
    %142 = vector.shape_cast %141 : vector<1x2x128xf32> to vector<2x128xf32>
    %143 = vector.extract_strided_slice %138 {offsets = [0, 0], sizes = [128, 128], strides = [1, 1]} : vector<256x128xf32> to vector<128x128xf32>
    %144 = vector.extract_strided_slice %140 {offsets = [0, 0], sizes = [1, 128], strides = [1, 1]} : vector<2x128xf32> to vector<1x128xf32>
    %145 = vector.broadcast %144 : vector<1x128xf32> to vector<128x128xf32>
    %146 = arith.mulf %145, %143 : vector<128x128xf32>
    %147 = vector.extract_strided_slice %142 {offsets = [0, 0], sizes = [1, 128], strides = [1, 1]} : vector<2x128xf32> to vector<1x128xf32>
    %148 = vector.broadcast %147 : vector<1x128xf32> to vector<128x128xf32>
    %149 = arith.addf %146, %148 : vector<128x128xf32>
    %cst_53 = arith.constant 0.000000e+00 : f32
    %150 = vector.broadcast %cst_53 : f32 to vector<128x128xf32>
    %151 = arith.maximumf %149, %150 : vector<128x128xf32>
    %152 = vector.extract_strided_slice %138 {offsets = [128, 0], sizes = [128, 128], strides = [1, 1]} : vector<256x128xf32> to vector<128x128xf32>
    %153 = vector.extract_strided_slice %140 {offsets = [1, 0], sizes = [1, 128], strides = [1, 1]} : vector<2x128xf32> to vector<1x128xf32>
    %154 = vector.broadcast %153 : vector<1x128xf32> to vector<128x128xf32>
    %155 = arith.mulf %154, %152 : vector<128x128xf32>
    %156 = vector.extract_strided_slice %142 {offsets = [1, 0], sizes = [1, 128], strides = [1, 1]} : vector<2x128xf32> to vector<1x128xf32>
    %157 = vector.broadcast %156 : vector<1x128xf32> to vector<128x128xf32>
    %158 = arith.addf %155, %157 : vector<128x128xf32>
    %cst_54 = arith.constant 0.000000e+00 : f32
    %159 = vector.broadcast %cst_54 : f32 to vector<128x128xf32>
    %160 = arith.maximumf %158, %159 : vector<128x128xf32>
    %161 = tpu.concatenate %151, %160 in 0 : vector<128x128xf32>, vector<128x128xf32> -> vector<256x128xf32>
    %c1_55 = arith.constant 1 : index
    %c0_56 = arith.constant 0 : index
    %c0_57 = arith.constant 0 : index
    %162 = vector.load %arg6[%c1_55, %c0_56, %c0_57] : memref<5x128x128xbf16, #tpu.memory_space<vmem>>, vector<1x128x128xbf16>
    %163 = vector.shape_cast %162 : vector<1x128x128xbf16> to vector<128x128xbf16>
    %164 = arith.truncf %161 : vector<256x128xf32> to vector<256x128xbf16>
    %cst_58 = arith.constant dense<0.000000e+00> : vector<256x128xf32>
    %165 = tpu.matmul %164, %163, %cst_58 {dimension_numbers = #tpu.dot_dimension_numbers<[1], [0], [0], [1], [0, 0, 1, 1], [], []>} : vector<256x128xbf16>, vector<128x128xbf16>, vector<256x128xf32> -> vector<256x128xf32>
    %c1_59 = arith.constant 1 : index
    %c0_60 = arith.constant 0 : index
    %c0_61 = arith.constant 0 : index
    %166 = vector.load %arg7[%c1_59, %c0_60, %c0_61] : memref<5x1x128xf32, #tpu.memory_space<vmem>>, vector<1x1x128xf32>
    %167 = vector.shape_cast %166 : vector<1x1x128xf32> to vector<1x128xf32>
    %168 = vector.broadcast %167 : vector<1x128xf32> to vector<256x128xf32>
    %169 = arith.addf %165, %168 : vector<256x128xf32>
    %cst_62 = arith.constant dense<0.000000e+00> : vector<128xf32>
    %170 = vector.multi_reduction <add>, %169, %cst_62 [0] : vector<256x128xf32> to vector<128xf32>
    %171 = vector.shape_cast %170 : vector<128xf32> to vector<1x128xf32>
    %172 = arith.mulf %169, %169 : vector<256x128xf32>
    %cst_63 = arith.constant dense<0.000000e+00> : vector<128xf32>
    %173 = vector.multi_reduction <add>, %172, %cst_63 [0] : vector<256x128xf32> to vector<128xf32>
    %174 = vector.shape_cast %173 : vector<128xf32> to vector<1x128xf32>
    %cst_64 = arith.constant 3.906250e-03 : f32
    %175 = vector.broadcast %cst_64 : f32 to vector<1x128xf32>
    %176 = arith.mulf %171, %175 : vector<1x128xf32>
    %cst_65 = arith.constant 3.906250e-03 : f32
    %177 = vector.broadcast %cst_65 : f32 to vector<1x128xf32>
    %178 = arith.mulf %174, %177 : vector<1x128xf32>
    %179 = arith.mulf %176, %176 : vector<1x128xf32>
    %180 = arith.subf %178, %179 : vector<1x128xf32>
    %181 = vector.broadcast %176 : vector<1x128xf32> to vector<256x128xf32>
    %182 = arith.subf %169, %181 : vector<256x128xf32>
    %cst_66 = arith.constant 9.99999974E-6 : f32
    %183 = vector.broadcast %cst_66 : f32 to vector<1x128xf32>
    %184 = arith.addf %180, %183 : vector<1x128xf32>
    %185 = math.rsqrt %184 : vector<1x128xf32>
    %186 = vector.broadcast %185 : vector<1x128xf32> to vector<256x128xf32>
    %187 = arith.mulf %182, %186 : vector<256x128xf32>
    %c3 = arith.constant 3 : index
    %c0_67 = arith.constant 0 : index
    %c0_68 = arith.constant 0 : index
    %188 = vector.load %arg2[%c3, %c0_67, %c0_68] : memref<11x2x128xf32, #tpu.memory_space<vmem>>, vector<1x2x128xf32>
    %189 = vector.shape_cast %188 : vector<1x2x128xf32> to vector<2x128xf32>
    %c3_69 = arith.constant 3 : index
    %c0_70 = arith.constant 0 : index
    %c0_71 = arith.constant 0 : index
    %190 = vector.load %arg3[%c3_69, %c0_70, %c0_71] : memref<11x2x128xf32, #tpu.memory_space<vmem>>, vector<1x2x128xf32>
    %191 = vector.shape_cast %190 : vector<1x2x128xf32> to vector<2x128xf32>
    %192 = vector.extract_strided_slice %187 {offsets = [0, 0], sizes = [128, 128], strides = [1, 1]} : vector<256x128xf32> to vector<128x128xf32>
    %193 = vector.extract_strided_slice %189 {offsets = [0, 0], sizes = [1, 128], strides = [1, 1]} : vector<2x128xf32> to vector<1x128xf32>
    %194 = vector.broadcast %193 : vector<1x128xf32> to vector<128x128xf32>
    %195 = arith.mulf %194, %192 : vector<128x128xf32>
    %196 = vector.extract_strided_slice %191 {offsets = [0, 0], sizes = [1, 128], strides = [1, 1]} : vector<2x128xf32> to vector<1x128xf32>
    %197 = vector.broadcast %196 : vector<1x128xf32> to vector<128x128xf32>
    %198 = arith.addf %195, %197 : vector<128x128xf32>
    %cst_72 = arith.constant 0.000000e+00 : f32
    %199 = vector.broadcast %cst_72 : f32 to vector<128x128xf32>
    %200 = arith.maximumf %198, %199 : vector<128x128xf32>
    %201 = vector.extract_strided_slice %187 {offsets = [128, 0], sizes = [128, 128], strides = [1, 1]} : vector<256x128xf32> to vector<128x128xf32>
    %202 = vector.extract_strided_slice %189 {offsets = [1, 0], sizes = [1, 128], strides = [1, 1]} : vector<2x128xf32> to vector<1x128xf32>
    %203 = vector.broadcast %202 : vector<1x128xf32> to vector<128x128xf32>
    %204 = arith.mulf %203, %201 : vector<128x128xf32>
    %205 = vector.extract_strided_slice %191 {offsets = [1, 0], sizes = [1, 128], strides = [1, 1]} : vector<2x128xf32> to vector<1x128xf32>
    %206 = vector.broadcast %205 : vector<1x128xf32> to vector<128x128xf32>
    %207 = arith.addf %204, %206 : vector<128x128xf32>
    %cst_73 = arith.constant 0.000000e+00 : f32
    %208 = vector.broadcast %cst_73 : f32 to vector<128x128xf32>
    %209 = arith.maximumf %207, %208 : vector<128x128xf32>
    %210 = tpu.concatenate %200, %209 in 0 : vector<128x128xf32>, vector<128x128xf32> -> vector<256x128xf32>
    %c1_74 = arith.constant 1 : index
    %c0_75 = arith.constant 0 : index
    %c0_76 = arith.constant 0 : index
    %211 = vector.load %arg8[%c1_74, %c0_75, %c0_76] : memref<5x128x128xbf16, #tpu.memory_space<vmem>>, vector<1x128x128xbf16>
    %212 = vector.shape_cast %211 : vector<1x128x128xbf16> to vector<128x128xbf16>
    %213 = arith.truncf %210 : vector<256x128xf32> to vector<256x128xbf16>
    %cst_77 = arith.constant dense<0.000000e+00> : vector<256x128xf32>
    %214 = tpu.matmul %213, %212, %cst_77 {dimension_numbers = #tpu.dot_dimension_numbers<[1], [0], [0], [1], [0, 0, 1, 1], [], []>} : vector<256x128xbf16>, vector<128x128xbf16>, vector<256x128xf32> -> vector<256x128xf32>
    %215 = arith.addf %120, %214 : vector<256x128xf32>
    %c1_78 = arith.constant 1 : index
    %c0_79 = arith.constant 0 : index
    %c0_80 = arith.constant 0 : index
    %216 = vector.load %arg9[%c1_78, %c0_79, %c0_80] : memref<5x1x128xf32, #tpu.memory_space<vmem>>, vector<1x1x128xf32>
    %217 = vector.shape_cast %216 : vector<1x1x128xf32> to vector<1x128xf32>
    %218 = vector.broadcast %217 : vector<1x128xf32> to vector<256x128xf32>
    %219 = arith.addf %215, %218 : vector<256x128xf32>
    %cst_81 = arith.constant dense<0.000000e+00> : vector<128xf32>
    %220 = vector.multi_reduction <add>, %219, %cst_81 [0] : vector<256x128xf32> to vector<128xf32>
    %221 = vector.shape_cast %220 : vector<128xf32> to vector<1x128xf32>
    %222 = arith.mulf %219, %219 : vector<256x128xf32>
    %cst_82 = arith.constant dense<0.000000e+00> : vector<128xf32>
    %223 = vector.multi_reduction <add>, %222, %cst_82 [0] : vector<256x128xf32> to vector<128xf32>
    %224 = vector.shape_cast %223 : vector<128xf32> to vector<1x128xf32>
    %cst_83 = arith.constant 3.906250e-03 : f32
    %225 = vector.broadcast %cst_83 : f32 to vector<1x128xf32>
    %226 = arith.mulf %221, %225 : vector<1x128xf32>
    %cst_84 = arith.constant 3.906250e-03 : f32
    %227 = vector.broadcast %cst_84 : f32 to vector<1x128xf32>
    %228 = arith.mulf %224, %227 : vector<1x128xf32>
    %229 = arith.mulf %226, %226 : vector<1x128xf32>
    %230 = arith.subf %228, %229 : vector<1x128xf32>
    %231 = vector.broadcast %226 : vector<1x128xf32> to vector<256x128xf32>
    %232 = arith.subf %219, %231 : vector<256x128xf32>
    %cst_85 = arith.constant 9.99999974E-6 : f32
    %233 = vector.broadcast %cst_85 : f32 to vector<1x128xf32>
    %234 = arith.addf %230, %233 : vector<1x128xf32>
    %235 = math.rsqrt %234 : vector<1x128xf32>
    %236 = vector.broadcast %235 : vector<1x128xf32> to vector<256x128xf32>
    %237 = arith.mulf %232, %236 : vector<256x128xf32>
    %c4 = arith.constant 4 : index
    %c0_86 = arith.constant 0 : index
    %c0_87 = arith.constant 0 : index
    %238 = vector.load %arg2[%c4, %c0_86, %c0_87] : memref<11x2x128xf32, #tpu.memory_space<vmem>>, vector<1x2x128xf32>
    %239 = vector.shape_cast %238 : vector<1x2x128xf32> to vector<2x128xf32>
    %c4_88 = arith.constant 4 : index
    %c0_89 = arith.constant 0 : index
    %c0_90 = arith.constant 0 : index
    %240 = vector.load %arg3[%c4_88, %c0_89, %c0_90] : memref<11x2x128xf32, #tpu.memory_space<vmem>>, vector<1x2x128xf32>
    %241 = vector.shape_cast %240 : vector<1x2x128xf32> to vector<2x128xf32>
    %242 = vector.extract_strided_slice %237 {offsets = [0, 0], sizes = [128, 128], strides = [1, 1]} : vector<256x128xf32> to vector<128x128xf32>
    %243 = vector.extract_strided_slice %239 {offsets = [0, 0], sizes = [1, 128], strides = [1, 1]} : vector<2x128xf32> to vector<1x128xf32>
    %244 = vector.broadcast %243 : vector<1x128xf32> to vector<128x128xf32>
    %245 = arith.mulf %244, %242 : vector<128x128xf32>
    %246 = vector.extract_strided_slice %241 {offsets = [0, 0], sizes = [1, 128], strides = [1, 1]} : vector<2x128xf32> to vector<1x128xf32>
    %247 = vector.broadcast %246 : vector<1x128xf32> to vector<128x128xf32>
    %248 = arith.addf %245, %247 : vector<128x128xf32>
    %cst_91 = arith.constant 0.000000e+00 : f32
    %249 = vector.broadcast %cst_91 : f32 to vector<128x128xf32>
    %250 = arith.maximumf %248, %249 : vector<128x128xf32>
    %251 = vector.extract_strided_slice %237 {offsets = [128, 0], sizes = [128, 128], strides = [1, 1]} : vector<256x128xf32> to vector<128x128xf32>
    %252 = vector.extract_strided_slice %239 {offsets = [1, 0], sizes = [1, 128], strides = [1, 1]} : vector<2x128xf32> to vector<1x128xf32>
    %253 = vector.broadcast %252 : vector<1x128xf32> to vector<128x128xf32>
    %254 = arith.mulf %253, %251 : vector<128x128xf32>
    %255 = vector.extract_strided_slice %241 {offsets = [1, 0], sizes = [1, 128], strides = [1, 1]} : vector<2x128xf32> to vector<1x128xf32>
    %256 = vector.broadcast %255 : vector<1x128xf32> to vector<128x128xf32>
    %257 = arith.addf %254, %256 : vector<128x128xf32>
    %cst_92 = arith.constant 0.000000e+00 : f32
    %258 = vector.broadcast %cst_92 : f32 to vector<128x128xf32>
    %259 = arith.maximumf %257, %258 : vector<128x128xf32>
    %260 = tpu.concatenate %250, %259 in 0 : vector<128x128xf32>, vector<128x128xf32> -> vector<256x128xf32>
    %c2_93 = arith.constant 2 : index
    %c0_94 = arith.constant 0 : index
    %c0_95 = arith.constant 0 : index
    %261 = vector.load %arg6[%c2_93, %c0_94, %c0_95] : memref<5x128x128xbf16, #tpu.memory_space<vmem>>, vector<1x128x128xbf16>
    %262 = vector.shape_cast %261 : vector<1x128x128xbf16> to vector<128x128xbf16>
    %263 = arith.truncf %260 : vector<256x128xf32> to vector<256x128xbf16>
    %cst_96 = arith.constant dense<0.000000e+00> : vector<256x128xf32>
    %264 = tpu.matmul %263, %262, %cst_96 {dimension_numbers = #tpu.dot_dimension_numbers<[1], [0], [0], [1], [0, 0, 1, 1], [], []>} : vector<256x128xbf16>, vector<128x128xbf16>, vector<256x128xf32> -> vector<256x128xf32>
    %c2_97 = arith.constant 2 : index
    %c0_98 = arith.constant 0 : index
    %c0_99 = arith.constant 0 : index
    %265 = vector.load %arg7[%c2_97, %c0_98, %c0_99] : memref<5x1x128xf32, #tpu.memory_space<vmem>>, vector<1x1x128xf32>
    %266 = vector.shape_cast %265 : vector<1x1x128xf32> to vector<1x128xf32>
    %267 = vector.broadcast %266 : vector<1x128xf32> to vector<256x128xf32>
    %268 = arith.addf %264, %267 : vector<256x128xf32>
    %cst_100 = arith.constant dense<0.000000e+00> : vector<128xf32>
    %269 = vector.multi_reduction <add>, %268, %cst_100 [0] : vector<256x128xf32> to vector<128xf32>
    %270 = vector.shape_cast %269 : vector<128xf32> to vector<1x128xf32>
    %271 = arith.mulf %268, %268 : vector<256x128xf32>
    %cst_101 = arith.constant dense<0.000000e+00> : vector<128xf32>
    %272 = vector.multi_reduction <add>, %271, %cst_101 [0] : vector<256x128xf32> to vector<128xf32>
    %273 = vector.shape_cast %272 : vector<128xf32> to vector<1x128xf32>
    %cst_102 = arith.constant 3.906250e-03 : f32
    %274 = vector.broadcast %cst_102 : f32 to vector<1x128xf32>
    %275 = arith.mulf %270, %274 : vector<1x128xf32>
    %cst_103 = arith.constant 3.906250e-03 : f32
    %276 = vector.broadcast %cst_103 : f32 to vector<1x128xf32>
    %277 = arith.mulf %273, %276 : vector<1x128xf32>
    %278 = arith.mulf %275, %275 : vector<1x128xf32>
    %279 = arith.subf %277, %278 : vector<1x128xf32>
    %280 = vector.broadcast %275 : vector<1x128xf32> to vector<256x128xf32>
    %281 = arith.subf %268, %280 : vector<256x128xf32>
    %cst_104 = arith.constant 9.99999974E-6 : f32
    %282 = vector.broadcast %cst_104 : f32 to vector<1x128xf32>
    %283 = arith.addf %279, %282 : vector<1x128xf32>
    %284 = math.rsqrt %283 : vector<1x128xf32>
    %285 = vector.broadcast %284 : vector<1x128xf32> to vector<256x128xf32>
    %286 = arith.mulf %281, %285 : vector<256x128xf32>
    %c5 = arith.constant 5 : index
    %c0_105 = arith.constant 0 : index
    %c0_106 = arith.constant 0 : index
    %287 = vector.load %arg2[%c5, %c0_105, %c0_106] : memref<11x2x128xf32, #tpu.memory_space<vmem>>, vector<1x2x128xf32>
    %288 = vector.shape_cast %287 : vector<1x2x128xf32> to vector<2x128xf32>
    %c5_107 = arith.constant 5 : index
    %c0_108 = arith.constant 0 : index
    %c0_109 = arith.constant 0 : index
    %289 = vector.load %arg3[%c5_107, %c0_108, %c0_109] : memref<11x2x128xf32, #tpu.memory_space<vmem>>, vector<1x2x128xf32>
    %290 = vector.shape_cast %289 : vector<1x2x128xf32> to vector<2x128xf32>
    %291 = vector.extract_strided_slice %286 {offsets = [0, 0], sizes = [128, 128], strides = [1, 1]} : vector<256x128xf32> to vector<128x128xf32>
    %292 = vector.extract_strided_slice %288 {offsets = [0, 0], sizes = [1, 128], strides = [1, 1]} : vector<2x128xf32> to vector<1x128xf32>
    %293 = vector.broadcast %292 : vector<1x128xf32> to vector<128x128xf32>
    %294 = arith.mulf %293, %291 : vector<128x128xf32>
    %295 = vector.extract_strided_slice %290 {offsets = [0, 0], sizes = [1, 128], strides = [1, 1]} : vector<2x128xf32> to vector<1x128xf32>
    %296 = vector.broadcast %295 : vector<1x128xf32> to vector<128x128xf32>
    %297 = arith.addf %294, %296 : vector<128x128xf32>
    %cst_110 = arith.constant 0.000000e+00 : f32
    %298 = vector.broadcast %cst_110 : f32 to vector<128x128xf32>
    %299 = arith.maximumf %297, %298 : vector<128x128xf32>
    %300 = vector.extract_strided_slice %286 {offsets = [128, 0], sizes = [128, 128], strides = [1, 1]} : vector<256x128xf32> to vector<128x128xf32>
    %301 = vector.extract_strided_slice %288 {offsets = [1, 0], sizes = [1, 128], strides = [1, 1]} : vector<2x128xf32> to vector<1x128xf32>
    %302 = vector.broadcast %301 : vector<1x128xf32> to vector<128x128xf32>
    %303 = arith.mulf %302, %300 : vector<128x128xf32>
    %304 = vector.extract_strided_slice %290 {offsets = [1, 0], sizes = [1, 128], strides = [1, 1]} : vector<2x128xf32> to vector<1x128xf32>
    %305 = vector.broadcast %304 : vector<1x128xf32> to vector<128x128xf32>
    %306 = arith.addf %303, %305 : vector<128x128xf32>
    %cst_111 = arith.constant 0.000000e+00 : f32
    %307 = vector.broadcast %cst_111 : f32 to vector<128x128xf32>
    %308 = arith.maximumf %306, %307 : vector<128x128xf32>
    %309 = tpu.concatenate %299, %308 in 0 : vector<128x128xf32>, vector<128x128xf32> -> vector<256x128xf32>
    %c2_112 = arith.constant 2 : index
    %c0_113 = arith.constant 0 : index
    %c0_114 = arith.constant 0 : index
    %310 = vector.load %arg8[%c2_112, %c0_113, %c0_114] : memref<5x128x128xbf16, #tpu.memory_space<vmem>>, vector<1x128x128xbf16>
    %311 = vector.shape_cast %310 : vector<1x128x128xbf16> to vector<128x128xbf16>
    %312 = arith.truncf %309 : vector<256x128xf32> to vector<256x128xbf16>
    %cst_115 = arith.constant dense<0.000000e+00> : vector<256x128xf32>
    %313 = tpu.matmul %312, %311, %cst_115 {dimension_numbers = #tpu.dot_dimension_numbers<[1], [0], [0], [1], [0, 0, 1, 1], [], []>} : vector<256x128xbf16>, vector<128x128xbf16>, vector<256x128xf32> -> vector<256x128xf32>
    %314 = arith.addf %219, %313 : vector<256x128xf32>
    %c2_116 = arith.constant 2 : index
    %c0_117 = arith.constant 0 : index
    %c0_118 = arith.constant 0 : index
    %315 = vector.load %arg9[%c2_116, %c0_117, %c0_118] : memref<5x1x128xf32, #tpu.memory_space<vmem>>, vector<1x1x128xf32>
    %316 = vector.shape_cast %315 : vector<1x1x128xf32> to vector<1x128xf32>
    %317 = vector.broadcast %316 : vector<1x128xf32> to vector<256x128xf32>
    %318 = arith.addf %314, %317 : vector<256x128xf32>
    %cst_119 = arith.constant dense<0.000000e+00> : vector<128xf32>
    %319 = vector.multi_reduction <add>, %318, %cst_119 [0] : vector<256x128xf32> to vector<128xf32>
    %320 = vector.shape_cast %319 : vector<128xf32> to vector<1x128xf32>
    %321 = arith.mulf %318, %318 : vector<256x128xf32>
    %cst_120 = arith.constant dense<0.000000e+00> : vector<128xf32>
    %322 = vector.multi_reduction <add>, %321, %cst_120 [0] : vector<256x128xf32> to vector<128xf32>
    %323 = vector.shape_cast %322 : vector<128xf32> to vector<1x128xf32>
    %cst_121 = arith.constant 3.906250e-03 : f32
    %324 = vector.broadcast %cst_121 : f32 to vector<1x128xf32>
    %325 = arith.mulf %320, %324 : vector<1x128xf32>
    %cst_122 = arith.constant 3.906250e-03 : f32
    %326 = vector.broadcast %cst_122 : f32 to vector<1x128xf32>
    %327 = arith.mulf %323, %326 : vector<1x128xf32>
    %328 = arith.mulf %325, %325 : vector<1x128xf32>
    %329 = arith.subf %327, %328 : vector<1x128xf32>
    %330 = vector.broadcast %325 : vector<1x128xf32> to vector<256x128xf32>
    %331 = arith.subf %318, %330 : vector<256x128xf32>
    %cst_123 = arith.constant 9.99999974E-6 : f32
    %332 = vector.broadcast %cst_123 : f32 to vector<1x128xf32>
    %333 = arith.addf %329, %332 : vector<1x128xf32>
    %334 = math.rsqrt %333 : vector<1x128xf32>
    %335 = vector.broadcast %334 : vector<1x128xf32> to vector<256x128xf32>
    %336 = arith.mulf %331, %335 : vector<256x128xf32>
    %c6 = arith.constant 6 : index
    %c0_124 = arith.constant 0 : index
    %c0_125 = arith.constant 0 : index
    %337 = vector.load %arg2[%c6, %c0_124, %c0_125] : memref<11x2x128xf32, #tpu.memory_space<vmem>>, vector<1x2x128xf32>
    %338 = vector.shape_cast %337 : vector<1x2x128xf32> to vector<2x128xf32>
    %c6_126 = arith.constant 6 : index
    %c0_127 = arith.constant 0 : index
    %c0_128 = arith.constant 0 : index
    %339 = vector.load %arg3[%c6_126, %c0_127, %c0_128] : memref<11x2x128xf32, #tpu.memory_space<vmem>>, vector<1x2x128xf32>
    %340 = vector.shape_cast %339 : vector<1x2x128xf32> to vector<2x128xf32>
    %341 = vector.extract_strided_slice %336 {offsets = [0, 0], sizes = [128, 128], strides = [1, 1]} : vector<256x128xf32> to vector<128x128xf32>
    %342 = vector.extract_strided_slice %338 {offsets = [0, 0], sizes = [1, 128], strides = [1, 1]} : vector<2x128xf32> to vector<1x128xf32>
    %343 = vector.broadcast %342 : vector<1x128xf32> to vector<128x128xf32>
    %344 = arith.mulf %343, %341 : vector<128x128xf32>
    %345 = vector.extract_strided_slice %340 {offsets = [0, 0], sizes = [1, 128], strides = [1, 1]} : vector<2x128xf32> to vector<1x128xf32>
    %346 = vector.broadcast %345 : vector<1x128xf32> to vector<128x128xf32>
    %347 = arith.addf %344, %346 : vector<128x128xf32>
    %cst_129 = arith.constant 0.000000e+00 : f32
    %348 = vector.broadcast %cst_129 : f32 to vector<128x128xf32>
    %349 = arith.maximumf %347, %348 : vector<128x128xf32>
    %350 = vector.extract_strided_slice %336 {offsets = [128, 0], sizes = [128, 128], strides = [1, 1]} : vector<256x128xf32> to vector<128x128xf32>
    %351 = vector.extract_strided_slice %338 {offsets = [1, 0], sizes = [1, 128], strides = [1, 1]} : vector<2x128xf32> to vector<1x128xf32>
    %352 = vector.broadcast %351 : vector<1x128xf32> to vector<128x128xf32>
    %353 = arith.mulf %352, %350 : vector<128x128xf32>
    %354 = vector.extract_strided_slice %340 {offsets = [1, 0], sizes = [1, 128], strides = [1, 1]} : vector<2x128xf32> to vector<1x128xf32>
    %355 = vector.broadcast %354 : vector<1x128xf32> to vector<128x128xf32>
    %356 = arith.addf %353, %355 : vector<128x128xf32>
    %cst_130 = arith.constant 0.000000e+00 : f32
    %357 = vector.broadcast %cst_130 : f32 to vector<128x128xf32>
    %358 = arith.maximumf %356, %357 : vector<128x128xf32>
    %359 = tpu.concatenate %349, %358 in 0 : vector<128x128xf32>, vector<128x128xf32> -> vector<256x128xf32>
    %c3_131 = arith.constant 3 : index
    %c0_132 = arith.constant 0 : index
    %c0_133 = arith.constant 0 : index
    %360 = vector.load %arg6[%c3_131, %c0_132, %c0_133] : memref<5x128x128xbf16, #tpu.memory_space<vmem>>, vector<1x128x128xbf16>
    %361 = vector.shape_cast %360 : vector<1x128x128xbf16> to vector<128x128xbf16>
    %362 = arith.truncf %359 : vector<256x128xf32> to vector<256x128xbf16>
    %cst_134 = arith.constant dense<0.000000e+00> : vector<256x128xf32>
    %363 = tpu.matmul %362, %361, %cst_134 {dimension_numbers = #tpu.dot_dimension_numbers<[1], [0], [0], [1], [0, 0, 1, 1], [], []>} : vector<256x128xbf16>, vector<128x128xbf16>, vector<256x128xf32> -> vector<256x128xf32>
    %c3_135 = arith.constant 3 : index
    %c0_136 = arith.constant 0 : index
    %c0_137 = arith.constant 0 : index
    %364 = vector.load %arg7[%c3_135, %c0_136, %c0_137] : memref<5x1x128xf32, #tpu.memory_space<vmem>>, vector<1x1x128xf32>
    %365 = vector.shape_cast %364 : vector<1x1x128xf32> to vector<1x128xf32>
    %366 = vector.broadcast %365 : vector<1x128xf32> to vector<256x128xf32>
    %367 = arith.addf %363, %366 : vector<256x128xf32>
    %cst_138 = arith.constant dense<0.000000e+00> : vector<128xf32>
    %368 = vector.multi_reduction <add>, %367, %cst_138 [0] : vector<256x128xf32> to vector<128xf32>
    %369 = vector.shape_cast %368 : vector<128xf32> to vector<1x128xf32>
    %370 = arith.mulf %367, %367 : vector<256x128xf32>
    %cst_139 = arith.constant dense<0.000000e+00> : vector<128xf32>
    %371 = vector.multi_reduction <add>, %370, %cst_139 [0] : vector<256x128xf32> to vector<128xf32>
    %372 = vector.shape_cast %371 : vector<128xf32> to vector<1x128xf32>
    %cst_140 = arith.constant 3.906250e-03 : f32
    %373 = vector.broadcast %cst_140 : f32 to vector<1x128xf32>
    %374 = arith.mulf %369, %373 : vector<1x128xf32>
    %cst_141 = arith.constant 3.906250e-03 : f32
    %375 = vector.broadcast %cst_141 : f32 to vector<1x128xf32>
    %376 = arith.mulf %372, %375 : vector<1x128xf32>
    %377 = arith.mulf %374, %374 : vector<1x128xf32>
    %378 = arith.subf %376, %377 : vector<1x128xf32>
    %379 = vector.broadcast %374 : vector<1x128xf32> to vector<256x128xf32>
    %380 = arith.subf %367, %379 : vector<256x128xf32>
    %cst_142 = arith.constant 9.99999974E-6 : f32
    %381 = vector.broadcast %cst_142 : f32 to vector<1x128xf32>
    %382 = arith.addf %378, %381 : vector<1x128xf32>
    %383 = math.rsqrt %382 : vector<1x128xf32>
    %384 = vector.broadcast %383 : vector<1x128xf32> to vector<256x128xf32>
    %385 = arith.mulf %380, %384 : vector<256x128xf32>
    %c7 = arith.constant 7 : index
    %c0_143 = arith.constant 0 : index
    %c0_144 = arith.constant 0 : index
    %386 = vector.load %arg2[%c7, %c0_143, %c0_144] : memref<11x2x128xf32, #tpu.memory_space<vmem>>, vector<1x2x128xf32>
    %387 = vector.shape_cast %386 : vector<1x2x128xf32> to vector<2x128xf32>
    %c7_145 = arith.constant 7 : index
    %c0_146 = arith.constant 0 : index
    %c0_147 = arith.constant 0 : index
    %388 = vector.load %arg3[%c7_145, %c0_146, %c0_147] : memref<11x2x128xf32, #tpu.memory_space<vmem>>, vector<1x2x128xf32>
    %389 = vector.shape_cast %388 : vector<1x2x128xf32> to vector<2x128xf32>
    %390 = vector.extract_strided_slice %385 {offsets = [0, 0], sizes = [128, 128], strides = [1, 1]} : vector<256x128xf32> to vector<128x128xf32>
    %391 = vector.extract_strided_slice %387 {offsets = [0, 0], sizes = [1, 128], strides = [1, 1]} : vector<2x128xf32> to vector<1x128xf32>
    %392 = vector.broadcast %391 : vector<1x128xf32> to vector<128x128xf32>
    %393 = arith.mulf %392, %390 : vector<128x128xf32>
    %394 = vector.extract_strided_slice %389 {offsets = [0, 0], sizes = [1, 128], strides = [1, 1]} : vector<2x128xf32> to vector<1x128xf32>
    %395 = vector.broadcast %394 : vector<1x128xf32> to vector<128x128xf32>
    %396 = arith.addf %393, %395 : vector<128x128xf32>
    %cst_148 = arith.constant 0.000000e+00 : f32
    %397 = vector.broadcast %cst_148 : f32 to vector<128x128xf32>
    %398 = arith.maximumf %396, %397 : vector<128x128xf32>
    %399 = vector.extract_strided_slice %385 {offsets = [128, 0], sizes = [128, 128], strides = [1, 1]} : vector<256x128xf32> to vector<128x128xf32>
    %400 = vector.extract_strided_slice %387 {offsets = [1, 0], sizes = [1, 128], strides = [1, 1]} : vector<2x128xf32> to vector<1x128xf32>
    %401 = vector.broadcast %400 : vector<1x128xf32> to vector<128x128xf32>
    %402 = arith.mulf %401, %399 : vector<128x128xf32>
    %403 = vector.extract_strided_slice %389 {offsets = [1, 0], sizes = [1, 128], strides = [1, 1]} : vector<2x128xf32> to vector<1x128xf32>
    %404 = vector.broadcast %403 : vector<1x128xf32> to vector<128x128xf32>
    %405 = arith.addf %402, %404 : vector<128x128xf32>
    %cst_149 = arith.constant 0.000000e+00 : f32
    %406 = vector.broadcast %cst_149 : f32 to vector<128x128xf32>
    %407 = arith.maximumf %405, %406 : vector<128x128xf32>
    %408 = tpu.concatenate %398, %407 in 0 : vector<128x128xf32>, vector<128x128xf32> -> vector<256x128xf32>
    %c3_150 = arith.constant 3 : index
    %c0_151 = arith.constant 0 : index
    %c0_152 = arith.constant 0 : index
    %409 = vector.load %arg8[%c3_150, %c0_151, %c0_152] : memref<5x128x128xbf16, #tpu.memory_space<vmem>>, vector<1x128x128xbf16>
    %410 = vector.shape_cast %409 : vector<1x128x128xbf16> to vector<128x128xbf16>
    %411 = arith.truncf %408 : vector<256x128xf32> to vector<256x128xbf16>
    %cst_153 = arith.constant dense<0.000000e+00> : vector<256x128xf32>
    %412 = tpu.matmul %411, %410, %cst_153 {dimension_numbers = #tpu.dot_dimension_numbers<[1], [0], [0], [1], [0, 0, 1, 1], [], []>} : vector<256x128xbf16>, vector<128x128xbf16>, vector<256x128xf32> -> vector<256x128xf32>
    %413 = arith.addf %318, %412 : vector<256x128xf32>
    %c3_154 = arith.constant 3 : index
    %c0_155 = arith.constant 0 : index
    %c0_156 = arith.constant 0 : index
    %414 = vector.load %arg9[%c3_154, %c0_155, %c0_156] : memref<5x1x128xf32, #tpu.memory_space<vmem>>, vector<1x1x128xf32>
    %415 = vector.shape_cast %414 : vector<1x1x128xf32> to vector<1x128xf32>
    %416 = vector.broadcast %415 : vector<1x128xf32> to vector<256x128xf32>
    %417 = arith.addf %413, %416 : vector<256x128xf32>
    %cst_157 = arith.constant dense<0.000000e+00> : vector<128xf32>
    %418 = vector.multi_reduction <add>, %417, %cst_157 [0] : vector<256x128xf32> to vector<128xf32>
    %419 = vector.shape_cast %418 : vector<128xf32> to vector<1x128xf32>
    %420 = arith.mulf %417, %417 : vector<256x128xf32>
    %cst_158 = arith.constant dense<0.000000e+00> : vector<128xf32>
    %421 = vector.multi_reduction <add>, %420, %cst_158 [0] : vector<256x128xf32> to vector<128xf32>
    %422 = vector.shape_cast %421 : vector<128xf32> to vector<1x128xf32>
    %cst_159 = arith.constant 3.906250e-03 : f32
    %423 = vector.broadcast %cst_159 : f32 to vector<1x128xf32>
    %424 = arith.mulf %419, %423 : vector<1x128xf32>
    %cst_160 = arith.constant 3.906250e-03 : f32
    %425 = vector.broadcast %cst_160 : f32 to vector<1x128xf32>
    %426 = arith.mulf %422, %425 : vector<1x128xf32>
    %427 = arith.mulf %424, %424 : vector<1x128xf32>
    %428 = arith.subf %426, %427 : vector<1x128xf32>
    %429 = vector.broadcast %424 : vector<1x128xf32> to vector<256x128xf32>
    %430 = arith.subf %417, %429 : vector<256x128xf32>
    %cst_161 = arith.constant 9.99999974E-6 : f32
    %431 = vector.broadcast %cst_161 : f32 to vector<1x128xf32>
    %432 = arith.addf %428, %431 : vector<1x128xf32>
    %433 = math.rsqrt %432 : vector<1x128xf32>
    %434 = vector.broadcast %433 : vector<1x128xf32> to vector<256x128xf32>
    %435 = arith.mulf %430, %434 : vector<256x128xf32>
    %c8 = arith.constant 8 : index
    %c0_162 = arith.constant 0 : index
    %c0_163 = arith.constant 0 : index
    %436 = vector.load %arg2[%c8, %c0_162, %c0_163] : memref<11x2x128xf32, #tpu.memory_space<vmem>>, vector<1x2x128xf32>
    %437 = vector.shape_cast %436 : vector<1x2x128xf32> to vector<2x128xf32>
    %c8_164 = arith.constant 8 : index
    %c0_165 = arith.constant 0 : index
    %c0_166 = arith.constant 0 : index
    %438 = vector.load %arg3[%c8_164, %c0_165, %c0_166] : memref<11x2x128xf32, #tpu.memory_space<vmem>>, vector<1x2x128xf32>
    %439 = vector.shape_cast %438 : vector<1x2x128xf32> to vector<2x128xf32>
    %440 = vector.extract_strided_slice %435 {offsets = [0, 0], sizes = [128, 128], strides = [1, 1]} : vector<256x128xf32> to vector<128x128xf32>
    %441 = vector.extract_strided_slice %437 {offsets = [0, 0], sizes = [1, 128], strides = [1, 1]} : vector<2x128xf32> to vector<1x128xf32>
    %442 = vector.broadcast %441 : vector<1x128xf32> to vector<128x128xf32>
    %443 = arith.mulf %442, %440 : vector<128x128xf32>
    %444 = vector.extract_strided_slice %439 {offsets = [0, 0], sizes = [1, 128], strides = [1, 1]} : vector<2x128xf32> to vector<1x128xf32>
    %445 = vector.broadcast %444 : vector<1x128xf32> to vector<128x128xf32>
    %446 = arith.addf %443, %445 : vector<128x128xf32>
    %cst_167 = arith.constant 0.000000e+00 : f32
    %447 = vector.broadcast %cst_167 : f32 to vector<128x128xf32>
    %448 = arith.maximumf %446, %447 : vector<128x128xf32>
    %449 = vector.extract_strided_slice %435 {offsets = [128, 0], sizes = [128, 128], strides = [1, 1]} : vector<256x128xf32> to vector<128x128xf32>
    %450 = vector.extract_strided_slice %437 {offsets = [1, 0], sizes = [1, 128], strides = [1, 1]} : vector<2x128xf32> to vector<1x128xf32>
    %451 = vector.broadcast %450 : vector<1x128xf32> to vector<128x128xf32>
    %452 = arith.mulf %451, %449 : vector<128x128xf32>
    %453 = vector.extract_strided_slice %439 {offsets = [1, 0], sizes = [1, 128], strides = [1, 1]} : vector<2x128xf32> to vector<1x128xf32>
    %454 = vector.broadcast %453 : vector<1x128xf32> to vector<128x128xf32>
    %455 = arith.addf %452, %454 : vector<128x128xf32>
    %cst_168 = arith.constant 0.000000e+00 : f32
    %456 = vector.broadcast %cst_168 : f32 to vector<128x128xf32>
    %457 = arith.maximumf %455, %456 : vector<128x128xf32>
    %458 = tpu.concatenate %448, %457 in 0 : vector<128x128xf32>, vector<128x128xf32> -> vector<256x128xf32>
    %c4_169 = arith.constant 4 : index
    %c0_170 = arith.constant 0 : index
    %c0_171 = arith.constant 0 : index
    %459 = vector.load %arg6[%c4_169, %c0_170, %c0_171] : memref<5x128x128xbf16, #tpu.memory_space<vmem>>, vector<1x128x128xbf16>
    %460 = vector.shape_cast %459 : vector<1x128x128xbf16> to vector<128x128xbf16>
    %461 = arith.truncf %458 : vector<256x128xf32> to vector<256x128xbf16>
    %cst_172 = arith.constant dense<0.000000e+00> : vector<256x128xf32>
    %462 = tpu.matmul %461, %460, %cst_172 {dimension_numbers = #tpu.dot_dimension_numbers<[1], [0], [0], [1], [0, 0, 1, 1], [], []>} : vector<256x128xbf16>, vector<128x128xbf16>, vector<256x128xf32> -> vector<256x128xf32>
    %c4_173 = arith.constant 4 : index
    %c0_174 = arith.constant 0 : index
    %c0_175 = arith.constant 0 : index
    %463 = vector.load %arg7[%c4_173, %c0_174, %c0_175] : memref<5x1x128xf32, #tpu.memory_space<vmem>>, vector<1x1x128xf32>
    %464 = vector.shape_cast %463 : vector<1x1x128xf32> to vector<1x128xf32>
    %465 = vector.broadcast %464 : vector<1x128xf32> to vector<256x128xf32>
    %466 = arith.addf %462, %465 : vector<256x128xf32>
    %cst_176 = arith.constant dense<0.000000e+00> : vector<128xf32>
    %467 = vector.multi_reduction <add>, %466, %cst_176 [0] : vector<256x128xf32> to vector<128xf32>
    %468 = vector.shape_cast %467 : vector<128xf32> to vector<1x128xf32>
    %469 = arith.mulf %466, %466 : vector<256x128xf32>
    %cst_177 = arith.constant dense<0.000000e+00> : vector<128xf32>
    %470 = vector.multi_reduction <add>, %469, %cst_177 [0] : vector<256x128xf32> to vector<128xf32>
    %471 = vector.shape_cast %470 : vector<128xf32> to vector<1x128xf32>
    %cst_178 = arith.constant 3.906250e-03 : f32
    %472 = vector.broadcast %cst_178 : f32 to vector<1x128xf32>
    %473 = arith.mulf %468, %472 : vector<1x128xf32>
    %cst_179 = arith.constant 3.906250e-03 : f32
    %474 = vector.broadcast %cst_179 : f32 to vector<1x128xf32>
    %475 = arith.mulf %471, %474 : vector<1x128xf32>
    %476 = arith.mulf %473, %473 : vector<1x128xf32>
    %477 = arith.subf %475, %476 : vector<1x128xf32>
    %478 = vector.broadcast %473 : vector<1x128xf32> to vector<256x128xf32>
    %479 = arith.subf %466, %478 : vector<256x128xf32>
    %cst_180 = arith.constant 9.99999974E-6 : f32
    %480 = vector.broadcast %cst_180 : f32 to vector<1x128xf32>
    %481 = arith.addf %477, %480 : vector<1x128xf32>
    %482 = math.rsqrt %481 : vector<1x128xf32>
    %483 = vector.broadcast %482 : vector<1x128xf32> to vector<256x128xf32>
    %484 = arith.mulf %479, %483 : vector<256x128xf32>
    %c9 = arith.constant 9 : index
    %c0_181 = arith.constant 0 : index
    %c0_182 = arith.constant 0 : index
    %485 = vector.load %arg2[%c9, %c0_181, %c0_182] : memref<11x2x128xf32, #tpu.memory_space<vmem>>, vector<1x2x128xf32>
    %486 = vector.shape_cast %485 : vector<1x2x128xf32> to vector<2x128xf32>
    %c9_183 = arith.constant 9 : index
    %c0_184 = arith.constant 0 : index
    %c0_185 = arith.constant 0 : index
    %487 = vector.load %arg3[%c9_183, %c0_184, %c0_185] : memref<11x2x128xf32, #tpu.memory_space<vmem>>, vector<1x2x128xf32>
    %488 = vector.shape_cast %487 : vector<1x2x128xf32> to vector<2x128xf32>
    %489 = vector.extract_strided_slice %484 {offsets = [0, 0], sizes = [128, 128], strides = [1, 1]} : vector<256x128xf32> to vector<128x128xf32>
    %490 = vector.extract_strided_slice %486 {offsets = [0, 0], sizes = [1, 128], strides = [1, 1]} : vector<2x128xf32> to vector<1x128xf32>
    %491 = vector.broadcast %490 : vector<1x128xf32> to vector<128x128xf32>
    %492 = arith.mulf %491, %489 : vector<128x128xf32>
    %493 = vector.extract_strided_slice %488 {offsets = [0, 0], sizes = [1, 128], strides = [1, 1]} : vector<2x128xf32> to vector<1x128xf32>
    %494 = vector.broadcast %493 : vector<1x128xf32> to vector<128x128xf32>
    %495 = arith.addf %492, %494 : vector<128x128xf32>
    %cst_186 = arith.constant 0.000000e+00 : f32
    %496 = vector.broadcast %cst_186 : f32 to vector<128x128xf32>
    %497 = arith.maximumf %495, %496 : vector<128x128xf32>
    %498 = vector.extract_strided_slice %484 {offsets = [128, 0], sizes = [128, 128], strides = [1, 1]} : vector<256x128xf32> to vector<128x128xf32>
    %499 = vector.extract_strided_slice %486 {offsets = [1, 0], sizes = [1, 128], strides = [1, 1]} : vector<2x128xf32> to vector<1x128xf32>
    %500 = vector.broadcast %499 : vector<1x128xf32> to vector<128x128xf32>
    %501 = arith.mulf %500, %498 : vector<128x128xf32>
    %502 = vector.extract_strided_slice %488 {offsets = [1, 0], sizes = [1, 128], strides = [1, 1]} : vector<2x128xf32> to vector<1x128xf32>
    %503 = vector.broadcast %502 : vector<1x128xf32> to vector<128x128xf32>
    %504 = arith.addf %501, %503 : vector<128x128xf32>
    %cst_187 = arith.constant 0.000000e+00 : f32
    %505 = vector.broadcast %cst_187 : f32 to vector<128x128xf32>
    %506 = arith.maximumf %504, %505 : vector<128x128xf32>
    %507 = tpu.concatenate %497, %506 in 0 : vector<128x128xf32>, vector<128x128xf32> -> vector<256x128xf32>
    %c4_188 = arith.constant 4 : index
    %c0_189 = arith.constant 0 : index
    %c0_190 = arith.constant 0 : index
    %508 = vector.load %arg8[%c4_188, %c0_189, %c0_190] : memref<5x128x128xbf16, #tpu.memory_space<vmem>>, vector<1x128x128xbf16>
    %509 = vector.shape_cast %508 : vector<1x128x128xbf16> to vector<128x128xbf16>
    %510 = arith.truncf %507 : vector<256x128xf32> to vector<256x128xbf16>
    %cst_191 = arith.constant dense<0.000000e+00> : vector<256x128xf32>
    %511 = tpu.matmul %510, %509, %cst_191 {dimension_numbers = #tpu.dot_dimension_numbers<[1], [0], [0], [1], [0, 0, 1, 1], [], []>} : vector<256x128xbf16>, vector<128x128xbf16>, vector<256x128xf32> -> vector<256x128xf32>
    %512 = arith.addf %417, %511 : vector<256x128xf32>
    %c4_192 = arith.constant 4 : index
    %c0_193 = arith.constant 0 : index
    %c0_194 = arith.constant 0 : index
    %513 = vector.load %arg9[%c4_192, %c0_193, %c0_194] : memref<5x1x128xf32, #tpu.memory_space<vmem>>, vector<1x1x128xf32>
    %514 = vector.shape_cast %513 : vector<1x1x128xf32> to vector<1x128xf32>
    %515 = vector.broadcast %514 : vector<1x128xf32> to vector<256x128xf32>
    %516 = arith.addf %512, %515 : vector<256x128xf32>
    %cst_195 = arith.constant dense<0.000000e+00> : vector<128xf32>
    %517 = vector.multi_reduction <add>, %516, %cst_195 [0] : vector<256x128xf32> to vector<128xf32>
    %518 = vector.shape_cast %517 : vector<128xf32> to vector<1x128xf32>
    %519 = arith.mulf %516, %516 : vector<256x128xf32>
    %cst_196 = arith.constant dense<0.000000e+00> : vector<128xf32>
    %520 = vector.multi_reduction <add>, %519, %cst_196 [0] : vector<256x128xf32> to vector<128xf32>
    %521 = vector.shape_cast %520 : vector<128xf32> to vector<1x128xf32>
    %cst_197 = arith.constant 3.906250e-03 : f32
    %522 = vector.broadcast %cst_197 : f32 to vector<1x128xf32>
    %523 = arith.mulf %518, %522 : vector<1x128xf32>
    %cst_198 = arith.constant 3.906250e-03 : f32
    %524 = vector.broadcast %cst_198 : f32 to vector<1x128xf32>
    %525 = arith.mulf %521, %524 : vector<1x128xf32>
    %526 = arith.mulf %523, %523 : vector<1x128xf32>
    %527 = arith.subf %525, %526 : vector<1x128xf32>
    %528 = vector.broadcast %523 : vector<1x128xf32> to vector<256x128xf32>
    %529 = arith.subf %516, %528 : vector<256x128xf32>
    %cst_199 = arith.constant 9.99999974E-6 : f32
    %530 = vector.broadcast %cst_199 : f32 to vector<1x128xf32>
    %531 = arith.addf %527, %530 : vector<1x128xf32>
    %532 = math.rsqrt %531 : vector<1x128xf32>
    %533 = vector.broadcast %532 : vector<1x128xf32> to vector<256x128xf32>
    %534 = arith.mulf %529, %533 : vector<256x128xf32>
    %c10 = arith.constant 10 : index
    %c0_200 = arith.constant 0 : index
    %c0_201 = arith.constant 0 : index
    %535 = vector.load %arg2[%c10, %c0_200, %c0_201] : memref<11x2x128xf32, #tpu.memory_space<vmem>>, vector<1x2x128xf32>
    %536 = vector.shape_cast %535 : vector<1x2x128xf32> to vector<2x128xf32>
    %c10_202 = arith.constant 10 : index
    %c0_203 = arith.constant 0 : index
    %c0_204 = arith.constant 0 : index
    %537 = vector.load %arg3[%c10_202, %c0_203, %c0_204] : memref<11x2x128xf32, #tpu.memory_space<vmem>>, vector<1x2x128xf32>
    %538 = vector.shape_cast %537 : vector<1x2x128xf32> to vector<2x128xf32>
    %539 = vector.extract_strided_slice %534 {offsets = [0, 0], sizes = [128, 128], strides = [1, 1]} : vector<256x128xf32> to vector<128x128xf32>
    %540 = vector.extract_strided_slice %536 {offsets = [0, 0], sizes = [1, 128], strides = [1, 1]} : vector<2x128xf32> to vector<1x128xf32>
    %541 = vector.broadcast %540 : vector<1x128xf32> to vector<128x128xf32>
    %542 = arith.mulf %541, %539 : vector<128x128xf32>
    %543 = vector.extract_strided_slice %538 {offsets = [0, 0], sizes = [1, 128], strides = [1, 1]} : vector<2x128xf32> to vector<1x128xf32>
    %544 = vector.broadcast %543 : vector<1x128xf32> to vector<128x128xf32>
    %545 = arith.addf %542, %544 : vector<128x128xf32>
    %cst_205 = arith.constant 0.000000e+00 : f32
    %546 = vector.broadcast %cst_205 : f32 to vector<128x128xf32>
    %547 = arith.maximumf %545, %546 : vector<128x128xf32>
    %548 = vector.extract_strided_slice %534 {offsets = [128, 0], sizes = [128, 128], strides = [1, 1]} : vector<256x128xf32> to vector<128x128xf32>
    %549 = vector.extract_strided_slice %536 {offsets = [1, 0], sizes = [1, 128], strides = [1, 1]} : vector<2x128xf32> to vector<1x128xf32>
    %550 = vector.broadcast %549 : vector<1x128xf32> to vector<128x128xf32>
    %551 = arith.mulf %550, %548 : vector<128x128xf32>
    %552 = vector.extract_strided_slice %538 {offsets = [1, 0], sizes = [1, 128], strides = [1, 1]} : vector<2x128xf32> to vector<1x128xf32>
    %553 = vector.broadcast %552 : vector<1x128xf32> to vector<128x128xf32>
    %554 = arith.addf %551, %553 : vector<128x128xf32>
    %cst_206 = arith.constant 0.000000e+00 : f32
    %555 = vector.broadcast %cst_206 : f32 to vector<128x128xf32>
    %556 = arith.maximumf %554, %555 : vector<128x128xf32>
    %557 = tpu.concatenate %547, %556 in 0 : vector<128x128xf32>, vector<128x128xf32> -> vector<256x128xf32>
    %c0_207 = arith.constant 0 : index
    %c0_208 = arith.constant 0 : index
    %558 = vector.load %arg10[%c0_207, %c0_208] : memref<128x128xbf16, #tpu.memory_space<vmem>>, vector<128x128xbf16>
    %559 = arith.truncf %557 : vector<256x128xf32> to vector<256x128xbf16>
    %cst_209 = arith.constant dense<0.000000e+00> : vector<256x128xf32>
    %560 = tpu.matmul %559, %558, %cst_209 {dimension_numbers = #tpu.dot_dimension_numbers<[1], [0], [0], [1], [0, 0, 1, 1], [], []>} : vector<256x128xbf16>, vector<128x128xbf16>, vector<256x128xf32> -> vector<256x128xf32>
    %c0_210 = arith.constant 0 : index
    %c0_211 = arith.constant 0 : index
    %561 = vector.load %arg11[%c0_210, %c0_211] : memref<1x128xf32, #tpu.memory_space<vmem>>, vector<1x128xf32>
    %562 = vector.broadcast %561 : vector<1x128xf32> to vector<256x128xf32>
    %563 = arith.addf %560, %562 : vector<256x128xf32>
    %c0_212 = arith.constant 0 : index
    %c0_213 = arith.constant 0 : index
    %564 = vector.load %arg12[%c0_212, %c0_213] : memref<256x128xf32, #tpu.memory_space<vmem>>, vector<256x128xf32>
    tpu.vector_store %arg12[%c0_212, %c0_213], %563 {strides = array<i32>} : memref<256x128xf32, #tpu.memory_space<vmem>>, vector<256x128xf32>,
    return
  }
  func.func @transform_0(%arg0: i32) -> (i32, i32) {
    %c0_i32 = arith.constant 0 : i32
    %c0_i32_0 = arith.constant 0 : i32
    %c0_i32_1 = arith.constant 0 : i32
    return %c0_i32, %c0_i32_0 : i32, i32
  }
  func.func @transform_1(%arg0: i32) -> (i32, i32, i32) {
    %c0_i32 = arith.constant 0 : i32
    %c0_i32_0 = arith.constant 0 : i32
    %c0_i32_1 = arith.constant 0 : i32
    %c0_i32_2 = arith.constant 0 : i32
    return %c0_i32, %c0_i32_0, %c0_i32_1 : i32, i32, i32
  }
  func.func @transform_2(%arg0: i32) -> (i32, i32, i32) {
    %c0_i32 = arith.constant 0 : i32
    %c0_i32_0 = arith.constant 0 : i32
    %c0_i32_1 = arith.constant 0 : i32
    %c0_i32_2 = arith.constant 0 : i32
    return %c0_i32, %c0_i32_0, %c0_i32_1 : i32, i32, i32
  }
  func.func @transform_3(%arg0: i32) -> (i32, i32) {
    %c0_i32 = arith.constant 0 : i32
    %c0_i32_0 = arith.constant 0 : i32
    %c0_i32_1 = arith.constant 0 : i32
    return %c0_i32, %c0_i32_0 : i32, i32
  }
  func.func @transform_4(%arg0: i32) -> (i32, i32) {
    %c0_i32 = arith.constant 0 : i32
    %c0_i32_0 = arith.constant 0 : i32
    %c0_i32_1 = arith.constant 0 : i32
    return %c0_i32, %c0_i32_0 : i32, i32
  }
  func.func @transform_5(%arg0: i32) -> (i32, i32, i32) {
    %c0_i32 = arith.constant 0 : i32
    %c0_i32_0 = arith.constant 0 : i32
    %c0_i32_1 = arith.constant 0 : i32
    %c0_i32_2 = arith.constant 0 : i32
    return %c0_i32, %c0_i32_0, %c0_i32_1 : i32, i32, i32
  }
  func.func @transform_6(%arg0: i32) -> (i32, i32, i32) {
    %c0_i32 = arith.constant 0 : i32
    %c0_i32_0 = arith.constant 0 : i32
    %c0_i32_1 = arith.constant 0 : i32
    %c0_i32_2 = arith.constant 0 : i32
    return %c0_i32, %c0_i32_0, %c0_i32_1 : i32, i32, i32
  }
  func.func @transform_7(%arg0: i32) -> (i32, i32, i32) {
    %c0_i32 = arith.constant 0 : i32
    %c0_i32_0 = arith.constant 0 : i32
    %c0_i32_1 = arith.constant 0 : i32
    %c0_i32_2 = arith.constant 0 : i32
    return %c0_i32, %c0_i32_0, %c0_i32_1 : i32, i32, i32
  }
  func.func @transform_8(%arg0: i32) -> (i32, i32, i32) {
    %c0_i32 = arith.constant 0 : i32
    %c0_i32_0 = arith.constant 0 : i32
    %c0_i32_1 = arith.constant 0 : i32
    %c0_i32_2 = arith.constant 0 : i32
    return %c0_i32, %c0_i32_0, %c0_i32_1 : i32, i32, i32
  }
  func.func @transform_9(%arg0: i32) -> (i32, i32) {
    %c0_i32 = arith.constant 0 : i32
    %c0_i32_0 = arith.constant 0 : i32
    %c0_i32_1 = arith.constant 0 : i32
    return %c0_i32, %c0_i32_0 : i32, i32
  }
  func.func @transform_10(%arg0: i32) -> (i32, i32) {
    %c0_i32 = arith.constant 0 : i32
    %c0_i32_0 = arith.constant 0 : i32
    %c0_i32_1 = arith.constant 0 : i32
    return %c0_i32, %c0_i32_0 : i32, i32
  }
  func.func @transform_11(%arg0: i32) -> (i32, i32) {
    %c0_i32 = arith.constant 0 : i32
    %c0_i32_0 = arith.constant 0 : i32
    %c0_i32_1 = arith.constant 0 : i32
    return %c0_i32, %c0_i32_0 : i32, i32
  }
}

</mosaic_0001>

<bundles_post_ra>
// kernel: tpu_custom_call.1
= control target key start
LH: loop header
LB: loop body
LE: loop exit
PB: predicated region body
PF: predicated region fallthrough
CT: control target
= control target key end

     0   :  { %16 = vsyncpa [#allocation3], 0  ;;  %s13500_s0 = inlined_call_operand.vmem [shape: f32[256,3], index: 0, kind: input, shape index: {}]   ;;  %s13501_s1 = inlined_call_operand.vmem [shape: f32[11,2,128], index: 1, kind: input, shape index: {}]   ;;  %s13502_s2 = inlined_call_operand.vmem [shape: f32[11,2,128], index: 2, kind: input, shape index: {}]   ;;  %s13503_s3 = inlined_call_operand.vmem [shape: f32[3,128], index: 3, kind: input, shape index: {}]   ;;  %s13504_s4 = inlined_call_operand.vmem [shape: f32[1,128], index: 4, kind: input, shape index: {}]   ;;  %s13505_s5 = inlined_call_operand.hbm [shape: bf16[5,128,128], index: 5, kind: input, shape index: {}]   ;;  %s13506_s6 = inlined_call_operand.vmem [shape: f32[5,1,128], index: 6, kind: input, shape index: {}]   ;;  %s13507_s7 = inlined_call_operand.hbm [shape: bf16[5,128,128], index: 7, kind: input, shape index: {}]   ;;  %s13508_s8 = inlined_call_operand.vmem [shape: f32[5,1,128], index: 8, kind: input, shape index: {}]   ;;  %s13509_s9 = inlined_call_operand.vmem [shape: bf16[128,128], index: 9, kind: input, shape index: {}]   ;;  %s13510_s10 = inlined_call_operand.vmem [shape: f32[1,128], index: 10, kind: input, shape index: {}]   ;;  %s13511_s11 = inlined_call_operand.hbm [shape: f32[256,128], index: 11, kind: output, shape index: {}]  }
   0x1   :  { %17 = vsyncpa [#allocation6], 0 }
   0x2   :  { %18 = vsyncpa [#allocation4], 0  ;;  %s8240_s17 = smov [#allocation2]   ;;  %s8168_s21 = scalar_lea.hbm %s13505_s5, 5120 }
   0x3   :  { %s34_s18 = sshll.u32 %s8240_s17, 4  ;;  %p8169_p0 = scmp.ne.s32.totalorder %s13505_s5, %s8168_s21  ;;  %s35_s18 = int_to_ptr.vmem [resolvable:$true] %s34_s18 }
   0x4   :  { %p8172_p1 = scmp.lt.u32.totalorder %s8168_s21, %s13505_s5 }
   0x6   :  { %p8174_p2 = pnand %p8172_p1, %p8169_p0 }
   0x8   :  { %8177 = shalt.err (!%p8174_p2)
}
   0x9   :  { %s8178_s26 = scalar_lea.vmem %s35_s18, 5120  ;;  %p8183_p4 = scmp.lt.s32.totalorder %s35_s18, %s35_s18 }
   0xa   :  { %p8179_p3 = scmp.ne.s32.totalorder %s35_s18, %s8178_s26  ;;  %p8184_p5 = scmp.lt.s32.totalorder %s8178_s26, %s8178_s26 }
   0xc   :  { %p8185_p6 = por %p8184_p5, %p8183_p4 }
   0xe   :  { %p8186_p7 = pnand %p8185_p6, %p8179_p3 }
  0x10   :  { %8189 = shalt.err (!%p8186_p7)
}
  0x11   :  { %s8241_s27 = smov 64   ;;  %s8242_s28 = smov 4  }
  0x12   :  { %40 = dma.hbm_to_vmem [thread:$0]  %s13505_s5, 5120, %s35_s18, [#allocation3], %s8241_s27, %s8241_s27, %s8242_s28  }
  0x13   :  { %s8243_s12 = smov [#allocation5]   ;;  %s8190_s16 = scalar_lea.hbm %s13507_s7, 5120 }
  0x14   :  { %s48_s13 = sshll.u32 %s8243_s12, 4  ;;  %p8191_p8 = scmp.ne.s32.totalorder %s13507_s7, %s8190_s16  ;;  %s49_s13 = int_to_ptr.vmem [resolvable:$true] %s48_s13 }
  0x15   :  { %p8194_p9 = scmp.lt.u32.totalorder %s8190_s16, %s13507_s7 }
  0x17   :  { %p8196_p10 = pnand %p8194_p9, %p8191_p8 }
  0x19   :  { %8199 = shalt.err (!%p8196_p10)
}
  0x1a   :  { %s8200_s22 = scalar_lea.vmem %s49_s13, 5120  ;;  %p8205_p12 = scmp.lt.s32.totalorder %s49_s13, %s49_s13 }
  0x1b   :  { %p8201_p11 = scmp.ne.s32.totalorder %s49_s13, %s8200_s22  ;;  %p8206_p13 = scmp.lt.s32.totalorder %s8200_s22, %s8200_s22 }
  0x1d   :  { %p8207_p0 = por %p8206_p13, %p8205_p12 }
  0x1f   :  { %p8208_p1 = pnand %p8207_p0, %p8201_p11 }
  0x21   :  { %8211 = shalt.err (!%p8208_p1)
}
  0x22   :  { %54 = dma.hbm_to_vmem [thread:$0]  %s13507_s7, 5120, %s49_s13, [#allocation6], %s8241_s27, %s8241_s27, %s8242_s28  }
  0x23   :  { %8234 = dma.done.wait [#allocation3], 5120  }
  0x24   :  { %8235 = vsyncadd [#allocation3], 4294962176 }
  0x25   :  { %8236 = dma.done.wait [#allocation6], 5120  }
  0x26   :  { %8237 = vsyncadd [#allocation6], 4294962176  ;;  %v8244_v0 = vmov 1   ;;  %v8245_v1 = vmov 0   ;;  %v68_v2 = vld [vmem:[%s13500_s0] sm:$0xff]  ;;  %v69_v3 = vld [vmem:[%s13500_s0 + $0x8] sm:$0xff]  ;;  %v261_v32 = vlaneseq }
  0x27   :  { %7999 = vset.pattern.permute.xlu1 %v8244_v0  ;;  %7998 = vset.pattern.permute.xlu0 %v8245_v1  ;;  %v70_v4 = vld [vmem:[%s13500_s0 + $0x10] sm:$0xff]  ;;  %v73_v5 = vld [vmem:[%s13500_s0 + $0x28] sm:$0xff]  ;;  %v8246_v7 = vmov 2   ;;  %v71_v8 = vld [vmem:[%s13500_s0 + $0x18] sm:$0xff] }
  0x28   :  { %298 = vperm.xlu1 %7999, %v68_v2   ;;  %103 = vperm.xlu0 %7998, %v68_v2   ;;  %v74_v6 = vld [vmem:[%s13500_s0 + $0x30] sm:$0xff]  ;;  %v72_v9 = vld [vmem:[%s13500_s0 + $0x20] sm:$0xff]  ;;  %v8371_v11 = vld [vmem:[%s13500_s0 + $0x58] sm:$0xff]  ;;  %v262_v35 = vshrl.u32 %v261_v32, 7 }
  0x29   :  { %v8365_v10 = vld [vmem:[%s13500_s0 + $0x50] sm:$0xff]  ;;  %v8377_v12 = vld [vmem:[%s13500_s0 + $0x78] sm:$0xff]  ;;  %v8384_v13 = vld [vmem:[%s13500_s0 + $0x80] sm:$0xff] }
  0x2a   :  { %v8391_v14 = vld [vmem:[%s13500_s0 + $0xa0] sm:$0xff]  ;;  %v75_v15 = vld [vmem:[%s13500_s0 + $0x38] sm:$0xff]  ;;  %v8401_v16 = vld [vmem:[%s13500_s0 + $0xa8] sm:$0xff]  ;;  %v8504_v38 = vsub.s32 1, %v262_v35  ;;  %v8506_v39 = vsub.s32 0, %v262_v35  ;;  %v623_v46 = vsub.s32 2, %v262_v35 }
  0x2b   :  { %v8408_v17 = vld [vmem:[%s13500_s0 + $0xc8] sm:$0xff]  ;;  %v8414_v18 = vld [vmem:[%s13500_s0 + $0xd0] sm:$0xff]  ;;  %v76_v19 = vld [vmem:[%s13500_s0 + $0x40] sm:$0xff] }
  0x2c   :  { %302 = vperm.xlu1 %7999, %v69_v3   ;;  %108 = vperm.xlu0 %7998, %v69_v3   ;;  %v77_v20 = vld [vmem:[%s13500_s0 + $0x48] sm:$0xff]  ;;  %v82_v22 = vld [vmem:[%s13500_s0 + $0x70] sm:$0xff]  ;;  %v8448_v24 = vld [vmem:[%s13500_s0 + $0x98] sm:$0xff]  ;;  %13651 = vst [vmem:[#allocation11_spill] sm:$0xff] %v8504_v38 }
  0x2d   :  { %v81_v21 = vld [vmem:[%s13500_s0 + $0x68] sm:$0xff]  ;;  %v8442_v23 = vld [vmem:[%s13500_s0 + $0x90] sm:$0xff]  ;;  %v80_v25 = vld [vmem:[%s13500_s0 + $0x60] sm:$0xff]  ;;  %13652 = vst [vmem:[#allocation12_spill] sm:$0xff] %v8506_v39 }
  0x2e   :  { %v8459_v26 = vld [vmem:[%s13500_s0 + $0xb8] sm:$0xff]  ;;  %v8466_v27 = vld [vmem:[%s13500_s0 + $0xc0] sm:$0xff]  ;;  %v8480_v29 = vld [vmem:[%s13500_s0 + $0xe8] sm:$0xff] }
  0x2f   :  { %v8473_v28 = vld [vmem:[%s13500_s0 + $0xe0] sm:$0xff]  ;;  %v85_v43 = vld [vmem:[%s13500_s0 + $0x88] sm:$0xff]  ;;  %v8530_v48 = vld [vmem:[%s13500_s0 + $0xf0] sm:$0xff] }
  0x30   :  { %306 = vperm.xlu1 %7999, %v70_v4   ;;  %113 = vperm.xlu0 %7998, %v70_v4   ;;  %v100_v40 = vld [vmem:[%s13503_s3] sm:$0x7]  ;;  %v8543_v54 = vld [vmem:[%s13500_s0 + $0xf8] sm:$0xff]  ;;  %v90_v32 = vld [vmem:[%s13500_s0 + $0xb0] sm:$0xff] }
  0x31   :  { %v8520_v44 = vrot.slane %v100_v40, %v8504_v38  ;;  %v8523_v45 = vrot.slane %v100_v40, %v8506_v39  ;;  %v8536_v52 = vrot.slane %v100_v40, %v623_v46 }
  0x34   :  { %8000 = vset.pattern.permute.xlu1 %v8246_v7  ;;  %128 = vperm.xlu0 %7998, %v73_v5  }
  0x35   :  { %498 = vperm.xlu1 %8000, %v69_v3  }
  0x38   :  { %133 = vperm.xlu0 %7998, %v74_v6  }
  0x39   :  { %8001 = vset.pattern.permute.xlu1 %v8245_v1 }
  0x3a   :  { %118 = vperm.xlu1 %8001, %v71_v8  }
  0x3c   :  { %8007 = vset.pattern.permute.xlu0 %v8246_v7 }
  0x3d   :  { %494 = vperm.xlu0 %8007, %v68_v2  }
  0x3e   :  { %8002 = vset.pattern.permute.xlu1 %v8246_v7 }
  0x3f   :  { %502 = vperm.xlu1 %8002, %v70_v4  }
  0x41   :  { %514 = vperm.xlu0 %8007, %v73_v5  }
  0x43   :  { %8003 = vset.pattern.permute.xlu1 %v8245_v1 }
  0x44   :  { %123 = vperm.xlu1 %8003, %v72_v9  }
  0x45   :  { %518 = vperm.xlu0 %8007, %v74_v6  }
  0x48   :  { %8004 = vset.pattern.permute.xlu1 %v8246_v7 }
  0x49   :  { %506 = vperm.xlu1 %8004, %v71_v8   ;;  %534 = vperm.xlu0 %8007, %v8365_v10  }
  0x4d   :  { %8005 = vset.pattern.permute.xlu1 %v8244_v0  ;;  %538 = vperm.xlu0 %8007, %v8371_v11  }
  0x4e   :  { %318 = vperm.xlu1 %8005, %v73_v5  }
  0x51   :  { %554 = vperm.xlu0 %8007, %v8377_v12  }
  0x52   :  { %8006 = vset.pattern.permute.xlu1 %v8246_v7 }
  0x53   :  { %510 = vperm.xlu1 %8006, %v72_v9  }
  0x55   :  { %558 = vperm.xlu0 %8007, %v8384_v13  }
  0x57   :  { %8008 = vset.pattern.permute.xlu1 %v8244_v0 }
  0x58   :  { %322 = vperm.xlu1 %8008, %v74_v6  }
  0x59   :  { %574 = vperm.xlu0 %8007, %v8391_v14  }
  0x5c   :  { %8009 = vset.pattern.permute.xlu1 %v8245_v1 }
  0x5d   :  { %138 = vperm.xlu1 %8009, %v75_v15   ;;  %578 = vperm.xlu0 %8007, %v8401_v16  }
  0x61   :  { %8010 = vset.pattern.permute.xlu1 %v8244_v0  ;;  %594 = vperm.xlu0 %8007, %v8408_v17  }
  0x62   :  { %326 = vperm.xlu1 %8010, %v75_v15  }
  0x65   :  { %598 = vperm.xlu0 %8007, %v8414_v18  }
  0x66   :  { %8011 = vset.pattern.permute.xlu1 %v8245_v1 }
  0x67   :  { %143 = vperm.xlu1 %8011, %v76_v19  }
  0x69   :  { %8047 = vset.pattern.permute.xlu0 %v8244_v0 }
  0x6a   :  { %310 = vperm.xlu0 %8047, %v71_v8  }
  0x6b   :  { %8012 = vset.pattern.permute.xlu1 %v8246_v7 }
  0x6c   :  { %522 = vperm.xlu1 %8012, %v75_v15  }
  0x6e   :  { %314 = vperm.xlu0 %8047, %v72_v9  }
  0x70   :  { %8013 = vset.pattern.permute.xlu1 %v8245_v1 }
  0x71   :  { %148 = vperm.xlu1 %8013, %v77_v20  }
  0x72   :  { %330 = vperm.xlu0 %8047, %v76_v19  }
  0x75   :  { %8014 = vset.pattern.permute.xlu1 %v8246_v7 }
  0x76   :  { %526 = vperm.xlu1 %8014, %v76_v19   ;;  %334 = vperm.xlu0 %8047, %v77_v20  }
  0x7a   :  { %8015 = vset.pattern.permute.xlu1 %v8244_v0  ;;  %350 = vperm.xlu0 %8047, %v81_v21  }
  0x7b   :  { %338 = vperm.xlu1 %8015, %v8365_v10  }
  0x7e   :  { %354 = vperm.xlu0 %8047, %v82_v22  }
  0x7f   :  { %8016 = vset.pattern.permute.xlu1 %v8246_v7 }
  0x80   :  { %530 = vperm.xlu1 %8016, %v77_v20  }
  0x82   :  { %370 = vperm.xlu0 %8047, %v8442_v23  }
  0x84   :  { %8017 = vset.pattern.permute.xlu1 %v8244_v0 }
  0x85   :  { %342 = vperm.xlu1 %8017, %v8371_v11  }
  0x86   :  { %374 = vperm.xlu0 %8047, %v8448_v24  }
  0x89   :  { %8018 = vset.pattern.permute.xlu1 %v8245_v1 }
  0x8a   :  { %163 = vperm.xlu1 %8018, %v80_v25   ;;  %390 = vperm.xlu0 %8047, %v8459_v26  }
  0x8e   :  { %8019 = vset.pattern.permute.xlu1 %v8244_v0  ;;  %394 = vperm.xlu0 %8047, %v8466_v27  }
  0x8f   :  { %346 = vperm.xlu1 %8019, %v80_v25  }
  0x92   :  { %410 = vperm.xlu0 %8047, %v8473_v28  }
  0x93   :  { %8020 = vset.pattern.permute.xlu1 %v8245_v1 }
  0x94   :  { %168 = vperm.xlu1 %8020, %v81_v21  }
  0x96   :  { %414 = vperm.xlu0 %8047, %v8480_v29  }
  0x98   :  { %8021 = vset.pattern.permute.xlu1 %v8246_v7 }
  0x99   :  { %542 = vperm.xlu1 %8021, %v80_v25  }
  0x9a   :  { %8051 = vset.pattern.permute.xlu0 %v8245_v1 }
  0x9b   :  { %153 = vperm.xlu0 %8051, %v8365_v10  }
  0x9d   :  { %8022 = vset.pattern.permute.xlu1 %v8245_v1 }
  0x9e   :  { %173 = vperm.xlu1 %8022, %v82_v22  }
  0x9f   :  { %158 = vperm.xlu0 %8051, %v8371_v11  }
  0xa2   :  { %8023 = vset.pattern.permute.xlu1 %v8246_v7 }
  0xa3   :  { %546 = vperm.xlu1 %8023, %v81_v21   ;;  %178 = vperm.xlu0 %8051, %v8377_v12  }
  0xa7   :  { %8024 = vset.pattern.permute.xlu1 %v8244_v0  ;;  %v299_v30 = vpop.permute.xlu1 %298  ;;  %v104_v31 = vpop.permute.xlu0 %103  ;;  %183 = vperm.xlu0 %8051, %v8384_v13  }
  0xa8   :  { %358 = vperm.xlu1 %8024, %v8377_v12   ;;  %v429_v49 = vmul.f32 %v8520_v44, %v299_v30  ;;  %v265_v50 = vmul.f32 %v8523_v45, %v104_v31 }
  0xaa   :  { %v461_v55 = vadd.f32 %v429_v49, %v265_v50 }
  0xab   :  { %v8493_v33 = vpop.permute.xlu1 %302  ;;  %v8495_v34 = vpop.permute.xlu0 %108  ;;  %203 = vperm.xlu0 %8051, %v8391_v14  }
  0xac   :  { %8025 = vset.pattern.permute.xlu1 %v8246_v7 }
  0xad   :  { %550 = vperm.xlu1 %8025, %v82_v22  }
  0xaf   :  { %v8499_v36 = vpop.permute.xlu1 %306  ;;  %v8501_v37 = vpop.permute.xlu0 %113  ;;  %208 = vperm.xlu0 %8051, %v8401_v16  }
  0xb1   :  { %8026 = vset.pattern.permute.xlu1 %v8244_v0 }
  0xb2   :  { %362 = vperm.xlu1 %8026, %v8384_v13  }
  0xb3   :  { %v129_v41 = vpop.permute.xlu0 %128  ;;  %228 = vperm.xlu0 %8051, %v8408_v17  }
  0xb4   :  { %v8514_v42 = vpop.permute.xlu1 %498  ;;  %v270_v2 = vmul.f32 %v8523_v45, %v129_v41 }
  0xb6   :  { %8027 = vset.pattern.permute.xlu1 %v8245_v1 }
  0xb7   :  { %188 = vperm.xlu1 %8027, %v85_v43   ;;  %v134_v47 = vpop.permute.xlu0 %133  ;;  %233 = vperm.xlu0 %8051, %v8414_v18  }
  0xb8   :  { %v271_v13 = vmul.f32 %v8523_v45, %v134_v47 }
  0xb9   :  { %v8534_v51 = vpop.permute.xlu1 %118 }
  0xbb   :  { %8028 = vset.pattern.permute.xlu1 %v8244_v0  ;;  %253 = vperm.xlu0 %8051, %v8530_v48  }
  0xbc   :  { %366 = vperm.xlu1 %8028, %v85_v43   ;;  %v495_v53 = vpop.permute.xlu0 %494 }
  0xbd   :  { %v625_v56 = vmul.f32 %v8536_v52, %v495_v53 }
  0xbe   :  { %v8546_v57 = vpop.permute.xlu1 %502 }
  0xbf   :  { %v8548_v58 = vadd.f32 %v625_v56, %v461_v55  ;;  %258 = vperm.xlu0 %8051, %v8543_v54  }
  0xc0   :  { %8029 = vset.pattern.permute.xlu1 %v8245_v1  ;;  %v515_v59 = vpop.permute.xlu0 %514 }
  0xc1   :  { %193 = vperm.xlu1 %8029, %v8442_v23   ;;  %v630_v5 = vmul.f32 %v8536_v52, %v515_v59 }
  0xc3   :  { %v8553_v60 = vpop.permute.xlu1 %123  ;;  %8056 = vset.pattern.permute.xlu0 %v8246_v7 }
  0xc4   :  { %v519_v61 = vpop.permute.xlu0 %518  ;;  %614 = vperm.xlu0 %8056, %v8530_v48  }
  0xc5   :  { %8030 = vset.pattern.permute.xlu1 %v8246_v7  ;;  %v631_v19 = vmul.f32 %v8536_v52, %v519_v61 }
  0xc6   :  { %562 = vperm.xlu1 %8030, %v85_v43  }
  0xc8   :  { %v8558_v62 = vpop.permute.xlu1 %506  ;;  %v8560_v63 = vpop.permute.xlu0 %534 }
  0xca   :  { %8031 = vset.pattern.permute.xlu1 %v8245_v1 }
  0xcb   :  { %198 = vperm.xlu1 %8031, %v8448_v24  }
  0xcc   :  { %v8565_v3 = vpop.permute.xlu0 %538 }
  0xcd   :  { %v319_v4 = vpop.permute.xlu1 %318 }
  0xce   :  { %v434_v6 = vmul.f32 %v8520_v44, %v319_v4 }
  0xcf   :  { %8032 = vset.pattern.permute.xlu1 %v8246_v7 }
  0xd0   :  { %v466_v8 = vadd.f32 %v434_v6, %v270_v2  ;;  %566 = vperm.xlu1 %8032, %v8442_v23   ;;  %v8571_v9 = vpop.permute.xlu0 %554 }
  0xd2   :  { %v8573_v10 = vadd.f32 %v630_v5, %v466_v8  ;;  %v8575_v11 = vpop.permute.xlu1 %510 }
  0xd4   :  { %8033 = vset.pattern.permute.xlu1 %v8244_v0  ;;  %v8578_v12 = vpop.permute.xlu0 %558 }
  0xd5   :  { %378 = vperm.xlu1 %8033, %v8391_v14  }
  0xd7   :  { %v323_v15 = vpop.permute.xlu1 %322 }
  0xd8   :  { %v435_v20 = vmul.f32 %v8520_v44, %v323_v15  ;;  %v8584_v21 = vpop.permute.xlu0 %574 }
  0xd9   :  { %8034 = vset.pattern.permute.xlu1 %v8246_v7 }
  0xda   :  { %v467_v22 = vadd.f32 %v435_v20, %v271_v13  ;;  %570 = vperm.xlu1 %8034, %v8448_v24  }
  0xdc   :  { %v8588_v23 = vadd.f32 %v631_v19, %v467_v22  ;;  %v139_v25 = vpop.permute.xlu1 %138  ;;  %v8590_v30 = vpop.permute.xlu0 %578 }
  0xdd   :  { %v272_v35 = vmul.f32 %v8523_v45, %v139_v25 }
  0xde   :  { %8035 = vset.pattern.permute.xlu1 %v8244_v0 }
  0xdf   :  { %382 = vperm.xlu1 %8035, %v8401_v16  }
  0xe0   :  { %v8594_v14 = vpop.permute.xlu0 %594 }
  0xe1   :  { %v327_v31 = vpop.permute.xlu1 %326 }
  0xe2   :  { %v436_v24 = vmul.f32 %v8520_v44, %v327_v31 }
  0xe3   :  { %8036 = vset.pattern.permute.xlu1 %v8245_v1 }
  0xe4   :  { %v468_v40 = vadd.f32 %v436_v24, %v272_v35  ;;  %213 = vperm.xlu1 %8036, %v90_v32   ;;  %v8602_v41 = vpop.permute.xlu0 %598 }
  0xe6   :  { %v144_v43 = vpop.permute.xlu1 %143 }
  0xe7   :  { %v273_v59 = vmul.f32 %v8523_v45, %v144_v43 }
  0xe8   :  { %8037 = vset.pattern.permute.xlu1 %v8244_v0 }
  0xe9   :  { %386 = vperm.xlu1 %8037, %v90_v32   ;;  %v8605_v16 = vpop.permute.xlu0 %310 }
  0xeb   :  { %v523_v46 = vpop.permute.xlu1 %522 }
  0xec   :  { %v632_v47 = vmul.f32 %v8536_v52, %v523_v46 }
  0xed   :  { %8038 = vset.pattern.permute.xlu1 %v8245_v1  ;;  %v8609_v49 = vpop.permute.xlu0 %314 }
  0xee   :  { %v8611_v50 = vadd.f32 %v632_v47, %v468_v40  ;;  %218 = vperm.xlu1 %8038, %v8459_v26  }
  0xf0   :  { %v149_v53 = vpop.permute.xlu1 %148 }
  0xf1   :  { %v331_v55 = vpop.permute.xlu0 %330  ;;  %v274_v20 = vmul.f32 %v8523_v45, %v149_v53 }
  0xf2   :  { %8039 = vset.pattern.permute.xlu1 %v8246_v7  ;;  %v437_v56 = vmul.f32 %v8520_v44, %v331_v55 }
  0xf3   :  { %582 = vperm.xlu1 %8039, %v90_v32  }
  0xf4   :  { %v469_v4 = vadd.f32 %v437_v56, %v273_v59 }
  0xf5   :  { %v527_v61 = vpop.permute.xlu1 %526  ;;  %v335_v2 = vpop.permute.xlu0 %334 }
  0xf6   :  { %v633_v5 = vmul.f32 %v8536_v52, %v527_v61  ;;  %v438_v15 = vmul.f32 %v8520_v44, %v335_v2 }
  0xf7   :  { %8040 = vset.pattern.permute.xlu1 %v8245_v1 }
  0xf8   :  { %v8619_v6 = vadd.f32 %v633_v5, %v469_v4  ;;  %223 = vperm.xlu1 %8040, %v8466_v27   ;;  %v470_v25 = vadd.f32 %v438_v15, %v274_v20  ;;  %v635_v5 = vmul.f32 %v8536_v52, %v8560_v63 }
  0xf9   :  { %v351_v8 = vpop.permute.xlu0 %350 }
  0xfa   :  { %v339_v13 = vpop.permute.xlu1 %338 }
  0xfb   :  { %v439_v15 = vmul.f32 %v8520_v44, %v339_v13 }
  0xfc   :  { %8041 = vset.pattern.permute.xlu1 %v8246_v7 }
  0xfd   :  { %586 = vperm.xlu1 %8041, %v8459_v26   ;;  %v8625_v19 = vpop.permute.xlu0 %354 }
  0xff   :  { %v531_v22 = vpop.permute.xlu1 %530 }
 0x100   :  { %v634_v31 = vmul.f32 %v8536_v52, %v531_v22 }
 0x101   :  { %8042 = vset.pattern.permute.xlu1 %v8244_v0  ;;  %v8630_v32 = vpop.permute.xlu0 %370 }
 0x102   :  { %v8632_v35 = vadd.f32 %v634_v31, %v470_v25  ;;  %398 = vperm.xlu1 %8042, %v8408_v17   ;;  %v95_v17 = vld [vmem:[%s13500_s0 + $0xd8] sm:$0xff] }
 0x104   :  { %v343_v24 = vpop.permute.xlu1 %342 }
 0x105   :  { %v8635_v40 = vpop.permute.xlu0 %374 }
 0x106   :  { %8043 = vset.pattern.permute.xlu1 %v8246_v7 }
 0x107   :  { %590 = vperm.xlu1 %8043, %v8466_v27  }
 0x109   :  { %v164_v26 = vpop.permute.xlu1 %163  ;;  %v8639_v43 = vpop.permute.xlu0 %390 }
 0x10a   :  { %v277_v53 = vmul.f32 %v8523_v45, %v164_v26  ;;  %v636_v26 = vmul.f32 %v8536_v52, %v8565_v3 }
 0x10b   :  { %8044 = vset.pattern.permute.xlu1 %v8244_v0 }
 0x10c   :  { %402 = vperm.xlu1 %8044, %v8414_v18  }
 0x10d   :  { %v8643_v46 = vpop.permute.xlu0 %394 }
 0x10e   :  { %v347_v47 = vpop.permute.xlu1 %346 }
 0x10f   :  { %v441_v55 = vmul.f32 %v8520_v44, %v347_v47  ;;  %v442_v47 = vmul.f32 %v8520_v44, %v351_v8 }
 0x110   :  { %8045 = vset.pattern.permute.xlu1 %v8245_v1 }
 0x111   :  { %v473_v27 = vadd.f32 %v441_v55, %v277_v53  ;;  %238 = vperm.xlu1 %8045, %v95_v17   ;;  %v8651_v56 = vpop.permute.xlu0 %410  ;;  %v440_v55 = vmul.f32 %v8520_v44, %v343_v24 }
 0x113   :  { %v169_v59 = vpop.permute.xlu1 %168 }
 0x114   :  { %v278_v63 = vmul.f32 %v8523_v45, %v169_v59 }
 0x115   :  { %8046 = vset.pattern.permute.xlu1 %v8244_v0  ;;  %v8654_v18 = vpop.permute.xlu0 %414 }
 0x116   :  { %406 = vperm.xlu1 %8046, %v95_v17  }
 0x118   :  { %v543_v61 = vpop.permute.xlu1 %542 }
 0x119   :  { %v637_v2 = vmul.f32 %v8536_v52, %v543_v61 }
 0x11a   :  { %8048 = vset.pattern.permute.xlu1 %v8245_v1  ;;  %v154_v4 = vpop.permute.xlu0 %153 }
 0x11b   :  { %v8661_v20 = vadd.f32 %v637_v2, %v473_v27  ;;  %v275_v22 = vmul.f32 %v8523_v45, %v154_v4  ;;  %243 = vperm.xlu1 %8048, %v8473_v28   ;;  %v474_v4 = vadd.f32 %v442_v47, %v278_v63 }
 0x11d   :  { %v471_v25 = vadd.f32 %v439_v15, %v275_v22  ;;  %v174_v31 = vpop.permute.xlu1 %173 }
 0x11e   :  { %v159_v53 = vpop.permute.xlu0 %158 }
 0x11f   :  { %v8670_v61 = vadd.f32 %v635_v5, %v471_v25  ;;  %v276_v13 = vmul.f32 %v8523_v45, %v159_v53  ;;  %8049 = vset.pattern.permute.xlu1 %v8246_v7  ;;  %v443_v25 = vmul.f32 %v8520_v44, %v8625_v19 }
 0x120   :  { %602 = vperm.xlu1 %8049, %v95_v17   ;;  %v640_v17 = vmul.f32 %v8536_v52, %v8571_v9 }
 0x121   :  { %v472_v27 = vadd.f32 %v440_v55, %v276_v13 }
 0x122   :  { %v547_v2 = vpop.permute.xlu1 %546  ;;  %v179_v8 = vpop.permute.xlu0 %178 }
 0x123   :  { %v8674_v15 = vadd.f32 %v636_v26, %v472_v27  ;;  %v638_v3 = vmul.f32 %v8536_v52, %v547_v2  ;;  %v280_v59 = vmul.f32 %v8523_v45, %v179_v8  ;;  %v279_v26 = vmul.f32 %v8523_v45, %v174_v31 }
 0x124   :  { %8050 = vset.pattern.permute.xlu1 %v8245_v1 }
 0x125   :  { %v8678_v24 = vadd.f32 %v638_v3, %v474_v4  ;;  %248 = vperm.xlu1 %8050, %v8480_v29   ;;  %v475_v55 = vadd.f32 %v443_v25, %v279_v26  ;;  %v8058_v26 = vld [vmem:[#allocation2] sm:$0xff]  }
 0x126   :  { %v184_v13 = vpop.permute.xlu0 %183  ;;  %7444 = vmatprep.subr.bf16.mxu0 %v8058_v26  ;;  %7972 = vmatprep.subr.bf16.mxu1 %v8058_v26 }
 0x127   :  { %v359_v5 = vpop.permute.xlu1 %358  ;;  %v281_v19 = vmul.f32 %v8523_v45, %v184_v13  ;;  %7445 = vmatpush3.bf16.msra.mxu0 %v8058_v26  ;;  %7980 = vmatpush3.bf16.msra.mxu1 %v8058_v26 }
 0x128   :  { %v444_v22 = vmul.f32 %v8520_v44, %v359_v5 }
 0x129   :  { %8052 = vset.pattern.permute.xlu1 %v8246_v7 }
 0x12a   :  { %v476_v1 = vadd.f32 %v444_v22, %v280_v59  ;;  %606 = vperm.xlu1 %8052, %v8473_v28   ;;  %v641_v28 = vmul.f32 %v8536_v52, %v8578_v12 }
 0x12c   :  { %v8690_v47 = vadd.f32 %v640_v17, %v476_v1  ;;  %v551_v53 = vpop.permute.xlu1 %550 }
 0x12d   :  { %v639_v63 = vmul.f32 %v8536_v52, %v551_v53 }
 0x12e   :  { %8053 = vset.pattern.permute.xlu1 %v8244_v0 }
 0x12f   :  { %v8694_v9 = vadd.f32 %v639_v63, %v475_v55  ;;  %418 = vperm.xlu1 %8053, %v8530_v48   ;;  %v8061_v55 = vld [vmem:[#allocation2 + $0x18] sm:$0xff]   ;;  %v8062_v63 = vld [vmem:[#allocation2 + $0x20] sm:$0xff]  }
 0x131   :  { %v363_v31 = vpop.permute.xlu1 %362 }
 0x132   :  { %v445_v27 = vmul.f32 %v8520_v44, %v363_v31  ;;  %v430_v31 = vmul.f32 %v8520_v44, %v8493_v33  ;;  %v8064_v33 = vld [vmem:[#allocation2 + $0x30] sm:$0xff]  }
 0x133   :  { %8054 = vset.pattern.permute.xlu1 %v8246_v7 }
 0x134   :  { %v477_v2 = vadd.f32 %v445_v27, %v281_v19  ;;  %610 = vperm.xlu1 %8054, %v8480_v29   ;;  %v8063_v19 = vld [vmem:[#allocation2 + $0x28] sm:$0xff]   ;;  %v266_v27 = vmul.f32 %v8523_v45, %v8495_v34 }
 0x136   :  { %v8703_v4 = vadd.f32 %v641_v28, %v477_v2  ;;  %v189_v3 = vpop.permute.xlu1 %188  ;;  %v431_v28 = vmul.f32 %v8520_v44, %v8499_v36  ;;  %v267_v2 = vmul.f32 %v8523_v45, %v8501_v37  ;;  %v462_v34 = vadd.f32 %v430_v31, %v266_v27 }
 0x137   :  { %v282_v8 = vmul.f32 %v8523_v45, %v189_v3  ;;  %v626_v3 = vmul.f32 %v8536_v52, %v8514_v42  ;;  %v268_v36 = vmul.f32 %v8523_v45, %v8534_v51  ;;  %v627_v37 = vmul.f32 %v8536_v52, %v8546_v57  ;;  %v8751_v51 = vld [vmem:[%s13504_s4] ss:$0 sm:$0xff] }
 0x138   :  { %8055 = vset.pattern.permute.xlu1 %v8244_v0 }
 0x139   :  { %422 = vperm.xlu1 %8055, %v8543_v54   ;;  %v658_v42 = vadd.f32 %v626_v3, %v462_v34 }
 0x13b   :  { %v367_v48 = vpop.permute.xlu1 %366 }
 0x13c   :  { %v446_v59 = vmul.f32 %v8520_v44, %v367_v48  ;;  %v432_v48 = vmul.f32 %v8520_v44, %v8605_v16  ;;  %v269_v16 = vmul.f32 %v8523_v45, %v8553_v60 }
 0x13d   :  { %8057 = vset.pattern.permute.xlu1 %v8246_v7  ;;  %v8059_v7 = vld [vmem:[#allocation2 + $0x8] sm:$0xff]  }
 0x13e   :  { %v478_v5 = vadd.f32 %v446_v59, %v282_v8  ;;  %618 = vperm.xlu1 %8057, %v8543_v54   ;;  %7446 = vmatprep.subr.bf16.mxu0 %v8059_v7  ;;  %v8060_v54 = vld [vmem:[#allocation2 + $0x10] sm:$0xff]   ;;  %v433_v59 = vmul.f32 %v8520_v44, %v8609_v49  ;;  %v8757_v49 = vadd.f32 %v8751_v51, %v8548_v58 }
 0x13f   :  { %7973 = vmatprep.subr.bf16.mxu1 %v8059_v7  ;;  %7447 = vmatpush3.bf16.msra.mxu0 %v8059_v7 }
 0x140   :  { %v8711_v12 = vpop.permute.xlu1 %193  ;;  %7981 = vmatpush3.bf16.msra.mxu1 %v8059_v7  ;;  %7448 = vmatprep.subr.bf16.mxu0 %v8060_v54  ;;  %v628_v7 = vmul.f32 %v8536_v52, %v8558_v62  ;;  %v465_v60 = vadd.f32 %v433_v59, %v269_v16  ;;  %v765_v58 = vmul.f32 %v8757_v49, %v8757_v49 }
 0x141   :  { %7974 = vmatprep.subr.bf16.mxu1 %v8060_v54 }
 0x143   :  { %7449 = vmatpush3.bf16.msra.mxu0 %v8060_v54 }
 0x144   :  { %7982 = vmatpush3.bf16.msra.mxu1 %v8060_v54  ;;  %7450 = vmatprep.subr.bf16.mxu0 %v8061_v55  ;;  %v8762_v54 = vadd.f32 %v8751_v51, %v658_v42  ;;  %v8795_v42 = vadd.f32 %v8751_v51, %v8573_v10 }
 0x145   :  { %v563_v29 = vpop.permute.xlu1 %562  ;;  %7975 = vmatprep.subr.bf16.mxu1 %v8061_v55 }
 0x146   :  { %v642_v17 = vmul.f32 %v8536_v52, %v563_v29  ;;  %v464_v29 = vadd.f32 %v432_v48, %v268_v36  ;;  %v766_v27 = vmul.f32 %v8762_v54, %v8762_v54  ;;  %13653 = vst [vmem:[#allocation13_spill] sm:$0xff] %v8795_v42 }
 0x147   :  { %7451 = vmatpush3.bf16.msra.mxu0 %v8061_v55 }
 0x148   :  { %v8714_v22 = vadd.f32 %v642_v17, %v478_v5  ;;  %7983 = vmatpush3.bf16.msra.mxu1 %v8061_v55  ;;  %7452 = vmatprep.subr.bf16.mxu0 %v8062_v63  ;;  %v463_v5 = vadd.f32 %v431_v28, %v267_v2  ;;  %v8065_v17 = vld [vmem:[#allocation2 + $0x38] sm:$0xff]   ;;  %v629_v55 = vmul.f32 %v8536_v52, %v8575_v11 }
 0x149   :  { %7976 = vmatprep.subr.bf16.mxu1 %v8062_v63  ;;  %v728_v11 = vadd.f32 %v8762_v54, %v8757_v49  ;;  %v797_v2 = vadd.f32 %v766_v27, %v765_v58 }
 0x14a   :  { %v8716_v0 = vpop.permute.xlu1 %198  ;;  %v659_v26 = vadd.f32 %v627_v37, %v463_v5  ;;  %v661_v31 = vadd.f32 %v629_v55, %v465_v60  ;;  %v8804_v60 = vadd.f32 %v8751_v51, %v8588_v23 }
 0x14b   :  { %7453 = vmatpush3.bf16.msra.mxu0 %v8062_v63 }
 0x14c   :  { %7984 = vmatpush3.bf16.msra.mxu1 %v8062_v63  ;;  %7454 = vmatprep.subr.bf16.mxu0 %v8063_v19  ;;  %v660_v63 = vadd.f32 %v628_v7, %v464_v29  ;;  %v8783_v48 = vadd.f32 %v8751_v51, %v661_v31  ;;  %v770_v7 = vmul.f32 %v8795_v42, %v8795_v42 }
 0x14d   :  { %7977 = vmatprep.subr.bf16.mxu1 %v8063_v19  ;;  %v771_v10 = vmul.f32 %v8804_v60, %v8804_v60  ;;  %v8813_v31 = vadd.f32 %v8751_v51, %v8611_v50 }
 0x14e   :  { %v8776_v28 = vadd.f32 %v8751_v51, %v660_v63  ;;  %v769_v59 = vmul.f32 %v8783_v48, %v8783_v48 }
 0x14f   :  { %v8718_v25 = vpop.permute.xlu1 %566  ;;  %7455 = vmatpush3.bf16.msra.mxu0 %v8063_v19  ;;  %v772_v23 = vmul.f32 %v8813_v31, %v8813_v31 }
 0x150   :  { %7985 = vmatpush3.bf16.msra.mxu1 %v8063_v19  ;;  %7456 = vmatprep.subr.bf16.mxu0 %v8064_v33  ;;  %v8769_v19 = vadd.f32 %v8751_v51, %v659_v26  ;;  %v768_v34 = vmul.f32 %v8776_v28, %v8776_v28 }
 0x151   :  { %7978 = vmatprep.subr.bf16.mxu1 %v8064_v33 }
 0x152   :  { %v767_v3 = vmul.f32 %v8769_v19, %v8769_v19  ;;  %v729_v36 = vadd.f32 %v728_v11, %v8769_v19 }
 0x153   :  { %7457 = vmatpush3.bf16.msra.mxu0 %v8064_v33 }
 0x154   :  { %v8720_v1 = vpop.permute.xlu1 %378  ;;  %7986 = vmatpush3.bf16.msra.mxu1 %v8064_v33  ;;  %7458 = vmatprep.subr.bf16.mxu0 %v8065_v17  ;;  %v798_v37 = vadd.f32 %v797_v2, %v767_v3  ;;  %v730_v5 = vadd.f32 %v729_v36, %v8776_v28  ;;  %v8822_v3 = vadd.f32 %v8751_v51, %v8619_v6 }
 0x155   :  { %7979 = vmatprep.subr.bf16.mxu1 %v8065_v17 }
 0x156   :  { %v799_v16 = vadd.f32 %v798_v37, %v768_v34  ;;  %13654 = vst [vmem:[#allocation14_spill] sm:$0xff] %v8822_v3  ;;  %v8826_v34 = vadd.f32 %v8751_v51, %v8632_v35  ;;  %v8831_v37 = vadd.f32 %v8751_v51, %v8670_v61 }
 0x157   :  { %7459 = vmatpush3.bf16.msra.mxu0 %v8065_v17 }
 0x158   :  { %7987 = vmatpush3.bf16.msra.mxu1 %v8065_v17  ;;  %v731_v17 = vadd.f32 %v730_v5, %v8783_v48  ;;  %v800_v26 = vadd.f32 %v799_v16, %v769_v59  ;;  %13655 = vst [vmem:[#allocation15_spill] sm:$0xff] %v8826_v34  ;;  %13656 = vst [vmem:[#allocation16_spill] sm:$0xff] %v8831_v37  ;;  %v773_v5 = vmul.f32 %v8822_v3, %v8822_v3 }
 0x159   :  { %v8722_v53 = vpop.permute.xlu1 %570  ;;  %v774_v6 = vmul.f32 %v8826_v34, %v8826_v34  ;;  %v8841_v16 = vadd.f32 %v8751_v51, %v8674_v15  ;;  %v8854_v15 = vadd.f32 %v8751_v51, %v8661_v20  ;;  %v8869_v20 = vadd.f32 %v8751_v51, %v8694_v9 }
 0x15a   :  { %v732_v55 = vadd.f32 %v731_v17, %v8795_v42  ;;  %v801_v58 = vadd.f32 %v800_v26, %v770_v7  ;;  %v775_v26 = vmul.f32 %v8831_v37, %v8831_v37 }
 0x15b   :  { %13657 = vst [vmem:[#allocation17_spill] sm:$0xff] %v8841_v16  ;;  %13658 = vst [vmem:[#allocation18_spill] sm:$0xff] %v8854_v15 }
 0x15c   :  { %v733_v27 = vadd.f32 %v732_v55, %v8804_v60  ;;  %v802_v11 = vadd.f32 %v801_v58, %v771_v10  ;;  %v776_v55 = vmul.f32 %v8841_v16, %v8841_v16  ;;  %13660 = vst [vmem:[#allocation20_spill] sm:$0xff] %v8869_v20 }
 0x15e   :  { %v8724_v13 = vpop.permute.xlu1 %382  ;;  %v734_v36 = vadd.f32 %v733_v27, %v8813_v31  ;;  %v803_v50 = vadd.f32 %v802_v11, %v772_v23 }
 0x160   :  { %v735_v35 = vadd.f32 %v734_v36, %v8822_v3  ;;  %v804_v17 = vadd.f32 %v803_v50, %v773_v5  ;;  %v447_v36 = vmul.f32 %v8520_v44, %v8630_v32  ;;  %v777_v5 = vmul.f32 %v8854_v15, %v8854_v15 }
 0x162   :  { %v736_v61 = vadd.f32 %v735_v35, %v8826_v34  ;;  %v805_v7 = vadd.f32 %v804_v17, %v774_v6  ;;  %v8865_v6 = vadd.f32 %v8751_v51, %v8678_v24  ;;  %v283_v35 = vmul.f32 %v8523_v45, %v8711_v12  ;;  %v204_v17 = vpop.permute.xlu0 %203 }
 0x163   :  { %v8738_v8 = vpop.permute.xlu1 %213  ;;  %v284_v24 = vmul.f32 %v8523_v45, %v8716_v0  ;;  %v8892_v0 = vadd.f32 %v8751_v51, %v8690_v47  ;;  %v8906_v47 = vadd.f32 %v8751_v51, %v8714_v22 }
 0x164   :  { %v737_v10 = vadd.f32 %v736_v61, %v8831_v37  ;;  %v806_v27 = vadd.f32 %v805_v7, %v775_v26  ;;  %13659 = vst [vmem:[#allocation19_spill] sm:$0xff] %v8865_v6  ;;  %v643_v61 = vmul.f32 %v8536_v52, %v8718_v25  ;;  %v448_v7 = vmul.f32 %v8520_v44, %v8635_v40 }
 0x165   :  { %v778_v9 = vmul.f32 %v8865_v6, %v8865_v6  ;;  %v479_v12 = vadd.f32 %v447_v36, %v283_v35  ;;  %v285_v25 = vmul.f32 %v8523_v45, %v204_v17  ;;  %v644_v40 = vmul.f32 %v8536_v52, %v8722_v53  ;;  %13661 = vst [vmem:[#allocation21_spill] sm:$0xff] %v8892_v0 }
 0x166   :  { %v738_v11 = vadd.f32 %v737_v10, %v8841_v16  ;;  %v807_v23 = vadd.f32 %v806_v27, %v776_v55  ;;  %v779_v55 = vmul.f32 %v8869_v20, %v8869_v20  ;;  %v209_v10 = vpop.permute.xlu0 %208  ;;  %v480_v35 = vadd.f32 %v448_v7, %v284_v24  ;;  %13663 = vst [vmem:[#allocation23_spill] sm:$0xff] %v8906_v47 }
 0x167   :  { %v675_v36 = vadd.f32 %v643_v61, %v479_v12  ;;  %v450_v17 = vmul.f32 %v8520_v44, %v8724_v13  ;;  %v780_v61 = vmul.f32 %v8892_v0, %v8892_v0  ;;  %v645_v7 = vmul.f32 %v8536_v52, %v8584_v21 }
 0x168   :  { %v8753_v57 = vpop.permute.xlu1 %386  ;;  %v739_v26 = vadd.f32 %v738_v11, %v8854_v15  ;;  %v808_v32 = vadd.f32 %v807_v23, %v777_v5  ;;  %v8896_v5 = vadd.f32 %v8751_v51, %v8703_v4  ;;  %v449_v15 = vmul.f32 %v8520_v44, %v8720_v1 }
 0x169   :  { %v8915_v13 = vadd.f32 %v8751_v51, %v675_v36  ;;  %v451_v22 = vmul.f32 %v8520_v44, %v8753_v57  ;;  %v646_v12 = vmul.f32 %v8536_v52, %v8590_v30  ;;  %v287_v21 = vmul.f32 %v8523_v45, %v8738_v8 }
 0x16a   :  { %v740_v11 = vadd.f32 %v739_v26, %v8865_v6  ;;  %v809_v23 = vadd.f32 %v808_v32, %v778_v9  ;;  %13662 = vst [vmem:[#allocation22_spill] sm:$0xff] %v8896_v5  ;;  %v286_v26 = vmul.f32 %v8523_v45, %v209_v10  ;;  %v676_v9 = vadd.f32 %v644_v40, %v480_v35 }
 0x16b   :  { %v781_v1 = vmul.f32 %v8896_v5, %v8896_v5  ;;  %13664 = vst [vmem:[#allocation24_spill] sm:$0xff] %v8915_v13  ;;  %v481_v24 = vadd.f32 %v449_v15, %v285_v25  ;;  %v782_v40 = vmul.f32 %v8906_v47, %v8906_v47  ;;  %v452_v30 = vmul.f32 %v8520_v44, %v8639_v43 }
 0x16c   :  { %v741_v53 = vadd.f32 %v740_v11, %v8869_v20  ;;  %v810_v32 = vadd.f32 %v809_v23, %v779_v55  ;;  %v482_v55 = vadd.f32 %v450_v17, %v286_v26  ;;  %v8927_v23 = vadd.f32 %v8751_v51, %v676_v9  ;;  %v229_v17 = vpop.permute.xlu0 %228 }
 0x16d   :  { %v8771_v62 = vpop.permute.xlu1 %218  ;;  %v783_v35 = vmul.f32 %v8915_v13, %v8915_v13  ;;  %v483_v8 = vadd.f32 %v451_v22, %v287_v21 }
 0x16e   :  { %v742_v10 = vadd.f32 %v741_v53, %v8892_v0  ;;  %v811_v11 = vadd.f32 %v810_v32, %v780_v61  ;;  %13665 = vst [vmem:[#allocation25_spill] sm:$0xff] %v8927_v23  ;;  %v288_v15 = vmul.f32 %v8523_v45, %v8771_v62  ;;  %v677_v53 = vadd.f32 %v645_v7, %v481_v24 }
 0x16f   :  { %v678_v32 = vadd.f32 %v646_v12, %v482_v55  ;;  %v784_v61 = vmul.f32 %v8927_v23, %v8927_v23  ;;  %v290_v24 = vmul.f32 %v8523_v45, %v229_v17 }
 0x170   :  { %v743_v25 = vadd.f32 %v742_v10, %v8896_v5  ;;  %v812_v36 = vadd.f32 %v811_v11, %v781_v1  ;;  %v484_v1 = vadd.f32 %v452_v30, %v288_v15  ;;  %v453_v11 = vmul.f32 %v8520_v44, %v8643_v46  ;;  %v234_v55 = vpop.permute.xlu0 %233 }
 0x171   :  { %v8957_v12 = vadd.f32 %v8751_v51, %v678_v32  ;;  %v650_v32 = vmul.f32 %v8536_v52, %v8594_v14 }
 0x172   :  { %v8785_v33 = vpop.permute.xlu1 %582  ;;  %v744_v9 = vadd.f32 %v743_v25, %v8906_v47  ;;  %v813_v43 = vadd.f32 %v812_v36, %v782_v40 }
 0x173   :  { %v647_v57 = vmul.f32 %v8536_v52, %v8785_v33  ;;  %13667 = vst [vmem:[#allocation27_spill] sm:$0xff] %v8957_v12 }
 0x174   :  { %v745_v7 = vadd.f32 %v744_v9, %v8915_v13  ;;  %v814_v22 = vadd.f32 %v813_v43, %v783_v35  ;;  %v651_v43 = vmul.f32 %v8536_v52, %v8602_v41  ;;  %v457_v41 = vmul.f32 %v8520_v44, %v8651_v56 }
 0x175   :  { %v679_v10 = vadd.f32 %v647_v57, %v483_v8  ;;  %v291_v57 = vmul.f32 %v8523_v45, %v234_v55 }
 0x176   :  { %v815_v25 = vadd.f32 %v814_v22, %v784_v61 }
 0x177   :  { %v8797_v29 = vpop.permute.xlu1 %223  ;;  %v8966_v36 = vadd.f32 %v8751_v51, %v679_v10 }
 0x178   :  { %v289_v33 = vmul.f32 %v8523_v45, %v8797_v29  ;;  %v8954_v29 = vadd.f32 %v8751_v51, %v677_v53  ;;  %v786_v53 = vmul.f32 %v8957_v12, %v8957_v12 }
 0x179   :  { %13668 = vst [vmem:[#allocation28_spill] sm:$0xff] %v8966_v36  ;;  %v787_v10 = vmul.f32 %v8966_v36, %v8966_v36 }
 0x17a   :  { %13666 = vst [vmem:[#allocation26_spill] sm:$0xff] %v8954_v29  ;;  %v485_v15 = vadd.f32 %v453_v11, %v289_v33  ;;  %v785_v17 = vmul.f32 %v8954_v29, %v8954_v29 }
 0x17c   :  { %v8807_v63 = vpop.permute.xlu1 %586 }
 0x17d   :  { %v648_v62 = vmul.f32 %v8536_v52, %v8807_v63 }
 0x17f   :  { %v680_v40 = vadd.f32 %v648_v62, %v484_v1  ;;  %v254_v62 = vpop.permute.xlu0 %253  ;;  %v816_v1 = vadd.f32 %v815_v25, %v785_v17 }
 0x181   :  { %v8816_v2 = vpop.permute.xlu1 %398 }
 0x182   :  { %v454_v46 = vmul.f32 %v8520_v44, %v8816_v2  ;;  %v8973_v2 = vadd.f32 %v8751_v51, %v680_v40 }
 0x184   :  { %13669 = vst [vmem:[#allocation29_spill] sm:$0xff] %v8973_v2  ;;  %v788_v55 = vmul.f32 %v8973_v2, %v8973_v2 }
 0x186   :  { %v8833_v59 = vpop.permute.xlu1 %590 }
 0x187   :  { %v649_v63 = vmul.f32 %v8536_v52, %v8833_v59  ;;  %v746_v59 = vadd.f32 %v745_v7, %v8927_v23 }
 0x189   :  { %v681_v35 = vadd.f32 %v649_v63, %v485_v15  ;;  %v747_v61 = vadd.f32 %v746_v59, %v8954_v29  ;;  %v817_v63 = vadd.f32 %v816_v1, %v786_v53 }
 0x18b   :  { %v8849_v58 = vpop.permute.xlu1 %402  ;;  %v8985_v11 = vadd.f32 %v8751_v51, %v681_v35 }
 0x18c   :  { %v455_v30 = vmul.f32 %v8520_v44, %v8849_v58  ;;  %v486_v58 = vadd.f32 %v454_v46, %v290_v24  ;;  %v748_v24 = vadd.f32 %v747_v61, %v8957_v12 }
 0x18d   :  { %13670 = vst [vmem:[#allocation30_spill] sm:$0xff] %v8985_v11 }
 0x18e   :  { %v487_v8 = vadd.f32 %v455_v30, %v291_v57  ;;  %v682_v22 = vadd.f32 %v650_v32, %v486_v58  ;;  %v259_v30 = vpop.permute.xlu0 %258 }
 0x190   :  { %v8859_v50 = vpop.permute.xlu1 %238  ;;  %v683_v40 = vadd.f32 %v651_v43, %v487_v8  ;;  %v9004_v53 = vadd.f32 %v8751_v51, %v682_v22  ;;  %v458_v8 = vmul.f32 %v8520_v44, %v8654_v18 }
 0x191   :  { %v292_v14 = vmul.f32 %v8523_v45, %v8859_v50  ;;  %v749_v50 = vadd.f32 %v748_v24, %v8966_v36 }
 0x192   :  { %13671 = vst [vmem:[#allocation31_spill] sm:$0xff] %v9004_v53  ;;  %v9007_v32 = vadd.f32 %v8751_v51, %v683_v40 }
 0x193   :  { %v750_v25 = vadd.f32 %v749_v50, %v8973_v2 }
 0x194   :  { %13672 = vst [vmem:[#allocation32_spill] sm:$0xff] %v9007_v32  ;;  %v791_v18 = vmul.f32 %v9007_v32, %v9007_v32 }
 0x195   :  { %v8884_v27 = vpop.permute.xlu1 %406 }
 0x196   :  { %v456_v9 = vmul.f32 %v8520_v44, %v8884_v27 }
 0x198   :  { %v488_v15 = vadd.f32 %v456_v9, %v292_v14  ;;  %v751_v9 = vadd.f32 %v750_v25, %v8985_v11 }
 0x19a   :  { %v8908_v4 = vpop.permute.xlu1 %243  ;;  %v752_v24 = vadd.f32 %v751_v9, %v9004_v53 }
 0x19b   :  { %v293_v7 = vmul.f32 %v8523_v45, %v8908_v4  ;;  %v818_v4 = vadd.f32 %v817_v63, %v787_v10  ;;  %v295_v10 = vmul.f32 %v8523_v45, %v254_v62 }
 0x19d   :  { %v489_v56 = vadd.f32 %v457_v41, %v293_v7  ;;  %v819_v17 = vadd.f32 %v818_v4, %v788_v55 }
 0x19f   :  { %v603_v26 = vpop.permute.xlu1 %602 }
 0x1a0   :  { %v652_v27 = vmul.f32 %v8536_v52, %v603_v26  ;;  %v789_v26 = vmul.f32 %v8985_v11, %v8985_v11 }
 0x1a2   :  { %v684_v59 = vadd.f32 %v652_v27, %v488_v15  ;;  %v820_v43 = vadd.f32 %v819_v17, %v789_v26  ;;  %v790_v27 = vmul.f32 %v9004_v53, %v9004_v53  ;;  %v753_v15 = vadd.f32 %v752_v24, %v9007_v32 }
 0x1a4   :  { %v249_v21 = vpop.permute.xlu1 %248  ;;  %v9014_v61 = vadd.f32 %v8751_v51, %v684_v59  ;;  %v821_v40 = vadd.f32 %v820_v43, %v790_v27 }
 0x1a5   :  { %v294_v35 = vmul.f32 %v8523_v45, %v249_v21  ;;  %v615_v21 = vpop.permute.xlu0 %614 }
 0x1a6   :  { %13673 = vst [vmem:[#allocation33_spill] sm:$0xff] %v9014_v61  ;;  %v655_v55 = vmul.f32 %v8536_v52, %v615_v21  ;;  %v792_v62 = vmul.f32 %v9014_v61, %v9014_v61  ;;  %v754_v26 = vadd.f32 %v753_v15, %v9014_v61 }
 0x1a7   :  { %v490_v14 = vadd.f32 %v458_v8, %v294_v35  ;;  %v296_v35 = vmul.f32 %v8523_v45, %v259_v30 }
 0x1a9   :  { %v607_v33 = vpop.permute.xlu1 %606 }
 0x1aa   :  { %v653_v46 = vmul.f32 %v8536_v52, %v607_v33 }
 0x1ac   :  { %v685_v58 = vadd.f32 %v653_v46, %v489_v56 }
 0x1ae   :  { %v419_v57 = vpop.permute.xlu1 %418  ;;  %v9023_v41 = vadd.f32 %v8751_v51, %v685_v58 }
 0x1af   :  { %v459_v33 = vmul.f32 %v8520_v44, %v419_v57  ;;  %v822_v57 = vadd.f32 %v821_v40, %v791_v18 }
 0x1b0   :  { %13674 = vst [vmem:[#allocation34_spill] sm:$0xff] %v9023_v41  ;;  %v793_v4 = vmul.f32 %v9023_v41, %v9023_v41  ;;  %v755_v17 = vadd.f32 %v754_v26, %v9023_v41 }
 0x1b1   :  { %v491_v63 = vadd.f32 %v459_v33, %v295_v10  ;;  %v823_v25 = vadd.f32 %v822_v57, %v792_v62 }
 0x1b3   :  { %v611_v1 = vpop.permute.xlu1 %610  ;;  %v687_v56 = vadd.f32 %v655_v55, %v491_v63  ;;  %v824_v8 = vadd.f32 %v823_v25, %v793_v4 }
 0x1b4   :  { %v654_v7 = vmul.f32 %v8536_v52, %v611_v1 }
 0x1b5   :  { %v9042_v33 = vadd.f32 %v8751_v51, %v687_v56 }
 0x1b6   :  { %v686_v22 = vadd.f32 %v654_v7, %v490_v14 }
 0x1b7   :  { %13676 = vst [vmem:[#allocation36_spill] sm:$0xff] %v9042_v33  ;;  %v795_v45 = vmul.f32 %v9042_v33, %v9042_v33 }
 0x1b8   :  { %v9031_v46 = vadd.f32 %v8751_v51, %v686_v22  ;;  %v423_v50 = vpop.permute.xlu1 %422 }
 0x1b9   :  { %v460_v59 = vmul.f32 %v8520_v44, %v423_v50 }
 0x1ba   :  { %13675 = vst [vmem:[#allocation35_spill] sm:$0xff] %v9031_v46  ;;  %v794_v58 = vmul.f32 %v9031_v46, %v9031_v46  ;;  %v756_v43 = vadd.f32 %v755_v17, %v9031_v46 }
 0x1bb   :  { %v492_v21 = vadd.f32 %v460_v59, %v296_v35 }
 0x1bc   :  { %v825_v10 = vadd.f32 %v824_v8, %v794_v58  ;;  %v757_v14 = vadd.f32 %v756_v43, %v9042_v33  ;;  %v904_v58 = vld [vmem:[%s13501_s1] sm:$0x3] }
 0x1bd   :  { %v619_v9 = vpop.permute.xlu1 %618  ;;  %v905_v8 = vld [vmem:[%s13502_s2] sm:$0x3] }
 0x1be   :  { %v656_v1 = vmul.f32 %v8536_v52, %v619_v9  ;;  %v826_v18 = vadd.f32 %v825_v10, %v795_v45  ;;  %v9066_v9 = vrot.slane %v904_v58, %v8506_v39  ;;  %v9069_v43 = vrot.slane %v905_v8, %v8506_v39 }
 0x1c0   :  { %v688_v44 = vadd.f32 %v656_v1, %v492_v21  ;;  %v9072_v21 = vrot.slane %v904_v58, %v8504_v38  ;;  %v9075_v1 = vrot.slane %v905_v8, %v8504_v38  ;;  %v13678_v58 = vld [vmem:[#allocation18_spill] sm:$0xff] }
 0x1c2   :  { %v9049_v30 = vadd.f32 %v8751_v51, %v688_v44 }
 0x1c4   :  { %13677 = vst [vmem:[#allocation37_spill] sm:$0xff] %v9049_v30  ;;  %v758_v7 = vadd.f32 %v757_v14, %v9049_v30  ;;  %v796_v27 = vmul.f32 %v9049_v30, %v9049_v30 }
 0x1c6   :  { %v759_v24 = vrot.slane %v758_v7, 4  ;;  %v827_v63 = vadd.f32 %v826_v18, %v796_v27 }
 0x1c8   :  { %v760_v55 = vadd.f32 %v759_v24, %v758_v7  ;;  %v828_v52 = vrot.slane %v827_v63, 4 }
 0x1ca   :  { %v761_v22 = vrot.slane %v760_v55, 2  ;;  %v829_v40 = vadd.f32 %v828_v52, %v827_v63 }
 0x1cc   :  { %v762_v62 = vadd.f32 %v761_v22, %v760_v55  ;;  %v830_v15 = vrot.slane %v829_v40, 2 }
 0x1ce   :  { %v763_v50 = vrot.slane %v762_v62, 1  ;;  %v831_v57 = vadd.f32 %v830_v15, %v829_v40 }
 0x1d0   :  { %v764_v51 = vadd.f32 %v763_v50, %v762_v62  ;;  %v832_v4 = vrot.slane %v831_v57, 1 }
 0x1d2   :  { %v833_v26 = vadd.f32 %v832_v4, %v831_v57  ;;  %v9055_v56 = vmul.f32 0.00390625, %v764_v51 }
 0x1d4   :  { %v835_v59 = vmul.f32 0.00390625, %v833_v26  ;;  %v836_v25 = vmul.f32 %v9055_v56, %v9055_v56  ;;  %v838_v10 = vsub.f32 %v8757_v49, %v9055_v56  ;;  %v839_v44 = vsub.f32 %v8762_v54, %v9055_v56 }
 0x1d5   :  { %v854_v45 = vsub.f32 %v8896_v5, %v9055_v56  ;;  %v855_v14 = vsub.f32 %v8906_v47, %v9055_v56  ;;  %v840_v7 = vsub.f32 %v8769_v19, %v9055_v56  ;;  %v841_v27 = vsub.f32 %v8776_v28, %v9055_v56 }
 0x1d6   :  { %v837_v35 = vsub.f32 %v835_v59, %v836_v25  ;;  %v856_v18 = vsub.f32 %v8915_v13, %v9055_v56  ;;  %v857_v24 = vsub.f32 %v8927_v23, %v9055_v56  ;;  %v842_v63 = vsub.f32 %v8783_v48, %v9055_v56 }
 0x1d7   :  { %v843_v55 = vsub.f32 %v8795_v42, %v9055_v56  ;;  %v858_v52 = vsub.f32 %v8954_v29, %v9055_v56  ;;  %v859_v22 = vsub.f32 %v8957_v12, %v9055_v56 }
 0x1d8   :  { %v870_v17 = vadd.f32 1e-05, %v837_v35 }
 0x1da   :  { %8146 = vrsqrt.f32 %v870_v17 }
 0x1e4   :  { %v9133_v51 = vpop.eup %8146 }
 0x1e5   :  { %v872_v25 = vmul.f32 %v9133_v51, %v838_v10  ;;  %v873_v26 = vmul.f32 %v9133_v51, %v839_v44  ;;  %v888_v59 = vmul.f32 %v9133_v51, %v854_v45  ;;  %v889_v57 = vmul.f32 %v9133_v51, %v855_v14 }
 0x1e6   :  { %v874_v50 = vmul.f32 %v9133_v51, %v840_v7  ;;  %v875_v35 = vmul.f32 %v9133_v51, %v841_v27  ;;  %v890_v17 = vmul.f32 %v9133_v51, %v856_v18  ;;  %v891_v15 = vmul.f32 %v9133_v51, %v857_v24 }
 0x1e7   :  { %v910_v8 = vmul.f32 %v9066_v9, %v872_v25  ;;  %v911_v4 = vmul.f32 %v9066_v9, %v873_v26  ;;  %v966_v10 = vmul.f32 %v9072_v21, %v888_v59  ;;  %v967_v44 = vmul.f32 %v9072_v21, %v889_v57 }
 0x1e8   :  { %v912_v45 = vmul.f32 %v9066_v9, %v874_v50  ;;  %v913_v14 = vmul.f32 %v9066_v9, %v875_v35  ;;  %v968_v7 = vmul.f32 %v9072_v21, %v890_v17  ;;  %v969_v27 = vmul.f32 %v9072_v21, %v891_v15 }
 0x1e9   :  { %v930_v18 = vadd.f32 %v9069_v43, %v910_v8  ;;  %v931_v24 = vadd.f32 %v9069_v43, %v911_v4  ;;  %v986_v25 = vadd.f32 %v9075_v1, %v966_v10  ;;  %v987_v26 = vadd.f32 %v9075_v1, %v967_v44 }
 0x1ea   :  { %v932_v59 = vadd.f32 %v9069_v43, %v912_v45  ;;  %v933_v57 = vadd.f32 %v9069_v43, %v913_v14  ;;  %v988_v50 = vadd.f32 %v9075_v1, %v968_v7  ;;  %v989_v35 = vadd.f32 %v9075_v1, %v969_v27 }
 0x1eb   :  { %v946_v62 = vmax.f32 %v930_v18, 0.0  ;;  %v947_v17 = vmax.f32 %v931_v24, 0.0  ;;  %v1002_v40 = vmax.f32 %v986_v25, 0.0  ;;  %v1003_v15 = vmax.f32 %v987_v26, 0.0 }
 0x1ec   :  { %v948_v12 = vmax.f32 %v932_v59, 0.0  ;;  %v949_v8 = vmax.f32 %v933_v57, 0.0  ;;  %v1004_v29 = vmax.f32 %v988_v50, 0.0  ;;  %v1005_v4 = vmax.f32 %v989_v35, 0.0 }
 0x1ed   :  { %v1034_v47 = vpack.c.bf16 %v947_v17, %v946_v62  ;;  %v1042_v10 = vpack.c.bf16 %v1003_v15, %v1002_v40  ;;  %v876_v44 = vmul.f32 %v9133_v51, %v842_v63  ;;  %v877_v45 = vmul.f32 %v9133_v51, %v843_v55 }
 0x1ee   :  { %v1035_v23 = vpack.c.bf16 %v949_v8, %v948_v12  ;;  %v1043_v14 = vpack.c.bf16 %v1005_v4, %v1004_v29  ;;  %v892_v7 = vmul.f32 %v9133_v51, %v858_v52  ;;  %v893_v27 = vmul.f32 %v9133_v51, %v859_v22 }
 0x1ef   :  { %7460 = vmatprep.mubr.bf16.mxu0 %v1034_v47  ;;  %7476 = vmatprep.mubr.bf16.mxu1 %v1042_v10  ;;  %v914_v18 = vmul.f32 %v9066_v9, %v876_v44  ;;  %v915_v24 = vmul.f32 %v9066_v9, %v877_v45  ;;  %v13679_v62 = vsub.f32 %v8804_v60, %v9055_v56 }
 0x1f0   :  { %7461 = vmatmul.mubr.bf16.vlgmr.msra.gmra.mrb[0].mxu0 %v1035_v23  ;;  %7477 = vmatmul.mubr.bf16.vlgmr.msra.gmra.mrb[0].mxu1 %v1043_v14  ;;  %v970_v12 = vmul.f32 %v9072_v21, %v892_v7  ;;  %v971_v29 = vmul.f32 %v9072_v21, %v893_v27  ;;  %v13680_v63 = vsub.f32 %v8813_v31, %v9055_v56 }
 0x1f1   :  { %v878_v40 = vmul.f32 %v9133_v51, %v13679_v62  ;;  %v934_v55 = vadd.f32 %v9069_v43, %v914_v18  ;;  %v935_v52 = vadd.f32 %v9069_v43, %v915_v24  ;;  %v13681_v25 = vsub.f32 %v8966_v36, %v9055_v56 }
 0x1f2   :  { %v879_v47 = vmul.f32 %v9133_v51, %v13680_v63  ;;  %v990_v26 = vadd.f32 %v9075_v1, %v970_v12  ;;  %v991_v59 = vadd.f32 %v9075_v1, %v971_v29  ;;  %v13682_v50 = vsub.f32 %v8973_v2, %v9055_v56 }
 0x1f3   :  { %v916_v22 = vmul.f32 %v9066_v9, %v878_v40  ;;  %v894_v23 = vmul.f32 %v9133_v51, %v13681_v25  ;;  %v950_v17 = vmax.f32 %v934_v55, 0.0  ;;  %v951_v15 = vmax.f32 %v935_v52, 0.0 }
 0x1f4   :  { %v917_v57 = vmul.f32 %v9066_v9, %v879_v47  ;;  %v895_v35 = vmul.f32 %v9133_v51, %v13682_v50  ;;  %v1006_v10 = vmax.f32 %v990_v26, 0.0  ;;  %v1007_v44 = vmax.f32 %v991_v59, 0.0 }
 0x1f5   :  { %v936_v8 = vadd.f32 %v9069_v43, %v916_v22  ;;  %v972_v4 = vmul.f32 %v9072_v21, %v894_v23  ;;  %v1036_v7 = vpack.c.bf16 %v951_v15, %v950_v17  ;;  %v13683_v24 = vsub.f32 %v8822_v3, %v9055_v56 }
 0x1f6   :  { %v937_v45 = vadd.f32 %v9069_v43, %v917_v57  ;;  %v973_v14 = vmul.f32 %v9072_v21, %v895_v35  ;;  %v1044_v40 = vpack.c.bf16 %v1007_v44, %v1006_v10  ;;  %v13684_v63 = vsub.f32 %v8826_v34, %v9055_v56 }
 0x1f7   :  { %v952_v27 = vmax.f32 %v936_v8, 0.0  ;;  %v992_v18 = vadd.f32 %v9075_v1, %v972_v4  ;;  %v880_v62 = vmul.f32 %v9133_v51, %v13683_v24  ;;  %7464 = vmatprep.mubr.bf16.mxu0 %v1036_v7  ;;  %v13685_v22 = vsub.f32 %v8985_v11, %v9055_v56 }
 0x1f8   :  { %v953_v12 = vmax.f32 %v937_v45, 0.0  ;;  %v993_v29 = vadd.f32 %v9075_v1, %v973_v14  ;;  %v881_v47 = vmul.f32 %v9133_v51, %v13684_v63  ;;  %v13686_v23 = vsub.f32 %v9004_v53, %v9055_v56  ;;  %7480 = vmatprep.mubr.bf16.mxu1 %v1044_v40 }
 0x1f9   :  { %v1008_v55 = vmax.f32 %v992_v18, 0.0  ;;  %v918_v52 = vmul.f32 %v9066_v9, %v880_v62  ;;  %v896_v25 = vmul.f32 %v9133_v51, %v13685_v22  ;;  %v13687_v35 = vsub.f32 %v8831_v37, %v9055_v56 }
 0x1fa   :  { %v897_v26 = vmul.f32 %v9133_v51, %v13686_v23  ;;  %v1037_v59 = vpack.c.bf16 %v953_v12, %v952_v27  ;;  %v1009_v57 = vmax.f32 %v993_v29, 0.0  ;;  %v919_v50 = vmul.f32 %v9066_v9, %v881_v47 }
 0x1fb   :  { %v882_v17 = vmul.f32 %v9133_v51, %v13687_v35  ;;  %v938_v15 = vadd.f32 %v9069_v43, %v918_v52  ;;  %v974_v8 = vmul.f32 %v9072_v21, %v896_v25  ;;  %v13688_v10 = vsub.f32 %v8841_v16, %v9055_v56 }
 0x1fc   :  { %v975_v4 = vmul.f32 %v9072_v21, %v897_v26  ;;  %7465 = vmatmul.mubr.bf16.gmra.mrb[4].mxu0 %v1037_v59  ;;  %v1045_v45 = vpack.c.bf16 %v1009_v57, %v1008_v55  ;;  %v939_v14 = vadd.f32 %v9069_v43, %v919_v50  ;;  %v13689_v27 = vsub.f32 %v9007_v32, %v9055_v56 }
 0x1fd   :  { %v883_v44 = vmul.f32 %v9133_v51, %v13688_v10  ;;  %v920_v7 = vmul.f32 %v9066_v9, %v882_v17  ;;  %v954_v24 = vmax.f32 %v938_v15, 0.0  ;;  %v994_v62 = vadd.f32 %v9075_v1, %v974_v8 }
 0x1fe   :  { %v898_v18 = vmul.f32 %v9133_v51, %v13689_v27  ;;  %v995_v40 = vadd.f32 %v9075_v1, %v975_v4  ;;  %7481 = vmatmul.mubr.bf16.gmra.mrb[4].mxu1 %v1045_v45  ;;  %v955_v29 = vmax.f32 %v939_v14, 0.0  ;;  %v13690_v47 = vsub.f32 %v9014_v61, %v9055_v56 }
 0x1ff   :  { %v921_v12 = vmul.f32 %v9066_v9, %v883_v44  ;;  %v940_v63 = vadd.f32 %v9069_v43, %v920_v7  ;;  %v1010_v22 = vmax.f32 %v994_v62, 0.0  ;;  %v13691_v26 = vsub.f32 %v13678_v58, %v9055_v56 }
 0x200   :  { %v899_v55 = vmul.f32 %v9133_v51, %v13690_v47  ;;  %v976_v52 = vmul.f32 %v9072_v21, %v898_v18  ;;  %v1011_v25 = vmax.f32 %v995_v40, 0.0  ;;  %v1038_v57 = vpack.c.bf16 %v955_v29, %v954_v24 }
 0x201   :  { %v941_v23 = vadd.f32 %v9069_v43, %v921_v12  ;;  %v884_v59 = vmul.f32 %v9133_v51, %v13691_v26  ;;  %v956_v50 = vmax.f32 %v940_v63, 0.0  ;;  %v13692_v4 = vsub.f32 %v8865_v6, %v9055_v56 }
 0x202   :  { %v977_v35 = vmul.f32 %v9072_v21, %v899_v55  ;;  %v996_v17 = vadd.f32 %v9075_v1, %v976_v52  ;;  %v1046_v15 = vpack.c.bf16 %v1011_v25, %v1010_v22  ;;  %7468 = vmatprep.mubr.bf16.mxu0 %v1038_v57  ;;  %v13693_v7 = vsub.f32 %v9023_v41, %v9055_v56 }
 0x203   :  { %v957_v8 = vmax.f32 %v941_v23, 0.0  ;;  %v885_v10 = vmul.f32 %v9133_v51, %v13692_v4  ;;  %v922_v44 = vmul.f32 %v9066_v9, %v884_v59  ;;  %v13694_v18 = vsub.f32 %v9031_v46, %v9055_v56 }
 0x204   :  { %v997_v45 = vadd.f32 %v9075_v1, %v977_v35  ;;  %v1012_v14 = vmax.f32 %v996_v17, 0.0  ;;  %v900_v27 = vmul.f32 %v9133_v51, %v13693_v7  ;;  %7484 = vmatprep.mubr.bf16.mxu1 %v1046_v15  ;;  %v13695_v29 = vsub.f32 %v8869_v20, %v9055_v56 }
 0x205   :  { %v901_v24 = vmul.f32 %v9133_v51, %v13694_v18  ;;  %v1039_v62 = vpack.c.bf16 %v957_v8, %v956_v50  ;;  %v923_v40 = vmul.f32 %v9066_v9, %v885_v10  ;;  %v942_v12 = vadd.f32 %v9069_v43, %v922_v44 }
 0x206   :  { %v886_v63 = vmul.f32 %v9133_v51, %v13695_v29  ;;  %v1013_v47 = vmax.f32 %v997_v45, 0.0  ;;  %v978_v55 = vmul.f32 %v9072_v21, %v900_v27  ;;  %v13696_v22 = vsub.f32 %v8892_v0, %v9055_v56 }
 0x207   :  { %v979_v52 = vmul.f32 %v9072_v21, %v901_v24  ;;  %7469 = vmatmul.mubr.bf16.gmra.mrb[8].mxu0 %v1039_v62  ;;  %v943_v23 = vadd.f32 %v9069_v43, %v923_v40  ;;  %v958_v26 = vmax.f32 %v942_v12, 0.0  ;;  %v13697_v57 = vsub.f32 %v9042_v33, %v9055_v56 }
 0x208   :  { %v887_v25 = vmul.f32 %v9133_v51, %v13696_v22  ;;  %v924_v59 = vmul.f32 %v9066_v9, %v886_v63  ;;  %v1047_v35 = vpack.c.bf16 %v1013_v47, %v1012_v14  ;;  %v998_v17 = vadd.f32 %v9075_v1, %v978_v55  ;;  %v8069_v22 = vld [vmem:[#allocation5 + $0x18] sm:$0xff]  }
 0x209   :  { %v902_v50 = vmul.f32 %v9133_v51, %v13697_v57  ;;  %v999_v15 = vadd.f32 %v9075_v1, %v979_v52  ;;  %v959_v4 = vmax.f32 %v943_v23, 0.0  ;;  %v13698_v44 = vsub.f32 %v9049_v30, %v9055_v56  ;;  %v8066_v52 = vld [vmem:[#allocation5] sm:$0xff]   ;;  %v9302_v23 = vld [vmem:[%s13506_s6] ss:$0 sm:$0xff] }
 0x20a   :  { %v925_v8 = vmul.f32 %v9066_v9, %v887_v25  ;;  %v944_v10 = vadd.f32 %v9069_v43, %v924_v59  ;;  %7485 = vmatmul.mubr.bf16.gmra.mrb[8].mxu1 %v1047_v35  ;;  %v1014_v27 = vmax.f32 %v998_v17, 0.0  ;;  %7492 = vmatprep.subr.bf16.mxu1 %v8066_v52  ;;  %v8070_v25 = vld [vmem:[#allocation5 + $0x20] sm:$0xff]   ;;  %v8072_v57 = vld [vmem:[#allocation5 + $0x30] sm:$0xff]  }
 0x20b   :  { %v903_v45 = vmul.f32 %v9133_v51, %v13698_v44  ;;  %v980_v7 = vmul.f32 %v9072_v21, %v902_v50  ;;  %v1015_v18 = vmax.f32 %v999_v15, 0.0  ;;  %v1040_v24 = vpack.c.bf16 %v959_v4, %v958_v26  ;;  %7493 = vmatpush3.bf16.msra.mxu1 %v8066_v52 }
 0x20c   :  { %v945_v14 = vadd.f32 %v9069_v43, %v925_v8  ;;  %v960_v62 = vmax.f32 %v944_v10, 0.0  ;;  %v8067_v43 = vld [vmem:[#allocation5 + $0x8] sm:$0xff]  }
 0x20d   :  { %v981_v40 = vmul.f32 %v9072_v21, %v903_v45  ;;  %v1000_v9 = vadd.f32 %v9075_v1, %v980_v7  ;;  %v1048_v12 = vpack.c.bf16 %v1015_v18, %v1014_v27  ;;  %7472 = vmatprep.mubr.bf16.mxu0 %v1040_v24  ;;  %7494 = vmatprep.subr.bf16.mxu1 %v8067_v43  ;;  %v8068_v21 = vld [vmem:[#allocation5 + $0x10] sm:$0xff]   ;;  %v8073_v7 = vld [vmem:[#allocation5 + $0x38] sm:$0xff]  }
 0x20e   :  { %v961_v29 = vmax.f32 %v945_v14, 0.0 }
 0x20f   :  { %v1001_v56 = vadd.f32 %v9075_v1, %v981_v40  ;;  %v1016_v63 = vmax.f32 %v1000_v9, 0.0  ;;  %7488 = vmatprep.mubr.bf16.mxu1 %v1048_v12  ;;  %7495 = vmatpush3.bf16.msra.mxu1 %v8067_v43  ;;  %v8071_v1 = vld [vmem:[#allocation5 + $0x28] sm:$0xff]  }
 0x210   :  { %v1041_v51 = vpack.c.bf16 %v961_v29, %v960_v62  ;;  %7496 = vmatprep.subr.bf16.mxu1 %v8068_v21 }
 0x211   :  { %v1017_v47 = vmax.f32 %v1001_v56, 0.0 }
 0x212   :  { %7473 = vmatmul.mubr.bf16.gmra.mrb[12].mxu0 %v1041_v51 }
 0x213   :  { %v1049_v55 = vpack.c.bf16 %v1017_v47, %v1016_v63  ;;  %7497 = vmatpush3.bf16.msra.mxu1 %v8068_v21 }
 0x214   :  { %7498 = vmatprep.subr.bf16.mxu1 %v8069_v22 }
 0x215   :  { %7489 = vmatmul.mubr.bf16.gmra.mrb[12].mxu1 %v1049_v55 }
 0x217   :  { %7499 = vmatpush3.bf16.msra.mxu1 %v8069_v22 }
 0x218   :  { %7500 = vmatprep.subr.bf16.mxu1 %v8070_v25 }
 0x21b   :  { %7501 = vmatpush3.bf16.msra.mxu1 %v8070_v25 }
 0x21c   :  { %7502 = vmatprep.subr.bf16.mxu1 %v8071_v1 }
 0x21f   :  { %7503 = vmatpush3.bf16.msra.mxu1 %v8071_v1 }
 0x220   :  { %7504 = vmatprep.subr.bf16.mxu1 %v8072_v57 }
 0x223   :  { %7505 = vmatpush3.bf16.msra.mxu1 %v8072_v57 }
 0x224   :  { %7506 = vmatprep.subr.bf16.mxu1 %v8073_v7 }
 0x227   :  { %7507 = vmatpush3.bf16.msra.mxu1 %v8073_v7 }
 0x2c3   :  { %v7462_v26 = vpop.f32.mrb[0].mxu0  ;;  %v9304_v59 = vpop.f32.mrb[0].mxu1 }
 0x2c4   :  { %v1139_v50 = vpop.f32.mrb[1].mxu0  ;;  %v9306_v35 = vpop.f32.mrb[1].mxu1  ;;  %v9316_v44 = vadd.f32 %v7462_v26, %v9302_v23 }
 0x2c5   :  { %v9309_v17 = vadd.f32 %v9302_v23, %v1139_v50  ;;  %v7463_v15 = vpop.f32.mrb[2].mxu0  ;;  %v9311_v8 = vpop.f32.mrb[2].mxu1 }
 0x2c6   :  { %v1142_v4 = vpop.f32.mrb[3].mxu0  ;;  %v9313_v10 = vpop.f32.mrb[3].mxu1  ;;  %v9324_v18 = vadd.f32 %v7463_v15, %v9302_v23  ;;  %v1305_v62 = vmul.f32 %v9316_v44, %v9316_v44 }
 0x2c7   :  { %v9319_v45 = vadd.f32 %v9302_v23, %v1142_v4  ;;  %v1303_v27 = vmul.f32 %v9309_v17, %v9309_v17 }
 0x2c8   :  { %v1306_v12 = vmul.f32 %v9324_v18, %v9324_v18 }
 0x2c9   :  { %v1266_v14 = vadd.f32 %v9319_v45, %v9309_v17  ;;  %v1304_v24 = vmul.f32 %v9319_v45, %v9319_v45 }
 0x2cb   :  { %v1267_v40 = vadd.f32 %v1266_v14, %v9316_v44  ;;  %v1335_v9 = vadd.f32 %v1304_v24, %v1303_v27 }
 0x2cd   :  { %v1336_v29 = vadd.f32 %v1335_v9, %v1305_v62  ;;  %v1268_v63 = vadd.f32 %v1267_v40, %v9324_v18 }
 0x2cf   :  { %v7466_v56 = vpop.f32.mrb[4].mxu0  ;;  %v1337_v52 = vadd.f32 %v1336_v29, %v1306_v12 }
 0x2d0   :  { %v1155_v51 = vpop.f32.mrb[5].mxu0  ;;  %v9344_v25 = vadd.f32 %v7466_v56, %v9302_v23 }
 0x2d1   :  { %v9336_v47 = vpop.f32.mrb[4].mxu1  ;;  %v9339_v55 = vadd.f32 %v9302_v23, %v1155_v51  ;;  %v7467_v43 = vpop.f32.mrb[6].mxu0 }
 0x2d2   :  { %v9341_v21 = vpop.f32.mrb[5].mxu1  ;;  %v1158_v22 = vpop.f32.mrb[7].mxu0  ;;  %v9357_v7 = vadd.f32 %v7467_v43, %v9302_v23  ;;  %v1309_v24 = vmul.f32 %v9344_v25, %v9344_v25 }
 0x2d3   :  { %v1269_v1 = vadd.f32 %v1268_v63, %v9339_v55  ;;  %v1307_v26 = vmul.f32 %v9339_v55, %v9339_v55  ;;  %v9349_v57 = vpop.f32.mrb[6].mxu1  ;;  %v9352_v50 = vadd.f32 %v9302_v23, %v1158_v22 }
 0x2d4   :  { %v9354_v15 = vpop.f32.mrb[7].mxu1  ;;  %v1310_v12 = vmul.f32 %v9357_v7, %v9357_v7 }
 0x2d5   :  { %v1338_v4 = vadd.f32 %v1337_v52, %v1307_v26  ;;  %v1270_v27 = vadd.f32 %v1269_v1, %v9352_v50  ;;  %v1308_v14 = vmul.f32 %v9352_v50, %v9352_v50 }
 0x2d7   :  { %v1271_v62 = vadd.f32 %v1270_v27, %v9344_v25  ;;  %v1339_v40 = vadd.f32 %v1338_v4, %v1308_v14 }
 0x2d9   :  { %v1340_v29 = vadd.f32 %v1339_v40, %v1309_v24  ;;  %v1272_v63 = vadd.f32 %v1271_v62, %v9357_v7 }
 0x2da   :  { %v7470_v9 = vpop.f32.mrb[8].mxu0 }
 0x2db   :  { %v1171_v56 = vpop.f32.mrb[9].mxu0  ;;  %v1341_v22 = vadd.f32 %v1340_v29, %v1310_v12  ;;  %v9382_v24 = vadd.f32 %v7470_v9, %v9302_v23 }
 0x2dc   :  { %v9369_v51 = vadd.f32 %v9302_v23, %v1171_v56  ;;  %v7471_v52 = vpop.f32.mrb[10].mxu0 }
 0x2dd   :  { %v9371_v43 = vpop.f32.mrb[8].mxu1  ;;  %v1174_v1 = vpop.f32.mrb[11].mxu0  ;;  %v9390_v29 = vadd.f32 %v7471_v52, %v9302_v23 }
 0x2de   :  { %v1273_v26 = vadd.f32 %v1272_v63, %v9369_v51  ;;  %v1311_v4 = vmul.f32 %v9369_v51, %v9369_v51  ;;  %v9376_v27 = vpop.f32.mrb[9].mxu1  ;;  %v9379_v14 = vadd.f32 %v9302_v23, %v1174_v1  ;;  %v1313_v1 = vmul.f32 %v9382_v24, %v9382_v24 }
 0x2df   :  { %v9384_v62 = vpop.f32.mrb[10].mxu1 }
 0x2e0   :  { %v1342_v40 = vadd.f32 %v1341_v22, %v1311_v4  ;;  %v1274_v56 = vadd.f32 %v1273_v26, %v9379_v14  ;;  %v9387_v12 = vpop.f32.mrb[11].mxu1  ;;  %v1312_v63 = vmul.f32 %v9379_v14, %v9379_v14  ;;  %v1314_v26 = vmul.f32 %v9390_v29, %v9390_v29 }
 0x2e2   :  { %v1275_v46 = vadd.f32 %v1274_v56, %v9382_v24  ;;  %v1343_v9 = vadd.f32 %v1342_v40, %v1312_v63 }
 0x2e4   :  { %v1276_v22 = vadd.f32 %v1275_v46, %v9390_v29  ;;  %v1344_v4 = vadd.f32 %v1343_v9, %v1313_v1 }
 0x2e5   :  { %v7474_v30 = vpop.f32.mrb[12].mxu0 }
 0x2e6   :  { %v1187_v41 = vpop.f32.mrb[13].mxu0  ;;  %v1345_v63 = vadd.f32 %v1344_v4, %v1314_v26  ;;  %v9409_v46 = vadd.f32 %v7474_v30, %v9302_v23  ;;  %v9424_v26 = vadd.f32 %v9302_v23, %v9306_v35  ;;  %v9438_v35 = vadd.f32 %v9304_v59, %v9302_v23 }
 0x2e7   :  { %v9401_v52 = vadd.f32 %v9302_v23, %v1187_v41  ;;  %v7475_v33 = vpop.f32.mrb[14].mxu0 }
 0x2e8   :  { %v9403_v53 = vpop.f32.mrb[12].mxu1  ;;  %v1190_v61 = vpop.f32.mrb[15].mxu0  ;;  %v9417_v2 = vadd.f32 %v7475_v33, %v9302_v23  ;;  %v1317_v30 = vmul.f32 %v9409_v46, %v9409_v46  ;;  %v1319_v5 = vmul.f32 %v9424_v26, %v9424_v26  ;;  %v1321_v59 = vmul.f32 %v9438_v35, %v9438_v35 }
 0x2e9   :  { %v1277_v56 = vadd.f32 %v1276_v22, %v9401_v52  ;;  %v1315_v40 = vmul.f32 %v9401_v52, %v9401_v52  ;;  %v1251_v11 = vpop.f32.mrb[13].mxu1  ;;  %v9414_v1 = vadd.f32 %v9302_v23, %v1190_v61 }
 0x2ea   :  { %v9411_v32 = vpop.f32.mrb[14].mxu1  ;;  %v1318_v33 = vmul.f32 %v9417_v2, %v9417_v2 }
 0x2eb   :  { %v1346_v41 = vadd.f32 %v1345_v63, %v1315_v40  ;;  %v1254_v9 = vpop.f32.mrb[15].mxu1  ;;  %v1278_v22 = vadd.f32 %v1277_v56, %v9414_v1  ;;  %v1316_v36 = vmul.f32 %v9414_v1, %v9414_v1  ;;  %v9431_v40 = vadd.f32 %v9302_v23, %v9313_v10 }
 0x2ec   :  { %v9445_v10 = vadd.f32 %v9311_v8, %v9302_v23 }
 0x2ed   :  { %v1279_v61 = vadd.f32 %v1278_v22, %v9409_v46  ;;  %v1347_v4 = vadd.f32 %v1346_v41, %v1316_v36  ;;  %v1320_v41 = vmul.f32 %v9431_v40, %v9431_v40 }
 0x2ee   :  { %v1322_v8 = vmul.f32 %v9445_v10, %v9445_v10 }
 0x2ef   :  { %v1280_v56 = vadd.f32 %v1279_v61, %v9417_v2  ;;  %v1348_v63 = vadd.f32 %v1347_v4, %v1317_v30  ;;  %v9454_v4 = vadd.f32 %v9302_v23, %v9341_v21 }
 0x2f1   :  { %v1281_v22 = vadd.f32 %v1280_v56, %v9424_v26  ;;  %v1349_v36 = vadd.f32 %v1348_v63, %v1318_v33  ;;  %v9461_v63 = vadd.f32 %v9302_v23, %v9354_v15  ;;  %v1323_v21 = vmul.f32 %v9454_v4, %v9454_v4 }
 0x2f3   :  { %v1282_v61 = vadd.f32 %v1281_v22, %v9431_v40  ;;  %v1350_v30 = vadd.f32 %v1349_v36, %v1319_v5  ;;  %v9466_v36 = vadd.f32 %v9336_v47, %v9302_v23  ;;  %v1324_v15 = vmul.f32 %v9461_v63, %v9461_v63 }
 0x2f5   :  { %v1283_v56 = vadd.f32 %v1282_v61, %v9438_v35  ;;  %v1351_v33 = vadd.f32 %v1350_v30, %v1320_v41  ;;  %v9473_v30 = vadd.f32 %v9349_v57, %v9302_v23  ;;  %v1325_v47 = vmul.f32 %v9466_v36, %v9466_v36 }
 0x2f7   :  { %v1284_v22 = vadd.f32 %v1283_v56, %v9445_v10  ;;  %v1352_v5 = vadd.f32 %v1351_v33, %v1321_v59  ;;  %v9482_v56 = vadd.f32 %v9302_v23, %v9376_v27  ;;  %v1326_v57 = vmul.f32 %v9473_v30, %v9473_v30 }
 0x2f9   :  { %v1285_v61 = vadd.f32 %v1284_v22, %v9454_v4  ;;  %v1353_v41 = vadd.f32 %v1352_v5, %v1322_v8  ;;  %v9489_v22 = vadd.f32 %v9302_v23, %v9387_v12  ;;  %v1327_v27 = vmul.f32 %v9482_v56, %v9482_v56 }
 0x2fb   :  { %v1354_v13 = vadd.f32 %v1353_v41, %v1323_v21  ;;  %v1286_v59 = vadd.f32 %v1285_v61, %v9461_v63  ;;  %v9494_v61 = vadd.f32 %v9371_v43, %v9302_v23  ;;  %v1328_v12 = vmul.f32 %v9489_v22, %v9489_v22 }
 0x2fd   :  { %v1287_v33 = vadd.f32 %v1286_v59, %v9466_v36  ;;  %v1355_v8 = vadd.f32 %v1354_v13, %v1324_v15  ;;  %v9501_v15 = vadd.f32 %v9384_v62, %v9302_v23  ;;  %v1329_v43 = vmul.f32 %v9494_v61, %v9494_v61 }
 0x2fe   :  { %v9515_v62 = vadd.f32 %v9302_v23, %v1254_v9 }
 0x2ff   :  { %v1288_v5 = vadd.f32 %v1287_v33, %v9473_v30  ;;  %v1356_v21 = vadd.f32 %v1355_v8, %v1325_v47  ;;  %v9509_v33 = vadd.f32 %v9302_v23, %v1251_v11 }
 0x301   :  { %v1289_v41 = vadd.f32 %v1288_v5, %v9482_v56  ;;  %v1357_v13 = vadd.f32 %v1356_v21, %v1326_v57  ;;  %v1330_v57 = vmul.f32 %v9501_v15, %v9501_v15  ;;  %v1331_v11 = vmul.f32 %v9509_v33, %v9509_v33 }
 0x303   :  { %v1290_v59 = vadd.f32 %v1289_v41, %v9489_v22  ;;  %v1358_v47 = vadd.f32 %v1357_v13, %v1327_v27  ;;  %v9520_v27 = vadd.f32 %v9403_v53, %v9302_v23 }
 0x305   :  { %v1291_v8 = vadd.f32 %v1290_v59, %v9494_v61  ;;  %v1359_v5 = vadd.f32 %v1358_v47, %v1328_v12  ;;  %v9527_v12 = vadd.f32 %v9411_v32, %v9302_v23  ;;  %v1332_v59 = vmul.f32 %v9515_v62, %v9515_v62 }
 0x306   :  { %v1333_v53 = vmul.f32 %v9520_v27, %v9520_v27 }
 0x307   :  { %v1292_v21 = vadd.f32 %v1291_v8, %v9501_v15  ;;  %v1360_v6 = vadd.f32 %v1359_v5, %v1329_v43  ;;  %v1334_v5 = vmul.f32 %v9527_v12, %v9527_v12 }
 0x309   :  { %v1293_v41 = vadd.f32 %v1292_v21, %v9509_v33  ;;  %v1361_v13 = vadd.f32 %v1360_v6, %v1330_v57 }
 0x30b   :  { %v1294_v9 = vadd.f32 %v1293_v41, %v9515_v62  ;;  %v1362_v47 = vadd.f32 %v1361_v13, %v1331_v11 }
 0x30d   :  { %v1295_v43 = vadd.f32 %v1294_v9, %v9520_v27  ;;  %v1363_v8 = vadd.f32 %v1362_v47, %v1332_v59 }
 0x30f   :  { %v1296_v6 = vadd.f32 %v1295_v43, %v9527_v12  ;;  %v1364_v57 = vadd.f32 %v1363_v8, %v1333_v53 }
 0x311   :  { %v1297_v32 = vrot.slane %v1296_v6, 4  ;;  %v1365_v23 = vadd.f32 %v1364_v57, %v1334_v5 }
 0x313   :  { %v1298_v21 = vadd.f32 %v1297_v32, %v1296_v6  ;;  %v1366_v41 = vrot.slane %v1365_v23, 4 }
 0x315   :  { %v1299_v0 = vrot.slane %v1298_v21, 2  ;;  %v1367_v58 = vadd.f32 %v1366_v41, %v1365_v23 }
 0x317   :  { %v1300_v20 = vadd.f32 %v1299_v0, %v1298_v21  ;;  %v1368_v11 = vrot.slane %v1367_v58, 2 }
 0x319   :  { %v1301_v13 = vrot.slane %v1300_v20, 1  ;;  %v1369_v34 = vadd.f32 %v1368_v11, %v1367_v58 }
 0x31b   :  { %v1302_v16 = vadd.f32 %v1301_v13, %v1300_v20  ;;  %v1370_v3 = vrot.slane %v1369_v34, 1  ;;  %v7063_v20 = vld [vmem:[%s13502_s2 + $0x2] sm:$0x3] }
 0x31c   :  { %v9574_v57 = vrot.slane %v7063_v20, %v8504_v38 }
 0x31d   :  { %v1371_v9 = vadd.f32 %v1370_v3, %v1369_v34  ;;  %v9538_v59 = vmul.f32 0.00390625, %v1302_v16  ;;  %v7062_v16 = vld [vmem:[%s13501_s1 + $0x2] sm:$0x3] }
 0x31e   :  { %v9571_v6 = vrot.slane %v7062_v16, %v8504_v38 }
 0x31f   :  { %v1373_v47 = vmul.f32 0.00390625, %v1371_v9  ;;  %v1374_v43 = vmul.f32 %v9538_v59, %v9538_v59  ;;  %v1405_v53 = vsub.f32 %v9515_v62, %v9538_v59  ;;  %v1388_v0 = vsub.f32 %v9401_v52, %v9538_v59 }
 0x320   :  { %v1389_v58 = vsub.f32 %v9414_v1, %v9538_v59  ;;  %v1390_v3 = vsub.f32 %v9409_v46, %v9538_v59  ;;  %v1391_v34 = vsub.f32 %v9417_v2, %v9538_v59  ;;  %v1404_v52 = vsub.f32 %v9509_v33, %v9538_v59 }
 0x321   :  { %v1375_v8 = vsub.f32 %v1373_v47, %v1374_v43  ;;  %v1406_v1 = vsub.f32 %v9520_v27, %v9538_v59  ;;  %v1407_v46 = vsub.f32 %v9527_v12, %v9538_v59  ;;  %v9565_v2 = vrot.slane %v7062_v16, %v8506_v39 }
 0x322   :  { %v9568_v62 = vrot.slane %v7063_v20, %v8506_v39  ;;  %v1376_v33 = vsub.f32 %v9309_v17, %v9538_v59  ;;  %v1377_v27 = vsub.f32 %v9319_v45, %v9538_v59  ;;  %v1378_v12 = vsub.f32 %v9316_v44, %v9538_v59 }
 0x323   :  { %v1408_v5 = vadd.f32 1e-05, %v1375_v8  ;;  %v1379_v32 = vsub.f32 %v9324_v18, %v9538_v59  ;;  %v1380_v23 = vsub.f32 %v9339_v55, %v9538_v59  ;;  %v1381_v21 = vsub.f32 %v9352_v50, %v9538_v59 }
 0x324   :  { %v1382_v41 = vsub.f32 %v9344_v25, %v9538_v59  ;;  %v1383_v17 = vsub.f32 %v9357_v7, %v9538_v59  ;;  %v1384_v45 = vsub.f32 %v9369_v51, %v9538_v59  ;;  %v1385_v44 = vsub.f32 %v9379_v14, %v9538_v59 }
 0x325   :  { %8148 = vrsqrt.f32 %v1408_v5  ;;  %v1386_v18 = vsub.f32 %v9382_v24, %v9538_v59  ;;  %v1387_v55 = vsub.f32 %v9390_v29, %v9538_v59  ;;  %v1392_v50 = vsub.f32 %v9424_v26, %v9538_v59 }
 0x326   :  { %v1393_v25 = vsub.f32 %v9431_v40, %v9538_v59  ;;  %v1394_v7 = vsub.f32 %v9438_v35, %v9538_v59  ;;  %v1395_v51 = vsub.f32 %v9445_v10, %v9538_v59  ;;  %v1396_v14 = vsub.f32 %v9454_v4, %v9538_v59 }
 0x327   :  { %v1397_v24 = vsub.f32 %v9461_v63, %v9538_v59  ;;  %v1398_v29 = vsub.f32 %v9466_v36, %v9538_v59  ;;  %v1399_v26 = vsub.f32 %v9473_v30, %v9538_v59  ;;  %v1400_v40 = vsub.f32 %v9482_v56, %v9538_v59 }
 0x328   :  { %v1401_v35 = vsub.f32 %v9489_v22, %v9538_v59  ;;  %v1402_v10 = vsub.f32 %v9494_v61, %v9538_v59  ;;  %v1403_v4 = vsub.f32 %v9501_v15, %v9538_v59 }
 0x32f   :  { %v8149_v11 = vpop.eup %8148 }
 0x330   :  { %v9624_v63 = vmul.f32 %v8149_v11, %v1405_v53  ;;  %v1410_v13 = vmul.f32 %v8149_v11, %v1376_v33  ;;  %v1411_v36 = vmul.f32 %v8149_v11, %v1377_v27  ;;  %v1412_v9 = vmul.f32 %v8149_v11, %v1378_v12 }
 0x331   :  { %v1413_v47 = vmul.f32 %v8149_v11, %v1379_v32  ;;  %v1414_v30 = vmul.f32 %v8149_v11, %v1380_v23  ;;  %v1415_v43 = vmul.f32 %v8149_v11, %v1381_v21  ;;  %v1416_v8 = vmul.f32 %v8149_v11, %v1382_v41 }
 0x332   :  { %v1417_v5 = vmul.f32 %v8149_v11, %v1383_v17  ;;  %v1418_v56 = vmul.f32 %v8149_v11, %v1384_v45  ;;  %v1419_v16 = vmul.f32 %v8149_v11, %v1385_v44  ;;  %v1420_v20 = vmul.f32 %v8149_v11, %v1386_v18 }
 0x333   :  { %v1421_v22 = vmul.f32 %v8149_v11, %v1387_v55  ;;  %v1422_v38 = vmul.f32 %v8149_v11, %v1388_v0  ;;  %v1423_v39 = vmul.f32 %v8149_v11, %v1389_v58  ;;  %v1424_v61 = vmul.f32 %v8149_v11, %v1390_v3 }
 0x334   :  { %v1425_v37 = vmul.f32 %v8149_v11, %v1391_v34  ;;  %v9626_v42 = vmul.f32 %v8149_v11, %v1392_v50  ;;  %v9628_v15 = vmul.f32 %v8149_v11, %v1393_v25  ;;  %v9630_v59 = vmul.f32 %v8149_v11, %v1394_v7 }
 0x335   :  { %v9632_v53 = vmul.f32 %v8149_v11, %v1395_v51  ;;  %v9634_v33 = vmul.f32 %v8149_v11, %v1396_v14  ;;  %v9636_v27 = vmul.f32 %v8149_v11, %v1397_v24  ;;  %v9638_v12 = vmul.f32 %v8149_v11, %v1398_v29 }
 0x336   :  { %v9640_v32 = vmul.f32 %v8149_v11, %v1399_v26  ;;  %v9642_v0 = vmul.f32 %v8149_v11, %v1400_v40  ;;  %v9644_v58 = vmul.f32 %v8149_v11, %v1401_v35  ;;  %v9646_v3 = vmul.f32 %v8149_v11, %v1402_v10 }
 0x337   :  { %v9648_v34 = vmul.f32 %v8149_v11, %v1403_v4  ;;  %v9650_v23 = vmul.f32 %v8149_v11, %v1404_v52  ;;  %v9652_v21 = vmul.f32 %v8149_v11, %v1406_v1  ;;  %v9654_v41 = vmul.f32 %v8149_v11, %v1407_v46 }
 0x338   :  { %v1452_v17 = vmul.f32 %v9565_v2, %v1412_v9  ;;  %v1453_v45 = vmul.f32 %v9565_v2, %v1413_v47  ;;  %v1450_v44 = vmul.f32 %v9565_v2, %v1410_v13  ;;  %v1451_v18 = vmul.f32 %v9565_v2, %v1411_v36 }
 0x339   :  { %v1454_v55 = vmul.f32 %v9565_v2, %v1414_v30  ;;  %v1455_v50 = vmul.f32 %v9565_v2, %v1415_v43  ;;  %v1456_v25 = vmul.f32 %v9565_v2, %v1416_v8  ;;  %v1457_v52 = vmul.f32 %v9565_v2, %v1417_v5 }
 0x33a   :  { %v1472_v1 = vadd.f32 %v9568_v62, %v1452_v17  ;;  %v1473_v46 = vadd.f32 %v9568_v62, %v1453_v45  ;;  %v1470_v7 = vadd.f32 %v9568_v62, %v1450_v44  ;;  %v1471_v51 = vadd.f32 %v9568_v62, %v1451_v18 }
 0x33b   :  { %v1474_v14 = vadd.f32 %v9568_v62, %v1454_v55  ;;  %v1475_v24 = vadd.f32 %v9568_v62, %v1455_v50  ;;  %v1476_v29 = vadd.f32 %v9568_v62, %v1456_v25  ;;  %v1477_v26 = vadd.f32 %v9568_v62, %v1457_v52 }
 0x33c   :  { %v1488_v11 = vmax.f32 %v1472_v1, 0.0  ;;  %v1489_v40 = vmax.f32 %v1473_v46, 0.0  ;;  %v1486_v35 = vmax.f32 %v1470_v7, 0.0  ;;  %v1487_v10 = vmax.f32 %v1471_v51, 0.0 }
 0x33d   :  { %v1490_v4 = vmax.f32 %v1474_v14, 0.0  ;;  %v1491_v13 = vmax.f32 %v1475_v24, 0.0  ;;  %v1492_v36 = vmax.f32 %v1476_v29, 0.0  ;;  %v1493_v9 = vmax.f32 %v1477_v26, 0.0 }
 0x33e   :  { %v1574_v47 = vpack.c.bf16 %v1487_v10, %v1486_v35  ;;  %v1575_v30 = vpack.c.bf16 %v1489_v40, %v1488_v11  ;;  %v1458_v43 = vmul.f32 %v9565_v2, %v1418_v56  ;;  %v1459_v8 = vmul.f32 %v9565_v2, %v1419_v16 }
 0x33f   :  { %v1576_v5 = vpack.c.bf16 %v1491_v13, %v1490_v4  ;;  %v1577_v17 = vpack.c.bf16 %v1493_v9, %v1492_v36  ;;  %v1460_v45 = vmul.f32 %v9565_v2, %v1420_v20  ;;  %v1461_v44 = vmul.f32 %v9565_v2, %v1421_v22 }
 0x340   :  { %7508 = vmatprep.mubr.bf16.mxu1 %v1574_v47  ;;  %v1478_v18 = vadd.f32 %v9568_v62, %v1458_v43  ;;  %v1479_v55 = vadd.f32 %v9568_v62, %v1459_v8  ;;  %v1462_v50 = vmul.f32 %v9565_v2, %v1422_v38  ;;  %v1463_v25 = vmul.f32 %v9565_v2, %v1423_v39 }
 0x341   :  { %7509 = vmatmul.mubr.bf16.vlgmr.msra.gmra.mrb[16].mxu1 %v1575_v30  ;;  %v1480_v56 = vadd.f32 %v9568_v62, %v1460_v45  ;;  %v1481_v16 = vadd.f32 %v9568_v62, %v1461_v44  ;;  %v1464_v52 = vmul.f32 %v9565_v2, %v1424_v61  ;;  %v1465_v20 = vmul.f32 %v9565_v2, %v1425_v37 }
 0x342   :  { %7512 = vmatprep.mubr.bf16.mxu1 %v1576_v5  ;;  %v1494_v22 = vmax.f32 %v1478_v18, 0.0  ;;  %v1495_v1 = vmax.f32 %v1479_v55, 0.0  ;;  %v1482_v46 = vadd.f32 %v9568_v62, %v1462_v50  ;;  %v1483_v7 = vadd.f32 %v9568_v62, %v1463_v25 }
 0x343   :  { %v1496_v51 = vmax.f32 %v1480_v56, 0.0  ;;  %v1497_v38 = vmax.f32 %v1481_v16, 0.0  ;;  %v1484_v39 = vadd.f32 %v9568_v62, %v1464_v52  ;;  %v1485_v14 = vadd.f32 %v9568_v62, %v1465_v20 }
 0x344   :  { %v1578_v24 = vpack.c.bf16 %v1495_v1, %v1494_v22  ;;  %v1498_v29 = vmax.f32 %v1482_v46, 0.0  ;;  %v1499_v26 = vmax.f32 %v1483_v7, 0.0  ;;  %v1506_v61 = vmul.f32 %v9571_v6, %v9626_v42 }
 0x345   :  { %v1579_v37 = vpack.c.bf16 %v1497_v38, %v1496_v51  ;;  %v1500_v2 = vmax.f32 %v1484_v39, 0.0  ;;  %v1501_v11 = vmax.f32 %v1485_v14, 0.0  ;;  %v1507_v40 = vmul.f32 %v9571_v6, %v9628_v15 }
 0x346   :  { %v1580_v35 = vpack.c.bf16 %v1499_v26, %v1498_v29  ;;  %v1526_v10 = vadd.f32 %v9574_v57, %v1506_v61  ;;  %v1508_v4 = vmul.f32 %v9571_v6, %v9630_v59  ;;  %v1509_v62 = vmul.f32 %v9571_v6, %v9632_v53 }
 0x347   :  { %v1581_v13 = vpack.c.bf16 %v1501_v11, %v1500_v2  ;;  %v1527_v36 = vadd.f32 %v9574_v57, %v1507_v40  ;;  %v1510_v42 = vmul.f32 %v9571_v6, %v9634_v33  ;;  %v1511_v9 = vmul.f32 %v9571_v6, %v9636_v27 }
 0x348   :  { %v1542_v47 = vmax.f32 %v1526_v10, 0.0  ;;  %v1528_v15 = vadd.f32 %v9574_v57, %v1508_v4  ;;  %v1529_v30 = vadd.f32 %v9574_v57, %v1509_v62  ;;  %v1512_v59 = vmul.f32 %v9571_v6, %v9638_v12 }
 0x349   :  { %7513 = vmatmul.mubr.bf16.gmra.mrb[20].mxu1 %v1577_v17  ;;  %v1543_v43 = vmax.f32 %v1527_v36, 0.0  ;;  %v1530_v53 = vadd.f32 %v9574_v57, %v1510_v42  ;;  %v1531_v8 = vadd.f32 %v9574_v57, %v1511_v9  ;;  %v1513_v33 = vmul.f32 %v9571_v6, %v9640_v32  ;;  %v8080_v36 = vld [vmem:[#allocation2 + $0x70] sm:$0xff]   ;;  %v8081_v42 = vld [vmem:[#allocation2 + $0x78] sm:$0xff]  }
 0x34a   :  { %7516 = vmatprep.mubr.bf16.mxu1 %v1578_v24  ;;  %v1544_v5 = vmax.f32 %v1528_v15, 0.0  ;;  %v1545_v27 = vmax.f32 %v1529_v30, 0.0  ;;  %v1532_v45 = vadd.f32 %v9574_v57, %v1512_v59  ;;  %v1514_v44 = vmul.f32 %v9571_v6, %v9642_v0 }
 0x34b   :  { %v1582_v18 = vpack.c.bf16 %v1543_v43, %v1542_v47  ;;  %v1546_v55 = vmax.f32 %v1530_v53, 0.0  ;;  %v1547_v12 = vmax.f32 %v1531_v8, 0.0  ;;  %v1533_v17 = vadd.f32 %v9574_v57, %v1513_v33  ;;  %v9739_v47 = vld [vmem:[%s13508_s8] ss:$0 sm:$0xff] }
 0x34c   :  { %v1583_v50 = vpack.c.bf16 %v1545_v27, %v1544_v5  ;;  %v1548_v25 = vmax.f32 %v1532_v45, 0.0  ;;  %v1515_v56 = vmul.f32 %v9571_v6, %v9644_v58  ;;  %v1534_v32 = vadd.f32 %v9574_v57, %v1514_v44 }
 0x34d   :  { %v1584_v16 = vpack.c.bf16 %v1547_v12, %v1546_v55  ;;  %v1549_v52 = vmax.f32 %v1533_v17, 0.0  ;;  %v1516_v20 = vmul.f32 %v9571_v6, %v9646_v3  ;;  %v1517_v0 = vmul.f32 %v9571_v6, %v9648_v34 }
 0x34e   :  { %v1535_v22 = vadd.f32 %v9574_v57, %v1515_v56  ;;  %v1550_v1 = vmax.f32 %v1534_v32, 0.0  ;;  %v1518_v46 = vmul.f32 %v9571_v6, %v9650_v23  ;;  %v1519_v7 = vmul.f32 %v9571_v6, %v9624_v63 }
 0x34f   :  { %v1585_v58 = vpack.c.bf16 %v1549_v52, %v1548_v25  ;;  %v1536_v51 = vadd.f32 %v9574_v57, %v1516_v20  ;;  %v1537_v38 = vadd.f32 %v9574_v57, %v1517_v0  ;;  %v1520_v3 = vmul.f32 %v9571_v6, %v9652_v21 }
 0x350   :  { %v1551_v39 = vmax.f32 %v1535_v22, 0.0  ;;  %v1538_v34 = vadd.f32 %v9574_v57, %v1518_v46  ;;  %v1539_v14 = vadd.f32 %v9574_v57, %v1519_v7  ;;  %v1521_v24 = vmul.f32 %v9571_v6, %v9654_v41  ;;  %v8074_v6 = vld [vmem:[#allocation2 + $0x40] sm:$0xff]   ;;  %v8075_v41 = vld [vmem:[#allocation2 + $0x48] sm:$0xff]   ;;  %v13699_v22 = vld [vmem:[#allocation13_spill] sm:$0xff] }
 0x351   :  { %7517 = vmatmul.mubr.bf16.gmra.mrb[24].mxu1 %v1579_v37  ;;  %v1552_v23 = vmax.f32 %v1536_v51, 0.0  ;;  %v1553_v29 = vmax.f32 %v1537_v38, 0.0  ;;  %v1540_v63 = vadd.f32 %v9574_v57, %v1520_v3  ;;  %7540 = vmatprep.subr.bf16.mxu0 %v8074_v6  ;;  %v8077_v37 = vld [vmem:[#allocation2 + $0x58] sm:$0xff]  }
 0x352   :  { %7520 = vmatprep.mubr.bf16.mxu1 %v1580_v35  ;;  %v1586_v26 = vpack.c.bf16 %v1551_v39, %v1550_v1  ;;  %v1554_v61 = vmax.f32 %v1538_v34, 0.0  ;;  %v1555_v2 = vmax.f32 %v1539_v14, 0.0  ;;  %v1541_v11 = vadd.f32 %v9574_v57, %v1521_v24  ;;  %7541 = vmatpush3.bf16.msra.mxu0 %v8074_v6  ;;  %v8076_v57 = vld [vmem:[#allocation2 + $0x50] sm:$0xff]   ;;  %v8078_v35 = vld [vmem:[#allocation2 + $0x60] sm:$0xff]   ;;  %v13701_v14 = vld [vmem:[#allocation16_spill] sm:$0xff] }
 0x353   :  { %v1587_v21 = vpack.c.bf16 %v1553_v29, %v1552_v23  ;;  %v1556_v40 = vmax.f32 %v1540_v63, 0.0  ;;  %7542 = vmatprep.subr.bf16.mxu0 %v8075_v41 }
 0x354   :  { %v1588_v10 = vpack.c.bf16 %v1555_v2, %v1554_v61  ;;  %v1557_v4 = vmax.f32 %v1541_v11, 0.0  ;;  %v13702_v61 = vld [vmem:[#allocation14_spill] sm:$0xff] }
 0x356   :  { %v1589_v62 = vpack.c.bf16 %v1557_v4, %v1556_v40  ;;  %7543 = vmatpush3.bf16.msra.mxu0 %v8075_v41  ;;  %v13703_v40 = vld [vmem:[#allocation17_spill] sm:$0xff] }
 0x357   :  { %7544 = vmatprep.subr.bf16.mxu0 %v8076_v57 }
 0x359   :  { %7521 = vmatmul.mubr.bf16.gmra.mrb[28].mxu1 %v1581_v13  ;;  %v8079_v13 = vld [vmem:[#allocation2 + $0x68] sm:$0xff]  }
 0x35a   :  { %7524 = vmatprep.mubr.bf16.mxu1 %v1582_v18  ;;  %7545 = vmatpush3.bf16.msra.mxu0 %v8076_v57  ;;  %v13705_v57 = vld [vmem:[#allocation15_spill] sm:$0xff] }
 0x35b   :  { %7546 = vmatprep.subr.bf16.mxu0 %v8077_v37 }
 0x35e   :  { %7547 = vmatpush3.bf16.msra.mxu0 %v8077_v37 }
 0x35f   :  { %7548 = vmatprep.subr.bf16.mxu0 %v8078_v35 }
 0x361   :  { %7525 = vmatmul.mubr.bf16.gmra.mrb[32].mxu1 %v1583_v50 }
 0x362   :  { %7528 = vmatprep.mubr.bf16.mxu1 %v1584_v16  ;;  %7549 = vmatpush3.bf16.msra.mxu0 %v8078_v35 }
 0x363   :  { %7550 = vmatprep.subr.bf16.mxu0 %v8079_v13 }
 0x366   :  { %7551 = vmatpush3.bf16.msra.mxu0 %v8079_v13 }
 0x367   :  { %7552 = vmatprep.subr.bf16.mxu0 %v8080_v36 }
 0x369   :  { %7529 = vmatmul.mubr.bf16.gmra.mrb[36].mxu1 %v1585_v58 }
 0x36a   :  { %7532 = vmatprep.mubr.bf16.mxu1 %v1586_v26  ;;  %7553 = vmatpush3.bf16.msra.mxu0 %v8080_v36 }
 0x36b   :  { %7554 = vmatprep.subr.bf16.mxu0 %v8081_v42 }
 0x36e   :  { %7555 = vmatpush3.bf16.msra.mxu0 %v8081_v42 }
 0x371   :  { %7533 = vmatmul.mubr.bf16.gmra.mrb[40].mxu1 %v1587_v21 }
 0x372   :  { %7536 = vmatprep.mubr.bf16.mxu1 %v1588_v10 }
 0x379   :  { %7537 = vmatmul.mubr.bf16.gmra.mrb[44].mxu1 %v1589_v62 }
 0x414   :  { %v7510_v9 = vpop.f32.mrb[16].mxu1 }
 0x415   :  { %v1672_v15 = vpop.f32.mrb[17].mxu1  ;;  %v1801_v30 = vadd.f32 %v7510_v9, %v8769_v19 }
 0x416   :  { %v1799_v59 = vadd.f32 %v1672_v15, %v8757_v49  ;;  %v7511_v43 = vpop.f32.mrb[18].mxu1 }
 0x417   :  { %v1802_v53 = vadd.f32 %v7511_v43, %v8776_v28  ;;  %v1675_v8 = vpop.f32.mrb[19].mxu1  ;;  %v9749_v27 = vadd.f32 %v9739_v47, %v1801_v30 }
 0x418   :  { %v9745_v33 = vadd.f32 %v9739_v47, %v1799_v59  ;;  %v1800_v5 = vadd.f32 %v1675_v8, %v8762_v54  ;;  %v13709_v8 = vld [vmem:[#allocation20_spill] sm:$0xff] }
 0x419   :  { %v9755_v19 = vadd.f32 %v9739_v47, %v1802_v53  ;;  %v1909_v12 = vmul.f32 %v9749_v27, %v9749_v27 }
 0x41a   :  { %v9752_v45 = vadd.f32 %v9739_v47, %v1800_v5  ;;  %v1907_v49 = vmul.f32 %v9745_v33, %v9745_v33 }
 0x41b   :  { %v1910_v32 = vmul.f32 %v9755_v19, %v9755_v19 }
 0x41c   :  { %v1870_v28 = vadd.f32 %v9752_v45, %v9745_v33  ;;  %v1908_v44 = vmul.f32 %v9752_v45, %v9752_v45  ;;  %v7514_v54 = vpop.f32.mrb[20].mxu1 }
 0x41d   :  { %v1805_v18 = vadd.f32 %v7514_v54, %v8804_v60  ;;  %v1688_v55 = vpop.f32.mrb[21].mxu1 }
 0x41e   :  { %v1871_v17 = vadd.f32 %v1870_v28, %v9749_v27  ;;  %v1939_v50 = vadd.f32 %v1908_v44, %v1907_v49  ;;  %v1803_v25 = vadd.f32 %v1688_v55, %v8783_v48  ;;  %v7515_v56 = vpop.f32.mrb[22].mxu1 }
 0x41f   :  { %v1806_v16 = vadd.f32 %v7515_v56, %v8813_v31  ;;  %v1691_v52 = vpop.f32.mrb[23].mxu1  ;;  %v9777_v46 = vadd.f32 %v9739_v47, %v1805_v18  ;;  %v13710_v18 = vld [vmem:[#allocation18_spill] sm:$0xff] }
 0x420   :  { %v1940_v20 = vadd.f32 %v1939_v50, %v1909_v12  ;;  %v9772_v0 = vadd.f32 %v9739_v47, %v1803_v25  ;;  %v1872_v60 = vadd.f32 %v1871_v17, %v9755_v19  ;;  %v1804_v1 = vadd.f32 %v1691_v52, %v13699_v22  ;;  %v13711_v50 = vld [vmem:[#allocation21_spill] sm:$0xff] }
 0x421   :  { %v9786_v51 = vadd.f32 %v9739_v47, %v1806_v16  ;;  %v1913_v29 = vmul.f32 %v9777_v46, %v9777_v46 }
 0x422   :  { %v1873_v48 = vadd.f32 %v1872_v60, %v9772_v0  ;;  %v1911_v7 = vmul.f32 %v9772_v0, %v9772_v0  ;;  %v1941_v58 = vadd.f32 %v1940_v20, %v1910_v32  ;;  %v9783_v31 = vadd.f32 %v9739_v47, %v1804_v1  ;;  %v13713_v20 = vld [vmem:[#allocation19_spill] sm:$0xff] }
 0x423   :  { %v1914_v21 = vmul.f32 %v9786_v51, %v9786_v51 }
 0x424   :  { %13700 = vst [vmem:[#allocation13_spill] sm:$0xff] %v9783_v31  ;;  %v1942_v38 = vadd.f32 %v1941_v58, %v1911_v7  ;;  %v1874_v3 = vadd.f32 %v1873_v48, %v9783_v31  ;;  %v1912_v39 = vmul.f32 %v9783_v31, %v9783_v31  ;;  %v7518_v34 = vpop.f32.mrb[24].mxu1 }
 0x425   :  { %v1809_v24 = vadd.f32 %v7518_v34, %v13701_v14  ;;  %v1704_v23 = vpop.f32.mrb[25].mxu1 }
 0x426   :  { %v1875_v63 = vadd.f32 %v1874_v3, %v9777_v46  ;;  %v1943_v26 = vadd.f32 %v1942_v38, %v1912_v39  ;;  %v1807_v2 = vadd.f32 %v1704_v23, %v13702_v61  ;;  %v7519_v11 = vpop.f32.mrb[26].mxu1 }
 0x427   :  { %v1810_v10 = vadd.f32 %v7519_v11, %v13703_v40  ;;  %v1707_v4 = vpop.f32.mrb[27].mxu1  ;;  %v9805_v35 = vadd.f32 %v9739_v47, %v1809_v24  ;;  %v13717_v24 = vld [vmem:[#allocation24_spill] sm:$0xff] }
 0x428   :  { %v1944_v62 = vadd.f32 %v1943_v26, %v1913_v29  ;;  %v9800_v6 = vadd.f32 %v9739_v47, %v1807_v2  ;;  %v1876_v41 = vadd.f32 %v1875_v63, %v9786_v51  ;;  %v1808_v37 = vadd.f32 %v1707_v4, %v13705_v57  ;;  %v13718_v2 = vld [vmem:[#allocation22_spill] sm:$0xff] }
 0x429   :  { %13706 = vst [vmem:[#allocation14_spill] sm:$0xff] %v9805_v35  ;;  %v9814_v15 = vadd.f32 %v9739_v47, %v1810_v10  ;;  %v1917_v28 = vmul.f32 %v9805_v35, %v9805_v35  ;;  %v13719_v10 = vld [vmem:[#allocation25_spill] sm:$0xff] }
 0x42a   :  { %13704 = vst [vmem:[#allocation16_spill] sm:$0xff] %v9800_v6  ;;  %v1877_v13 = vadd.f32 %v1876_v41, %v9800_v6  ;;  %v1915_v36 = vmul.f32 %v9800_v6, %v9800_v6  ;;  %v1945_v42 = vadd.f32 %v1944_v62, %v1914_v21  ;;  %v9811_v9 = vadd.f32 %v9739_v47, %v1808_v37 }
 0x42b   :  { %13708 = vst [vmem:[#allocation15_spill] sm:$0xff] %v9814_v15  ;;  %v1918_v17 = vmul.f32 %v9814_v15, %v9814_v15 }
 0x42c   :  { %13707 = vst [vmem:[#allocation17_spill] sm:$0xff] %v9811_v9  ;;  %v1946_v30 = vadd.f32 %v1945_v42, %v1915_v36  ;;  %v1878_v59 = vadd.f32 %v1877_v13, %v9811_v9  ;;  %v1916_v43 = vmul.f32 %v9811_v9, %v9811_v9  ;;  %v7522_v53 = vpop.f32.mrb[28].mxu1  ;;  %v13721_v13 = vld [vmem:[#allocation23_spill] sm:$0xff] }
 0x42d   :  { %v1813_v5 = vadd.f32 %v7522_v53, %v13709_v8  ;;  %v1720_v49 = vpop.f32.mrb[29].mxu1 }
 0x42e   :  { %v1879_v44 = vadd.f32 %v1878_v59, %v9805_v35  ;;  %v1947_v54 = vadd.f32 %v1946_v30, %v1916_v43  ;;  %v1811_v55 = vadd.f32 %v1720_v49, %v13710_v18  ;;  %v7523_v12 = vpop.f32.mrb[30].mxu1 }
 0x42f   :  { %v1814_v25 = vadd.f32 %v7523_v12, %v13711_v50  ;;  %v1723_v56 = vpop.f32.mrb[31].mxu1  ;;  %v9833_v22 = vadd.f32 %v9739_v47, %v1813_v5 }
 0x430   :  { %v1948_v32 = vadd.f32 %v1947_v54, %v1917_v28  ;;  %v9828_v16 = vadd.f32 %v9739_v47, %v1811_v55  ;;  %v1880_v52 = vadd.f32 %v1879_v44, %v9814_v15  ;;  %v1812_v60 = vadd.f32 %v1723_v56, %v13713_v20  ;;  %v13725_v54 = vld [vmem:[#allocation28_spill] sm:$0xff]  ;;  %v13727_v20 = vld [vmem:[#allocation29_spill] sm:$0xff] }
 0x431   :  { %13714 = vst [vmem:[#allocation18_spill] sm:$0xff] %v9833_v22  ;;  %v9842_v38 = vadd.f32 %v9739_v47, %v1814_v25  ;;  %v1921_v63 = vmul.f32 %v9833_v22, %v9833_v22  ;;  %v13726_v25 = vld [vmem:[#allocation26_spill] sm:$0xff] }
 0x432   :  { %13712 = vst [vmem:[#allocation20_spill] sm:$0xff] %v9828_v16  ;;  %v1881_v1 = vadd.f32 %v1880_v52, %v9828_v16  ;;  %v1919_v48 = vmul.f32 %v9828_v16, %v9828_v16  ;;  %v1949_v7 = vadd.f32 %v1948_v32, %v1918_v17  ;;  %v9839_v58 = vadd.f32 %v9739_v47, %v1812_v60 }
 0x433   :  { %13716 = vst [vmem:[#allocation19_spill] sm:$0xff] %v9842_v38  ;;  %v1922_v40 = vmul.f32 %v9842_v38, %v9842_v38 }
 0x434   :  { %13715 = vst [vmem:[#allocation21_spill] sm:$0xff] %v9839_v58  ;;  %v1950_v3 = vadd.f32 %v1949_v7, %v1919_v48  ;;  %v1882_v39 = vadd.f32 %v1881_v1, %v9839_v58  ;;  %v1920_v34 = vmul.f32 %v9839_v58, %v9839_v58  ;;  %v7526_v14 = vpop.f32.mrb[32].mxu1 }
 0x435   :  { %v1817_v23 = vadd.f32 %v7526_v14, %v13717_v24  ;;  %v1736_v29 = vpop.f32.mrb[33].mxu1 }
 0x436   :  { %v1883_v26 = vadd.f32 %v1882_v39, %v9833_v22  ;;  %v1951_v61 = vadd.f32 %v1950_v3, %v1920_v34  ;;  %v1815_v11 = vadd.f32 %v1736_v29, %v13718_v2  ;;  %v7527_v21 = vpop.f32.mrb[34].mxu1  ;;  %v13729_v39 = vld [vmem:[#allocation27_spill] sm:$0xff] }
 0x437   :  { %v1818_v4 = vadd.f32 %v7527_v21, %v13719_v10  ;;  %v1739_v62 = vpop.f32.mrb[35].mxu1  ;;  %v9861_v42 = vadd.f32 %v9739_v47, %v1817_v23 }
 0x438   :  { %v1952_v41 = vadd.f32 %v1951_v61, %v1921_v63  ;;  %v9856_v57 = vadd.f32 %v9739_v47, %v1815_v11  ;;  %v1884_v37 = vadd.f32 %v1883_v26, %v9842_v38  ;;  %v1816_v36 = vadd.f32 %v1739_v62, %v13721_v13  ;;  %v13734_v13 = vld [vmem:[#allocation30_spill] sm:$0xff] }
 0x439   :  { %13722 = vst [vmem:[#allocation22_spill] sm:$0xff] %v9861_v42  ;;  %v9870_v8 = vadd.f32 %v9739_v47, %v1818_v4  ;;  %v1925_v12 = vmul.f32 %v9861_v42, %v9861_v42 }
 0x43a   :  { %13720 = vst [vmem:[#allocation24_spill] sm:$0xff] %v9856_v57  ;;  %v1885_v30 = vadd.f32 %v1884_v37, %v9856_v57  ;;  %v1923_v59 = vmul.f32 %v9856_v57, %v9856_v57  ;;  %v1953_v43 = vadd.f32 %v1952_v41, %v1922_v40  ;;  %v9867_v53 = vadd.f32 %v9739_v47, %v1816_v36  ;;  %v13733_v40 = vld [vmem:[#allocation32_spill] sm:$0xff] }
 0x43b   :  { %13724 = vst [vmem:[#allocation23_spill] sm:$0xff] %v9870_v8  ;;  %v1926_v52 = vmul.f32 %v9870_v8, %v9870_v8 }
 0x43c   :  { %13723 = vst [vmem:[#allocation25_spill] sm:$0xff] %v9867_v53  ;;  %v1954_v5 = vadd.f32 %v1953_v43, %v1923_v59  ;;  %v1886_v49 = vadd.f32 %v1885_v30, %v9867_v53  ;;  %v1924_v28 = vmul.f32 %v9867_v53, %v9867_v53  ;;  %v7530_v44 = vpop.f32.mrb[36].mxu1  ;;  %v13735_v43 = vld [vmem:[#allocation33_spill] sm:$0xff] }
 0x43d   :  { %v1821_v18 = vadd.f32 %v7530_v44, %v13725_v54  ;;  %v1752_v55 = vpop.f32.mrb[37].mxu1 }
 0x43e   :  { %v1887_v17 = vadd.f32 %v1886_v49, %v9861_v42  ;;  %v1955_v50 = vadd.f32 %v1954_v5, %v1924_v28  ;;  %v1819_v56 = vadd.f32 %v1752_v55, %v13726_v25  ;;  %v7531_v32 = vpop.f32.mrb[38].mxu1 }
 0x43f   :  { %v1822_v60 = vadd.f32 %v7531_v32, %v13727_v20  ;;  %v1755_v1 = vpop.f32.mrb[39].mxu1  ;;  %v9889_v14 = vadd.f32 %v9739_v47, %v1821_v18  ;;  %v13737_v18 = vld [vmem:[#allocation31_spill] sm:$0xff] }
 0x440   :  { %v1956_v48 = vadd.f32 %v1955_v50, %v1925_v12  ;;  %v9884_v7 = vadd.f32 %v9739_v47, %v1819_v56  ;;  %v1888_v3 = vadd.f32 %v1887_v17, %v9870_v8  ;;  %v1820_v34 = vadd.f32 %v1755_v1, %v13729_v39 }
 0x441   :  { %13730 = vst [vmem:[#allocation26_spill] sm:$0xff] %v9889_v14  ;;  %v9898_v26 = vadd.f32 %v9739_v47, %v1822_v60  ;;  %v1929_v62 = vmul.f32 %v9889_v14, %v9889_v14 }
 0x442   :  { %13728 = vst [vmem:[#allocation28_spill] sm:$0xff] %v9884_v7  ;;  %v1889_v24 = vadd.f32 %v1888_v3, %v9884_v7  ;;  %v1927_v23 = vmul.f32 %v9884_v7, %v9884_v7  ;;  %v1957_v29 = vadd.f32 %v1956_v48, %v1926_v52  ;;  %v9895_v63 = vadd.f32 %v9739_v47, %v1820_v34  ;;  %v13741_v48 = vld [vmem:[#allocation36_spill] sm:$0xff] }
 0x443   :  { %13732 = vst [vmem:[#allocation27_spill] sm:$0xff] %v9898_v26  ;;  %v1930_v59 = vmul.f32 %v9898_v26, %v9898_v26 }
 0x444   :  { %13731 = vst [vmem:[#allocation29_spill] sm:$0xff] %v9895_v63  ;;  %v1958_v61 = vadd.f32 %v1957_v29, %v1927_v23  ;;  %v1890_v2 = vadd.f32 %v1889_v24, %v9895_v63  ;;  %v1928_v11 = vmul.f32 %v9895_v63, %v9895_v63  ;;  %v7534_v21 = vpop.f32.mrb[40].mxu1  ;;  %v13742_v29 = vld [vmem:[#allocation34_spill] sm:$0xff] }
 0x445   :  { %v1825_v10 = vadd.f32 %v7534_v21, %v13733_v40  ;;  %v1768_v4 = vpop.f32.mrb[41].mxu1  ;;  %v13743_v21 = vld [vmem:[#allocation37_spill] sm:$0xff] }
 0x446   :  { %v1891_v41 = vadd.f32 %v1890_v2, %v9889_v14  ;;  %v1959_v37 = vadd.f32 %v1958_v61, %v1928_v11  ;;  %v1823_v36 = vadd.f32 %v1768_v4, %v13734_v13  ;;  %v7535_v30 = vpop.f32.mrb[42].mxu1 }
 0x447   :  { %v1826_v5 = vadd.f32 %v7535_v30, %v13735_v43  ;;  %v1771_v49 = vpop.f32.mrb[43].mxu1  ;;  %v9917_v12 = vadd.f32 %v9739_v47, %v1825_v10 }
 0x448   :  { %v1960_v28 = vadd.f32 %v1959_v37, %v1929_v62  ;;  %v9912_v44 = vadd.f32 %v9739_v47, %v1823_v36  ;;  %v1892_v54 = vadd.f32 %v1891_v41, %v9898_v26  ;;  %v1824_v55 = vadd.f32 %v1771_v49, %v13737_v18  ;;  %v13745_v37 = vld [vmem:[#allocation35_spill] sm:$0xff] }
 0x449   :  { %13738 = vst [vmem:[#allocation30_spill] sm:$0xff] %v9917_v12  ;;  %v9926_v32 = vadd.f32 %v9739_v47, %v1826_v5  ;;  %v1933_v34 = vmul.f32 %v9917_v12, %v9917_v12 }
 0x44a   :  { %13736 = vst [vmem:[#allocation32_spill] sm:$0xff] %v9912_v44  ;;  %v1893_v17 = vadd.f32 %v1892_v54, %v9912_v44  ;;  %v1931_v50 = vmul.f32 %v9912_v44, %v9912_v44  ;;  %v1961_v25 = vadd.f32 %v1960_v28, %v1930_v59  ;;  %v9923_v56 = vadd.f32 %v9739_v47, %v1824_v55 }
 0x44b   :  { %13740 = vst [vmem:[#allocation31_spill] sm:$0xff] %v9926_v32  ;;  %v1934_v11 = vmul.f32 %v9926_v32, %v9926_v32 }
 0x44c   :  { %13739 = vst [vmem:[#allocation33_spill] sm:$0xff] %v9923_v56  ;;  %v1962_v52 = vadd.f32 %v1961_v25, %v1931_v50  ;;  %v1894_v20 = vadd.f32 %v1893_v17, %v9923_v56  ;;  %v1932_v60 = vmul.f32 %v9923_v56, %v9923_v56  ;;  %v7538_v1 = vpop.f32.mrb[44].mxu1 }
 0x44d   :  { %v1829_v3 = vadd.f32 %v7538_v1, %v13741_v48  ;;  %v1784_v39 = vpop.f32.mrb[45].mxu1 }
 0x44e   :  { %v1895_v24 = vadd.f32 %v1894_v20, %v9917_v12  ;;  %v1963_v23 = vadd.f32 %v1962_v52, %v1932_v60  ;;  %v1827_v61 = vadd.f32 %v1784_v39, %v13742_v29  ;;  %v7539_v2 = vpop.f32.mrb[46].mxu1 }
 0x44f   :  { %v1830_v40 = vadd.f32 %v7539_v2, %v13743_v21  ;;  %v1787_v10 = vpop.f32.mrb[47].mxu1  ;;  %v9945_v36 = vadd.f32 %v9739_v47, %v1829_v3 }
 0x450   :  { %v1964_v4 = vadd.f32 %v1963_v23, %v1933_v34  ;;  %v9940_v62 = vadd.f32 %v9739_v47, %v1827_v61  ;;  %v1896_v41 = vadd.f32 %v1895_v24, %v9926_v32  ;;  %v1828_v13 = vadd.f32 %v1787_v10, %v13745_v37  ;;  %v9972_v37 = vld [vmem:[%s13501_s1 + $0x4] sm:$0x3] }
 0x451   :  { %13746 = vst [vmem:[#allocation34_spill] sm:$0xff] %v9945_v36  ;;  %v9954_v28 = vadd.f32 %v9739_v47, %v1830_v40  ;;  %v1937_v55 = vmul.f32 %v9945_v36, %v9945_v36 }
 0x452   :  { %13744 = vst [vmem:[#allocation36_spill] sm:$0xff] %v9940_v62  ;;  %v1897_v30 = vadd.f32 %v1896_v41, %v9940_v62  ;;  %v1935_v59 = vmul.f32 %v9940_v62, %v9940_v62  ;;  %v1965_v43 = vadd.f32 %v1964_v4, %v1934_v11  ;;  %v9951_v5 = vadd.f32 %v9739_v47, %v1828_v13  ;;  %v9977_v13 = vld [vmem:[%s13502_s2 + $0x4] sm:$0x3] }
 0x453   :  { %13748 = vst [vmem:[#allocation35_spill] sm:$0xff] %v9954_v28  ;;  %v1938_v25 = vmul.f32 %v9954_v28, %v9954_v28 }
 0x454   :  { %13747 = vst [vmem:[#allocation37_spill] sm:$0xff] %v9951_v5  ;;  %v1966_v49 = vadd.f32 %v1965_v43, %v1935_v59  ;;  %v1898_v54 = vadd.f32 %v1897_v30, %v9951_v5  ;;  %v1936_v18 = vmul.f32 %v9951_v5, %v9951_v5  ;;  %v13749_v30 = vld [vmem:[#allocation12_spill] sm:$0xff] }
 0x455   :  { %v9981_v59 = vrot.slane %v9972_v37, %v13749_v30 }
 0x456   :  { %v1899_v17 = vadd.f32 %v1898_v54, %v9945_v36  ;;  %v1967_v50 = vadd.f32 %v1966_v49, %v1936_v18  ;;  %v9991_v18 = vrot.slane %v9977_v13, %v13749_v30 }
 0x458   :  { %v1900_v52 = vadd.f32 %v1899_v17, %v9954_v28  ;;  %v1968_v20 = vadd.f32 %v1967_v50, %v1937_v55 }
 0x45a   :  { %v1901_v60 = vrot.slane %v1900_v52, 4  ;;  %v1969_v47 = vadd.f32 %v1968_v20, %v1938_v25 }
 0x45c   :  { %v1902_v1 = vadd.f32 %v1901_v60, %v1900_v52  ;;  %v1970_v48 = vrot.slane %v1969_v47, 4 }
 0x45e   :  { %v1903_v3 = vrot.slane %v1902_v1, 2  ;;  %v1971_v39 = vadd.f32 %v1970_v48, %v1969_v47 }
 0x460   :  { %v1904_v34 = vadd.f32 %v1903_v3, %v1902_v1  ;;  %v1972_v24 = vrot.slane %v1971_v39, 2 }
 0x462   :  { %v1905_v23 = vrot.slane %v1904_v34, 1  ;;  %v1973_v29 = vadd.f32 %v1972_v24, %v1971_v39 }
 0x464   :  { %v1906_v61 = vadd.f32 %v1905_v23, %v1904_v34  ;;  %v1974_v2 = vrot.slane %v1973_v29, 1 }
 0x466   :  { %v1975_v11 = vadd.f32 %v1974_v2, %v1973_v29  ;;  %v9965_v21 = vmul.f32 0.00390625, %v1906_v61 }
 0x468   :  { %v1977_v40 = vmul.f32 0.00390625, %v1975_v11  ;;  %v1978_v10 = vmul.f32 %v9965_v21, %v9965_v21  ;;  %v1980_v43 = vsub.f32 %v9745_v33, %v9965_v21  ;;  %v1981_v49 = vsub.f32 %v9752_v45, %v9965_v21 }
 0x469   :  { %v1982_v54 = vsub.f32 %v9749_v27, %v9965_v21  ;;  %v1983_v55 = vsub.f32 %v9755_v19, %v9965_v21  ;;  %v1984_v17 = vsub.f32 %v9772_v0, %v9965_v21  ;;  %v1985_v50 = vsub.f32 %v9783_v31, %v9965_v21 }
 0x46a   :  { %v1979_v4 = vsub.f32 %v1977_v40, %v1978_v10  ;;  %v1986_v25 = vsub.f32 %v9777_v46, %v9965_v21  ;;  %v1987_v20 = vsub.f32 %v9786_v51, %v9965_v21  ;;  %v1988_v60 = vsub.f32 %v9800_v6, %v9965_v21 }
 0x46b   :  { %v1989_v47 = vsub.f32 %v9811_v9, %v9965_v21  ;;  %v1990_v1 = vsub.f32 %v9805_v35, %v9965_v21 }
 0x46c   :  { %v2012_v41 = vadd.f32 1e-05, %v1979_v4  ;;  %v1991_v4 = vsub.f32 %v9814_v15, %v9965_v21 }
 0x46e   :  { %8150 = vrsqrt.f32 %v2012_v41 }
 0x478   :  { %v10001_v52 = vpop.eup %8150 }
 0x479   :  { %v2016_v48 = vmul.f32 %v10001_v52, %v1982_v54  ;;  %v2017_v3 = vmul.f32 %v10001_v52, %v1983_v55  ;;  %v2014_v39 = vmul.f32 %v10001_v52, %v1980_v43  ;;  %v2015_v34 = vmul.f32 %v10001_v52, %v1981_v49 }
 0x47a   :  { %v2018_v24 = vmul.f32 %v10001_v52, %v1984_v17  ;;  %v2019_v23 = vmul.f32 %v10001_v52, %v1985_v50  ;;  %v2020_v29 = vmul.f32 %v10001_v52, %v1986_v25  ;;  %v2021_v61 = vmul.f32 %v10001_v52, %v1987_v20 }
 0x47b   :  { %v2056_v2 = vmul.f32 %v9981_v59, %v2016_v48  ;;  %v2057_v11 = vmul.f32 %v9981_v59, %v2017_v3  ;;  %v2054_v40 = vmul.f32 %v9981_v59, %v2014_v39  ;;  %v2055_v10 = vmul.f32 %v9981_v59, %v2015_v34 }
 0x47c   :  { %v2058_v41 = vmul.f32 %v9981_v59, %v2018_v24  ;;  %v2059_v43 = vmul.f32 %v9981_v59, %v2019_v23  ;;  %v2060_v49 = vmul.f32 %v9981_v59, %v2020_v29  ;;  %v1992_v25 = vsub.f32 %v9828_v16, %v9965_v21 }
 0x47d   :  { %v2074_v54 = vadd.f32 %v9991_v18, %v2054_v40  ;;  %v2075_v55 = vadd.f32 %v9991_v18, %v2055_v10  ;;  %v2076_v17 = vadd.f32 %v9991_v18, %v2056_v2  ;;  %v2077_v50 = vadd.f32 %v9991_v18, %v2057_v11 }
 0x47e   :  { %v2078_v20 = vadd.f32 %v9991_v18, %v2058_v41  ;;  %v2079_v48 = vadd.f32 %v9991_v18, %v2059_v43  ;;  %v2061_v3 = vmul.f32 %v9981_v59, %v2021_v61  ;;  %v1993_v29 = vsub.f32 %v9839_v58, %v9965_v21 }
 0x47f   :  { %v2090_v39 = vmax.f32 %v2074_v54, 0.0  ;;  %v2091_v34 = vmax.f32 %v2075_v55, 0.0  ;;  %v2092_v24 = vmax.f32 %v2076_v17, 0.0  ;;  %v2093_v23 = vmax.f32 %v2077_v50, 0.0 }
 0x480   :  { %v2094_v40 = vmax.f32 %v2078_v20, 0.0  ;;  %v2095_v2 = vmax.f32 %v2079_v48, 0.0  ;;  %v2080_v11 = vadd.f32 %v9991_v18, %v2060_v49  ;;  %v2022_v16 = vmul.f32 %v10001_v52, %v1988_v60 }
 0x481   :  { %v2179_v10 = vpack.c.bf16 %v2091_v34, %v2090_v39  ;;  %v2180_v9 = vpack.c.bf16 %v2093_v23, %v2092_v24  ;;  %v2023_v41 = vmul.f32 %v10001_v52, %v1989_v47  ;;  %v2081_v61 = vadd.f32 %v9991_v18, %v2061_v3 }
 0x482   :  { %v2181_v43 = vpack.c.bf16 %v2095_v2, %v2094_v40  ;;  %v2024_v54 = vmul.f32 %v10001_v52, %v1990_v1  ;;  %v2025_v55 = vmul.f32 %v10001_v52, %v1991_v4  ;;  %v2062_v17 = vmul.f32 %v9981_v59, %v2022_v16 }
 0x483   :  { %7556 = vmatprep.mubr.bf16.mxu0 %v2179_v10  ;;  %v2063_v50 = vmul.f32 %v9981_v59, %v2023_v41  ;;  %v2026_v49 = vmul.f32 %v10001_v52, %v1992_v25  ;;  %v2027_v20 = vmul.f32 %v10001_v52, %v1993_v29  ;;  %v1994_v60 = vsub.f32 %v9833_v22, %v9965_v21 }
 0x484   :  { %7557 = vmatmul.mubr.bf16.vlgmr.msra.gmra.mrb[16].mxu0 %v2180_v9  ;;  %v1995_v47 = vsub.f32 %v9842_v38, %v9965_v21  ;;  %v2096_v1 = vmax.f32 %v2080_v11, 0.0  ;;  %v2082_v4 = vadd.f32 %v9991_v18, %v2062_v17  ;;  %v2097_v16 = vmax.f32 %v2081_v61, 0.0  ;;  %v13750_v11 = vld [vmem:[#allocation11_spill] sm:$0xff] }
 0x485   :  { %7560 = vmatprep.mubr.bf16.mxu0 %v2181_v43  ;;  %v2083_v48 = vadd.f32 %v9991_v18, %v2063_v50  ;;  %v2064_v3 = vmul.f32 %v9981_v59, %v2024_v54  ;;  %v2065_v25 = vmul.f32 %v9981_v59, %v2025_v55  ;;  %v2066_v39 = vmul.f32 %v9981_v59, %v2026_v49 }
 0x486   :  { %v2098_v34 = vmax.f32 %v2082_v4, 0.0  ;;  %v2067_v9 = vmul.f32 %v9981_v59, %v2027_v20  ;;  %v2028_v23 = vmul.f32 %v10001_v52, %v1994_v60  ;;  %v2029_v29 = vmul.f32 %v10001_v52, %v1995_v47 }
 0x487   :  { %v2099_v24 = vmax.f32 %v2083_v48, 0.0  ;;  %v1996_v40 = vsub.f32 %v9856_v57, %v9965_v21  ;;  %v1997_v2 = vsub.f32 %v9867_v53, %v9965_v21  ;;  %v10067_v10 = vrot.slane %v9972_v37, %v13750_v11 }
 0x488   :  { %v2182_v41 = vpack.c.bf16 %v2097_v16, %v2096_v1  ;;  %v2084_v43 = vadd.f32 %v9991_v18, %v2064_v3  ;;  %v2085_v61 = vadd.f32 %v9991_v18, %v2065_v25  ;;  %v2086_v54 = vadd.f32 %v9991_v18, %v2066_v39 }
 0x489   :  { %v2183_v55 = vpack.c.bf16 %v2099_v24, %v2098_v34  ;;  %v2087_v17 = vadd.f32 %v9991_v18, %v2067_v9  ;;  %v2030_v50 = vmul.f32 %v10001_v52, %v1996_v40  ;;  %v2031_v49 = vmul.f32 %v10001_v52, %v1997_v2 }
 0x48a   :  { %v2068_v20 = vmul.f32 %v9981_v59, %v2028_v23  ;;  %v2069_v37 = vmul.f32 %v9981_v59, %v2029_v29  ;;  %v10079_v60 = vrot.slane %v9977_v13, %v13750_v11  ;;  %v1998_v47 = vsub.f32 %v9861_v42, %v9965_v21 }
 0x48b   :  { %v1999_v1 = vsub.f32 %v9870_v8, %v9965_v21  ;;  %v2100_v4 = vmax.f32 %v2084_v43, 0.0  ;;  %v2101_v48 = vmax.f32 %v2085_v61, 0.0  ;;  %v2102_v16 = vmax.f32 %v2086_v54, 0.0 }
 0x48c   :  { %7561 = vmatmul.mubr.bf16.gmra.mrb[20].mxu0 %v2182_v41  ;;  %v2103_v3 = vmax.f32 %v2087_v17, 0.0  ;;  %v2110_v25 = vmul.f32 %v10067_v10, %v2030_v50  ;;  %v2111_v39 = vmul.f32 %v10067_v10, %v2031_v49  ;;  %v2000_v59 = vsub.f32 %v9884_v7, %v9965_v21 }
 0x48d   :  { %7564 = vmatprep.mubr.bf16.mxu0 %v2183_v55  ;;  %v2001_v13 = vsub.f32 %v9895_v63, %v9965_v21  ;;  %v2088_v34 = vadd.f32 %v9991_v18, %v2068_v20  ;;  %v2089_v24 = vadd.f32 %v9991_v18, %v2069_v37  ;;  %v2032_v9 = vmul.f32 %v10001_v52, %v1998_v47 }
 0x48e   :  { %v2033_v23 = vmul.f32 %v10001_v52, %v1999_v1  ;;  %v2184_v29 = vpack.c.bf16 %v2101_v48, %v2100_v4  ;;  %v2034_v40 = vmul.f32 %v10001_v52, %v2000_v59  ;;  %v2185_v41 = vpack.c.bf16 %v2103_v3, %v2102_v16 }
 0x48f   :  { %v2035_v2 = vmul.f32 %v10001_v52, %v2001_v13  ;;  %v2130_v43 = vadd.f32 %v10079_v60, %v2110_v25  ;;  %v2131_v61 = vadd.f32 %v10079_v60, %v2111_v39  ;;  %v2010_v54 = vsub.f32 %v9945_v36, %v9965_v21 }
 0x490   :  { %v2104_v55 = vmax.f32 %v2088_v34, 0.0  ;;  %v2105_v18 = vmax.f32 %v2089_v24, 0.0  ;;  %v2002_v17 = vsub.f32 %v9889_v14, %v9965_v21  ;;  %v2112_v50 = vmul.f32 %v10067_v10, %v2032_v9 }
 0x491   :  { %v2113_v49 = vmul.f32 %v10067_v10, %v2033_v23  ;;  %v2011_v20 = vsub.f32 %v9954_v28, %v9965_v21  ;;  %v2114_v37 = vmul.f32 %v10067_v10, %v2034_v40  ;;  %v2115_v47 = vmul.f32 %v10067_v10, %v2035_v2 }
 0x492   :  { %v2044_v1 = vmul.f32 %v10001_v52, %v2010_v54  ;;  %v2003_v4 = vsub.f32 %v9898_v26, %v9965_v21  ;;  %v2004_v48 = vsub.f32 %v9912_v44, %v9965_v21  ;;  %v2146_v16 = vmax.f32 %v2130_v43, 0.0 }
 0x493   :  { %v2147_v3 = vmax.f32 %v2131_v61, 0.0  ;;  %v2005_v25 = vsub.f32 %v9923_v56, %v9965_v21  ;;  %v2186_v39 = vpack.c.bf16 %v2105_v18, %v2104_v55  ;;  %v2045_v59 = vmul.f32 %v10001_v52, %v2011_v20 }
 0x494   :  { %7565 = vmatmul.mubr.bf16.gmra.mrb[24].mxu0 %v2184_v29  ;;  %v2124_v13 = vmul.f32 %v10067_v10, %v2044_v1  ;;  %v2132_v34 = vadd.f32 %v10079_v60, %v2112_v50  ;;  %v2133_v24 = vadd.f32 %v10079_v60, %v2113_v49  ;;  %v2036_v9 = vmul.f32 %v10001_v52, %v2002_v17 }
 0x495   :  { %7568 = vmatprep.mubr.bf16.mxu0 %v2185_v41  ;;  %v2037_v23 = vmul.f32 %v10001_v52, %v2003_v4  ;;  %v2134_v29 = vadd.f32 %v10079_v60, %v2114_v37  ;;  %v2135_v40 = vadd.f32 %v10079_v60, %v2115_v47  ;;  %v2125_v2 = vmul.f32 %v10067_v10, %v2045_v59 }
 0x496   :  { %v2144_v41 = vadd.f32 %v10079_v60, %v2124_v13  ;;  %v2187_v43 = vpack.c.bf16 %v2147_v3, %v2146_v16  ;;  %v2038_v61 = vmul.f32 %v10001_v52, %v2004_v48  ;;  %v2039_v54 = vmul.f32 %v10001_v52, %v2005_v25 }
 0x497   :  { %v2145_v55 = vadd.f32 %v10079_v60, %v2125_v2  ;;  %v2148_v17 = vmax.f32 %v2132_v34, 0.0  ;;  %v2116_v50 = vmul.f32 %v10067_v10, %v2036_v9  ;;  %v2117_v49 = vmul.f32 %v10067_v10, %v2037_v23 }
 0x498   :  { %v2160_v18 = vmax.f32 %v2144_v41, 0.0  ;;  %v2149_v20 = vmax.f32 %v2133_v24, 0.0  ;;  %v2150_v37 = vmax.f32 %v2134_v29, 0.0  ;;  %v2151_v47 = vmax.f32 %v2135_v40, 0.0 }
 0x499   :  { %v2161_v1 = vmax.f32 %v2145_v55, 0.0  ;;  %v2118_v4 = vmul.f32 %v10067_v10, %v2038_v61  ;;  %v2119_v48 = vmul.f32 %v10067_v10, %v2039_v54  ;;  %v2006_v16 = vsub.f32 %v9917_v12, %v9965_v21 }
 0x49a   :  { %v2007_v3 = vsub.f32 %v9926_v32, %v9965_v21  ;;  %v2008_v59 = vsub.f32 %v9940_v62, %v9965_v21  ;;  %v2136_v13 = vadd.f32 %v10079_v60, %v2116_v50  ;;  %v2137_v34 = vadd.f32 %v10079_v60, %v2117_v49 }
 0x49b   :  { %v2194_v25 = vpack.c.bf16 %v2161_v1, %v2160_v18  ;;  %v2188_v24 = vpack.c.bf16 %v2149_v20, %v2148_v17  ;;  %v2189_v9 = vpack.c.bf16 %v2151_v47, %v2150_v37  ;;  %v2040_v23 = vmul.f32 %v10001_v52, %v2006_v16 }
 0x49c   :  { %7569 = vmatmul.mubr.bf16.gmra.mrb[28].mxu0 %v2186_v39  ;;  %v2009_v39 = vsub.f32 %v9951_v5, %v9965_v21  ;;  %v2041_v29 = vmul.f32 %v10001_v52, %v2007_v3  ;;  %v2138_v40 = vadd.f32 %v10079_v60, %v2118_v4  ;;  %v2139_v2 = vadd.f32 %v10079_v60, %v2119_v48 }
 0x49d   :  { %7572 = vmatprep.mubr.bf16.mxu0 %v2187_v43  ;;  %v2042_v41 = vmul.f32 %v10001_v52, %v2008_v59  ;;  %v2152_v21 = vmax.f32 %v2136_v13, 0.0  ;;  %v2153_v61 = vmax.f32 %v2137_v34, 0.0  ;;  %v2120_v54 = vmul.f32 %v10067_v10, %v2040_v23  ;;  %v8083_v34 = vld [vmem:[#allocation5 + $0x48] sm:$0xff]  }
 0x49e   :  { %v2043_v43 = vmul.f32 %v10001_v52, %v2009_v39  ;;  %v2121_v55 = vmul.f32 %v10067_v10, %v2041_v29  ;;  %v2154_v18 = vmax.f32 %v2138_v40, 0.0  ;;  %v2155_v17 = vmax.f32 %v2139_v2, 0.0  ;;  %v8087_v23 = vld [vmem:[#allocation5 + $0x68] sm:$0xff]   ;;  %v8088_v29 = vld [vmem:[#allocation5 + $0x70] sm:$0xff]   ;;  %v8089_v40 = vld [vmem:[#allocation5 + $0x78] sm:$0xff]  }
 0x49f   :  { %v2122_v50 = vmul.f32 %v10067_v10, %v2042_v41  ;;  %v2190_v20 = vpack.c.bf16 %v2153_v61, %v2152_v21  ;;  %v2140_v37 = vadd.f32 %v10079_v60, %v2120_v54 }
 0x4a0   :  { %v2123_v49 = vmul.f32 %v10067_v10, %v2043_v43  ;;  %v2141_v47 = vadd.f32 %v10079_v60, %v2121_v55  ;;  %v2191_v52 = vpack.c.bf16 %v2155_v17, %v2154_v18  ;;  %v8082_v10 = vld [vmem:[#allocation5 + $0x40] sm:$0xff]  }
 0x4a1   :  { %v2142_v1 = vadd.f32 %v10079_v60, %v2122_v50  ;;  %v2156_v48 = vmax.f32 %v2140_v37, 0.0  ;;  %7588 = vmatprep.subr.bf16.mxu1 %v8082_v10 }
 0x4a2   :  { %v2143_v4 = vadd.f32 %v10079_v60, %v2123_v49  ;;  %v2157_v16 = vmax.f32 %v2141_v47, 0.0  ;;  %7589 = vmatpush3.bf16.msra.mxu1 %v8082_v10  ;;  %v8086_v60 = vld [vmem:[#allocation5 + $0x60] sm:$0xff]  }
 0x4a3   :  { %v2158_v3 = vmax.f32 %v2142_v1, 0.0  ;;  %7590 = vmatprep.subr.bf16.mxu1 %v8083_v34 }
 0x4a4   :  { %7573 = vmatmul.mubr.bf16.gmra.mrb[32].mxu0 %v2188_v24  ;;  %v2159_v39 = vmax.f32 %v2143_v4, 0.0  ;;  %v2192_v59 = vpack.c.bf16 %v2157_v16, %v2156_v48  ;;  %v8084_v24 = vld [vmem:[#allocation5 + $0x50] sm:$0xff]  }
 0x4a5   :  { %7576 = vmatprep.mubr.bf16.mxu0 %v2189_v9  ;;  %v8085_v9 = vld [vmem:[#allocation5 + $0x58] sm:$0xff]  }
 0x4a6   :  { %v2193_v13 = vpack.c.bf16 %v2159_v39, %v2158_v3  ;;  %7591 = vmatpush3.bf16.msra.mxu1 %v8083_v34 }
 0x4a7   :  { %7592 = vmatprep.subr.bf16.mxu1 %v8084_v24 }
 0x4aa   :  { %7593 = vmatpush3.bf16.msra.mxu1 %v8084_v24 }
 0x4ab   :  { %7594 = vmatprep.subr.bf16.mxu1 %v8085_v9 }
 0x4ac   :  { %7577 = vmatmul.mubr.bf16.gmra.mrb[36].mxu0 %v2190_v20 }
 0x4ad   :  { %7580 = vmatprep.mubr.bf16.mxu0 %v2191_v52 }
 0x4ae   :  { %7595 = vmatpush3.bf16.msra.mxu1 %v8085_v9 }
 0x4af   :  { %7596 = vmatprep.subr.bf16.mxu1 %v8086_v60 }
 0x4b2   :  { %7597 = vmatpush3.bf16.msra.mxu1 %v8086_v60 }
 0x4b3   :  { %7598 = vmatprep.subr.bf16.mxu1 %v8087_v23 }
 0x4b4   :  { %7581 = vmatmul.mubr.bf16.gmra.mrb[40].mxu0 %v2192_v59 }
 0x4b5   :  { %7584 = vmatprep.mubr.bf16.mxu0 %v2193_v13 }
 0x4b6   :  { %7599 = vmatpush3.bf16.msra.mxu1 %v8087_v23 }
 0x4b7   :  { %7600 = vmatprep.subr.bf16.mxu1 %v8088_v29 }
 0x4ba   :  { %7601 = vmatpush3.bf16.msra.mxu1 %v8088_v29 }
 0x4bb   :  { %7602 = vmatprep.subr.bf16.mxu1 %v8089_v40 }
 0x4bc   :  { %7585 = vmatmul.mubr.bf16.gmra.mrb[44].mxu0 %v2194_v25  ;;  %v10160_v25 = vld [vmem:[%s13506_s6 + $0x1] ss:$0 sm:$0xff] }
 0x4be   :  { %7603 = vmatpush3.bf16.msra.mxu1 %v8089_v40 }
 0x557   :  { %v7558_v2 = vpop.f32.mrb[16].mxu0 }
 0x558   :  { %v2285_v41 = vpop.f32.mrb[17].mxu0  ;;  %v10166_v54 = vadd.f32 %v7558_v2, %v10160_v25 }
 0x559   :  { %v10163_v43 = vadd.f32 %v10160_v25, %v2285_v41  ;;  %v7559_v21 = vpop.f32.mrb[18].mxu0 }
 0x55a   :  { %v2288_v61 = vpop.f32.mrb[19].mxu0  ;;  %v10174_v17 = vadd.f32 %v7559_v21, %v10160_v25  ;;  %v2451_v20 = vmul.f32 %v10166_v54, %v10166_v54 }
 0x55b   :  { %v10169_v55 = vadd.f32 %v10160_v25, %v2288_v61  ;;  %v2449_v18 = vmul.f32 %v10163_v43, %v10163_v43 }
 0x55c   :  { %v2452_v4 = vmul.f32 %v10174_v17, %v10174_v17 }
 0x55d   :  { %v2412_v50 = vadd.f32 %v10169_v55, %v10163_v43  ;;  %v2450_v49 = vmul.f32 %v10169_v55, %v10169_v55 }
 0x55f   :  { %v2413_v37 = vadd.f32 %v2412_v50, %v10166_v54  ;;  %v2481_v47 = vadd.f32 %v2450_v49, %v2449_v18  ;;  %v7562_v52 = vpop.f32.mrb[20].mxu0 }
 0x560   :  { %v2301_v1 = vpop.f32.mrb[21].mxu0  ;;  %v10190_v59 = vadd.f32 %v7562_v52, %v10160_v25 }
 0x561   :  { %v2482_v48 = vadd.f32 %v2481_v47, %v2451_v20  ;;  %v10186_v16 = vadd.f32 %v10160_v25, %v2301_v1  ;;  %v2414_v3 = vadd.f32 %v2413_v37, %v10174_v17  ;;  %v7563_v39 = vpop.f32.mrb[22].mxu0 }
 0x562   :  { %v2304_v13 = vpop.f32.mrb[23].mxu0  ;;  %v10199_v23 = vadd.f32 %v7563_v39, %v10160_v25  ;;  %v2455_v2 = vmul.f32 %v10190_v59, %v10190_v59 }
 0x563   :  { %v2415_v10 = vadd.f32 %v2414_v3, %v10186_v16  ;;  %v2453_v34 = vmul.f32 %v10186_v16, %v10186_v16  ;;  %v2483_v24 = vadd.f32 %v2482_v48, %v2452_v4  ;;  %v10196_v9 = vadd.f32 %v10160_v25, %v2304_v13 }
 0x564   :  { %v2456_v50 = vmul.f32 %v10199_v23, %v10199_v23 }
 0x565   :  { %v2484_v60 = vadd.f32 %v2483_v24, %v2453_v34  ;;  %v2416_v29 = vadd.f32 %v2415_v10, %v10196_v9  ;;  %v2454_v40 = vmul.f32 %v10196_v9, %v10196_v9 }
 0x567   :  { %v2417_v41 = vadd.f32 %v2416_v29, %v10190_v59  ;;  %v2485_v21 = vadd.f32 %v2484_v60, %v2454_v40  ;;  %v7566_v61 = vpop.f32.mrb[24].mxu0 }
 0x568   :  { %v2317_v18 = vpop.f32.mrb[25].mxu0  ;;  %v10214_v52 = vadd.f32 %v7566_v61, %v10160_v25 }
 0x569   :  { %v2486_v49 = vadd.f32 %v2485_v21, %v2455_v2  ;;  %v10210_v20 = vadd.f32 %v10160_v25, %v2317_v18  ;;  %v2418_v37 = vadd.f32 %v2417_v41, %v10199_v23  ;;  %v7567_v47 = vpop.f32.mrb[26].mxu0 }
 0x56a   :  { %v2320_v1 = vpop.f32.mrb[27].mxu0  ;;  %v10223_v10 = vadd.f32 %v7567_v47, %v10160_v25  ;;  %v2459_v60 = vmul.f32 %v10214_v52, %v10214_v52 }
 0x56b   :  { %v2419_v4 = vadd.f32 %v2418_v37, %v10210_v20  ;;  %v2457_v48 = vmul.f32 %v10210_v20, %v10210_v20  ;;  %v2487_v3 = vadd.f32 %v2486_v49, %v2456_v50  ;;  %v10220_v39 = vadd.f32 %v10160_v25, %v2320_v1 }
 0x56c   :  { %v2460_v21 = vmul.f32 %v10223_v10, %v10223_v10 }
 0x56d   :  { %v2488_v13 = vadd.f32 %v2487_v3, %v2457_v48  ;;  %v2420_v34 = vadd.f32 %v2419_v4, %v10220_v39  ;;  %v2458_v24 = vmul.f32 %v10220_v39, %v10220_v39 }
 0x56f   :  { %v2421_v29 = vadd.f32 %v2420_v34, %v10214_v52  ;;  %v2489_v40 = vadd.f32 %v2488_v13, %v2458_v24  ;;  %v7570_v2 = vpop.f32.mrb[28].mxu0 }
 0x570   :  { %v2333_v41 = vpop.f32.mrb[29].mxu0  ;;  %v10238_v37 = vadd.f32 %v7570_v2, %v10160_v25 }
 0x571   :  { %v2490_v61 = vadd.f32 %v2489_v40, %v2459_v60  ;;  %v10234_v18 = vadd.f32 %v10160_v25, %v2333_v41  ;;  %v2422_v50 = vadd.f32 %v2421_v29, %v10223_v10  ;;  %v7571_v49 = vpop.f32.mrb[30].mxu0 }
 0x572   :  { %v2336_v47 = vpop.f32.mrb[31].mxu0  ;;  %v10247_v34 = vadd.f32 %v7571_v49, %v10160_v25  ;;  %v2463_v29 = vmul.f32 %v10238_v37, %v10238_v37 }
 0x573   :  { %v2423_v1 = vadd.f32 %v2422_v50, %v10234_v18  ;;  %v2461_v4 = vmul.f32 %v10234_v18, %v10234_v18  ;;  %v2491_v48 = vadd.f32 %v2490_v61, %v2460_v21  ;;  %v10244_v3 = vadd.f32 %v10160_v25, %v2336_v47 }
 0x574   :  { %v2464_v61 = vmul.f32 %v10247_v34, %v10247_v34 }
 0x575   :  { %v2492_v13 = vadd.f32 %v2491_v48, %v2461_v4  ;;  %v2424_v24 = vadd.f32 %v2423_v1, %v10244_v3  ;;  %v2462_v60 = vmul.f32 %v10244_v3, %v10244_v3 }
 0x577   :  { %v2425_v40 = vadd.f32 %v2424_v24, %v10238_v37  ;;  %v2493_v2 = vadd.f32 %v2492_v13, %v2462_v60  ;;  %v7574_v41 = vpop.f32.mrb[32].mxu0 }
 0x578   :  { %v2349_v21 = vpop.f32.mrb[33].mxu0  ;;  %v10262_v4 = vadd.f32 %v7574_v41, %v10160_v25 }
 0x579   :  { %v2494_v50 = vadd.f32 %v2493_v2, %v2463_v29  ;;  %v10258_v49 = vadd.f32 %v10160_v25, %v2349_v21  ;;  %v2426_v47 = vadd.f32 %v2425_v40, %v10247_v34  ;;  %v7575_v1 = vpop.f32.mrb[34].mxu0 }
 0x57a   :  { %v2352_v48 = vpop.f32.mrb[35].mxu0  ;;  %v10271_v2 = vadd.f32 %v7575_v1, %v10160_v25  ;;  %v2467_v21 = vmul.f32 %v10262_v4, %v10262_v4 }
 0x57b   :  { %v2427_v5 = vadd.f32 %v2426_v47, %v10258_v49  ;;  %v2465_v13 = vmul.f32 %v10258_v49, %v10258_v49  ;;  %v2495_v24 = vadd.f32 %v2494_v50, %v2464_v61  ;;  %v10268_v60 = vadd.f32 %v10160_v25, %v2352_v48 }
 0x57c   :  { %v2468_v50 = vmul.f32 %v10271_v2, %v10271_v2 }
 0x57d   :  { %v2496_v29 = vadd.f32 %v2495_v24, %v2465_v13  ;;  %v2428_v40 = vadd.f32 %v2427_v5, %v10268_v60  ;;  %v2466_v41 = vmul.f32 %v10268_v60, %v10268_v60 }
 0x57f   :  { %v2429_v47 = vadd.f32 %v2428_v40, %v10262_v4  ;;  %v2497_v28 = vadd.f32 %v2496_v29, %v2466_v41  ;;  %v7578_v62 = vpop.f32.mrb[36].mxu0 }
 0x580   :  { %v2365_v61 = vpop.f32.mrb[37].mxu0  ;;  %v10286_v24 = vadd.f32 %v7578_v62, %v10160_v25 }
 0x581   :  { %v2498_v48 = vadd.f32 %v2497_v28, %v2467_v21  ;;  %v10282_v1 = vadd.f32 %v10160_v25, %v2365_v61  ;;  %v2430_v5 = vadd.f32 %v2429_v47, %v10271_v2  ;;  %v7579_v13 = vpop.f32.mrb[38].mxu0 }
 0x582   :  { %v2368_v36 = vpop.f32.mrb[39].mxu0  ;;  %v10295_v21 = vadd.f32 %v7579_v13, %v10160_v25  ;;  %v2471_v61 = vmul.f32 %v10286_v24, %v10286_v24 }
 0x583   :  { %v2431_v56 = vadd.f32 %v2430_v5, %v10282_v1  ;;  %v2469_v29 = vmul.f32 %v10282_v1, %v10282_v1  ;;  %v2499_v40 = vadd.f32 %v2498_v48, %v2468_v50  ;;  %v10292_v41 = vadd.f32 %v10160_v25, %v2368_v36 }
 0x584   :  { %v2472_v36 = vmul.f32 %v10295_v21, %v10295_v21 }
 0x585   :  { %v2500_v28 = vadd.f32 %v2499_v40, %v2469_v29  ;;  %v2432_v47 = vadd.f32 %v2431_v56, %v10292_v41  ;;  %v2470_v62 = vmul.f32 %v10292_v41, %v10292_v41 }
 0x587   :  { %v2433_v5 = vadd.f32 %v2432_v47, %v10286_v24  ;;  %v2501_v32 = vadd.f32 %v2500_v28, %v2470_v62  ;;  %v7582_v44 = vpop.f32.mrb[40].mxu0 }
 0x588   :  { %v2381_v50 = vpop.f32.mrb[41].mxu0  ;;  %v10310_v40 = vadd.f32 %v7582_v44, %v10160_v25 }
 0x589   :  { %v2502_v48 = vadd.f32 %v2501_v32, %v2471_v61  ;;  %v10306_v13 = vadd.f32 %v10160_v25, %v2381_v50  ;;  %v2434_v56 = vadd.f32 %v2433_v5, %v10295_v21  ;;  %v7583_v29 = vpop.f32.mrb[42].mxu0 }
 0x58a   :  { %v2384_v12 = vpop.f32.mrb[43].mxu0  ;;  %v10319_v61 = vadd.f32 %v7583_v29, %v10160_v25  ;;  %v2475_v50 = vmul.f32 %v10310_v40, %v10310_v40 }
 0x58b   :  { %v2435_v63 = vadd.f32 %v2434_v56, %v10306_v13  ;;  %v2473_v28 = vmul.f32 %v10306_v13, %v10306_v13  ;;  %v2503_v47 = vadd.f32 %v2502_v48, %v2472_v36  ;;  %v10316_v62 = vadd.f32 %v10160_v25, %v2384_v12 }
 0x58c   :  { %v2476_v12 = vmul.f32 %v10319_v61, %v10319_v61 }
 0x58d   :  { %v2504_v32 = vadd.f32 %v2503_v47, %v2473_v28  ;;  %v2436_v5 = vadd.f32 %v2435_v63, %v10316_v62  ;;  %v2474_v44 = vmul.f32 %v10316_v62, %v10316_v62 }
 0x58f   :  { %v2437_v56 = vadd.f32 %v2436_v5, %v10310_v40  ;;  %v2505_v26 = vadd.f32 %v2504_v32, %v2474_v44  ;;  %v7586_v7 = vpop.f32.mrb[44].mxu0 }
 0x590   :  { %v2397_v36 = vpop.f32.mrb[45].mxu0  ;;  %v10334_v47 = vadd.f32 %v7586_v7, %v10160_v25 }
 0x591   :  { %v2506_v48 = vadd.f32 %v2505_v26, %v2475_v50  ;;  %v10330_v29 = vadd.f32 %v10160_v25, %v2397_v36  ;;  %v2438_v63 = vadd.f32 %v2437_v56, %v10319_v61  ;;  %v7587_v28 = vpop.f32.mrb[46].mxu0 }
 0x592   :  { %v2400_v14 = vpop.f32.mrb[47].mxu0  ;;  %v10343_v50 = vadd.f32 %v7587_v28, %v10160_v25  ;;  %v2479_v36 = vmul.f32 %v10334_v47, %v10334_v47 }
 0x593   :  { %v2439_v53 = vadd.f32 %v2438_v63, %v10330_v29  ;;  %v2477_v32 = vmul.f32 %v10330_v29, %v10330_v29  ;;  %v2507_v5 = vadd.f32 %v2506_v48, %v2476_v12  ;;  %v10340_v44 = vadd.f32 %v10160_v25, %v2400_v14 }
 0x594   :  { %v2480_v12 = vmul.f32 %v10343_v50, %v10343_v50 }
 0x595   :  { %v2508_v26 = vadd.f32 %v2507_v5, %v2477_v32  ;;  %v2440_v56 = vadd.f32 %v2439_v53, %v10340_v44  ;;  %v2478_v7 = vmul.f32 %v10340_v44, %v10340_v44 }
 0x597   :  { %v2441_v63 = vadd.f32 %v2440_v56, %v10334_v47  ;;  %v2509_v8 = vadd.f32 %v2508_v26, %v2478_v7 }
 0x599   :  { %v2442_v14 = vadd.f32 %v2441_v63, %v10343_v50  ;;  %v2510_v48 = vadd.f32 %v2509_v8, %v2479_v36 }
 0x59b   :  { %v2443_v32 = vrot.slane %v2442_v14, 4  ;;  %v2511_v25 = vadd.f32 %v2510_v48, %v2480_v12 }
 0x59d   :  { %v2444_v28 = vadd.f32 %v2443_v32, %v2442_v14  ;;  %v2512_v5 = vrot.slane %v2511_v25, 4 }
 0x59f   :  { %v2445_v53 = vrot.slane %v2444_v28, 2  ;;  %v2513_v57 = vadd.f32 %v2512_v5, %v2511_v25 }
 0x5a1   :  { %v2446_v42 = vadd.f32 %v2445_v53, %v2444_v28  ;;  %v2514_v58 = vrot.slane %v2513_v57, 2 }
 0x5a3   :  { %v2447_v38 = vrot.slane %v2446_v42, 1  ;;  %v2515_v22 = vadd.f32 %v2514_v58, %v2513_v57 }
 0x5a5   :  { %v2448_v15 = vadd.f32 %v2447_v38, %v2446_v42  ;;  %v2516_v6 = vrot.slane %v2515_v22, 1 }
 0x5a7   :  { %v2517_v56 = vadd.f32 %v2516_v6, %v2515_v22  ;;  %v10354_v26 = vmul.f32 0.00390625, %v2448_v15 }
 0x5a9   :  { %v2519_v7 = vmul.f32 0.00390625, %v2517_v56  ;;  %v2520_v63 = vmul.f32 %v10354_v26, %v10354_v26  ;;  %v2551_v8 = vsub.f32 %v10340_v44, %v10354_v26  ;;  %v2531_v12 = vsub.f32 %v10220_v39, %v10354_v26 }
 0x5aa   :  { %v2533_v14 = vsub.f32 %v10223_v10, %v10354_v26  ;;  %v2534_v6 = vsub.f32 %v10234_v18, %v10354_v26  ;;  %v2535_v15 = vsub.f32 %v10244_v3, %v10354_v26  ;;  %v2536_v22 = vsub.f32 %v10238_v37, %v10354_v26 }
 0x5ab   :  { %v2521_v36 = vsub.f32 %v2519_v7, %v2520_v63  ;;  %v2537_v38 = vsub.f32 %v10247_v34, %v10354_v26  ;;  %v2538_v57 = vsub.f32 %v10258_v49, %v10354_v26  ;;  %v2539_v42 = vsub.f32 %v10268_v60, %v10354_v26 }
 0x5ac   :  { %v2540_v39 = vsub.f32 %v10262_v4, %v10354_v26  ;;  %v2541_v10 = vsub.f32 %v10271_v2, %v10354_v26  ;;  %v2542_v18 = vsub.f32 %v10282_v1, %v10354_v26  ;;  %v2543_v37 = vsub.f32 %v10292_v41, %v10354_v26 }
 0x5ad   :  { %v2554_v58 = vadd.f32 1e-05, %v2521_v36  ;;  %v2544_v3 = vsub.f32 %v10286_v24, %v10354_v26  ;;  %v2545_v34 = vsub.f32 %v10295_v21, %v10354_v26  ;;  %v2546_v49 = vsub.f32 %v10306_v13, %v10354_v26  ;;  %v7085_v21 = vld [vmem:[%s13501_s1 + $0x6] sm:$0x3] }
 0x5ae   :  { %v2547_v4 = vsub.f32 %v10316_v62, %v10354_v26  ;;  %v2548_v60 = vsub.f32 %v10310_v40, %v10354_v26  ;;  %v2549_v2 = vsub.f32 %v10319_v61, %v10354_v26  ;;  %v2550_v1 = vsub.f32 %v10330_v29, %v10354_v26  ;;  %v7086_v13 = vld [vmem:[%s13502_s2 + $0x6] sm:$0x3] }
 0x5af   :  { %8152 = vrsqrt.f32 %v2554_v58  ;;  %v2552_v24 = vsub.f32 %v10334_v47, %v10354_v26  ;;  %v2553_v41 = vsub.f32 %v10343_v50, %v10354_v26  ;;  %v10409_v40 = vrot.slane %v7085_v21, %v13749_v30 }
 0x5b0   :  { %v10412_v62 = vrot.slane %v7086_v13, %v13749_v30  ;;  %v2522_v61 = vsub.f32 %v10163_v43, %v10354_v26  ;;  %v2523_v29 = vsub.f32 %v10169_v55, %v10354_v26  ;;  %v10419_v47 = vrot.slane %v7085_v21, %v13750_v11 }
 0x5b1   :  { %v10422_v44 = vrot.slane %v7086_v13, %v13750_v11  ;;  %v2524_v50 = vsub.f32 %v10166_v54, %v10354_v26  ;;  %v2525_v48 = vsub.f32 %v10174_v17, %v10354_v26  ;;  %v2526_v32 = vsub.f32 %v10186_v16, %v10354_v26 }
 0x5b2   :  { %v2527_v43 = vsub.f32 %v10196_v9, %v10354_v26  ;;  %v2528_v55 = vsub.f32 %v10190_v59, %v10354_v26  ;;  %v2529_v28 = vsub.f32 %v10199_v23, %v10354_v26  ;;  %v2530_v5 = vsub.f32 %v10210_v20, %v10354_v26 }
 0x5b3   :  { %v2532_v54 = vsub.f32 %v10214_v52, %v10354_v26 }
 0x5b9   :  { %v8153_v25 = vpop.eup %8152 }
 0x5ba   :  { %v10440_v17 = vmul.f32 %v8153_v25, %v2551_v8  ;;  %v2556_v53 = vmul.f32 %v8153_v25, %v2522_v61  ;;  %v2557_v16 = vmul.f32 %v8153_v25, %v2523_v29  ;;  %v2558_v56 = vmul.f32 %v8153_v25, %v2524_v50 }
 0x5bb   :  { %v2559_v7 = vmul.f32 %v8153_v25, %v2525_v48  ;;  %v2560_v9 = vmul.f32 %v8153_v25, %v2526_v32  ;;  %v2561_v63 = vmul.f32 %v8153_v25, %v2527_v43  ;;  %v2562_v36 = vmul.f32 %v8153_v25, %v2528_v55 }
 0x5bc   :  { %v2563_v58 = vmul.f32 %v8153_v25, %v2529_v28  ;;  %v2564_v59 = vmul.f32 %v8153_v25, %v2530_v5  ;;  %v2565_v21 = vmul.f32 %v8153_v25, %v2531_v12  ;;  %v2566_v13 = vmul.f32 %v8153_v25, %v2532_v54 }
 0x5bd   :  { %v2567_v23 = vmul.f32 %v8153_v25, %v2533_v14  ;;  %v2568_v11 = vmul.f32 %v8153_v25, %v2534_v6  ;;  %v2569_v30 = vmul.f32 %v8153_v25, %v2535_v15  ;;  %v2570_v20 = vmul.f32 %v8153_v25, %v2536_v22 }
 0x5be   :  { %v2571_v35 = vmul.f32 %v8153_v25, %v2537_v38  ;;  %v10442_v31 = vmul.f32 %v8153_v25, %v2538_v57  ;;  %v10444_v52 = vmul.f32 %v8153_v25, %v2539_v42  ;;  %v10446_v26 = vmul.f32 %v8153_v25, %v2540_v39 }
 0x5bf   :  { %v10448_v8 = vmul.f32 %v8153_v25, %v2541_v10  ;;  %v10450_v61 = vmul.f32 %v8153_v25, %v2542_v18  ;;  %v10452_v29 = vmul.f32 %v8153_v25, %v2543_v37  ;;  %v10454_v50 = vmul.f32 %v8153_v25, %v2544_v3 }
 0x5c0   :  { %v10456_v12 = vmul.f32 %v8153_v25, %v2545_v34  ;;  %v10458_v14 = vmul.f32 %v8153_v25, %v2546_v49  ;;  %v10460_v6 = vmul.f32 %v8153_v25, %v2547_v4  ;;  %v10462_v15 = vmul.f32 %v8153_v25, %v2548_v60 }
 0x5c1   :  { %v10464_v22 = vmul.f32 %v8153_v25, %v2549_v2  ;;  %v10466_v38 = vmul.f32 %v8153_v25, %v2550_v1  ;;  %v10468_v57 = vmul.f32 %v8153_v25, %v2552_v24  ;;  %v10470_v42 = vmul.f32 %v8153_v25, %v2553_v41 }
 0x5c2   :  { %v2598_v39 = vmul.f32 %v10409_v40, %v2558_v56  ;;  %v2599_v10 = vmul.f32 %v10409_v40, %v2559_v7  ;;  %v2596_v18 = vmul.f32 %v10409_v40, %v2556_v53  ;;  %v2597_v37 = vmul.f32 %v10409_v40, %v2557_v16 }
 0x5c3   :  { %v2600_v3 = vmul.f32 %v10409_v40, %v2560_v9  ;;  %v2601_v34 = vmul.f32 %v10409_v40, %v2561_v63  ;;  %v2602_v49 = vmul.f32 %v10409_v40, %v2562_v36  ;;  %v2603_v4 = vmul.f32 %v10409_v40, %v2563_v58 }
 0x5c4   :  { %v2618_v60 = vadd.f32 %v10412_v62, %v2598_v39  ;;  %v2619_v2 = vadd.f32 %v10412_v62, %v2599_v10  ;;  %v2616_v1 = vadd.f32 %v10412_v62, %v2596_v18  ;;  %v2617_v24 = vadd.f32 %v10412_v62, %v2597_v37 }
 0x5c5   :  { %v2620_v41 = vadd.f32 %v10412_v62, %v2600_v3  ;;  %v2621_v48 = vadd.f32 %v10412_v62, %v2601_v34  ;;  %v2622_v32 = vadd.f32 %v10412_v62, %v2602_v49  ;;  %v2623_v43 = vadd.f32 %v10412_v62, %v2603_v4 }
 0x5c6   :  { %v2634_v25 = vmax.f32 %v2618_v60, 0.0  ;;  %v2635_v55 = vmax.f32 %v2619_v2, 0.0  ;;  %v2632_v28 = vmax.f32 %v2616_v1, 0.0  ;;  %v2633_v5 = vmax.f32 %v2617_v24, 0.0 }
 0x5c7   :  { %v2636_v54 = vmax.f32 %v2620_v41, 0.0  ;;  %v2637_v53 = vmax.f32 %v2621_v48, 0.0  ;;  %v2638_v16 = vmax.f32 %v2622_v32, 0.0  ;;  %v2639_v56 = vmax.f32 %v2623_v43, 0.0 }
 0x5c8   :  { %v2721_v7 = vpack.c.bf16 %v2633_v5, %v2632_v28  ;;  %v2722_v9 = vpack.c.bf16 %v2635_v55, %v2634_v25  ;;  %v2604_v63 = vmul.f32 %v10409_v40, %v2564_v59  ;;  %v2605_v36 = vmul.f32 %v10409_v40, %v2565_v21 }
 0x5c9   :  { %v2723_v58 = vpack.c.bf16 %v2637_v53, %v2636_v54  ;;  %v2724_v39 = vpack.c.bf16 %v2639_v56, %v2638_v16  ;;  %v2606_v10 = vmul.f32 %v10409_v40, %v2566_v13  ;;  %v2607_v18 = vmul.f32 %v10409_v40, %v2567_v23 }
 0x5ca   :  { %7604 = vmatprep.mubr.bf16.mxu1 %v2721_v7  ;;  %v2624_v37 = vadd.f32 %v10412_v62, %v2604_v63  ;;  %v2625_v3 = vadd.f32 %v10412_v62, %v2605_v36  ;;  %v2608_v34 = vmul.f32 %v10409_v40, %v2568_v11  ;;  %v2609_v49 = vmul.f32 %v10409_v40, %v2569_v30 }
 0x5cb   :  { %7605 = vmatmul.mubr.bf16.vlgmr.msra.gmra.mrb[48].mxu1 %v2722_v9  ;;  %v2626_v59 = vadd.f32 %v10412_v62, %v2606_v10  ;;  %v2627_v21 = vadd.f32 %v10412_v62, %v2607_v18  ;;  %v2610_v4 = vmul.f32 %v10409_v40, %v2570_v20  ;;  %v2611_v13 = vmul.f32 %v10409_v40, %v2571_v35 }
 0x5cc   :  { %7608 = vmatprep.mubr.bf16.mxu1 %v2723_v58  ;;  %v2640_v23 = vmax.f32 %v2624_v37, 0.0  ;;  %v2641_v60 = vmax.f32 %v2625_v3, 0.0  ;;  %v2628_v2 = vadd.f32 %v10412_v62, %v2608_v34  ;;  %v2629_v1 = vadd.f32 %v10412_v62, %v2609_v49 }
 0x5cd   :  { %v2642_v24 = vmax.f32 %v2626_v59, 0.0  ;;  %v2643_v11 = vmax.f32 %v2627_v21, 0.0  ;;  %v2630_v30 = vadd.f32 %v10412_v62, %v2610_v4  ;;  %v2631_v41 = vadd.f32 %v10412_v62, %v2611_v13 }
 0x5ce   :  { %v2725_v48 = vpack.c.bf16 %v2641_v60, %v2640_v23  ;;  %v2644_v32 = vmax.f32 %v2628_v2, 0.0  ;;  %v2645_v43 = vmax.f32 %v2629_v1, 0.0  ;;  %v2652_v20 = vmul.f32 %v10419_v47, %v10442_v31 }
 0x5cf   :  { %v2726_v35 = vpack.c.bf16 %v2643_v11, %v2642_v24  ;;  %v2646_v40 = vmax.f32 %v2630_v30, 0.0  ;;  %v2647_v25 = vmax.f32 %v2631_v41, 0.0  ;;  %v2653_v55 = vmul.f32 %v10419_v47, %v10444_v52 }
 0x5d0   :  { %v2727_v28 = vpack.c.bf16 %v2645_v43, %v2644_v32  ;;  %v2672_v5 = vadd.f32 %v10422_v44, %v2652_v20  ;;  %v2654_v54 = vmul.f32 %v10419_v47, %v10446_v26  ;;  %v2655_v62 = vmul.f32 %v10419_v47, %v10448_v8 }
 0x5d1   :  { %v2728_v53 = vpack.c.bf16 %v2647_v25, %v2646_v40  ;;  %v2673_v16 = vadd.f32 %v10422_v44, %v2653_v55  ;;  %v2656_v31 = vmul.f32 %v10419_v47, %v10450_v61  ;;  %v2657_v56 = vmul.f32 %v10419_v47, %v10452_v29 }
 0x5d2   :  { %v2688_v7 = vmax.f32 %v2672_v5, 0.0  ;;  %v2674_v52 = vadd.f32 %v10422_v44, %v2654_v54  ;;  %v2675_v9 = vadd.f32 %v10422_v44, %v2655_v62  ;;  %v2658_v26 = vmul.f32 %v10419_v47, %v10454_v50 }
 0x5d3   :  { %7609 = vmatmul.mubr.bf16.gmra.mrb[52].mxu1 %v2724_v39  ;;  %v2689_v63 = vmax.f32 %v2673_v16, 0.0  ;;  %v2676_v8 = vadd.f32 %v10422_v44, %v2656_v31  ;;  %v2677_v36 = vadd.f32 %v10422_v44, %v2657_v56  ;;  %v2659_v61 = vmul.f32 %v10419_v47, %v10456_v12  ;;  %v8096_v16 = vld [vmem:[#allocation2 + $0xb0] sm:$0xff]   ;;  %v8097_v31 = vld [vmem:[#allocation2 + $0xb8] sm:$0xff]  }
 0x5d4   :  { %7612 = vmatprep.mubr.bf16.mxu1 %v2725_v48  ;;  %v2690_v58 = vmax.f32 %v2674_v52, 0.0  ;;  %v2691_v29 = vmax.f32 %v2675_v9, 0.0  ;;  %v2678_v10 = vadd.f32 %v10422_v44, %v2658_v26  ;;  %v2660_v18 = vmul.f32 %v10419_v47, %v10458_v14 }
 0x5d5   :  { %v2729_v37 = vpack.c.bf16 %v2689_v63, %v2688_v7  ;;  %v2692_v3 = vmax.f32 %v2676_v8, 0.0  ;;  %v2693_v50 = vmax.f32 %v2677_v36, 0.0  ;;  %v2679_v39 = vadd.f32 %v10422_v44, %v2659_v61  ;;  %v10555_v7 = vld [vmem:[%s13508_s8 + $0x1] ss:$0 sm:$0xff] }
 0x5d6   :  { %v2730_v34 = vpack.c.bf16 %v2691_v29, %v2690_v58  ;;  %v2694_v49 = vmax.f32 %v2678_v10, 0.0  ;;  %v2661_v59 = vmul.f32 %v10419_v47, %v10460_v6  ;;  %v2680_v12 = vadd.f32 %v10422_v44, %v2660_v18 }
 0x5d7   :  { %v2731_v21 = vpack.c.bf16 %v2693_v50, %v2692_v3  ;;  %v2695_v4 = vmax.f32 %v2679_v39, 0.0  ;;  %v2662_v13 = vmul.f32 %v10419_v47, %v10462_v15  ;;  %v2663_v14 = vmul.f32 %v10419_v47, %v10464_v22 }
 0x5d8   :  { %v2681_v23 = vadd.f32 %v10422_v44, %v2661_v59  ;;  %v2696_v60 = vmax.f32 %v2680_v12, 0.0  ;;  %v2664_v2 = vmul.f32 %v10419_v47, %v10466_v38  ;;  %v2665_v1 = vmul.f32 %v10419_v47, %v10440_v17 }
 0x5d9   :  { %v2732_v6 = vpack.c.bf16 %v2695_v4, %v2694_v49  ;;  %v2682_v24 = vadd.f32 %v10422_v44, %v2662_v13  ;;  %v2683_v11 = vadd.f32 %v10422_v44, %v2663_v14  ;;  %v2666_v15 = vmul.f32 %v10419_v47, %v10468_v57 }
 0x5da   :  { %v2697_v30 = vmax.f32 %v2681_v23, 0.0  ;;  %v2684_v22 = vadd.f32 %v10422_v44, %v2664_v2  ;;  %v2685_v41 = vadd.f32 %v10422_v44, %v2665_v1  ;;  %v2667_v48 = vmul.f32 %v10419_v47, %v10470_v42  ;;  %v8090_v47 = vld [vmem:[#allocation2 + $0x80] sm:$0xff]   ;;  %v8091_v42 = vld [vmem:[#allocation2 + $0x88] sm:$0xff]   ;;  %v13751_v23 = vld [vmem:[#allocation13_spill] sm:$0xff] }
 0x5db   :  { %7613 = vmatmul.mubr.bf16.gmra.mrb[56].mxu1 %v2726_v35  ;;  %v2698_v38 = vmax.f32 %v2682_v24, 0.0  ;;  %v2699_v32 = vmax.f32 %v2683_v11, 0.0  ;;  %v2686_v17 = vadd.f32 %v10422_v44, %v2666_v15  ;;  %7636 = vmatprep.subr.bf16.mxu0 %v8090_v47  ;;  %v8093_v35 = vld [vmem:[#allocation2 + $0x98] sm:$0xff]  }
 0x5dc   :  { %7616 = vmatprep.mubr.bf16.mxu1 %v2727_v28  ;;  %v2733_v43 = vpack.c.bf16 %v2697_v30, %v2696_v60  ;;  %v2700_v20 = vmax.f32 %v2684_v22, 0.0  ;;  %v2701_v40 = vmax.f32 %v2685_v41, 0.0  ;;  %v2687_v25 = vadd.f32 %v10422_v44, %v2667_v48  ;;  %7637 = vmatpush3.bf16.msra.mxu0 %v8090_v47  ;;  %v8092_v44 = vld [vmem:[#allocation2 + $0x90] sm:$0xff]   ;;  %v8094_v28 = vld [vmem:[#allocation2 + $0xa0] sm:$0xff]   ;;  %v13753_v41 = vld [vmem:[#allocation14_spill] sm:$0xff] }
 0x5dd   :  { %v2734_v57 = vpack.c.bf16 %v2699_v32, %v2698_v38  ;;  %v2702_v55 = vmax.f32 %v2686_v17, 0.0  ;;  %7638 = vmatprep.subr.bf16.mxu0 %v8091_v42 }
 0x5de   :  { %v2735_v5 = vpack.c.bf16 %v2701_v40, %v2700_v20  ;;  %v2703_v54 = vmax.f32 %v2687_v25, 0.0  ;;  %v13754_v20 = vld [vmem:[#allocation16_spill] sm:$0xff] }
 0x5e0   :  { %v2736_v62 = vpack.c.bf16 %v2703_v54, %v2702_v55  ;;  %7639 = vmatpush3.bf16.msra.mxu0 %v8091_v42  ;;  %v13755_v55 = vld [vmem:[#allocation15_spill] sm:$0xff] }
 0x5e1   :  { %7640 = vmatprep.subr.bf16.mxu0 %v8092_v44 }
 0x5e3   :  { %7617 = vmatmul.mubr.bf16.gmra.mrb[60].mxu1 %v2728_v53  ;;  %v8095_v53 = vld [vmem:[#allocation2 + $0xa8] sm:$0xff]  }
 0x5e4   :  { %7620 = vmatprep.mubr.bf16.mxu1 %v2729_v37  ;;  %7641 = vmatpush3.bf16.msra.mxu0 %v8092_v44  ;;  %v13757_v44 = vld [vmem:[#allocation17_spill] sm:$0xff] }
 0x5e5   :  { %7642 = vmatprep.subr.bf16.mxu0 %v8093_v35 }
 0x5e8   :  { %7643 = vmatpush3.bf16.msra.mxu0 %v8093_v35 }
 0x5e9   :  { %7644 = vmatprep.subr.bf16.mxu0 %v8094_v28 }
 0x5eb   :  { %7621 = vmatmul.mubr.bf16.gmra.mrb[64].mxu1 %v2730_v34 }
 0x5ec   :  { %7624 = vmatprep.mubr.bf16.mxu1 %v2731_v21  ;;  %7645 = vmatpush3.bf16.msra.mxu0 %v8094_v28 }
 0x5ed   :  { %7646 = vmatprep.subr.bf16.mxu0 %v8095_v53 }
 0x5f0   :  { %7647 = vmatpush3.bf16.msra.mxu0 %v8095_v53 }
 0x5f1   :  { %7648 = vmatprep.subr.bf16.mxu0 %v8096_v16 }
 0x5f3   :  { %7625 = vmatmul.mubr.bf16.gmra.mrb[68].mxu1 %v2732_v6 }
 0x5f4   :  { %7628 = vmatprep.mubr.bf16.mxu1 %v2733_v43  ;;  %7649 = vmatpush3.bf16.msra.mxu0 %v8096_v16 }
 0x5f5   :  { %7650 = vmatprep.subr.bf16.mxu0 %v8097_v31 }
 0x5f8   :  { %7651 = vmatpush3.bf16.msra.mxu0 %v8097_v31 }
 0x5fb   :  { %7629 = vmatmul.mubr.bf16.gmra.mrb[72].mxu1 %v2734_v57 }
 0x5fc   :  { %7632 = vmatprep.mubr.bf16.mxu1 %v2735_v5 }
 0x603   :  { %7633 = vmatmul.mubr.bf16.gmra.mrb[76].mxu1 %v2736_v62 }
 0x69e   :  { %v7606_v56 = vpop.f32.mrb[48].mxu1 }
 0x69f   :  { %v2819_v52 = vpop.f32.mrb[49].mxu1  ;;  %v2948_v9 = vadd.f32 %v7606_v56, %v9749_v27 }
 0x6a0   :  { %v2946_v26 = vadd.f32 %v2819_v52, %v9745_v33  ;;  %v7607_v63 = vpop.f32.mrb[50].mxu1 }
 0x6a1   :  { %v2949_v8 = vadd.f32 %v7607_v63, %v9755_v19  ;;  %v2822_v36 = vpop.f32.mrb[51].mxu1  ;;  %v10565_v29 = vadd.f32 %v10555_v7, %v2948_v9 }
 0x6a2   :  { %v10561_v61 = vadd.f32 %v10555_v7, %v2946_v26  ;;  %v2947_v58 = vadd.f32 %v2822_v36, %v9752_v45  ;;  %v13761_v36 = vld [vmem:[#allocation18_spill] sm:$0xff] }
 0x6a3   :  { %v10571_v18 = vadd.f32 %v10555_v7, %v2949_v8  ;;  %v3057_v50 = vmul.f32 %v10565_v29, %v10565_v29 }
 0x6a4   :  { %v10568_v10 = vadd.f32 %v10555_v7, %v2947_v58  ;;  %v3055_v33 = vmul.f32 %v10561_v61, %v10561_v61 }
 0x6a5   :  { %v3058_v12 = vmul.f32 %v10571_v18, %v10571_v18 }
 0x6a6   :  { %v3018_v27 = vadd.f32 %v10568_v10, %v10561_v61  ;;  %v3056_v19 = vmul.f32 %v10568_v10, %v10568_v10  ;;  %v7610_v37 = vpop.f32.mrb[52].mxu1 }
 0x6a7   :  { %v2952_v45 = vadd.f32 %v7610_v37, %v9777_v46  ;;  %v2835_v3 = vpop.f32.mrb[53].mxu1 }
 0x6a8   :  { %v3019_v39 = vadd.f32 %v3018_v27, %v10565_v29  ;;  %v3087_v34 = vadd.f32 %v3056_v19, %v3055_v33  ;;  %v2950_v49 = vadd.f32 %v2835_v3, %v9772_v0  ;;  %v7611_v59 = vpop.f32.mrb[54].mxu1 }
 0x6a9   :  { %v2953_v21 = vadd.f32 %v7611_v59, %v9786_v51  ;;  %v2838_v4 = vpop.f32.mrb[55].mxu1  ;;  %v10593_v2 = vadd.f32 %v10555_v7, %v2952_v45  ;;  %v13762_v45 = vld [vmem:[#allocation20_spill] sm:$0xff] }
 0x6aa   :  { %v3088_v13 = vadd.f32 %v3087_v34, %v3057_v50  ;;  %v10588_v14 = vadd.f32 %v10555_v7, %v2950_v49  ;;  %v3020_v46 = vadd.f32 %v3019_v39, %v10571_v18  ;;  %v2951_v60 = vadd.f32 %v2838_v4, %v13751_v23  ;;  %v13763_v34 = vld [vmem:[#allocation19_spill] sm:$0xff] }
 0x6ab   :  { %v10602_v24 = vadd.f32 %v10555_v7, %v2953_v21  ;;  %v3061_v32 = vmul.f32 %v10593_v2, %v10593_v2 }
 0x6ac   :  { %v3021_v0 = vadd.f32 %v3020_v46, %v10588_v14  ;;  %v3059_v1 = vmul.f32 %v10588_v14, %v10588_v14  ;;  %v3089_v6 = vadd.f32 %v3088_v13, %v3058_v12  ;;  %v10599_v51 = vadd.f32 %v10555_v7, %v2951_v60  ;;  %v13765_v13 = vld [vmem:[#allocation21_spill] sm:$0xff] }
 0x6ad   :  { %v3062_v57 = vmul.f32 %v10602_v24, %v10602_v24 }
 0x6ae   :  { %13752 = vst [vmem:[#allocation13_spill] sm:$0xff] %v10599_v51  ;;  %v3090_v11 = vadd.f32 %v3089_v6, %v3059_v1  ;;  %v3022_v15 = vadd.f32 %v3021_v0, %v10599_v51  ;;  %v3060_v30 = vmul.f32 %v10599_v51, %v10599_v51  ;;  %v7614_v22 = vpop.f32.mrb[56].mxu1 }
 0x6af   :  { %v2956_v48 = vadd.f32 %v7614_v22, %v13753_v41  ;;  %v2851_v38 = vpop.f32.mrb[57].mxu1 }
 0x6b0   :  { %v3023_v17 = vadd.f32 %v3022_v15, %v10593_v2  ;;  %v3091_v43 = vadd.f32 %v3090_v11, %v3060_v30  ;;  %v2954_v40 = vadd.f32 %v2851_v38, %v13754_v20  ;;  %v7615_v25 = vpop.f32.mrb[58].mxu1 }
 0x6b1   :  { %v2957_v5 = vadd.f32 %v7615_v25, %v13755_v55  ;;  %v2854_v54 = vpop.f32.mrb[59].mxu1  ;;  %v10621_v28 = vadd.f32 %v10555_v7, %v2956_v48  ;;  %v13769_v48 = vld [vmem:[#allocation22_spill] sm:$0xff] }
 0x6b2   :  { %v3092_v62 = vadd.f32 %v3091_v43, %v3061_v32  ;;  %v10616_v47 = vadd.f32 %v10555_v7, %v2954_v40  ;;  %v3024_v42 = vadd.f32 %v3023_v17, %v10602_v24  ;;  %v2955_v35 = vadd.f32 %v2854_v54, %v13757_v44  ;;  %v13770_v40 = vld [vmem:[#allocation24_spill] sm:$0xff] }
 0x6b3   :  { %13758 = vst [vmem:[#allocation16_spill] sm:$0xff] %v10621_v28  ;;  %v10630_v52 = vadd.f32 %v10555_v7, %v2957_v5  ;;  %v3065_v27 = vmul.f32 %v10621_v28, %v10621_v28  ;;  %v13771_v5 = vld [vmem:[#allocation23_spill] sm:$0xff] }
 0x6b4   :  { %13756 = vst [vmem:[#allocation14_spill] sm:$0xff] %v10616_v47  ;;  %v3025_v53 = vadd.f32 %v3024_v42, %v10616_v47  ;;  %v3063_v16 = vmul.f32 %v10616_v47, %v10616_v47  ;;  %v3093_v31 = vadd.f32 %v3092_v62, %v3062_v57  ;;  %v10627_v56 = vadd.f32 %v10555_v7, %v2955_v35 }
 0x6b5   :  { %13760 = vst [vmem:[#allocation17_spill] sm:$0xff] %v10630_v52  ;;  %v3066_v39 = vmul.f32 %v10630_v52, %v10630_v52 }
 0x6b6   :  { %13759 = vst [vmem:[#allocation15_spill] sm:$0xff] %v10627_v56  ;;  %v3094_v9 = vadd.f32 %v3093_v31, %v3063_v16  ;;  %v3026_v26 = vadd.f32 %v3025_v53, %v10627_v56  ;;  %v3064_v63 = vmul.f32 %v10627_v56, %v10627_v56  ;;  %v7618_v8 = vpop.f32.mrb[60].mxu1  ;;  %v13773_v53 = vld [vmem:[#allocation25_spill] sm:$0xff] }
 0x6b7   :  { %v2960_v58 = vadd.f32 %v7618_v8, %v13761_v36  ;;  %v2867_v33 = vpop.f32.mrb[61].mxu1 }
 0x6b8   :  { %v3027_v19 = vadd.f32 %v3026_v26, %v10621_v28  ;;  %v3095_v37 = vadd.f32 %v3094_v9, %v3064_v63  ;;  %v2958_v3 = vadd.f32 %v2867_v33, %v13762_v45  ;;  %v7619_v50 = vpop.f32.mrb[62].mxu1 }
 0x6b9   :  { %v2961_v49 = vadd.f32 %v7619_v50, %v13763_v34  ;;  %v2870_v59 = vpop.f32.mrb[63].mxu1  ;;  %v10649_v23 = vadd.f32 %v10555_v7, %v2960_v58 }
 0x6ba   :  { %v3096_v12 = vadd.f32 %v3095_v37, %v3065_v27  ;;  %v10644_v21 = vadd.f32 %v10555_v7, %v2958_v3  ;;  %v3028_v4 = vadd.f32 %v3027_v19, %v10630_v52  ;;  %v2959_v46 = vadd.f32 %v2870_v59, %v13765_v13  ;;  %v13777_v37 = vld [vmem:[#allocation26_spill] sm:$0xff]  ;;  %v13779_v13 = vld [vmem:[#allocation27_spill] sm:$0xff] }
 0x6bb   :  { %13766 = vst [vmem:[#allocation20_spill] sm:$0xff] %v10649_v23  ;;  %v10658_v11 = vadd.f32 %v10555_v7, %v2961_v49  ;;  %v3069_v17 = vmul.f32 %v10649_v23, %v10649_v23  ;;  %v13778_v49 = vld [vmem:[#allocation28_spill] sm:$0xff] }
 0x6bc   :  { %13764 = vst [vmem:[#allocation18_spill] sm:$0xff] %v10644_v21  ;;  %v3029_v60 = vadd.f32 %v3028_v4, %v10644_v21  ;;  %v3067_v0 = vmul.f32 %v10644_v21, %v10644_v21  ;;  %v3097_v1 = vadd.f32 %v3096_v12, %v3066_v39  ;;  %v10655_v6 = vadd.f32 %v10555_v7, %v2959_v46 }
 0x6bd   :  { %13768 = vst [vmem:[#allocation21_spill] sm:$0xff] %v10658_v11  ;;  %v3070_v55 = vmul.f32 %v10658_v11, %v10658_v11 }
 0x6be   :  { %13767 = vst [vmem:[#allocation19_spill] sm:$0xff] %v10655_v6  ;;  %v3098_v15 = vadd.f32 %v3097_v1, %v3067_v0  ;;  %v3030_v30 = vadd.f32 %v3029_v60, %v10655_v6  ;;  %v3068_v22 = vmul.f32 %v10655_v6, %v10655_v6  ;;  %v7622_v41 = vpop.f32.mrb[64].mxu1 }
 0x6bf   :  { %v2964_v38 = vadd.f32 %v7622_v41, %v13769_v48  ;;  %v2883_v32 = vpop.f32.mrb[65].mxu1 }
 0x6c0   :  { %v3031_v43 = vadd.f32 %v3030_v30, %v10649_v23  ;;  %v3099_v20 = vadd.f32 %v3098_v15, %v3068_v22  ;;  %v2962_v25 = vadd.f32 %v2883_v32, %v13770_v40  ;;  %v7623_v57 = vpop.f32.mrb[66].mxu1  ;;  %v13781_v30 = vld [vmem:[#allocation29_spill] sm:$0xff] }
 0x6c1   :  { %v2965_v54 = vadd.f32 %v7623_v57, %v13771_v5  ;;  %v2886_v62 = vpop.f32.mrb[67].mxu1  ;;  %v10677_v31 = vadd.f32 %v10555_v7, %v2964_v38 }
 0x6c2   :  { %v3100_v42 = vadd.f32 %v3099_v20, %v3069_v17  ;;  %v10672_v44 = vadd.f32 %v10555_v7, %v2962_v25  ;;  %v3032_v35 = vadd.f32 %v3031_v43, %v10658_v11  ;;  %v2963_v16 = vadd.f32 %v2886_v62, %v13773_v53  ;;  %v13786_v53 = vld [vmem:[#allocation32_spill] sm:$0xff] }
 0x6c3   :  { %13774 = vst [vmem:[#allocation24_spill] sm:$0xff] %v10677_v31  ;;  %v10686_v36 = vadd.f32 %v10555_v7, %v2965_v54  ;;  %v3073_v50 = vmul.f32 %v10677_v31, %v10677_v31 }
 0x6c4   :  { %13772 = vst [vmem:[#allocation22_spill] sm:$0xff] %v10672_v44  ;;  %v3033_v9 = vadd.f32 %v3032_v35, %v10672_v44  ;;  %v3071_v26 = vmul.f32 %v10672_v44, %v10672_v44  ;;  %v3101_v63 = vadd.f32 %v3100_v42, %v3070_v55  ;;  %v10683_v8 = vadd.f32 %v10555_v7, %v2963_v16  ;;  %v13785_v55 = vld [vmem:[#allocation30_spill] sm:$0xff] }
 0x6c5   :  { %13776 = vst [vmem:[#allocation25_spill] sm:$0xff] %v10686_v36  ;;  %v3074_v4 = vmul.f32 %v10686_v36, %v10686_v36 }
 0x6c6   :  { %13775 = vst [vmem:[#allocation23_spill] sm:$0xff] %v10683_v8  ;;  %v3102_v58 = vadd.f32 %v3101_v63, %v3071_v26  ;;  %v3034_v33 = vadd.f32 %v3033_v9, %v10683_v8  ;;  %v3072_v27 = vmul.f32 %v10683_v8, %v10683_v8  ;;  %v7626_v19 = vpop.f32.mrb[68].mxu1  ;;  %v13787_v63 = vld [vmem:[#allocation31_spill] sm:$0xff] }
 0x6c7   :  { %v2968_v45 = vadd.f32 %v7626_v19, %v13777_v37  ;;  %v2899_v3 = vpop.f32.mrb[69].mxu1 }
 0x6c8   :  { %v3035_v39 = vadd.f32 %v3034_v33, %v10677_v31  ;;  %v3103_v34 = vadd.f32 %v3102_v58, %v3072_v27  ;;  %v2966_v59 = vadd.f32 %v2899_v3, %v13778_v49  ;;  %v7627_v12 = vpop.f32.mrb[70].mxu1 }
 0x6c9   :  { %v2969_v46 = vadd.f32 %v7627_v12, %v13779_v13  ;;  %v2902_v60 = vpop.f32.mrb[71].mxu1  ;;  %v10705_v41 = vadd.f32 %v10555_v7, %v2968_v45  ;;  %v13789_v45 = vld [vmem:[#allocation33_spill] sm:$0xff] }
 0x6ca   :  { %v3104_v0 = vadd.f32 %v3103_v34, %v3073_v50  ;;  %v10700_v1 = vadd.f32 %v10555_v7, %v2966_v59  ;;  %v3036_v15 = vadd.f32 %v3035_v39, %v10686_v36  ;;  %v2967_v22 = vadd.f32 %v2902_v60, %v13781_v30 }
 0x6cb   :  { %13782 = vst [vmem:[#allocation28_spill] sm:$0xff] %v10705_v41  ;;  %v10714_v43 = vadd.f32 %v10555_v7, %v2969_v46  ;;  %v3077_v62 = vmul.f32 %v10705_v41, %v10705_v41 }
 0x6cc   :  { %13780 = vst [vmem:[#allocation26_spill] sm:$0xff] %v10700_v1  ;;  %v3037_v48 = vadd.f32 %v3036_v15, %v10700_v1  ;;  %v3075_v38 = vmul.f32 %v10700_v1, %v10700_v1  ;;  %v3105_v32 = vadd.f32 %v3104_v0, %v3074_v4  ;;  %v10711_v17 = vadd.f32 %v10555_v7, %v2967_v22  ;;  %v13793_v0 = vld [vmem:[#allocation34_spill] sm:$0xff] }
 0x6cd   :  { %13784 = vst [vmem:[#allocation29_spill] sm:$0xff] %v10714_v43  ;;  %v3078_v26 = vmul.f32 %v10714_v43, %v10714_v43 }
 0x6ce   :  { %13783 = vst [vmem:[#allocation27_spill] sm:$0xff] %v10711_v17  ;;  %v3106_v20 = vadd.f32 %v3105_v32, %v3075_v38  ;;  %v3038_v40 = vadd.f32 %v3037_v48, %v10711_v17  ;;  %v3076_v25 = vmul.f32 %v10711_v17, %v10711_v17  ;;  %v7630_v57 = vpop.f32.mrb[72].mxu1  ;;  %v13794_v32 = vld [vmem:[#allocation36_spill] sm:$0xff] }
 0x6cf   :  { %v2972_v5 = vadd.f32 %v7630_v57, %v13785_v55  ;;  %v2915_v54 = vpop.f32.mrb[73].mxu1  ;;  %v13795_v57 = vld [vmem:[#allocation35_spill] sm:$0xff] }
 0x6d0   :  { %v3039_v42 = vadd.f32 %v3038_v40, %v10705_v41  ;;  %v3107_v35 = vadd.f32 %v3106_v20, %v3076_v25  ;;  %v2970_v16 = vadd.f32 %v2915_v54, %v13786_v53  ;;  %v7631_v9 = vpop.f32.mrb[74].mxu1 }
 0x6d1   :  { %v2973_v58 = vadd.f32 %v7631_v9, %v13787_v63  ;;  %v2918_v33 = vpop.f32.mrb[75].mxu1  ;;  %v10733_v50 = vadd.f32 %v10555_v7, %v2972_v5 }
 0x6d2   :  { %v3108_v27 = vadd.f32 %v3107_v35, %v3077_v62  ;;  %v10728_v19 = vadd.f32 %v10555_v7, %v2970_v16  ;;  %v3040_v37 = vadd.f32 %v3039_v42, %v10714_v43  ;;  %v2971_v3 = vadd.f32 %v2918_v33, %v13789_v45  ;;  %v13797_v35 = vld [vmem:[#allocation37_spill] sm:$0xff] }
 0x6d3   :  { %13790 = vst [vmem:[#allocation32_spill] sm:$0xff] %v10733_v50  ;;  %v10742_v12 = vadd.f32 %v10555_v7, %v2973_v58  ;;  %v3081_v22 = vmul.f32 %v10733_v50, %v10733_v50 }
 0x6d4   :  { %13788 = vst [vmem:[#allocation30_spill] sm:$0xff] %v10728_v19  ;;  %v3041_v39 = vadd.f32 %v3040_v37, %v10728_v19  ;;  %v3079_v34 = vmul.f32 %v10728_v19, %v10728_v19  ;;  %v3109_v49 = vadd.f32 %v3108_v27, %v3078_v26  ;;  %v10739_v59 = vadd.f32 %v10555_v7, %v2971_v3 }
 0x6d5   :  { %13792 = vst [vmem:[#allocation33_spill] sm:$0xff] %v10742_v12  ;;  %v3082_v25 = vmul.f32 %v10742_v12, %v10742_v12 }
 0x6d6   :  { %13791 = vst [vmem:[#allocation31_spill] sm:$0xff] %v10739_v59  ;;  %v3110_v4 = vadd.f32 %v3109_v49, %v3079_v34  ;;  %v3042_v13 = vadd.f32 %v3041_v39, %v10739_v59  ;;  %v3080_v46 = vmul.f32 %v10739_v59, %v10739_v59  ;;  %v7634_v60 = vpop.f32.mrb[76].mxu1 }
 0x6d7   :  { %v2976_v15 = vadd.f32 %v7634_v60, %v13793_v0  ;;  %v2931_v30 = vpop.f32.mrb[77].mxu1 }
 0x6d8   :  { %v3043_v48 = vadd.f32 %v3042_v13, %v10733_v50  ;;  %v3111_v38 = vadd.f32 %v3110_v4, %v3080_v46  ;;  %v2974_v20 = vadd.f32 %v2931_v30, %v13794_v32  ;;  %v7635_v40 = vpop.f32.mrb[78].mxu1 }
 0x6d9   :  { %v2977_v55 = vadd.f32 %v7635_v40, %v13795_v57  ;;  %v2934_v5 = vpop.f32.mrb[79].mxu1  ;;  %v10761_v16 = vadd.f32 %v10555_v7, %v2976_v15 }
 0x6da   :  { %v3112_v54 = vadd.f32 %v3111_v38, %v3081_v22  ;;  %v10756_v62 = vadd.f32 %v10555_v7, %v2974_v20  ;;  %v3044_v42 = vadd.f32 %v3043_v48, %v10742_v12  ;;  %v2975_v53 = vadd.f32 %v2934_v5, %v13797_v35  ;;  %v10788_v35 = vld [vmem:[%s13501_s1 + $0x8] sm:$0x3] }
 0x6db   :  { %13798 = vst [vmem:[#allocation36_spill] sm:$0xff] %v10761_v16  ;;  %v10770_v27 = vadd.f32 %v10555_v7, %v2977_v55  ;;  %v3085_v3 = vmul.f32 %v10761_v16, %v10761_v16 }
 0x6dc   :  { %13796 = vst [vmem:[#allocation34_spill] sm:$0xff] %v10756_v62  ;;  %v3045_v9 = vadd.f32 %v3044_v42, %v10756_v62  ;;  %v3083_v26 = vmul.f32 %v10756_v62, %v10756_v62  ;;  %v3113_v63 = vadd.f32 %v3112_v54, %v3082_v25  ;;  %v10767_v58 = vadd.f32 %v10555_v7, %v2975_v53  ;;  %v10793_v53 = vld [vmem:[%s13502_s2 + $0x8] sm:$0x3] }
 0x6dd   :  { %13800 = vst [vmem:[#allocation37_spill] sm:$0xff] %v10770_v27  ;;  %v3086_v49 = vmul.f32 %v10770_v27, %v10770_v27 }
 0x6de   :  { %13799 = vst [vmem:[#allocation35_spill] sm:$0xff] %v10767_v58  ;;  %v3114_v33 = vadd.f32 %v3113_v63, %v3083_v26  ;;  %v3046_v37 = vadd.f32 %v3045_v9, %v10767_v58  ;;  %v3084_v45 = vmul.f32 %v10767_v58, %v10767_v58  ;;  %v13801_v9 = vld [vmem:[#allocation12_spill] sm:$0xff] }
 0x6df   :  { %v10797_v26 = vrot.slane %v10788_v35, %v13801_v9 }
 0x6e0   :  { %v3047_v39 = vadd.f32 %v3046_v37, %v10761_v16  ;;  %v3115_v34 = vadd.f32 %v3114_v33, %v3084_v45  ;;  %v10807_v45 = vrot.slane %v10793_v53, %v13801_v9 }
 0x6e2   :  { %v3048_v4 = vadd.f32 %v3047_v39, %v10770_v27  ;;  %v3116_v13 = vadd.f32 %v3115_v34, %v3085_v3 }
 0x6e4   :  { %v3049_v46 = vrot.slane %v3048_v4, 4  ;;  %v3117_v7 = vadd.f32 %v3116_v13, %v3086_v49 }
 0x6e6   :  { %v3050_v60 = vadd.f32 %v3049_v46, %v3048_v4  ;;  %v3118_v0 = vrot.slane %v3117_v7, 4 }
 0x6e8   :  { %v3051_v15 = vrot.slane %v3050_v60, 2  ;;  %v3119_v30 = vadd.f32 %v3118_v0, %v3117_v7 }
 0x6ea   :  { %v3052_v22 = vadd.f32 %v3051_v15, %v3050_v60  ;;  %v3120_v48 = vrot.slane %v3119_v30, 2 }
 0x6ec   :  { %v3053_v38 = vrot.slane %v3052_v22, 1  ;;  %v3121_v32 = vadd.f32 %v3120_v48, %v3119_v30 }
 0x6ee   :  { %v3054_v20 = vadd.f32 %v3053_v38, %v3052_v22  ;;  %v3122_v40 = vrot.slane %v3121_v32, 1 }
 0x6f0   :  { %v3123_v25 = vadd.f32 %v3122_v40, %v3121_v32  ;;  %v10781_v57 = vmul.f32 0.00390625, %v3054_v20 }
 0x6f2   :  { %v3125_v55 = vmul.f32 0.00390625, %v3123_v25  ;;  %v3126_v5 = vmul.f32 %v10781_v57, %v10781_v57  ;;  %v3128_v63 = vsub.f32 %v10561_v61, %v10781_v57  ;;  %v3129_v33 = vsub.f32 %v10568_v10, %v10781_v57 }
 0x6f3   :  { %v3130_v37 = vsub.f32 %v10565_v29, %v10781_v57  ;;  %v3131_v3 = vsub.f32 %v10571_v18, %v10781_v57  ;;  %v3132_v39 = vsub.f32 %v10588_v14, %v10781_v57  ;;  %v3133_v34 = vsub.f32 %v10599_v51, %v10781_v57 }
 0x6f4   :  { %v3127_v54 = vsub.f32 %v3125_v55, %v3126_v5  ;;  %v3134_v49 = vsub.f32 %v10593_v2, %v10781_v57  ;;  %v3135_v13 = vsub.f32 %v10602_v24, %v10781_v57  ;;  %v3136_v46 = vsub.f32 %v10616_v47, %v10781_v57 }
 0x6f5   :  { %v3137_v7 = vsub.f32 %v10627_v56, %v10781_v57  ;;  %v3138_v60 = vsub.f32 %v10621_v28, %v10781_v57 }
 0x6f6   :  { %v3160_v42 = vadd.f32 1e-05, %v3127_v54  ;;  %v3139_v54 = vsub.f32 %v10630_v52, %v10781_v57 }
 0x6f8   :  { %8154 = vrsqrt.f32 %v3160_v42 }
 0x702   :  { %v10817_v4 = vpop.eup %8154 }
 0x703   :  { %v3164_v0 = vmul.f32 %v10817_v4, %v3130_v37  ;;  %v3165_v15 = vmul.f32 %v10817_v4, %v3131_v3  ;;  %v3162_v30 = vmul.f32 %v10817_v4, %v3128_v63  ;;  %v3163_v22 = vmul.f32 %v10817_v4, %v3129_v33 }
 0x704   :  { %v3166_v48 = vmul.f32 %v10817_v4, %v3132_v39  ;;  %v3167_v38 = vmul.f32 %v10817_v4, %v3133_v34  ;;  %v3168_v32 = vmul.f32 %v10817_v4, %v3134_v49  ;;  %v3169_v20 = vmul.f32 %v10817_v4, %v3135_v13 }
 0x705   :  { %v3204_v40 = vmul.f32 %v10797_v26, %v3164_v0  ;;  %v3205_v25 = vmul.f32 %v10797_v26, %v3165_v15  ;;  %v3202_v55 = vmul.f32 %v10797_v26, %v3162_v30  ;;  %v3203_v5 = vmul.f32 %v10797_v26, %v3163_v22 }
 0x706   :  { %v3206_v42 = vmul.f32 %v10797_v26, %v3166_v48  ;;  %v3207_v63 = vmul.f32 %v10797_v26, %v3167_v38  ;;  %v3208_v33 = vmul.f32 %v10797_v26, %v3168_v32  ;;  %v3140_v49 = vsub.f32 %v10644_v21, %v10781_v57 }
 0x707   :  { %v3222_v37 = vadd.f32 %v10807_v45, %v3202_v55  ;;  %v3223_v3 = vadd.f32 %v10807_v45, %v3203_v5  ;;  %v3224_v39 = vadd.f32 %v10807_v45, %v3204_v40  ;;  %v3225_v34 = vadd.f32 %v10807_v45, %v3205_v25 }
 0x708   :  { %v3226_v13 = vadd.f32 %v10807_v45, %v3206_v42  ;;  %v3227_v0 = vadd.f32 %v10807_v45, %v3207_v63  ;;  %v3209_v15 = vmul.f32 %v10797_v26, %v3169_v20  ;;  %v3141_v32 = vsub.f32 %v10655_v6, %v10781_v57 }
 0x709   :  { %v3238_v30 = vmax.f32 %v3222_v37, 0.0  ;;  %v3239_v22 = vmax.f32 %v3223_v3, 0.0  ;;  %v3240_v48 = vmax.f32 %v3224_v39, 0.0  ;;  %v3241_v38 = vmax.f32 %v3225_v34, 0.0 }
 0x70a   :  { %v3242_v55 = vmax.f32 %v3226_v13, 0.0  ;;  %v3243_v40 = vmax.f32 %v3227_v0, 0.0  ;;  %v3228_v25 = vadd.f32 %v10807_v45, %v3208_v33  ;;  %v3170_v21 = vmul.f32 %v10817_v4, %v3136_v46 }
 0x70b   :  { %v3327_v5 = vpack.c.bf16 %v3239_v22, %v3238_v30  ;;  %v3328_v56 = vpack.c.bf16 %v3241_v38, %v3240_v48  ;;  %v3171_v42 = vmul.f32 %v10817_v4, %v3137_v7  ;;  %v3229_v20 = vadd.f32 %v10807_v45, %v3209_v15 }
 0x70c   :  { %v3329_v63 = vpack.c.bf16 %v3243_v40, %v3242_v55  ;;  %v3172_v37 = vmul.f32 %v10817_v4, %v3138_v60  ;;  %v3173_v3 = vmul.f32 %v10817_v4, %v3139_v54  ;;  %v3210_v39 = vmul.f32 %v10797_v26, %v3170_v21 }
 0x70d   :  { %7652 = vmatprep.mubr.bf16.mxu0 %v3327_v5  ;;  %v3211_v34 = vmul.f32 %v10797_v26, %v3171_v42  ;;  %v3174_v33 = vmul.f32 %v10817_v4, %v3140_v49  ;;  %v3175_v13 = vmul.f32 %v10817_v4, %v3141_v32  ;;  %v3142_v46 = vsub.f32 %v10649_v23, %v10781_v57 }
 0x70e   :  { %7653 = vmatmul.mubr.bf16.vlgmr.msra.gmra.mrb[48].mxu0 %v3328_v56  ;;  %v3143_v7 = vsub.f32 %v10658_v11, %v10781_v57  ;;  %v3244_v60 = vmax.f32 %v3228_v25, 0.0  ;;  %v3230_v54 = vadd.f32 %v10807_v45, %v3210_v39  ;;  %v3245_v21 = vmax.f32 %v3229_v20, 0.0  ;;  %v13802_v25 = vld [vmem:[#allocation11_spill] sm:$0xff] }
 0x70f   :  { %7656 = vmatprep.mubr.bf16.mxu0 %v3329_v63  ;;  %v3231_v0 = vadd.f32 %v10807_v45, %v3211_v34  ;;  %v3212_v15 = vmul.f32 %v10797_v26, %v3172_v37  ;;  %v3213_v49 = vmul.f32 %v10797_v26, %v3173_v3  ;;  %v3214_v30 = vmul.f32 %v10797_v26, %v3174_v33 }
 0x710   :  { %v3246_v22 = vmax.f32 %v3230_v54, 0.0  ;;  %v3215_v56 = vmul.f32 %v10797_v26, %v3175_v13  ;;  %v3176_v38 = vmul.f32 %v10817_v4, %v3142_v46  ;;  %v3177_v32 = vmul.f32 %v10817_v4, %v3143_v7 }
 0x711   :  { %v3247_v48 = vmax.f32 %v3231_v0, 0.0  ;;  %v3144_v55 = vsub.f32 %v10672_v44, %v10781_v57  ;;  %v3145_v40 = vsub.f32 %v10683_v8, %v10781_v57  ;;  %v10883_v5 = vrot.slane %v10788_v35, %v13802_v25 }
 0x712   :  { %v3330_v42 = vpack.c.bf16 %v3245_v21, %v3244_v60  ;;  %v3232_v63 = vadd.f32 %v10807_v45, %v3212_v15  ;;  %v3233_v20 = vadd.f32 %v10807_v45, %v3213_v49  ;;  %v3234_v37 = vadd.f32 %v10807_v45, %v3214_v30 }
 0x713   :  { %v3331_v3 = vpack.c.bf16 %v3247_v48, %v3246_v22  ;;  %v3235_v39 = vadd.f32 %v10807_v45, %v3215_v56  ;;  %v3178_v34 = vmul.f32 %v10817_v4, %v3144_v55  ;;  %v3179_v33 = vmul.f32 %v10817_v4, %v3145_v40 }
 0x714   :  { %v3216_v13 = vmul.f32 %v10797_v26, %v3176_v38  ;;  %v3217_v35 = vmul.f32 %v10797_v26, %v3177_v32  ;;  %v10895_v46 = vrot.slane %v10793_v53, %v13802_v25  ;;  %v3146_v7 = vsub.f32 %v10677_v31, %v10781_v57 }
 0x715   :  { %v3147_v60 = vsub.f32 %v10686_v36, %v10781_v57  ;;  %v3248_v54 = vmax.f32 %v3232_v63, 0.0  ;;  %v3249_v0 = vmax.f32 %v3233_v20, 0.0  ;;  %v3250_v21 = vmax.f32 %v3234_v37, 0.0 }
 0x716   :  { %7657 = vmatmul.mubr.bf16.gmra.mrb[52].mxu0 %v3330_v42  ;;  %v3251_v15 = vmax.f32 %v3235_v39, 0.0  ;;  %v3258_v49 = vmul.f32 %v10883_v5, %v3178_v34  ;;  %v3259_v30 = vmul.f32 %v10883_v5, %v3179_v33  ;;  %v3148_v26 = vsub.f32 %v10700_v1, %v10781_v57 }
 0x717   :  { %7660 = vmatprep.mubr.bf16.mxu0 %v3331_v3  ;;  %v3149_v53 = vsub.f32 %v10711_v17, %v10781_v57  ;;  %v3236_v22 = vadd.f32 %v10807_v45, %v3216_v13  ;;  %v3237_v48 = vadd.f32 %v10807_v45, %v3217_v35  ;;  %v3180_v56 = vmul.f32 %v10817_v4, %v3146_v7 }
 0x718   :  { %v3181_v38 = vmul.f32 %v10817_v4, %v3147_v60  ;;  %v3332_v32 = vpack.c.bf16 %v3249_v0, %v3248_v54  ;;  %v3182_v55 = vmul.f32 %v10817_v4, %v3148_v26  ;;  %v3333_v42 = vpack.c.bf16 %v3251_v15, %v3250_v21 }
 0x719   :  { %v3183_v40 = vmul.f32 %v10817_v4, %v3149_v53  ;;  %v3278_v63 = vadd.f32 %v10895_v46, %v3258_v49  ;;  %v3279_v20 = vadd.f32 %v10895_v46, %v3259_v30  ;;  %v3158_v37 = vsub.f32 %v10761_v16, %v10781_v57 }
 0x71a   :  { %v3252_v3 = vmax.f32 %v3236_v22, 0.0  ;;  %v3253_v45 = vmax.f32 %v3237_v48, 0.0  ;;  %v3150_v39 = vsub.f32 %v10705_v41, %v10781_v57  ;;  %v3260_v34 = vmul.f32 %v10883_v5, %v3180_v56 }
 0x71b   :  { %v3261_v33 = vmul.f32 %v10883_v5, %v3181_v38  ;;  %v3159_v13 = vsub.f32 %v10770_v27, %v10781_v57  ;;  %v3262_v35 = vmul.f32 %v10883_v5, %v3182_v55  ;;  %v3263_v7 = vmul.f32 %v10883_v5, %v3183_v40 }
 0x71c   :  { %v3192_v60 = vmul.f32 %v10817_v4, %v3158_v37  ;;  %v3151_v54 = vsub.f32 %v10714_v43, %v10781_v57  ;;  %v3152_v0 = vsub.f32 %v10728_v19, %v10781_v57  ;;  %v3294_v21 = vmax.f32 %v3278_v63, 0.0 }
 0x71d   :  { %v3295_v15 = vmax.f32 %v3279_v20, 0.0  ;;  %v3153_v49 = vsub.f32 %v10739_v59, %v10781_v57  ;;  %v3334_v30 = vpack.c.bf16 %v3253_v45, %v3252_v3  ;;  %v3193_v26 = vmul.f32 %v10817_v4, %v3159_v13 }
 0x71e   :  { %7661 = vmatmul.mubr.bf16.gmra.mrb[56].mxu0 %v3332_v32  ;;  %v3272_v53 = vmul.f32 %v10883_v5, %v3192_v60  ;;  %v3280_v22 = vadd.f32 %v10895_v46, %v3260_v34  ;;  %v3281_v48 = vadd.f32 %v10895_v46, %v3261_v33  ;;  %v3184_v56 = vmul.f32 %v10817_v4, %v3150_v39 }
 0x71f   :  { %7664 = vmatprep.mubr.bf16.mxu0 %v3333_v42  ;;  %v3185_v38 = vmul.f32 %v10817_v4, %v3151_v54  ;;  %v3282_v32 = vadd.f32 %v10895_v46, %v3262_v35  ;;  %v3283_v55 = vadd.f32 %v10895_v46, %v3263_v7  ;;  %v3273_v40 = vmul.f32 %v10883_v5, %v3193_v26 }
 0x720   :  { %v3292_v42 = vadd.f32 %v10895_v46, %v3272_v53  ;;  %v3335_v63 = vpack.c.bf16 %v3295_v15, %v3294_v21  ;;  %v3186_v20 = vmul.f32 %v10817_v4, %v3152_v0  ;;  %v3187_v37 = vmul.f32 %v10817_v4, %v3153_v49 }
 0x721   :  { %v3293_v3 = vadd.f32 %v10895_v46, %v3273_v40  ;;  %v3296_v39 = vmax.f32 %v3280_v22, 0.0  ;;  %v3264_v34 = vmul.f32 %v10883_v5, %v3184_v56  ;;  %v3265_v33 = vmul.f32 %v10883_v5, %v3185_v38 }
 0x722   :  { %v3308_v45 = vmax.f32 %v3292_v42, 0.0  ;;  %v3297_v13 = vmax.f32 %v3281_v48, 0.0  ;;  %v3298_v35 = vmax.f32 %v3282_v32, 0.0  ;;  %v3299_v7 = vmax.f32 %v3283_v55, 0.0 }
 0x723   :  { %v3309_v60 = vmax.f32 %v3293_v3, 0.0  ;;  %v3266_v54 = vmul.f32 %v10883_v5, %v3186_v20  ;;  %v3267_v0 = vmul.f32 %v10883_v5, %v3187_v37  ;;  %v3154_v21 = vsub.f32 %v10733_v50, %v10781_v57 }
 0x724   :  { %v3155_v15 = vsub.f32 %v10742_v12, %v10781_v57  ;;  %v3156_v26 = vsub.f32 %v10756_v62, %v10781_v57  ;;  %v3284_v53 = vadd.f32 %v10895_v46, %v3264_v34  ;;  %v3285_v22 = vadd.f32 %v10895_v46, %v3265_v33 }
 0x725   :  { %v3342_v49 = vpack.c.bf16 %v3309_v60, %v3308_v45  ;;  %v3336_v48 = vpack.c.bf16 %v3297_v13, %v3296_v39  ;;  %v3337_v56 = vpack.c.bf16 %v3299_v7, %v3298_v35  ;;  %v3188_v38 = vmul.f32 %v10817_v4, %v3154_v21 }
 0x726   :  { %7665 = vmatmul.mubr.bf16.gmra.mrb[60].mxu0 %v3334_v30  ;;  %v3157_v30 = vsub.f32 %v10767_v58, %v10781_v57  ;;  %v3189_v32 = vmul.f32 %v10817_v4, %v3155_v15  ;;  %v3286_v55 = vadd.f32 %v10895_v46, %v3266_v54  ;;  %v3287_v40 = vadd.f32 %v10895_v46, %v3267_v0 }
 0x727   :  { %7668 = vmatprep.mubr.bf16.mxu0 %v3335_v63  ;;  %v3190_v42 = vmul.f32 %v10817_v4, %v3156_v26  ;;  %v3300_v57 = vmax.f32 %v3284_v53, 0.0  ;;  %v3301_v20 = vmax.f32 %v3285_v22, 0.0  ;;  %v3268_v37 = vmul.f32 %v10883_v5, %v3188_v38  ;;  %v8099_v22 = vld [vmem:[#allocation5 + $0x88] sm:$0xff]  }
 0x728   :  { %v3191_v63 = vmul.f32 %v10817_v4, %v3157_v30  ;;  %v3269_v3 = vmul.f32 %v10883_v5, %v3189_v32  ;;  %v3302_v45 = vmax.f32 %v3286_v55, 0.0  ;;  %v3303_v39 = vmax.f32 %v3287_v40, 0.0  ;;  %v8103_v38 = vld [vmem:[#allocation5 + $0xa8] sm:$0xff]   ;;  %v8104_v32 = vld [vmem:[#allocation5 + $0xb0] sm:$0xff]   ;;  %v8105_v55 = vld [vmem:[#allocation5 + $0xb8] sm:$0xff]  }
 0x729   :  { %v3270_v34 = vmul.f32 %v10883_v5, %v3190_v42  ;;  %v3338_v13 = vpack.c.bf16 %v3301_v20, %v3300_v57  ;;  %v3288_v35 = vadd.f32 %v10895_v46, %v3268_v37 }
 0x72a   :  { %v3271_v33 = vmul.f32 %v10883_v5, %v3191_v63  ;;  %v3289_v7 = vadd.f32 %v10895_v46, %v3269_v3  ;;  %v3339_v4 = vpack.c.bf16 %v3303_v39, %v3302_v45  ;;  %v8098_v5 = vld [vmem:[#allocation5 + $0x80] sm:$0xff]  }
 0x72b   :  { %v3290_v60 = vadd.f32 %v10895_v46, %v3270_v34  ;;  %v3304_v0 = vmax.f32 %v3288_v35, 0.0  ;;  %7684 = vmatprep.subr.bf16.mxu1 %v8098_v5 }
 0x72c   :  { %v3291_v54 = vadd.f32 %v10895_v46, %v3271_v33  ;;  %v3305_v21 = vmax.f32 %v3289_v7, 0.0  ;;  %7685 = vmatpush3.bf16.msra.mxu1 %v8098_v5  ;;  %v8102_v46 = vld [vmem:[#allocation5 + $0xa0] sm:$0xff]  }
 0x72d   :  { %v3306_v15 = vmax.f32 %v3290_v60, 0.0  ;;  %7686 = vmatprep.subr.bf16.mxu1 %v8099_v22 }
 0x72e   :  { %7669 = vmatmul.mubr.bf16.gmra.mrb[64].mxu0 %v3336_v48  ;;  %v3307_v30 = vmax.f32 %v3291_v54, 0.0  ;;  %v3340_v26 = vpack.c.bf16 %v3305_v21, %v3304_v0  ;;  %v8100_v48 = vld [vmem:[#allocation5 + $0x90] sm:$0xff]  }
 0x72f   :  { %7672 = vmatprep.mubr.bf16.mxu0 %v3337_v56  ;;  %v8101_v56 = vld [vmem:[#allocation5 + $0x98] sm:$0xff]  }
 0x730   :  { %v3341_v53 = vpack.c.bf16 %v3307_v30, %v3306_v15  ;;  %7687 = vmatpush3.bf16.msra.mxu1 %v8099_v22 }
 0x731   :  { %7688 = vmatprep.subr.bf16.mxu1 %v8100_v48 }
 0x734   :  { %7689 = vmatpush3.bf16.msra.mxu1 %v8100_v48 }
 0x735   :  { %7690 = vmatprep.subr.bf16.mxu1 %v8101_v56 }
 0x736   :  { %7673 = vmatmul.mubr.bf16.gmra.mrb[68].mxu0 %v3338_v13 }
 0x737   :  { %7676 = vmatprep.mubr.bf16.mxu0 %v3339_v4 }
 0x738   :  { %7691 = vmatpush3.bf16.msra.mxu1 %v8101_v56 }
 0x739   :  { %7692 = vmatprep.subr.bf16.mxu1 %v8102_v46 }
 0x73c   :  { %7693 = vmatpush3.bf16.msra.mxu1 %v8102_v46 }
 0x73d   :  { %7694 = vmatprep.subr.bf16.mxu1 %v8103_v38 }
 0x73e   :  { %7677 = vmatmul.mubr.bf16.gmra.mrb[72].mxu0 %v3340_v26 }
 0x73f   :  { %7680 = vmatprep.mubr.bf16.mxu0 %v3341_v53 }
 0x740   :  { %7695 = vmatpush3.bf16.msra.mxu1 %v8103_v38 }
 0x741   :  { %7696 = vmatprep.subr.bf16.mxu1 %v8104_v32 }
 0x744   :  { %7697 = vmatpush3.bf16.msra.mxu1 %v8104_v32 }
 0x745   :  { %7698 = vmatprep.subr.bf16.mxu1 %v8105_v55 }
 0x746   :  { %7681 = vmatmul.mubr.bf16.gmra.mrb[76].mxu0 %v3342_v49  ;;  %v10976_v49 = vld [vmem:[%s13506_s6 + $0x2] ss:$0 sm:$0xff] }
 0x748   :  { %7699 = vmatpush3.bf16.msra.mxu1 %v8105_v55 }
 0x7e1   :  { %v7654_v40 = vpop.f32.mrb[48].mxu0 }
 0x7e2   :  { %v3433_v42 = vpop.f32.mrb[49].mxu0  ;;  %v10982_v37 = vadd.f32 %v7654_v40, %v10976_v49 }
 0x7e3   :  { %v10979_v63 = vadd.f32 %v10976_v49, %v3433_v42  ;;  %v7655_v57 = vpop.f32.mrb[50].mxu0 }
 0x7e4   :  { %v3436_v20 = vpop.f32.mrb[51].mxu0  ;;  %v10990_v39 = vadd.f32 %v7655_v57, %v10976_v49  ;;  %v3599_v13 = vmul.f32 %v10982_v37, %v10982_v37 }
 0x7e5   :  { %v10985_v3 = vadd.f32 %v10976_v49, %v3436_v20  ;;  %v3597_v45 = vmul.f32 %v10979_v63, %v10979_v63 }
 0x7e6   :  { %v3600_v54 = vmul.f32 %v10990_v39, %v10990_v39 }
 0x7e7   :  { %v3560_v34 = vadd.f32 %v10985_v3, %v10979_v63  ;;  %v3598_v33 = vmul.f32 %v10985_v3, %v10985_v3 }
 0x7e9   :  { %v3561_v35 = vadd.f32 %v3560_v34, %v10982_v37  ;;  %v3629_v7 = vadd.f32 %v3598_v33, %v3597_v45  ;;  %v7658_v4 = vpop.f32.mrb[52].mxu0 }
 0x7ea   :  { %v3449_v60 = vpop.f32.mrb[53].mxu0  ;;  %v11006_v26 = vadd.f32 %v7658_v4, %v10976_v49 }
 0x7eb   :  { %v3630_v0 = vadd.f32 %v3629_v7, %v3599_v13  ;;  %v11002_v21 = vadd.f32 %v10976_v49, %v3449_v60  ;;  %v3562_v15 = vadd.f32 %v3561_v35, %v10990_v39  ;;  %v7659_v30 = vpop.f32.mrb[54].mxu0 }
 0x7ec   :  { %v3452_v53 = vpop.f32.mrb[55].mxu0  ;;  %v11015_v38 = vadd.f32 %v7659_v30, %v10976_v49  ;;  %v3603_v40 = vmul.f32 %v11006_v26, %v11006_v26 }
 0x7ed   :  { %v3563_v5 = vadd.f32 %v3562_v15, %v11002_v21  ;;  %v3601_v22 = vmul.f32 %v11002_v21, %v11002_v21  ;;  %v3631_v48 = vadd.f32 %v3630_v0, %v3600_v54  ;;  %v11012_v56 = vadd.f32 %v10976_v49, %v3452_v53 }
 0x7ee   :  { %v3604_v34 = vmul.f32 %v11015_v38, %v11015_v38 }
 0x7ef   :  { %v3632_v46 = vadd.f32 %v3631_v48, %v3601_v22  ;;  %v3564_v32 = vadd.f32 %v3563_v5, %v11012_v56  ;;  %v3602_v55 = vmul.f32 %v11012_v56, %v11012_v56 }
 0x7f1   :  { %v3565_v42 = vadd.f32 %v3564_v32, %v11006_v26  ;;  %v3633_v57 = vadd.f32 %v3632_v46, %v3602_v55  ;;  %v7662_v20 = vpop.f32.mrb[56].mxu0 }
 0x7f2   :  { %v3465_v45 = vpop.f32.mrb[57].mxu0  ;;  %v11030_v4 = vadd.f32 %v7662_v20, %v10976_v49 }
 0x7f3   :  { %v3634_v33 = vadd.f32 %v3633_v57, %v3603_v40  ;;  %v11026_v13 = vadd.f32 %v10976_v49, %v3465_v45  ;;  %v3566_v35 = vadd.f32 %v3565_v42, %v11015_v38  ;;  %v7663_v7 = vpop.f32.mrb[58].mxu0 }
 0x7f4   :  { %v3468_v60 = vpop.f32.mrb[59].mxu0  ;;  %v11039_v5 = vadd.f32 %v7663_v7, %v10976_v49  ;;  %v3607_v46 = vmul.f32 %v11030_v4, %v11030_v4 }
 0x7f5   :  { %v3567_v54 = vadd.f32 %v3566_v35, %v11026_v13  ;;  %v3605_v0 = vmul.f32 %v11026_v13, %v11026_v13  ;;  %v3635_v15 = vadd.f32 %v3634_v33, %v3604_v34  ;;  %v11036_v30 = vadd.f32 %v10976_v49, %v3468_v60 }
 0x7f6   :  { %v3608_v57 = vmul.f32 %v11039_v5, %v11039_v5 }
 0x7f7   :  { %v3636_v53 = vadd.f32 %v3635_v15, %v3605_v0  ;;  %v3568_v22 = vadd.f32 %v3567_v54, %v11036_v30  ;;  %v3606_v48 = vmul.f32 %v11036_v30, %v11036_v30 }
 0x7f9   :  { %v3569_v32 = vadd.f32 %v3568_v22, %v11030_v4  ;;  %v3637_v55 = vadd.f32 %v3636_v53, %v3606_v48  ;;  %v7666_v40 = vpop.f32.mrb[60].mxu0 }
 0x7fa   :  { %v3481_v42 = vpop.f32.mrb[61].mxu0  ;;  %v11054_v35 = vadd.f32 %v7666_v40, %v10976_v49 }
 0x7fb   :  { %v3638_v20 = vadd.f32 %v3637_v55, %v3607_v46  ;;  %v11050_v45 = vadd.f32 %v10976_v49, %v3481_v42  ;;  %v3570_v34 = vadd.f32 %v3569_v32, %v11039_v5  ;;  %v7667_v33 = vpop.f32.mrb[62].mxu0 }
 0x7fc   :  { %v3484_v7 = vpop.f32.mrb[63].mxu0  ;;  %v11063_v22 = vadd.f32 %v7667_v33, %v10976_v49  ;;  %v3611_v32 = vmul.f32 %v11054_v35, %v11054_v35 }
 0x7fd   :  { %v3571_v60 = vadd.f32 %v3570_v34, %v11050_v45  ;;  %v3609_v54 = vmul.f32 %v11050_v45, %v11050_v45  ;;  %v3639_v0 = vadd.f32 %v3638_v20, %v3608_v57  ;;  %v11060_v15 = vadd.f32 %v10976_v49, %v3484_v7 }
 0x7fe   :  { %v3612_v20 = vmul.f32 %v11063_v22, %v11063_v22 }
 0x7ff   :  { %v3640_v53 = vadd.f32 %v3639_v0, %v3609_v54  ;;  %v3572_v48 = vadd.f32 %v3571_v60, %v11060_v15  ;;  %v3610_v46 = vmul.f32 %v11060_v15, %v11060_v15 }
 0x801   :  { %v3573_v55 = vadd.f32 %v3572_v48, %v11054_v35  ;;  %v3641_v40 = vadd.f32 %v3640_v53, %v3610_v46  ;;  %v7670_v42 = vpop.f32.mrb[64].mxu0 }
 0x802   :  { %v3497_v57 = vpop.f32.mrb[65].mxu0  ;;  %v11078_v54 = vadd.f32 %v7670_v42, %v10976_v49 }
 0x803   :  { %v3642_v34 = vadd.f32 %v3641_v40, %v3611_v32  ;;  %v11074_v33 = vadd.f32 %v10976_v49, %v3497_v57  ;;  %v3574_v7 = vadd.f32 %v3573_v55, %v11063_v22  ;;  %v7671_v60 = vpop.f32.mrb[66].mxu0 }
 0x804   :  { %v3500_v0 = vpop.f32.mrb[67].mxu0  ;;  %v11087_v40 = vadd.f32 %v7671_v60, %v10976_v49  ;;  %v3615_v57 = vmul.f32 %v11078_v54, %v11078_v54 }
 0x805   :  { %v3575_v58 = vadd.f32 %v3574_v7, %v11074_v33  ;;  %v3613_v53 = vmul.f32 %v11074_v33, %v11074_v33  ;;  %v3643_v48 = vadd.f32 %v3642_v34, %v3612_v20  ;;  %v11084_v46 = vadd.f32 %v10976_v49, %v3500_v0 }
 0x806   :  { %v3616_v34 = vmul.f32 %v11087_v40, %v11087_v40 }
 0x807   :  { %v3644_v32 = vadd.f32 %v3643_v48, %v3613_v53  ;;  %v3576_v55 = vadd.f32 %v3575_v58, %v11084_v46  ;;  %v3614_v42 = vmul.f32 %v11084_v46, %v11084_v46 }
 0x809   :  { %v3577_v7 = vadd.f32 %v3576_v55, %v11078_v54  ;;  %v3645_v27 = vadd.f32 %v3644_v32, %v3614_v42  ;;  %v7674_v62 = vpop.f32.mrb[68].mxu0 }
 0x80a   :  { %v3513_v20 = vpop.f32.mrb[69].mxu0  ;;  %v11102_v48 = vadd.f32 %v7674_v62, %v10976_v49 }
 0x80b   :  { %v3646_v0 = vadd.f32 %v3645_v27, %v3615_v57  ;;  %v11098_v60 = vadd.f32 %v10976_v49, %v3513_v20  ;;  %v3578_v58 = vadd.f32 %v3577_v7, %v11087_v40  ;;  %v7675_v53 = vpop.f32.mrb[70].mxu0 }
 0x80c   :  { %v3516_v16 = vpop.f32.mrb[71].mxu0  ;;  %v11111_v57 = vadd.f32 %v7675_v53, %v10976_v49  ;;  %v3619_v20 = vmul.f32 %v11102_v48, %v11102_v48 }
 0x80d   :  { %v3579_v59 = vadd.f32 %v3578_v58, %v11098_v60  ;;  %v3617_v32 = vmul.f32 %v11098_v60, %v11098_v60  ;;  %v3647_v55 = vadd.f32 %v3646_v0, %v3616_v34  ;;  %v11108_v42 = vadd.f32 %v10976_v49, %v3516_v16 }
 0x80e   :  { %v3620_v16 = vmul.f32 %v11111_v57, %v11111_v57 }
 0x80f   :  { %v3648_v27 = vadd.f32 %v3647_v55, %v3617_v32  ;;  %v3580_v7 = vadd.f32 %v3579_v59, %v11108_v42  ;;  %v3618_v62 = vmul.f32 %v11108_v42, %v11108_v42 }
 0x811   :  { %v3581_v58 = vadd.f32 %v3580_v7, %v11102_v48  ;;  %v3649_v12 = vadd.f32 %v3648_v27, %v3618_v62  ;;  %v7678_v19 = vpop.f32.mrb[72].mxu0 }
 0x812   :  { %v3529_v34 = vpop.f32.mrb[73].mxu0  ;;  %v11126_v55 = vadd.f32 %v7678_v19, %v10976_v49 }
 0x813   :  { %v3650_v0 = vadd.f32 %v3649_v12, %v3619_v20  ;;  %v11122_v53 = vadd.f32 %v10976_v49, %v3529_v34  ;;  %v3582_v59 = vadd.f32 %v3581_v58, %v11111_v57  ;;  %v7679_v32 = vpop.f32.mrb[74].mxu0 }
 0x814   :  { %v3532_v50 = vpop.f32.mrb[75].mxu0  ;;  %v11135_v20 = vadd.f32 %v7679_v32, %v10976_v49  ;;  %v3623_v34 = vmul.f32 %v11126_v55, %v11126_v55 }
 0x815   :  { %v3583_v17 = vadd.f32 %v3582_v59, %v11122_v53  ;;  %v3621_v27 = vmul.f32 %v11122_v53, %v11122_v53  ;;  %v3651_v7 = vadd.f32 %v3650_v0, %v3620_v16  ;;  %v11132_v62 = vadd.f32 %v10976_v49, %v3532_v50 }
 0x816   :  { %v3624_v50 = vmul.f32 %v11135_v20, %v11135_v20 }
 0x817   :  { %v3652_v12 = vadd.f32 %v3651_v7, %v3621_v27  ;;  %v3584_v58 = vadd.f32 %v3583_v17, %v11132_v62  ;;  %v3622_v19 = vmul.f32 %v11132_v62, %v11132_v62 }
 0x819   :  { %v3585_v59 = vadd.f32 %v3584_v58, %v11126_v55  ;;  %v3653_v43 = vadd.f32 %v3652_v12, %v3622_v19  ;;  %v7682_v1 = vpop.f32.mrb[76].mxu0 }
 0x81a   :  { %v3545_v16 = vpop.f32.mrb[77].mxu0  ;;  %v11150_v7 = vadd.f32 %v7682_v1, %v10976_v49 }
 0x81b   :  { %v3654_v0 = vadd.f32 %v3653_v43, %v3623_v34  ;;  %v11146_v32 = vadd.f32 %v10976_v49, %v3545_v16  ;;  %v3586_v17 = vadd.f32 %v3585_v59, %v11135_v20  ;;  %v7683_v27 = vpop.f32.mrb[78].mxu0 }
 0x81c   :  { %v3548_v41 = vpop.f32.mrb[79].mxu0  ;;  %v11159_v34 = vadd.f32 %v7683_v27, %v10976_v49  ;;  %v3627_v16 = vmul.f32 %v11150_v7, %v11150_v7 }
 0x81d   :  { %v3587_v8 = vadd.f32 %v3586_v17, %v11146_v32  ;;  %v3625_v12 = vmul.f32 %v11146_v32, %v11146_v32  ;;  %v3655_v58 = vadd.f32 %v3654_v0, %v3624_v50  ;;  %v11156_v19 = vadd.f32 %v10976_v49, %v3548_v41 }
 0x81e   :  { %v3628_v50 = vmul.f32 %v11159_v34, %v11159_v34 }
 0x81f   :  { %v3656_v43 = vadd.f32 %v3655_v58, %v3625_v12  ;;  %v3588_v59 = vadd.f32 %v3587_v8, %v11156_v19  ;;  %v3626_v1 = vmul.f32 %v11156_v19, %v11156_v19 }
 0x821   :  { %v3589_v17 = vadd.f32 %v3588_v59, %v11150_v7  ;;  %v3657_v36 = vadd.f32 %v3656_v43, %v3626_v1 }
 0x823   :  { %v3590_v41 = vadd.f32 %v3589_v17, %v11159_v34  ;;  %v3658_v0 = vadd.f32 %v3657_v36, %v3627_v16 }
 0x825   :  { %v3591_v12 = vrot.slane %v3590_v41, 4  ;;  %v3659_v49 = vadd.f32 %v3658_v0, %v3628_v50 }
 0x827   :  { %v3592_v27 = vadd.f32 %v3591_v12, %v3590_v41  ;;  %v3660_v58 = vrot.slane %v3659_v49, 4 }
 0x829   :  { %v3593_v8 = vrot.slane %v3592_v27, 2  ;;  %v3661_v44 = vadd.f32 %v3660_v58, %v3659_v49 }
 0x82b   :  { %v3594_v31 = vadd.f32 %v3593_v8, %v3592_v27  ;;  %v3662_v6 = vrot.slane %v3661_v44, 2 }
 0x82d   :  { %v3595_v11 = vrot.slane %v3594_v31, 1  ;;  %v3663_v23 = vadd.f32 %v3662_v6, %v3661_v44 }
 0x82f   :  { %v3596_v52 = vadd.f32 %v3595_v11, %v3594_v31  ;;  %v3664_v47 = vrot.slane %v3663_v23, 1 }
 0x831   :  { %v3665_v59 = vadd.f32 %v3664_v47, %v3663_v23  ;;  %v11170_v43 = vmul.f32 0.00390625, %v3596_v52 }
 0x833   :  { %v3667_v1 = vmul.f32 0.00390625, %v3665_v59  ;;  %v3668_v17 = vmul.f32 %v11170_v43, %v11170_v43  ;;  %v3699_v36 = vsub.f32 %v11156_v19, %v11170_v43  ;;  %v3679_v50 = vsub.f32 %v11036_v30, %v11170_v43 }
 0x834   :  { %v3681_v41 = vsub.f32 %v11039_v5, %v11170_v43  ;;  %v3682_v47 = vsub.f32 %v11050_v45, %v11170_v43  ;;  %v3683_v52 = vsub.f32 %v11060_v15, %v11170_v43  ;;  %v3684_v23 = vsub.f32 %v11054_v35, %v11170_v43 }
 0x835   :  { %v3669_v16 = vsub.f32 %v3667_v1, %v3668_v17  ;;  %v3685_v11 = vsub.f32 %v11063_v22, %v11170_v43  ;;  %v3686_v44 = vsub.f32 %v11074_v33, %v11170_v43  ;;  %v3687_v31 = vsub.f32 %v11084_v46, %v11170_v43 }
 0x836   :  { %v3688_v30 = vsub.f32 %v11078_v54, %v11170_v43  ;;  %v3689_v5 = vsub.f32 %v11087_v40, %v11170_v43  ;;  %v3690_v45 = vsub.f32 %v11098_v60, %v11170_v43  ;;  %v3691_v35 = vsub.f32 %v11108_v42, %v11170_v43 }
 0x837   :  { %v3702_v6 = vadd.f32 1e-05, %v3669_v16  ;;  %v3692_v15 = vsub.f32 %v11102_v48, %v11170_v43  ;;  %v3693_v22 = vsub.f32 %v11111_v57, %v11170_v43  ;;  %v3694_v33 = vsub.f32 %v11122_v53, %v11170_v43  ;;  %v7109_v57 = vld [vmem:[%s13501_s1 + $0xa] sm:$0x3] }
 0x838   :  { %v3695_v54 = vsub.f32 %v11132_v62, %v11170_v43  ;;  %v3696_v46 = vsub.f32 %v11126_v55, %v11170_v43  ;;  %v3697_v40 = vsub.f32 %v11135_v20, %v11170_v43  ;;  %v3698_v60 = vsub.f32 %v11146_v32, %v11170_v43  ;;  %v7110_v53 = vld [vmem:[%s13502_s2 + $0xa] sm:$0x3] }
 0x839   :  { %8156 = vrsqrt.f32 %v3702_v6  ;;  %v3700_v48 = vsub.f32 %v11150_v7, %v11170_v43  ;;  %v3701_v42 = vsub.f32 %v11159_v34, %v11170_v43  ;;  %v11225_v55 = vrot.slane %v7109_v57, %v13801_v9 }
 0x83a   :  { %v11228_v62 = vrot.slane %v7110_v53, %v13801_v9  ;;  %v3670_v20 = vsub.f32 %v10979_v63, %v11170_v43  ;;  %v3671_v32 = vsub.f32 %v10985_v3, %v11170_v43  ;;  %v11235_v7 = vrot.slane %v7109_v57, %v13802_v25 }
 0x83b   :  { %v11238_v19 = vrot.slane %v7110_v53, %v13802_v25  ;;  %v3672_v34 = vsub.f32 %v10982_v37, %v11170_v43  ;;  %v3673_v0 = vsub.f32 %v10990_v39, %v11170_v43  ;;  %v3674_v12 = vsub.f32 %v11002_v21, %v11170_v43 }
 0x83c   :  { %v3675_v63 = vsub.f32 %v11012_v56, %v11170_v43  ;;  %v3676_v3 = vsub.f32 %v11006_v26, %v11170_v43  ;;  %v3677_v27 = vsub.f32 %v11015_v38, %v11170_v43  ;;  %v3678_v58 = vsub.f32 %v11026_v13, %v11170_v43 }
 0x83d   :  { %v3680_v37 = vsub.f32 %v11030_v4, %v11170_v43 }
 0x843   :  { %v8157_v49 = vpop.eup %8156 }
 0x844   :  { %v11256_v39 = vmul.f32 %v8157_v49, %v3699_v36  ;;  %v3704_v8 = vmul.f32 %v8157_v49, %v3670_v20  ;;  %v3705_v21 = vmul.f32 %v8157_v49, %v3671_v32  ;;  %v3706_v59 = vmul.f32 %v8157_v49, %v3672_v34 }
 0x845   :  { %v3707_v1 = vmul.f32 %v8157_v49, %v3673_v0  ;;  %v3708_v56 = vmul.f32 %v8157_v49, %v3674_v12  ;;  %v3709_v17 = vmul.f32 %v8157_v49, %v3675_v63  ;;  %v3710_v16 = vmul.f32 %v8157_v49, %v3676_v3 }
 0x846   :  { %v3711_v6 = vmul.f32 %v8157_v49, %v3677_v27  ;;  %v3712_v26 = vmul.f32 %v8157_v49, %v3678_v58  ;;  %v3713_v57 = vmul.f32 %v8157_v49, %v3679_v50  ;;  %v3714_v53 = vmul.f32 %v8157_v49, %v3680_v37 }
 0x847   :  { %v3715_v38 = vmul.f32 %v8157_v49, %v3681_v41  ;;  %v3716_v25 = vmul.f32 %v8157_v49, %v3682_v47  ;;  %v3717_v9 = vmul.f32 %v8157_v49, %v3683_v52  ;;  %v3718_v13 = vmul.f32 %v8157_v49, %v3684_v23 }
 0x848   :  { %v3719_v28 = vmul.f32 %v8157_v49, %v3685_v11  ;;  %v11258_v51 = vmul.f32 %v8157_v49, %v3686_v44  ;;  %v11260_v4 = vmul.f32 %v8157_v49, %v3687_v31  ;;  %v11262_v43 = vmul.f32 %v8157_v49, %v3688_v30 }
 0x849   :  { %v11264_v36 = vmul.f32 %v8157_v49, %v3689_v5  ;;  %v11266_v20 = vmul.f32 %v8157_v49, %v3690_v45  ;;  %v11268_v32 = vmul.f32 %v8157_v49, %v3691_v35  ;;  %v11270_v34 = vmul.f32 %v8157_v49, %v3692_v15 }
 0x84a   :  { %v11272_v50 = vmul.f32 %v8157_v49, %v3693_v22  ;;  %v11274_v41 = vmul.f32 %v8157_v49, %v3694_v33  ;;  %v11276_v47 = vmul.f32 %v8157_v49, %v3695_v54  ;;  %v11278_v52 = vmul.f32 %v8157_v49, %v3696_v46 }
 0x84b   :  { %v11280_v23 = vmul.f32 %v8157_v49, %v3697_v40  ;;  %v11282_v11 = vmul.f32 %v8157_v49, %v3698_v60  ;;  %v11284_v44 = vmul.f32 %v8157_v49, %v3700_v48  ;;  %v11286_v31 = vmul.f32 %v8157_v49, %v3701_v42 }
 0x84c   :  { %v3746_v30 = vmul.f32 %v11225_v55, %v3706_v59  ;;  %v3747_v5 = vmul.f32 %v11225_v55, %v3707_v1  ;;  %v3744_v45 = vmul.f32 %v11225_v55, %v3704_v8  ;;  %v3745_v35 = vmul.f32 %v11225_v55, %v3705_v21 }
 0x84d   :  { %v3748_v15 = vmul.f32 %v11225_v55, %v3708_v56  ;;  %v3749_v22 = vmul.f32 %v11225_v55, %v3709_v17  ;;  %v3750_v33 = vmul.f32 %v11225_v55, %v3710_v16  ;;  %v3751_v54 = vmul.f32 %v11225_v55, %v3711_v6 }
 0x84e   :  { %v3766_v46 = vadd.f32 %v11228_v62, %v3746_v30  ;;  %v3767_v40 = vadd.f32 %v11228_v62, %v3747_v5  ;;  %v3764_v60 = vadd.f32 %v11228_v62, %v3744_v45  ;;  %v3765_v48 = vadd.f32 %v11228_v62, %v3745_v35 }
 0x84f   :  { %v3768_v42 = vadd.f32 %v11228_v62, %v3748_v15  ;;  %v3769_v0 = vadd.f32 %v11228_v62, %v3749_v22  ;;  %v3770_v12 = vadd.f32 %v11228_v62, %v3750_v33  ;;  %v3771_v63 = vadd.f32 %v11228_v62, %v3751_v54 }
 0x850   :  { %v3782_v49 = vmax.f32 %v3766_v46, 0.0  ;;  %v3783_v3 = vmax.f32 %v3767_v40, 0.0  ;;  %v3780_v27 = vmax.f32 %v3764_v60, 0.0  ;;  %v3781_v58 = vmax.f32 %v3765_v48, 0.0 }
 0x851   :  { %v3784_v37 = vmax.f32 %v3768_v42, 0.0  ;;  %v3785_v8 = vmax.f32 %v3769_v0, 0.0  ;;  %v3786_v21 = vmax.f32 %v3770_v12, 0.0  ;;  %v3787_v59 = vmax.f32 %v3771_v63, 0.0 }
 0x852   :  { %v3869_v1 = vpack.c.bf16 %v3781_v58, %v3780_v27  ;;  %v3870_v56 = vpack.c.bf16 %v3783_v3, %v3782_v49  ;;  %v3752_v17 = vmul.f32 %v11225_v55, %v3712_v26  ;;  %v3753_v16 = vmul.f32 %v11225_v55, %v3713_v57 }
 0x853   :  { %v3871_v6 = vpack.c.bf16 %v3785_v8, %v3784_v37  ;;  %v3872_v30 = vpack.c.bf16 %v3787_v59, %v3786_v21  ;;  %v3754_v5 = vmul.f32 %v11225_v55, %v3714_v53  ;;  %v3755_v45 = vmul.f32 %v11225_v55, %v3715_v38 }
 0x854   :  { %7700 = vmatprep.mubr.bf16.mxu1 %v3869_v1  ;;  %v3772_v35 = vadd.f32 %v11228_v62, %v3752_v17  ;;  %v3773_v15 = vadd.f32 %v11228_v62, %v3753_v16  ;;  %v3756_v22 = vmul.f32 %v11225_v55, %v3716_v25  ;;  %v3757_v33 = vmul.f32 %v11225_v55, %v3717_v9 }
 0x855   :  { %7701 = vmatmul.mubr.bf16.vlgmr.msra.gmra.mrb[80].mxu1 %v3870_v56  ;;  %v3774_v26 = vadd.f32 %v11228_v62, %v3754_v5  ;;  %v3775_v57 = vadd.f32 %v11228_v62, %v3755_v45  ;;  %v3758_v54 = vmul.f32 %v11225_v55, %v3718_v13  ;;  %v3759_v53 = vmul.f32 %v11225_v55, %v3719_v28 }
 0x856   :  { %7704 = vmatprep.mubr.bf16.mxu1 %v3871_v6  ;;  %v3788_v38 = vmax.f32 %v3772_v35, 0.0  ;;  %v3789_v46 = vmax.f32 %v3773_v15, 0.0  ;;  %v3776_v40 = vadd.f32 %v11228_v62, %v3756_v22  ;;  %v3777_v60 = vadd.f32 %v11228_v62, %v3757_v33 }
 0x857   :  { %v3790_v48 = vmax.f32 %v3774_v26, 0.0  ;;  %v3791_v25 = vmax.f32 %v3775_v57, 0.0  ;;  %v3778_v9 = vadd.f32 %v11228_v62, %v3758_v54  ;;  %v3779_v42 = vadd.f32 %v11228_v62, %v3759_v53 }
 0x858   :  { %v3873_v0 = vpack.c.bf16 %v3789_v46, %v3788_v38  ;;  %v3792_v12 = vmax.f32 %v3776_v40, 0.0  ;;  %v3793_v63 = vmax.f32 %v3777_v60, 0.0  ;;  %v3800_v13 = vmul.f32 %v11235_v7, %v11258_v51 }
 0x859   :  { %v3874_v28 = vpack.c.bf16 %v3791_v25, %v3790_v48  ;;  %v3794_v55 = vmax.f32 %v3778_v9, 0.0  ;;  %v3795_v49 = vmax.f32 %v3779_v42, 0.0  ;;  %v3801_v3 = vmul.f32 %v11235_v7, %v11260_v4 }
 0x85a   :  { %v3875_v27 = vpack.c.bf16 %v3793_v63, %v3792_v12  ;;  %v3820_v58 = vadd.f32 %v11238_v19, %v3800_v13  ;;  %v3802_v37 = vmul.f32 %v11235_v7, %v11262_v43  ;;  %v3803_v62 = vmul.f32 %v11235_v7, %v11264_v36 }
 0x85b   :  { %v3876_v8 = vpack.c.bf16 %v3795_v49, %v3794_v55  ;;  %v3821_v21 = vadd.f32 %v11238_v19, %v3801_v3  ;;  %v3804_v51 = vmul.f32 %v11235_v7, %v11266_v20  ;;  %v3805_v59 = vmul.f32 %v11235_v7, %v11268_v32 }
 0x85c   :  { %v3836_v1 = vmax.f32 %v3820_v58, 0.0  ;;  %v3822_v4 = vadd.f32 %v11238_v19, %v3802_v37  ;;  %v3823_v56 = vadd.f32 %v11238_v19, %v3803_v62  ;;  %v3806_v43 = vmul.f32 %v11235_v7, %v11270_v34 }
 0x85d   :  { %7705 = vmatmul.mubr.bf16.gmra.mrb[84].mxu1 %v3872_v30  ;;  %v3837_v17 = vmax.f32 %v3821_v21, 0.0  ;;  %v3824_v36 = vadd.f32 %v11238_v19, %v3804_v51  ;;  %v3825_v16 = vadd.f32 %v11238_v19, %v3805_v59  ;;  %v3807_v20 = vmul.f32 %v11235_v7, %v11272_v50  ;;  %v8112_v21 = vld [vmem:[#allocation2 + $0xf0] sm:$0xff]   ;;  %v8113_v51 = vld [vmem:[#allocation2 + $0xf8] sm:$0xff]  }
 0x85e   :  { %7708 = vmatprep.mubr.bf16.mxu1 %v3873_v0  ;;  %v3838_v6 = vmax.f32 %v3822_v4, 0.0  ;;  %v3839_v32 = vmax.f32 %v3823_v56, 0.0  ;;  %v3826_v5 = vadd.f32 %v11238_v19, %v3806_v43  ;;  %v3808_v45 = vmul.f32 %v11235_v7, %v11274_v41 }
 0x85f   :  { %v3877_v35 = vpack.c.bf16 %v3837_v17, %v3836_v1  ;;  %v3840_v15 = vmax.f32 %v3824_v36, 0.0  ;;  %v3841_v34 = vmax.f32 %v3825_v16, 0.0  ;;  %v3827_v30 = vadd.f32 %v11238_v19, %v3807_v20  ;;  %v11371_v1 = vld [vmem:[%s13508_s8 + $0x2] ss:$0 sm:$0xff] }
 0x860   :  { %v3878_v22 = vpack.c.bf16 %v3839_v32, %v3838_v6  ;;  %v3842_v33 = vmax.f32 %v3826_v5, 0.0  ;;  %v3809_v26 = vmul.f32 %v11235_v7, %v11276_v47  ;;  %v3828_v50 = vadd.f32 %v11238_v19, %v3808_v45 }
 0x861   :  { %v3879_v57 = vpack.c.bf16 %v3841_v34, %v3840_v15  ;;  %v3843_v54 = vmax.f32 %v3827_v30, 0.0  ;;  %v3810_v53 = vmul.f32 %v11235_v7, %v11278_v52  ;;  %v3811_v41 = vmul.f32 %v11235_v7, %v11280_v23 }
 0x862   :  { %v3829_v38 = vadd.f32 %v11238_v19, %v3809_v26  ;;  %v3844_v46 = vmax.f32 %v3828_v50, 0.0  ;;  %v3812_v40 = vmul.f32 %v11235_v7, %v11282_v11  ;;  %v3813_v60 = vmul.f32 %v11235_v7, %v11256_v39 }
 0x863   :  { %v3880_v47 = vpack.c.bf16 %v3843_v54, %v3842_v33  ;;  %v3830_v48 = vadd.f32 %v11238_v19, %v3810_v53  ;;  %v3831_v25 = vadd.f32 %v11238_v19, %v3811_v41  ;;  %v3814_v52 = vmul.f32 %v11235_v7, %v11284_v44 }
 0x864   :  { %v3845_v9 = vmax.f32 %v3829_v38, 0.0  ;;  %v3832_v23 = vadd.f32 %v11238_v19, %v3812_v40  ;;  %v3833_v42 = vadd.f32 %v11238_v19, %v3813_v60  ;;  %v3815_v0 = vmul.f32 %v11235_v7, %v11286_v31  ;;  %v8106_v7 = vld [vmem:[#allocation2 + $0xc0] sm:$0xff]   ;;  %v8107_v31 = vld [vmem:[#allocation2 + $0xc8] sm:$0xff]   ;;  %v13803_v38 = vld [vmem:[#allocation13_spill] sm:$0xff] }
 0x865   :  { %7709 = vmatmul.mubr.bf16.gmra.mrb[88].mxu1 %v3874_v28  ;;  %v3846_v11 = vmax.f32 %v3830_v48, 0.0  ;;  %v3847_v12 = vmax.f32 %v3831_v25, 0.0  ;;  %v3834_v39 = vadd.f32 %v11238_v19, %v3814_v52  ;;  %7732 = vmatprep.subr.bf16.mxu0 %v8106_v7  ;;  %v8109_v28 = vld [vmem:[#allocation2 + $0xd8] sm:$0xff]  }
 0x866   :  { %7712 = vmatprep.mubr.bf16.mxu1 %v3875_v27  ;;  %v3881_v63 = vpack.c.bf16 %v3845_v9, %v3844_v46  ;;  %v3848_v13 = vmax.f32 %v3832_v23, 0.0  ;;  %v3849_v55 = vmax.f32 %v3833_v42, 0.0  ;;  %v3835_v49 = vadd.f32 %v11238_v19, %v3815_v0  ;;  %7733 = vmatpush3.bf16.msra.mxu0 %v8106_v7  ;;  %v8108_v19 = vld [vmem:[#allocation2 + $0xd0] sm:$0xff]   ;;  %v8110_v27 = vld [vmem:[#allocation2 + $0xe0] sm:$0xff]   ;;  %v13805_v42 = vld [vmem:[#allocation16_spill] sm:$0xff] }
 0x867   :  { %v3882_v44 = vpack.c.bf16 %v3847_v12, %v3846_v11  ;;  %v3850_v3 = vmax.f32 %v3834_v39, 0.0  ;;  %7734 = vmatprep.subr.bf16.mxu0 %v8107_v31 }
 0x868   :  { %v3883_v58 = vpack.c.bf16 %v3849_v55, %v3848_v13  ;;  %v3851_v37 = vmax.f32 %v3835_v49, 0.0  ;;  %v13806_v13 = vld [vmem:[#allocation14_spill] sm:$0xff] }
 0x86a   :  { %v3884_v62 = vpack.c.bf16 %v3851_v37, %v3850_v3  ;;  %7735 = vmatpush3.bf16.msra.mxu0 %v8107_v31  ;;  %v13807_v3 = vld [vmem:[#allocation17_spill] sm:$0xff] }
 0x86b   :  { %7736 = vmatprep.subr.bf16.mxu0 %v8108_v19 }
 0x86d   :  { %7713 = vmatmul.mubr.bf16.gmra.mrb[92].mxu1 %v3876_v8  ;;  %v8111_v8 = vld [vmem:[#allocation2 + $0xe8] sm:$0xff]  }
 0x86e   :  { %7716 = vmatprep.mubr.bf16.mxu1 %v3877_v35  ;;  %7737 = vmatpush3.bf16.msra.mxu0 %v8108_v19  ;;  %v13809_v19 = vld [vmem:[#allocation15_spill] sm:$0xff] }
 0x86f   :  { %7738 = vmatprep.subr.bf16.mxu0 %v8109_v28 }
 0x872   :  { %7739 = vmatpush3.bf16.msra.mxu0 %v8109_v28 }
 0x873   :  { %7740 = vmatprep.subr.bf16.mxu0 %v8110_v27 }
 0x875   :  { %7717 = vmatmul.mubr.bf16.gmra.mrb[96].mxu1 %v3878_v22 }
 0x876   :  { %7720 = vmatprep.mubr.bf16.mxu1 %v3879_v57  ;;  %7741 = vmatpush3.bf16.msra.mxu0 %v8110_v27 }
 0x877   :  { %7742 = vmatprep.subr.bf16.mxu0 %v8111_v8 }
 0x87a   :  { %7743 = vmatpush3.bf16.msra.mxu0 %v8111_v8 }
 0x87b   :  { %7744 = vmatprep.subr.bf16.mxu0 %v8112_v21 }
 0x87d   :  { %7721 = vmatmul.mubr.bf16.gmra.mrb[100].mxu1 %v3880_v47 }
 0x87e   :  { %7724 = vmatprep.mubr.bf16.mxu1 %v3881_v63  ;;  %7745 = vmatpush3.bf16.msra.mxu0 %v8112_v21 }
 0x87f   :  { %7746 = vmatprep.subr.bf16.mxu0 %v8113_v51 }
 0x882   :  { %7747 = vmatpush3.bf16.msra.mxu0 %v8113_v51 }
 0x885   :  { %7725 = vmatmul.mubr.bf16.gmra.mrb[104].mxu1 %v3882_v44 }
 0x886   :  { %7728 = vmatprep.mubr.bf16.mxu1 %v3883_v58 }
 0x88d   :  { %7729 = vmatmul.mubr.bf16.gmra.mrb[108].mxu1 %v3884_v62 }
 0x928   :  { %v7702_v59 = vpop.f32.mrb[80].mxu1 }
 0x929   :  { %v3967_v4 = vpop.f32.mrb[81].mxu1  ;;  %v4096_v56 = vadd.f32 %v7702_v59, %v10565_v29 }
 0x92a   :  { %v4094_v43 = vadd.f32 %v3967_v4, %v10561_v61  ;;  %v7703_v17 = vpop.f32.mrb[82].mxu1 }
 0x92b   :  { %v4097_v36 = vadd.f32 %v7703_v17, %v10571_v18  ;;  %v3970_v16 = vpop.f32.mrb[83].mxu1  ;;  %v11381_v32 = vadd.f32 %v11371_v1, %v4096_v56 }
 0x92c   :  { %v11377_v20 = vadd.f32 %v11371_v1, %v4094_v43  ;;  %v4095_v6 = vadd.f32 %v3970_v16, %v10568_v10  ;;  %v13813_v16 = vld [vmem:[#allocation20_spill] sm:$0xff] }
 0x92d   :  { %v11387_v45 = vadd.f32 %v11371_v1, %v4097_v36  ;;  %v4205_v34 = vmul.f32 %v11381_v32, %v11381_v32 }
 0x92e   :  { %v11384_v5 = vadd.f32 %v11371_v1, %v4095_v6  ;;  %v4203_v61 = vmul.f32 %v11377_v20, %v11377_v20 }
 0x92f   :  { %v4206_v50 = vmul.f32 %v11387_v45, %v11387_v45 }
 0x930   :  { %v4166_v29 = vadd.f32 %v11384_v5, %v11377_v20  ;;  %v4204_v18 = vmul.f32 %v11384_v5, %v11384_v5  ;;  %v7706_v35 = vpop.f32.mrb[84].mxu1 }
 0x931   :  { %v4100_v10 = vadd.f32 %v7706_v35, %v10593_v2  ;;  %v3983_v15 = vpop.f32.mrb[85].mxu1 }
 0x932   :  { %v4167_v30 = vadd.f32 %v4166_v29, %v11381_v32  ;;  %v4235_v22 = vadd.f32 %v4204_v18, %v4203_v61  ;;  %v4098_v33 = vadd.f32 %v3983_v15, %v10588_v14  ;;  %v7707_v26 = vpop.f32.mrb[86].mxu1 }
 0x933   :  { %v4101_v57 = vadd.f32 %v7707_v26, %v10602_v24  ;;  %v3986_v54 = vpop.f32.mrb[87].mxu1  ;;  %v11409_v40 = vadd.f32 %v11371_v1, %v4100_v10  ;;  %v13814_v10 = vld [vmem:[#allocation18_spill] sm:$0xff] }
 0x934   :  { %v4236_v53 = vadd.f32 %v4235_v22, %v4205_v34  ;;  %v11404_v41 = vadd.f32 %v11371_v1, %v4098_v33  ;;  %v4168_v2 = vadd.f32 %v4167_v30, %v11387_v45  ;;  %v4099_v46 = vadd.f32 %v3986_v54, %v13803_v38  ;;  %v13815_v22 = vld [vmem:[#allocation21_spill] sm:$0xff] }
 0x935   :  { %v11418_v48 = vadd.f32 %v11371_v1, %v4101_v57  ;;  %v4209_v12 = vmul.f32 %v11409_v40, %v11409_v40 }
 0x936   :  { %v4169_v14 = vadd.f32 %v4168_v2, %v11404_v41  ;;  %v4207_v60 = vmul.f32 %v11404_v41, %v11404_v41  ;;  %v4237_v47 = vadd.f32 %v4236_v53, %v4206_v50  ;;  %v11415_v24 = vadd.f32 %v11371_v1, %v4099_v46  ;;  %v13817_v53 = vld [vmem:[#allocation19_spill] sm:$0xff] }
 0x937   :  { %v4210_v44 = vmul.f32 %v11418_v48, %v11418_v48 }
 0x938   :  { %13804 = vst [vmem:[#allocation13_spill] sm:$0xff] %v11415_v24  ;;  %v4238_v25 = vadd.f32 %v4237_v47, %v4207_v60  ;;  %v4170_v52 = vadd.f32 %v4169_v14, %v11415_v24  ;;  %v4208_v9 = vmul.f32 %v11415_v24, %v11415_v24  ;;  %v7710_v23 = vpop.f32.mrb[88].mxu1 }
 0x939   :  { %v4104_v0 = vadd.f32 %v7710_v23, %v13805_v42  ;;  %v3999_v11 = vpop.f32.mrb[89].mxu1 }
 0x93a   :  { %v4171_v39 = vadd.f32 %v4170_v52, %v11409_v40  ;;  %v4239_v63 = vadd.f32 %v4238_v25, %v4208_v9  ;;  %v4102_v55 = vadd.f32 %v3999_v11, %v13806_v13  ;;  %v7711_v49 = vpop.f32.mrb[90].mxu1 }
 0x93b   :  { %v4105_v58 = vadd.f32 %v7711_v49, %v13807_v3  ;;  %v4002_v37 = vpop.f32.mrb[91].mxu1  ;;  %v11437_v27 = vadd.f32 %v11371_v1, %v4104_v0  ;;  %v13821_v0 = vld [vmem:[#allocation24_spill] sm:$0xff] }
 0x93c   :  { %v4240_v62 = vadd.f32 %v4239_v63, %v4209_v12  ;;  %v11432_v7 = vadd.f32 %v11371_v1, %v4102_v55  ;;  %v4172_v31 = vadd.f32 %v4171_v39, %v11418_v48  ;;  %v4103_v28 = vadd.f32 %v4002_v37, %v13809_v19  ;;  %v13822_v55 = vld [vmem:[#allocation22_spill] sm:$0xff] }
 0x93d   :  { %13810 = vst [vmem:[#allocation14_spill] sm:$0xff] %v11437_v27  ;;  %v11446_v4 = vadd.f32 %v11371_v1, %v4105_v58  ;;  %v4213_v29 = vmul.f32 %v11437_v27, %v11437_v27  ;;  %v13823_v58 = vld [vmem:[#allocation25_spill] sm:$0xff] }
 0x93e   :  { %13808 = vst [vmem:[#allocation16_spill] sm:$0xff] %v11432_v7  ;;  %v4173_v8 = vadd.f32 %v4172_v31, %v11432_v7  ;;  %v4211_v21 = vmul.f32 %v11432_v7, %v11432_v7  ;;  %v4241_v51 = vadd.f32 %v4240_v62, %v4210_v44  ;;  %v11443_v59 = vadd.f32 %v11371_v1, %v4103_v28 }
 0x93f   :  { %13812 = vst [vmem:[#allocation15_spill] sm:$0xff] %v11446_v4  ;;  %v4214_v30 = vmul.f32 %v11446_v4, %v11446_v4 }
 0x940   :  { %13811 = vst [vmem:[#allocation17_spill] sm:$0xff] %v11443_v59  ;;  %v4242_v56 = vadd.f32 %v4241_v51, %v4211_v21  ;;  %v4174_v43 = vadd.f32 %v4173_v8, %v11443_v59  ;;  %v4212_v17 = vmul.f32 %v11443_v59, %v11443_v59  ;;  %v7714_v36 = vpop.f32.mrb[92].mxu1  ;;  %v13825_v8 = vld [vmem:[#allocation23_spill] sm:$0xff] }
 0x941   :  { %v4108_v6 = vadd.f32 %v7714_v36, %v13813_v16  ;;  %v4015_v61 = vpop.f32.mrb[93].mxu1 }
 0x942   :  { %v4175_v18 = vadd.f32 %v4174_v43, %v11437_v27  ;;  %v4243_v35 = vadd.f32 %v4242_v56, %v4212_v17  ;;  %v4106_v15 = vadd.f32 %v4015_v61, %v13814_v10  ;;  %v7715_v34 = vpop.f32.mrb[94].mxu1 }
 0x943   :  { %v4109_v33 = vadd.f32 %v7715_v34, %v13815_v22  ;;  %v4018_v26 = vpop.f32.mrb[95].mxu1  ;;  %v11465_v38 = vadd.f32 %v11371_v1, %v4108_v6 }
 0x944   :  { %v4244_v50 = vadd.f32 %v4243_v35, %v4213_v29  ;;  %v11460_v57 = vadd.f32 %v11371_v1, %v4106_v15  ;;  %v4176_v54 = vadd.f32 %v4175_v18, %v11446_v4  ;;  %v4107_v2 = vadd.f32 %v4018_v26, %v13817_v53  ;;  %v13829_v35 = vld [vmem:[#allocation28_spill] sm:$0xff]  ;;  %v13831_v53 = vld [vmem:[#allocation29_spill] sm:$0xff] }
 0x945   :  { %13818 = vst [vmem:[#allocation18_spill] sm:$0xff] %v11465_v38  ;;  %v11474_v25 = vadd.f32 %v11371_v1, %v4109_v33  ;;  %v4217_v39 = vmul.f32 %v11465_v38, %v11465_v38  ;;  %v13830_v33 = vld [vmem:[#allocation26_spill] sm:$0xff] }
 0x946   :  { %13816 = vst [vmem:[#allocation20_spill] sm:$0xff] %v11460_v57  ;;  %v4177_v46 = vadd.f32 %v4176_v54, %v11460_v57  ;;  %v4215_v14 = vmul.f32 %v11460_v57, %v11460_v57  ;;  %v4245_v60 = vadd.f32 %v4244_v50, %v4214_v30  ;;  %v11471_v47 = vadd.f32 %v11371_v1, %v4107_v2 }
 0x947   :  { %13820 = vst [vmem:[#allocation19_spill] sm:$0xff] %v11474_v25  ;;  %v4218_v3 = vmul.f32 %v11474_v25, %v11474_v25 }
 0x948   :  { %13819 = vst [vmem:[#allocation21_spill] sm:$0xff] %v11471_v47  ;;  %v4246_v52 = vadd.f32 %v4245_v60, %v4215_v14  ;;  %v4178_v9 = vadd.f32 %v4177_v46, %v11471_v47  ;;  %v4216_v23 = vmul.f32 %v11471_v47, %v11471_v47  ;;  %v7718_v42 = vpop.f32.mrb[96].mxu1 }
 0x949   :  { %v4112_v11 = vadd.f32 %v7718_v42, %v13821_v0  ;;  %v4031_v12 = vpop.f32.mrb[97].mxu1 }
 0x94a   :  { %v4179_v63 = vadd.f32 %v4178_v9, %v11465_v38  ;;  %v4247_v13 = vadd.f32 %v4246_v52, %v4216_v23  ;;  %v4110_v49 = vadd.f32 %v4031_v12, %v13822_v55  ;;  %v7719_v44 = vpop.f32.mrb[98].mxu1  ;;  %v13833_v9 = vld [vmem:[#allocation27_spill] sm:$0xff] }
 0x94b   :  { %v4113_v37 = vadd.f32 %v7719_v44, %v13823_v58  ;;  %v4034_v62 = vpop.f32.mrb[99].mxu1  ;;  %v11493_v51 = vadd.f32 %v11371_v1, %v4112_v11 }
 0x94c   :  { %v4248_v31 = vadd.f32 %v4247_v13, %v4217_v39  ;;  %v11488_v19 = vadd.f32 %v11371_v1, %v4110_v49  ;;  %v4180_v28 = vadd.f32 %v4179_v63, %v11474_v25  ;;  %v4111_v21 = vadd.f32 %v4034_v62, %v13825_v8  ;;  %v13838_v8 = vld [vmem:[#allocation30_spill] sm:$0xff] }
 0x94d   :  { %13826 = vst [vmem:[#allocation22_spill] sm:$0xff] %v11493_v51  ;;  %v11502_v16 = vadd.f32 %v11371_v1, %v4113_v37  ;;  %v4221_v34 = vmul.f32 %v11493_v51, %v11493_v51 }
 0x94e   :  { %13824 = vst [vmem:[#allocation24_spill] sm:$0xff] %v11488_v19  ;;  %v4181_v56 = vadd.f32 %v4180_v28, %v11488_v19  ;;  %v4219_v43 = vmul.f32 %v11488_v19, %v11488_v19  ;;  %v4249_v17 = vadd.f32 %v4248_v31, %v4218_v3  ;;  %v11499_v36 = vadd.f32 %v11371_v1, %v4111_v21  ;;  %v13837_v3 = vld [vmem:[#allocation32_spill] sm:$0xff] }
 0x94f   :  { %13828 = vst [vmem:[#allocation23_spill] sm:$0xff] %v11502_v16  ;;  %v4222_v54 = vmul.f32 %v11502_v16, %v11502_v16 }
 0x950   :  { %13827 = vst [vmem:[#allocation25_spill] sm:$0xff] %v11499_v36  ;;  %v4250_v6 = vadd.f32 %v4249_v17, %v4219_v43  ;;  %v4182_v61 = vadd.f32 %v4181_v56, %v11499_v36  ;;  %v4220_v29 = vmul.f32 %v11499_v36, %v11499_v36  ;;  %v7722_v18 = vpop.f32.mrb[100].mxu1  ;;  %v13839_v17 = vld [vmem:[#allocation33_spill] sm:$0xff] }
 0x951   :  { %v4116_v10 = vadd.f32 %v7722_v18, %v13829_v35  ;;  %v4047_v15 = vpop.f32.mrb[101].mxu1 }
 0x952   :  { %v4183_v30 = vadd.f32 %v4182_v61, %v11493_v51  ;;  %v4251_v22 = vadd.f32 %v4250_v6, %v4220_v29  ;;  %v4114_v26 = vadd.f32 %v4047_v15, %v13830_v33  ;;  %v7723_v50 = vpop.f32.mrb[102].mxu1 }
 0x953   :  { %v4117_v2 = vadd.f32 %v7723_v50, %v13831_v53  ;;  %v4050_v46 = vpop.f32.mrb[103].mxu1  ;;  %v11521_v42 = vadd.f32 %v11371_v1, %v4116_v10  ;;  %v13841_v10 = vld [vmem:[#allocation31_spill] sm:$0xff] }
 0x954   :  { %v4252_v14 = vadd.f32 %v4251_v22, %v4221_v34  ;;  %v11516_v60 = vadd.f32 %v11371_v1, %v4114_v26  ;;  %v4184_v52 = vadd.f32 %v4183_v30, %v11502_v16  ;;  %v4115_v23 = vadd.f32 %v4050_v46, %v13833_v9 }
 0x955   :  { %13834 = vst [vmem:[#allocation26_spill] sm:$0xff] %v11521_v42  ;;  %v11530_v63 = vadd.f32 %v11371_v1, %v4117_v2  ;;  %v4225_v62 = vmul.f32 %v11521_v42, %v11521_v42 }
 0x956   :  { %13832 = vst [vmem:[#allocation28_spill] sm:$0xff] %v11516_v60  ;;  %v4185_v0 = vadd.f32 %v4184_v52, %v11516_v60  ;;  %v4223_v11 = vmul.f32 %v11516_v60, %v11516_v60  ;;  %v4253_v12 = vadd.f32 %v4252_v14, %v4222_v54  ;;  %v11527_v39 = vadd.f32 %v11371_v1, %v4115_v23  ;;  %v13845_v14 = vld [vmem:[#allocation36_spill] sm:$0xff] }
 0x957   :  { %13836 = vst [vmem:[#allocation27_spill] sm:$0xff] %v11530_v63  ;;  %v4226_v43 = vmul.f32 %v11530_v63, %v11530_v63 }
 0x958   :  { %13835 = vst [vmem:[#allocation29_spill] sm:$0xff] %v11527_v39  ;;  %v4254_v13 = vadd.f32 %v4253_v12, %v4223_v11  ;;  %v4186_v55 = vadd.f32 %v4185_v0, %v11527_v39  ;;  %v4224_v49 = vmul.f32 %v11527_v39, %v11527_v39  ;;  %v7726_v44 = vpop.f32.mrb[104].mxu1  ;;  %v13846_v12 = vld [vmem:[#allocation34_spill] sm:$0xff] }
 0x959   :  { %v4120_v58 = vadd.f32 %v7726_v44, %v13837_v3  ;;  %v4063_v37 = vpop.f32.mrb[105].mxu1  ;;  %v13847_v44 = vld [vmem:[#allocation37_spill] sm:$0xff] }
 0x95a   :  { %v4187_v31 = vadd.f32 %v4186_v55, %v11521_v42  ;;  %v4255_v28 = vadd.f32 %v4254_v13, %v4224_v49  ;;  %v4118_v21 = vadd.f32 %v4063_v37, %v13838_v8  ;;  %v7727_v56 = vpop.f32.mrb[106].mxu1 }
 0x95b   :  { %v4121_v6 = vadd.f32 %v7727_v56, %v13839_v17  ;;  %v4066_v61 = vpop.f32.mrb[107].mxu1  ;;  %v11549_v34 = vadd.f32 %v11371_v1, %v4120_v58 }
 0x95c   :  { %v4256_v29 = vadd.f32 %v4255_v28, %v4225_v62  ;;  %v11544_v18 = vadd.f32 %v11371_v1, %v4118_v21  ;;  %v4188_v35 = vadd.f32 %v4187_v31, %v11530_v63  ;;  %v4119_v15 = vadd.f32 %v4066_v61, %v13841_v10  ;;  %v13849_v28 = vld [vmem:[#allocation35_spill] sm:$0xff] }
 0x95d   :  { %13842 = vst [vmem:[#allocation30_spill] sm:$0xff] %v11549_v34  ;;  %v11558_v50 = vadd.f32 %v11371_v1, %v4121_v6  ;;  %v4229_v23 = vmul.f32 %v11549_v34, %v11549_v34 }
 0x95e   :  { %13840 = vst [vmem:[#allocation32_spill] sm:$0xff] %v11544_v18  ;;  %v4189_v30 = vadd.f32 %v4188_v35, %v11544_v18  ;;  %v4227_v22 = vmul.f32 %v11544_v18, %v11544_v18  ;;  %v4257_v33 = vadd.f32 %v4256_v29, %v4226_v43  ;;  %v11555_v26 = vadd.f32 %v11371_v1, %v4119_v15 }
 0x95f   :  { %13844 = vst [vmem:[#allocation31_spill] sm:$0xff] %v11558_v50  ;;  %v4230_v49 = vmul.f32 %v11558_v50, %v11558_v50 }
 0x960   :  { %13843 = vst [vmem:[#allocation33_spill] sm:$0xff] %v11555_v26  ;;  %v4258_v54 = vadd.f32 %v4257_v33, %v4227_v22  ;;  %v4190_v53 = vadd.f32 %v4189_v30, %v11555_v26  ;;  %v4228_v2 = vmul.f32 %v11555_v26, %v11555_v26  ;;  %v7730_v46 = vpop.f32.mrb[108].mxu1 }
 0x961   :  { %v4124_v52 = vadd.f32 %v7730_v46, %v13845_v14  ;;  %v4079_v9 = vpop.f32.mrb[109].mxu1 }
 0x962   :  { %v4191_v0 = vadd.f32 %v4190_v53, %v11549_v34  ;;  %v4259_v11 = vadd.f32 %v4258_v54, %v4228_v2  ;;  %v4122_v13 = vadd.f32 %v4079_v9, %v13846_v12  ;;  %v7731_v55 = vpop.f32.mrb[110].mxu1 }
 0x963   :  { %v4125_v3 = vadd.f32 %v7731_v55, %v13847_v44  ;;  %v4082_v58 = vpop.f32.mrb[111].mxu1  ;;  %v11577_v21 = vadd.f32 %v11371_v1, %v4124_v52 }
 0x964   :  { %v4260_v37 = vadd.f32 %v4259_v11, %v4229_v23  ;;  %v11572_v62 = vadd.f32 %v11371_v1, %v4122_v13  ;;  %v4192_v31 = vadd.f32 %v4191_v0, %v11558_v50  ;;  %v4123_v8 = vadd.f32 %v4082_v58, %v13849_v28  ;;  %v11604_v28 = vld [vmem:[%s13501_s1 + $0xc] sm:$0x3] }
 0x965   :  { %13850 = vst [vmem:[#allocation34_spill] sm:$0xff] %v11577_v21  ;;  %v11586_v29 = vadd.f32 %v11371_v1, %v4125_v3  ;;  %v4233_v15 = vmul.f32 %v11577_v21, %v11577_v21 }
 0x966   :  { %13848 = vst [vmem:[#allocation36_spill] sm:$0xff] %v11572_v62  ;;  %v4193_v56 = vadd.f32 %v4192_v31, %v11572_v62  ;;  %v4231_v43 = vmul.f32 %v11572_v62, %v11572_v62  ;;  %v4261_v17 = vadd.f32 %v4260_v37, %v4230_v49  ;;  %v11583_v6 = vadd.f32 %v11371_v1, %v4123_v8  ;;  %v11609_v8 = vld [vmem:[%s13502_s2 + $0xc] sm:$0x3] }
 0x967   :  { %13852 = vst [vmem:[#allocation35_spill] sm:$0xff] %v11586_v29  ;;  %v4234_v33 = vmul.f32 %v11586_v29, %v11586_v29 }
 0x968   :  { %13851 = vst [vmem:[#allocation37_spill] sm:$0xff] %v11583_v6  ;;  %v4262_v61 = vadd.f32 %v4261_v17, %v4231_v43  ;;  %v4194_v35 = vadd.f32 %v4193_v56, %v11583_v6  ;;  %v4232_v10 = vmul.f32 %v11583_v6, %v11583_v6  ;;  %v13853_v56 = vld [vmem:[#allocation12_spill] sm:$0xff] }
 0x969   :  { %v11613_v43 = vrot.slane %v11604_v28, %v13853_v56 }
 0x96a   :  { %v4195_v30 = vadd.f32 %v4194_v35, %v11577_v21  ;;  %v4263_v22 = vadd.f32 %v4262_v61, %v4232_v10  ;;  %v11623_v10 = vrot.slane %v11609_v8, %v13853_v56 }
 0x96c   :  { %v4196_v54 = vadd.f32 %v4195_v30, %v11586_v29  ;;  %v4264_v53 = vadd.f32 %v4263_v22, %v4233_v15 }
 0x96e   :  { %v4197_v2 = vrot.slane %v4196_v54, 4  ;;  %v4265_v1 = vadd.f32 %v4264_v53, %v4234_v33 }
 0x970   :  { %v4198_v46 = vadd.f32 %v4197_v2, %v4196_v54  ;;  %v4266_v14 = vrot.slane %v4265_v1, 4 }
 0x972   :  { %v4199_v52 = vrot.slane %v4198_v46, 2  ;;  %v4267_v9 = vadd.f32 %v4266_v14, %v4265_v1 }
 0x974   :  { %v4200_v23 = vadd.f32 %v4199_v52, %v4198_v46  ;;  %v4268_v0 = vrot.slane %v4267_v9, 2 }
 0x976   :  { %v4201_v11 = vrot.slane %v4200_v23, 1  ;;  %v4269_v12 = vadd.f32 %v4268_v0, %v4267_v9 }
 0x978   :  { %v4202_v13 = vadd.f32 %v4201_v11, %v4200_v23  ;;  %v4270_v55 = vrot.slane %v4269_v12, 1 }
 0x97a   :  { %v4271_v49 = vadd.f32 %v4270_v55, %v4269_v12  ;;  %v11597_v44 = vmul.f32 0.00390625, %v4202_v13 }
 0x97c   :  { %v4273_v3 = vmul.f32 0.00390625, %v4271_v49  ;;  %v4274_v58 = vmul.f32 %v11597_v44, %v11597_v44  ;;  %v4276_v17 = vsub.f32 %v11377_v20, %v11597_v44  ;;  %v4277_v61 = vsub.f32 %v11384_v5, %v11597_v44 }
 0x97d   :  { %v4278_v35 = vsub.f32 %v11381_v32, %v11597_v44  ;;  %v4279_v15 = vsub.f32 %v11387_v45, %v11597_v44  ;;  %v4280_v30 = vsub.f32 %v11404_v41, %v11597_v44  ;;  %v4281_v22 = vsub.f32 %v11415_v24, %v11597_v44 }
 0x97e   :  { %v4275_v37 = vsub.f32 %v4273_v3, %v4274_v58  ;;  %v4282_v33 = vsub.f32 %v11409_v40, %v11597_v44  ;;  %v4283_v53 = vsub.f32 %v11418_v48, %v11597_v44  ;;  %v4284_v2 = vsub.f32 %v11432_v7, %v11597_v44 }
 0x97f   :  { %v4285_v1 = vsub.f32 %v11443_v59, %v11597_v44  ;;  %v4286_v46 = vsub.f32 %v11437_v27, %v11597_v44 }
 0x980   :  { %v4308_v31 = vadd.f32 1e-05, %v4275_v37  ;;  %v4287_v37 = vsub.f32 %v11446_v4, %v11597_v44 }
 0x982   :  { %8158 = vrsqrt.f32 %v4308_v31 }
 0x98c   :  { %v11633_v54 = vpop.eup %8158 }
 0x98d   :  { %v4312_v14 = vmul.f32 %v11633_v54, %v4278_v35  ;;  %v4313_v52 = vmul.f32 %v11633_v54, %v4279_v15  ;;  %v4310_v9 = vmul.f32 %v11633_v54, %v4276_v17  ;;  %v4311_v23 = vmul.f32 %v11633_v54, %v4277_v61 }
 0x98e   :  { %v4314_v0 = vmul.f32 %v11633_v54, %v4280_v30  ;;  %v4315_v11 = vmul.f32 %v11633_v54, %v4281_v22  ;;  %v4316_v12 = vmul.f32 %v11633_v54, %v4282_v33  ;;  %v4317_v13 = vmul.f32 %v11633_v54, %v4283_v53 }
 0x98f   :  { %v4352_v55 = vmul.f32 %v11613_v43, %v4312_v14  ;;  %v4353_v49 = vmul.f32 %v11613_v43, %v4313_v52  ;;  %v4350_v3 = vmul.f32 %v11613_v43, %v4310_v9  ;;  %v4351_v58 = vmul.f32 %v11613_v43, %v4311_v23 }
 0x990   :  { %v4354_v31 = vmul.f32 %v11613_v43, %v4314_v0  ;;  %v4355_v17 = vmul.f32 %v11613_v43, %v4315_v11  ;;  %v4356_v61 = vmul.f32 %v11613_v43, %v4316_v12  ;;  %v4288_v33 = vsub.f32 %v11460_v57, %v11597_v44 }
 0x991   :  { %v4370_v35 = vadd.f32 %v11623_v10, %v4350_v3  ;;  %v4371_v15 = vadd.f32 %v11623_v10, %v4351_v58  ;;  %v4372_v30 = vadd.f32 %v11623_v10, %v4352_v55  ;;  %v4373_v22 = vadd.f32 %v11623_v10, %v4353_v49 }
 0x992   :  { %v4374_v53 = vadd.f32 %v11623_v10, %v4354_v31  ;;  %v4375_v14 = vadd.f32 %v11623_v10, %v4355_v17  ;;  %v4357_v52 = vmul.f32 %v11613_v43, %v4317_v13  ;;  %v4289_v12 = vsub.f32 %v11471_v47, %v11597_v44 }
 0x993   :  { %v4386_v9 = vmax.f32 %v4370_v35, 0.0  ;;  %v4387_v23 = vmax.f32 %v4371_v15, 0.0  ;;  %v4388_v0 = vmax.f32 %v4372_v30, 0.0  ;;  %v4389_v11 = vmax.f32 %v4373_v22, 0.0 }
 0x994   :  { %v4390_v3 = vmax.f32 %v4374_v53, 0.0  ;;  %v4391_v55 = vmax.f32 %v4375_v14, 0.0  ;;  %v4376_v49 = vadd.f32 %v11623_v10, %v4356_v61  ;;  %v4318_v57 = vmul.f32 %v11633_v54, %v4284_v2 }
 0x995   :  { %v4475_v58 = vpack.c.bf16 %v4387_v23, %v4386_v9  ;;  %v4476_v59 = vpack.c.bf16 %v4389_v11, %v4388_v0  ;;  %v4319_v31 = vmul.f32 %v11633_v54, %v4285_v1  ;;  %v4377_v13 = vadd.f32 %v11623_v10, %v4357_v52 }
 0x996   :  { %v4477_v17 = vpack.c.bf16 %v4391_v55, %v4390_v3  ;;  %v4320_v35 = vmul.f32 %v11633_v54, %v4286_v46  ;;  %v4321_v15 = vmul.f32 %v11633_v54, %v4287_v37  ;;  %v4358_v30 = vmul.f32 %v11613_v43, %v4318_v57 }
 0x997   :  { %7748 = vmatprep.mubr.bf16.mxu0 %v4475_v58  ;;  %v4359_v22 = vmul.f32 %v11613_v43, %v4319_v31  ;;  %v4322_v61 = vmul.f32 %v11633_v54, %v4288_v33  ;;  %v4323_v53 = vmul.f32 %v11633_v54, %v4289_v12  ;;  %v4290_v2 = vsub.f32 %v11465_v38, %v11597_v44 }
 0x998   :  { %7749 = vmatmul.mubr.bf16.vlgmr.msra.gmra.mrb[80].mxu0 %v4476_v59  ;;  %v4291_v1 = vsub.f32 %v11474_v25, %v11597_v44  ;;  %v4392_v46 = vmax.f32 %v4376_v49, 0.0  ;;  %v4378_v37 = vadd.f32 %v11623_v10, %v4358_v30  ;;  %v4393_v57 = vmax.f32 %v4377_v13, 0.0  ;;  %v13854_v49 = vld [vmem:[#allocation11_spill] sm:$0xff] }
 0x999   :  { %7752 = vmatprep.mubr.bf16.mxu0 %v4477_v17  ;;  %v4379_v14 = vadd.f32 %v11623_v10, %v4359_v22  ;;  %v4360_v52 = vmul.f32 %v11613_v43, %v4320_v35  ;;  %v4361_v33 = vmul.f32 %v11613_v43, %v4321_v15  ;;  %v4362_v9 = vmul.f32 %v11613_v43, %v4322_v61 }
 0x99a   :  { %v4394_v23 = vmax.f32 %v4378_v37, 0.0  ;;  %v4363_v59 = vmul.f32 %v11613_v43, %v4323_v53  ;;  %v4324_v11 = vmul.f32 %v11633_v54, %v4290_v2  ;;  %v4325_v12 = vmul.f32 %v11633_v54, %v4291_v1 }
 0x99b   :  { %v4395_v0 = vmax.f32 %v4379_v14, 0.0  ;;  %v4292_v3 = vsub.f32 %v11488_v19, %v11597_v44  ;;  %v4293_v55 = vsub.f32 %v11499_v36, %v11597_v44  ;;  %v11699_v58 = vrot.slane %v11604_v28, %v13854_v49 }
 0x99c   :  { %v4478_v31 = vpack.c.bf16 %v4393_v57, %v4392_v46  ;;  %v4380_v17 = vadd.f32 %v11623_v10, %v4360_v52  ;;  %v4381_v13 = vadd.f32 %v11623_v10, %v4361_v33  ;;  %v4382_v35 = vadd.f32 %v11623_v10, %v4362_v9 }
 0x99d   :  { %v4479_v15 = vpack.c.bf16 %v4395_v0, %v4394_v23  ;;  %v4383_v30 = vadd.f32 %v11623_v10, %v4363_v59  ;;  %v4326_v22 = vmul.f32 %v11633_v54, %v4292_v3  ;;  %v4327_v61 = vmul.f32 %v11633_v54, %v4293_v55 }
 0x99e   :  { %v4364_v53 = vmul.f32 %v11613_v43, %v4324_v11  ;;  %v4365_v28 = vmul.f32 %v11613_v43, %v4325_v12  ;;  %v11711_v2 = vrot.slane %v11609_v8, %v13854_v49  ;;  %v4294_v1 = vsub.f32 %v11493_v51, %v11597_v44 }
 0x99f   :  { %v4295_v46 = vsub.f32 %v11502_v16, %v11597_v44  ;;  %v4396_v37 = vmax.f32 %v4380_v17, 0.0  ;;  %v4397_v14 = vmax.f32 %v4381_v13, 0.0  ;;  %v4398_v57 = vmax.f32 %v4382_v35, 0.0 }
 0x9a0   :  { %7753 = vmatmul.mubr.bf16.gmra.mrb[84].mxu0 %v4478_v31  ;;  %v4399_v52 = vmax.f32 %v4383_v30, 0.0  ;;  %v4406_v33 = vmul.f32 %v11699_v58, %v4326_v22  ;;  %v4407_v9 = vmul.f32 %v11699_v58, %v4327_v61  ;;  %v4296_v43 = vsub.f32 %v11516_v60, %v11597_v44 }
 0x9a1   :  { %7756 = vmatprep.mubr.bf16.mxu0 %v4479_v15  ;;  %v4297_v8 = vsub.f32 %v11527_v39, %v11597_v44  ;;  %v4384_v23 = vadd.f32 %v11623_v10, %v4364_v53  ;;  %v4385_v0 = vadd.f32 %v11623_v10, %v4365_v28  ;;  %v4328_v59 = vmul.f32 %v11633_v54, %v4294_v1 }
 0x9a2   :  { %v4329_v11 = vmul.f32 %v11633_v54, %v4295_v46  ;;  %v4480_v12 = vpack.c.bf16 %v4397_v14, %v4396_v37  ;;  %v4330_v3 = vmul.f32 %v11633_v54, %v4296_v43  ;;  %v4481_v31 = vpack.c.bf16 %v4399_v52, %v4398_v57 }
 0x9a3   :  { %v4331_v55 = vmul.f32 %v11633_v54, %v4297_v8  ;;  %v4426_v17 = vadd.f32 %v11711_v2, %v4406_v33  ;;  %v4427_v13 = vadd.f32 %v11711_v2, %v4407_v9  ;;  %v4306_v35 = vsub.f32 %v11577_v21, %v11597_v44 }
 0x9a4   :  { %v4400_v15 = vmax.f32 %v4384_v23, 0.0  ;;  %v4401_v10 = vmax.f32 %v4385_v0, 0.0  ;;  %v4298_v30 = vsub.f32 %v11521_v42, %v11597_v44  ;;  %v4408_v22 = vmul.f32 %v11699_v58, %v4328_v59 }
 0x9a5   :  { %v4409_v61 = vmul.f32 %v11699_v58, %v4329_v11  ;;  %v4307_v53 = vsub.f32 %v11586_v29, %v11597_v44  ;;  %v4410_v28 = vmul.f32 %v11699_v58, %v4330_v3  ;;  %v4411_v1 = vmul.f32 %v11699_v58, %v4331_v55 }
 0x9a6   :  { %v4340_v46 = vmul.f32 %v11633_v54, %v4306_v35  ;;  %v4299_v37 = vsub.f32 %v11530_v63, %v11597_v44  ;;  %v4300_v14 = vsub.f32 %v11544_v18, %v11597_v44  ;;  %v4442_v57 = vmax.f32 %v4426_v17, 0.0 }
 0x9a7   :  { %v4443_v52 = vmax.f32 %v4427_v13, 0.0  ;;  %v4301_v33 = vsub.f32 %v11555_v26, %v11597_v44  ;;  %v4482_v9 = vpack.c.bf16 %v4401_v10, %v4400_v15  ;;  %v4341_v43 = vmul.f32 %v11633_v54, %v4307_v53 }
 0x9a8   :  { %7757 = vmatmul.mubr.bf16.gmra.mrb[88].mxu0 %v4480_v12  ;;  %v4420_v8 = vmul.f32 %v11699_v58, %v4340_v46  ;;  %v4428_v23 = vadd.f32 %v11711_v2, %v4408_v22  ;;  %v4429_v0 = vadd.f32 %v11711_v2, %v4409_v61  ;;  %v4332_v59 = vmul.f32 %v11633_v54, %v4298_v30 }
 0x9a9   :  { %7760 = vmatprep.mubr.bf16.mxu0 %v4481_v31  ;;  %v4333_v11 = vmul.f32 %v11633_v54, %v4299_v37  ;;  %v4430_v12 = vadd.f32 %v11711_v2, %v4410_v28  ;;  %v4431_v3 = vadd.f32 %v11711_v2, %v4411_v1  ;;  %v4421_v55 = vmul.f32 %v11699_v58, %v4341_v43 }
 0x9aa   :  { %v4440_v31 = vadd.f32 %v11711_v2, %v4420_v8  ;;  %v4483_v17 = vpack.c.bf16 %v4443_v52, %v4442_v57  ;;  %v4334_v13 = vmul.f32 %v11633_v54, %v4300_v14  ;;  %v4335_v35 = vmul.f32 %v11633_v54, %v4301_v33 }
 0x9ab   :  { %v4441_v15 = vadd.f32 %v11711_v2, %v4421_v55  ;;  %v4444_v30 = vmax.f32 %v4428_v23, 0.0  ;;  %v4412_v22 = vmul.f32 %v11699_v58, %v4332_v59  ;;  %v4413_v61 = vmul.f32 %v11699_v58, %v4333_v11 }
 0x9ac   :  { %v4456_v10 = vmax.f32 %v4440_v31, 0.0  ;;  %v4445_v53 = vmax.f32 %v4429_v0, 0.0  ;;  %v4446_v28 = vmax.f32 %v4430_v12, 0.0  ;;  %v4447_v1 = vmax.f32 %v4431_v3, 0.0 }
 0x9ad   :  { %v4457_v46 = vmax.f32 %v4441_v15, 0.0  ;;  %v4414_v37 = vmul.f32 %v11699_v58, %v4334_v13  ;;  %v4415_v14 = vmul.f32 %v11699_v58, %v4335_v35  ;;  %v4302_v57 = vsub.f32 %v11549_v34, %v11597_v44 }
 0x9ae   :  { %v4303_v52 = vsub.f32 %v11558_v50, %v11597_v44  ;;  %v4304_v43 = vsub.f32 %v11572_v62, %v11597_v44  ;;  %v4432_v8 = vadd.f32 %v11711_v2, %v4412_v22  ;;  %v4433_v23 = vadd.f32 %v11711_v2, %v4413_v61 }
 0x9af   :  { %v4490_v33 = vpack.c.bf16 %v4457_v46, %v4456_v10  ;;  %v4484_v0 = vpack.c.bf16 %v4445_v53, %v4444_v30  ;;  %v4485_v59 = vpack.c.bf16 %v4447_v1, %v4446_v28  ;;  %v4336_v11 = vmul.f32 %v11633_v54, %v4302_v57 }
 0x9b0   :  { %7761 = vmatmul.mubr.bf16.gmra.mrb[92].mxu0 %v4482_v9  ;;  %v4305_v9 = vsub.f32 %v11583_v6, %v11597_v44  ;;  %v4337_v12 = vmul.f32 %v11633_v54, %v4303_v52  ;;  %v4434_v3 = vadd.f32 %v11711_v2, %v4414_v37  ;;  %v4435_v55 = vadd.f32 %v11711_v2, %v4415_v14 }
 0x9b1   :  { %7764 = vmatprep.mubr.bf16.mxu0 %v4483_v17  ;;  %v4338_v31 = vmul.f32 %v11633_v54, %v4304_v43  ;;  %v4448_v44 = vmax.f32 %v4432_v8, 0.0  ;;  %v4449_v13 = vmax.f32 %v4433_v23, 0.0  ;;  %v4416_v35 = vmul.f32 %v11699_v58, %v4336_v11  ;;  %v8115_v23 = vld [vmem:[#allocation5 + $0xc8] sm:$0xff]  }
 0x9b2   :  { %v4339_v17 = vmul.f32 %v11633_v54, %v4305_v9  ;;  %v4417_v15 = vmul.f32 %v11699_v58, %v4337_v12  ;;  %v4450_v10 = vmax.f32 %v4434_v3, 0.0  ;;  %v4451_v30 = vmax.f32 %v4435_v55, 0.0  ;;  %v8119_v11 = vld [vmem:[#allocation5 + $0xe8] sm:$0xff]   ;;  %v8120_v12 = vld [vmem:[#allocation5 + $0xf0] sm:$0xff]   ;;  %v8121_v3 = vld [vmem:[#allocation5 + $0xf8] sm:$0xff]  }
 0x9b3   :  { %v4418_v22 = vmul.f32 %v11699_v58, %v4338_v31  ;;  %v4486_v53 = vpack.c.bf16 %v4449_v13, %v4448_v44  ;;  %v4436_v28 = vadd.f32 %v11711_v2, %v4416_v35 }
 0x9b4   :  { %v4419_v61 = vmul.f32 %v11699_v58, %v4339_v17  ;;  %v4437_v1 = vadd.f32 %v11711_v2, %v4417_v15  ;;  %v4487_v54 = vpack.c.bf16 %v4451_v30, %v4450_v10  ;;  %v8114_v58 = vld [vmem:[#allocation5 + $0xc0] sm:$0xff]  }
 0x9b5   :  { %v4438_v46 = vadd.f32 %v11711_v2, %v4418_v22  ;;  %v4452_v14 = vmax.f32 %v4436_v28, 0.0  ;;  %7780 = vmatprep.subr.bf16.mxu1 %v8114_v58 }
 0x9b6   :  { %v4439_v37 = vadd.f32 %v11711_v2, %v4419_v61  ;;  %v4453_v57 = vmax.f32 %v4437_v1, 0.0  ;;  %7781 = vmatpush3.bf16.msra.mxu1 %v8114_v58  ;;  %v8118_v2 = vld [vmem:[#allocation5 + $0xe0] sm:$0xff]  }
 0x9b7   :  { %v4454_v52 = vmax.f32 %v4438_v46, 0.0  ;;  %7782 = vmatprep.subr.bf16.mxu1 %v8115_v23 }
 0x9b8   :  { %7765 = vmatmul.mubr.bf16.gmra.mrb[96].mxu0 %v4484_v0  ;;  %v4455_v9 = vmax.f32 %v4439_v37, 0.0  ;;  %v4488_v43 = vpack.c.bf16 %v4453_v57, %v4452_v14  ;;  %v8116_v0 = vld [vmem:[#allocation5 + $0xd0] sm:$0xff]  }
 0x9b9   :  { %7768 = vmatprep.mubr.bf16.mxu0 %v4485_v59  ;;  %v8117_v59 = vld [vmem:[#allocation5 + $0xd8] sm:$0xff]  }
 0x9ba   :  { %v4489_v8 = vpack.c.bf16 %v4455_v9, %v4454_v52  ;;  %7783 = vmatpush3.bf16.msra.mxu1 %v8115_v23 }
 0x9bb   :  { %7784 = vmatprep.subr.bf16.mxu1 %v8116_v0 }
 0x9be   :  { %7785 = vmatpush3.bf16.msra.mxu1 %v8116_v0 }
 0x9bf   :  { %7786 = vmatprep.subr.bf16.mxu1 %v8117_v59 }
 0x9c0   :  { %7769 = vmatmul.mubr.bf16.gmra.mrb[100].mxu0 %v4486_v53 }
 0x9c1   :  { %7772 = vmatprep.mubr.bf16.mxu0 %v4487_v54 }
 0x9c2   :  { %7787 = vmatpush3.bf16.msra.mxu1 %v8117_v59 }
 0x9c3   :  { %7788 = vmatprep.subr.bf16.mxu1 %v8118_v2 }
 0x9c6   :  { %7789 = vmatpush3.bf16.msra.mxu1 %v8118_v2 }
 0x9c7   :  { %7790 = vmatprep.subr.bf16.mxu1 %v8119_v11 }
 0x9c8   :  { %7773 = vmatmul.mubr.bf16.gmra.mrb[104].mxu0 %v4488_v43 }
 0x9c9   :  { %7776 = vmatprep.mubr.bf16.mxu0 %v4489_v8 }
 0x9ca   :  { %7791 = vmatpush3.bf16.msra.mxu1 %v8119_v11 }
 0x9cb   :  { %7792 = vmatprep.subr.bf16.mxu1 %v8120_v12 }
 0x9ce   :  { %7793 = vmatpush3.bf16.msra.mxu1 %v8120_v12 }
 0x9cf   :  { %7794 = vmatprep.subr.bf16.mxu1 %v8121_v3 }
 0x9d0   :  { %7777 = vmatmul.mubr.bf16.gmra.mrb[108].mxu0 %v4490_v33  ;;  %v11792_v33 = vld [vmem:[%s13506_s6 + $0x3] ss:$0 sm:$0xff] }
 0x9d2   :  { %7795 = vmatpush3.bf16.msra.mxu1 %v8121_v3 }
 0xa6b   :  { %v7750_v55 = vpop.f32.mrb[80].mxu0 }
 0xa6c   :  { %v4581_v31 = vpop.f32.mrb[81].mxu0  ;;  %v11798_v35 = vadd.f32 %v7750_v55, %v11792_v33 }
 0xa6d   :  { %v11795_v17 = vadd.f32 %v11792_v33, %v4581_v31  ;;  %v7751_v44 = vpop.f32.mrb[82].mxu0 }
 0xa6e   :  { %v4584_v13 = vpop.f32.mrb[83].mxu0  ;;  %v11806_v30 = vadd.f32 %v7751_v44, %v11792_v33  ;;  %v4747_v53 = vmul.f32 %v11798_v35, %v11798_v35 }
 0xa6f   :  { %v11801_v15 = vadd.f32 %v11792_v33, %v4584_v13  ;;  %v4745_v10 = vmul.f32 %v11795_v17, %v11795_v17 }
 0xa70   :  { %v4748_v37 = vmul.f32 %v11806_v30, %v11806_v30 }
 0xa71   :  { %v4708_v22 = vadd.f32 %v11801_v15, %v11795_v17  ;;  %v4746_v61 = vmul.f32 %v11801_v15, %v11801_v15 }
 0xa73   :  { %v4709_v28 = vadd.f32 %v4708_v22, %v11798_v35  ;;  %v4777_v1 = vadd.f32 %v4746_v61, %v4745_v10  ;;  %v7754_v54 = vpop.f32.mrb[84].mxu0 }
 0xa74   :  { %v4597_v46 = vpop.f32.mrb[85].mxu0  ;;  %v11822_v43 = vadd.f32 %v7754_v54, %v11792_v33 }
 0xa75   :  { %v4778_v14 = vadd.f32 %v4777_v1, %v4747_v53  ;;  %v11818_v57 = vadd.f32 %v11792_v33, %v4597_v46  ;;  %v4710_v52 = vadd.f32 %v4709_v28, %v11806_v30  ;;  %v7755_v9 = vpop.f32.mrb[86].mxu0 }
 0xa76   :  { %v4600_v8 = vpop.f32.mrb[87].mxu0  ;;  %v11831_v11 = vadd.f32 %v7755_v9, %v11792_v33  ;;  %v4751_v55 = vmul.f32 %v11822_v43, %v11822_v43 }
 0xa77   :  { %v4711_v58 = vadd.f32 %v4710_v52, %v11818_v57  ;;  %v4749_v23 = vmul.f32 %v11818_v57, %v11818_v57  ;;  %v4779_v0 = vadd.f32 %v4778_v14, %v4748_v37  ;;  %v11828_v59 = vadd.f32 %v11792_v33, %v4600_v8 }
 0xa78   :  { %v4752_v22 = vmul.f32 %v11831_v11, %v11831_v11 }
 0xa79   :  { %v4780_v2 = vadd.f32 %v4779_v0, %v4749_v23  ;;  %v4712_v12 = vadd.f32 %v4711_v58, %v11828_v59  ;;  %v4750_v3 = vmul.f32 %v11828_v59, %v11828_v59 }
 0xa7b   :  { %v4713_v31 = vadd.f32 %v4712_v12, %v11822_v43  ;;  %v4781_v44 = vadd.f32 %v4780_v2, %v4750_v3  ;;  %v7758_v13 = vpop.f32.mrb[88].mxu0 }
 0xa7c   :  { %v4613_v10 = vpop.f32.mrb[89].mxu0  ;;  %v11846_v54 = vadd.f32 %v7758_v13, %v11792_v33 }
 0xa7d   :  { %v4782_v61 = vadd.f32 %v4781_v44, %v4751_v55  ;;  %v11842_v53 = vadd.f32 %v11792_v33, %v4613_v10  ;;  %v4714_v28 = vadd.f32 %v4713_v31, %v11831_v11  ;;  %v7759_v1 = vpop.f32.mrb[90].mxu0 }
 0xa7e   :  { %v4616_v46 = vpop.f32.mrb[91].mxu0  ;;  %v11855_v58 = vadd.f32 %v7759_v1, %v11792_v33  ;;  %v4755_v2 = vmul.f32 %v11846_v54, %v11846_v54 }
 0xa7f   :  { %v4715_v37 = vadd.f32 %v4714_v28, %v11842_v53  ;;  %v4753_v14 = vmul.f32 %v11842_v53, %v11842_v53  ;;  %v4783_v52 = vadd.f32 %v4782_v61, %v4752_v22  ;;  %v11852_v9 = vadd.f32 %v11792_v33, %v4616_v46 }
 0xa80   :  { %v4756_v44 = vmul.f32 %v11855_v58, %v11855_v58 }
 0xa81   :  { %v4784_v8 = vadd.f32 %v4783_v52, %v4753_v14  ;;  %v4716_v23 = vadd.f32 %v4715_v37, %v11852_v9  ;;  %v4754_v0 = vmul.f32 %v11852_v9, %v11852_v9 }
 0xa83   :  { %v4717_v12 = vadd.f32 %v4716_v23, %v11846_v54  ;;  %v4785_v3 = vadd.f32 %v4784_v8, %v4754_v0  ;;  %v7762_v55 = vpop.f32.mrb[92].mxu0 }
 0xa84   :  { %v4629_v31 = vpop.f32.mrb[93].mxu0  ;;  %v11870_v28 = vadd.f32 %v7762_v55, %v11792_v33 }
 0xa85   :  { %v4786_v13 = vadd.f32 %v4785_v3, %v4755_v2  ;;  %v11866_v10 = vadd.f32 %v11792_v33, %v4629_v31  ;;  %v4718_v22 = vadd.f32 %v4717_v12, %v11855_v58  ;;  %v7763_v61 = vpop.f32.mrb[94].mxu0 }
 0xa86   :  { %v4632_v1 = vpop.f32.mrb[95].mxu0  ;;  %v11879_v23 = vadd.f32 %v7763_v61, %v11792_v33  ;;  %v4759_v12 = vmul.f32 %v11870_v28, %v11870_v28 }
 0xa87   :  { %v4719_v46 = vadd.f32 %v4718_v22, %v11866_v10  ;;  %v4757_v37 = vmul.f32 %v11866_v10, %v11866_v10  ;;  %v4787_v14 = vadd.f32 %v4786_v13, %v4756_v44  ;;  %v11876_v52 = vadd.f32 %v11792_v33, %v4632_v1 }
 0xa88   :  { %v4760_v13 = vmul.f32 %v11879_v23, %v11879_v23 }
 0xa89   :  { %v4788_v8 = vadd.f32 %v4787_v14, %v4757_v37  ;;  %v4720_v0 = vadd.f32 %v4719_v46, %v11876_v52  ;;  %v4758_v2 = vmul.f32 %v11876_v52, %v11876_v52 }
 0xa8b   :  { %v4721_v3 = vadd.f32 %v4720_v0, %v11870_v28  ;;  %v4789_v55 = vadd.f32 %v4788_v8, %v4758_v2  ;;  %v7766_v31 = vpop.f32.mrb[96].mxu0 }
 0xa8c   :  { %v4645_v44 = vpop.f32.mrb[97].mxu0  ;;  %v11894_v37 = vadd.f32 %v7766_v31, %v11792_v33 }
 0xa8d   :  { %v4790_v22 = vadd.f32 %v4789_v55, %v4759_v12  ;;  %v11890_v61 = vadd.f32 %v11792_v33, %v4645_v44  ;;  %v4722_v1 = vadd.f32 %v4721_v3, %v11879_v23  ;;  %v7767_v46 = vpop.f32.mrb[98].mxu0 }
 0xa8e   :  { %v4648_v14 = vpop.f32.mrb[99].mxu0  ;;  %v11903_v55 = vadd.f32 %v7767_v46, %v11792_v33  ;;  %v4763_v44 = vmul.f32 %v11894_v37, %v11894_v37 }
 0xa8f   :  { %v4723_v6 = vadd.f32 %v4722_v1, %v11890_v61  ;;  %v4761_v8 = vmul.f32 %v11890_v61, %v11890_v61  ;;  %v4791_v0 = vadd.f32 %v4790_v22, %v4760_v13  ;;  %v11900_v2 = vadd.f32 %v11792_v33, %v4648_v14 }
 0xa90   :  { %v4764_v22 = vmul.f32 %v11903_v55, %v11903_v55 }
 0xa91   :  { %v4792_v12 = vadd.f32 %v4791_v0, %v4761_v8  ;;  %v4724_v3 = vadd.f32 %v4723_v6, %v11900_v2  ;;  %v4762_v31 = vmul.f32 %v11900_v2, %v11900_v2 }
 0xa93   :  { %v4725_v1 = vadd.f32 %v4724_v3, %v11894_v37  ;;  %v4793_v29 = vadd.f32 %v4792_v12, %v4762_v31  ;;  %v7770_v62 = vpop.f32.mrb[100].mxu0 }
 0xa94   :  { %v4661_v13 = vpop.f32.mrb[101].mxu0  ;;  %v11918_v0 = vadd.f32 %v7770_v62, %v11792_v33 }
 0xa95   :  { %v4794_v14 = vadd.f32 %v4793_v29, %v4763_v44  ;;  %v11914_v46 = vadd.f32 %v11792_v33, %v4661_v13  ;;  %v4726_v6 = vadd.f32 %v4725_v1, %v11903_v55  ;;  %v7771_v8 = vpop.f32.mrb[102].mxu0 }
 0xa96   :  { %v4664_v21 = vpop.f32.mrb[103].mxu0  ;;  %v11927_v44 = vadd.f32 %v7771_v8, %v11792_v33  ;;  %v4767_v13 = vmul.f32 %v11918_v0, %v11918_v0 }
 0xa97   :  { %v4727_v26 = vadd.f32 %v4726_v6, %v11914_v46  ;;  %v4765_v12 = vmul.f32 %v11914_v46, %v11914_v46  ;;  %v4795_v3 = vadd.f32 %v4794_v14, %v4764_v22  ;;  %v11924_v31 = vadd.f32 %v11792_v33, %v4664_v21 }
 0xa98   :  { %v4768_v21 = vmul.f32 %v11927_v44, %v11927_v44 }
 0xa99   :  { %v4796_v29 = vadd.f32 %v4795_v3, %v4765_v12  ;;  %v4728_v1 = vadd.f32 %v4727_v26, %v11924_v31  ;;  %v4766_v62 = vmul.f32 %v11924_v31, %v11924_v31 }
 0xa9b   :  { %v4729_v6 = vadd.f32 %v4728_v1, %v11918_v0  ;;  %v4797_v50 = vadd.f32 %v4796_v29, %v4766_v62  ;;  %v7774_v18 = vpop.f32.mrb[104].mxu0 }
 0xa9c   :  { %v4677_v22 = vpop.f32.mrb[105].mxu0  ;;  %v11942_v3 = vadd.f32 %v7774_v18, %v11792_v33 }
 0xa9d   :  { %v4798_v14 = vadd.f32 %v4797_v50, %v4767_v13  ;;  %v11938_v8 = vadd.f32 %v11792_v33, %v4677_v22  ;;  %v4730_v26 = vadd.f32 %v4729_v6, %v11927_v44  ;;  %v7775_v12 = vpop.f32.mrb[106].mxu0 }
 0xa9e   :  { %v4680_v34 = vpop.f32.mrb[107].mxu0  ;;  %v11951_v13 = vadd.f32 %v7775_v12, %v11792_v33  ;;  %v4771_v22 = vmul.f32 %v11942_v3, %v11942_v3 }
 0xa9f   :  { %v4731_v39 = vadd.f32 %v4730_v26, %v11938_v8  ;;  %v4769_v29 = vmul.f32 %v11938_v8, %v11938_v8  ;;  %v4799_v1 = vadd.f32 %v4798_v14, %v4768_v21  ;;  %v11948_v62 = vadd.f32 %v11792_v33, %v4680_v34 }
 0xaa0   :  { %v4772_v34 = vmul.f32 %v11951_v13, %v11951_v13 }
 0xaa1   :  { %v4800_v50 = vadd.f32 %v4799_v1, %v4769_v29  ;;  %v4732_v6 = vadd.f32 %v4731_v39, %v11948_v62  ;;  %v4770_v18 = vmul.f32 %v11948_v62, %v11948_v62 }
 0xaa3   :  { %v4733_v26 = vadd.f32 %v4732_v6, %v11942_v3  ;;  %v4801_v63 = vadd.f32 %v4800_v50, %v4770_v18  ;;  %v7778_v60 = vpop.f32.mrb[108].mxu0 }
 0xaa4   :  { %v4693_v21 = vpop.f32.mrb[109].mxu0  ;;  %v11966_v1 = vadd.f32 %v7778_v60, %v11792_v33 }
 0xaa5   :  { %v4802_v14 = vadd.f32 %v4801_v63, %v4771_v22  ;;  %v11962_v12 = vadd.f32 %v11792_v33, %v4693_v21  ;;  %v4734_v39 = vadd.f32 %v4733_v26, %v11951_v13  ;;  %v7779_v29 = vpop.f32.mrb[110].mxu0 }
 0xaa6   :  { %v4696_v42 = vpop.f32.mrb[111].mxu0  ;;  %v11975_v22 = vadd.f32 %v7779_v29, %v11792_v33  ;;  %v4775_v21 = vmul.f32 %v11966_v1, %v11966_v1 }
 0xaa7   :  { %v4735_v36 = vadd.f32 %v4734_v39, %v11962_v12  ;;  %v4773_v50 = vmul.f32 %v11962_v12, %v11962_v12  ;;  %v4803_v6 = vadd.f32 %v4802_v14, %v4772_v34  ;;  %v11972_v18 = vadd.f32 %v11792_v33, %v4696_v42 }
 0xaa8   :  { %v4776_v34 = vmul.f32 %v11975_v22, %v11975_v22 }
 0xaa9   :  { %v4804_v63 = vadd.f32 %v4803_v6, %v4773_v50  ;;  %v4736_v26 = vadd.f32 %v4735_v36, %v11972_v18  ;;  %v4774_v60 = vmul.f32 %v11972_v18, %v11972_v18 }
 0xaab   :  { %v4737_v39 = vadd.f32 %v4736_v26, %v11966_v1  ;;  %v4805_v16 = vadd.f32 %v4804_v63, %v4774_v60 }
 0xaad   :  { %v4738_v42 = vadd.f32 %v4737_v39, %v11975_v22  ;;  %v4806_v14 = vadd.f32 %v4805_v16, %v4775_v21 }
 0xaaf   :  { %v4739_v50 = vrot.slane %v4738_v42, 4  ;;  %v4807_v33 = vadd.f32 %v4806_v14, %v4776_v34 }
 0xab1   :  { %v4740_v29 = vadd.f32 %v4739_v50, %v4738_v42  ;;  %v4808_v6 = vrot.slane %v4807_v33, 4 }
 0xab3   :  { %v4741_v36 = vrot.slane %v4740_v29, 2  ;;  %v4809_v19 = vadd.f32 %v4808_v6, %v4807_v33 }
 0xab5   :  { %v4742_v51 = vadd.f32 %v4741_v36, %v4740_v29  ;;  %v4810_v47 = vrot.slane %v4809_v19, 2 }
 0xab7   :  { %v4743_v25 = vrot.slane %v4742_v51, 1  ;;  %v4811_v38 = vadd.f32 %v4810_v47, %v4809_v19 }
 0xab9   :  { %v4744_v4 = vadd.f32 %v4743_v25, %v4742_v51  ;;  %v4812_v7 = vrot.slane %v4811_v38, 1 }
 0xabb   :  { %v4813_v26 = vadd.f32 %v4812_v7, %v4811_v38  ;;  %v11986_v63 = vmul.f32 0.00390625, %v4744_v4 }
 0xabd   :  { %v4815_v60 = vmul.f32 0.00390625, %v4813_v26  ;;  %v4816_v39 = vmul.f32 %v11986_v63, %v11986_v63  ;;  %v4847_v16 = vsub.f32 %v11972_v18, %v11986_v63  ;;  %v4827_v34 = vsub.f32 %v11852_v9, %v11986_v63 }
 0xabe   :  { %v4829_v42 = vsub.f32 %v11855_v58, %v11986_v63  ;;  %v4830_v7 = vsub.f32 %v11866_v10, %v11986_v63  ;;  %v4831_v4 = vsub.f32 %v11876_v52, %v11986_v63  ;;  %v4832_v38 = vsub.f32 %v11870_v28, %v11986_v63 }
 0xabf   :  { %v4817_v21 = vsub.f32 %v4815_v60, %v4816_v39  ;;  %v4833_v25 = vsub.f32 %v11879_v23, %v11986_v63  ;;  %v4834_v19 = vsub.f32 %v11890_v61, %v11986_v63  ;;  %v4835_v51 = vsub.f32 %v11900_v2, %v11986_v63 }
 0xac0   :  { %v4836_v9 = vsub.f32 %v11894_v37, %v11986_v63  ;;  %v4837_v58 = vsub.f32 %v11903_v55, %v11986_v63  ;;  %v4838_v10 = vsub.f32 %v11914_v46, %v11986_v63  ;;  %v4839_v28 = vsub.f32 %v11924_v31, %v11986_v63 }
 0xac1   :  { %v4850_v47 = vadd.f32 1e-05, %v4817_v21  ;;  %v4840_v52 = vsub.f32 %v11918_v0, %v11986_v63  ;;  %v4841_v23 = vsub.f32 %v11927_v44, %v11986_v63  ;;  %v4842_v61 = vsub.f32 %v11938_v8, %v11986_v63  ;;  %v7133_v44 = vld [vmem:[%s13501_s1 + $0xe] sm:$0x3] }
 0xac2   :  { %v4843_v37 = vsub.f32 %v11948_v62, %v11986_v63  ;;  %v4844_v2 = vsub.f32 %v11942_v3, %v11986_v63  ;;  %v4845_v55 = vsub.f32 %v11951_v13, %v11986_v63  ;;  %v4846_v46 = vsub.f32 %v11962_v12, %v11986_v63  ;;  %v7134_v8 = vld [vmem:[%s13502_s2 + $0xe] sm:$0x3] }
 0xac3   :  { %8160 = vrsqrt.f32 %v4850_v47  ;;  %v4848_v0 = vsub.f32 %v11966_v1, %v11986_v63  ;;  %v4849_v31 = vsub.f32 %v11975_v22, %v11986_v63  ;;  %v12041_v3 = vrot.slane %v7133_v44, %v13853_v56 }
 0xac4   :  { %v12044_v62 = vrot.slane %v7134_v8, %v13853_v56  ;;  %v4818_v13 = vsub.f32 %v11795_v17, %v11986_v63  ;;  %v4819_v12 = vsub.f32 %v11801_v15, %v11986_v63  ;;  %v12051_v1 = vrot.slane %v7133_v44, %v13854_v49 }
 0xac5   :  { %v12054_v18 = vrot.slane %v7134_v8, %v13854_v49  ;;  %v4820_v22 = vsub.f32 %v11798_v35, %v11986_v63  ;;  %v4821_v14 = vsub.f32 %v11806_v30, %v11986_v63  ;;  %v4822_v50 = vsub.f32 %v11818_v57, %v11986_v63 }
 0xac6   :  { %v4823_v17 = vsub.f32 %v11828_v59, %v11986_v63  ;;  %v4824_v15 = vsub.f32 %v11822_v43, %v11986_v63  ;;  %v4825_v29 = vsub.f32 %v11831_v11, %v11986_v63  ;;  %v4826_v6 = vsub.f32 %v11842_v53, %v11986_v63 }
 0xac7   :  { %v4828_v35 = vsub.f32 %v11846_v54, %v11986_v63 }
 0xacd   :  { %v8161_v33 = vpop.eup %8160 }
 0xace   :  { %v12072_v30 = vmul.f32 %v8161_v33, %v4847_v16  ;;  %v4852_v36 = vmul.f32 %v8161_v33, %v4818_v13  ;;  %v4853_v57 = vmul.f32 %v8161_v33, %v4819_v12  ;;  %v4854_v26 = vmul.f32 %v8161_v33, %v4820_v22 }
 0xacf   :  { %v4855_v60 = vmul.f32 %v8161_v33, %v4821_v14  ;;  %v4856_v59 = vmul.f32 %v8161_v33, %v4822_v50  ;;  %v4857_v39 = vmul.f32 %v8161_v33, %v4823_v17  ;;  %v4858_v21 = vmul.f32 %v8161_v33, %v4824_v15 }
 0xad0   :  { %v4859_v47 = vmul.f32 %v8161_v33, %v4825_v29  ;;  %v4860_v43 = vmul.f32 %v8161_v33, %v4826_v6  ;;  %v4861_v44 = vmul.f32 %v8161_v33, %v4827_v34  ;;  %v4862_v8 = vmul.f32 %v8161_v33, %v4828_v35 }
 0xad1   :  { %v4863_v11 = vmul.f32 %v8161_v33, %v4829_v42  ;;  %v4864_v49 = vmul.f32 %v8161_v33, %v4830_v7  ;;  %v4865_v56 = vmul.f32 %v8161_v33, %v4831_v4  ;;  %v4866_v53 = vmul.f32 %v8161_v33, %v4832_v38 }
 0xad2   :  { %v4867_v27 = vmul.f32 %v8161_v33, %v4833_v25  ;;  %v12074_v24 = vmul.f32 %v8161_v33, %v4834_v19  ;;  %v12076_v54 = vmul.f32 %v8161_v33, %v4835_v51  ;;  %v12078_v63 = vmul.f32 %v8161_v33, %v4836_v9 }
 0xad3   :  { %v12080_v16 = vmul.f32 %v8161_v33, %v4837_v58  ;;  %v12082_v13 = vmul.f32 %v8161_v33, %v4838_v10  ;;  %v12084_v12 = vmul.f32 %v8161_v33, %v4839_v28  ;;  %v12086_v22 = vmul.f32 %v8161_v33, %v4840_v52 }
 0xad4   :  { %v12088_v34 = vmul.f32 %v8161_v33, %v4841_v23  ;;  %v12090_v42 = vmul.f32 %v8161_v33, %v4842_v61  ;;  %v12092_v7 = vmul.f32 %v8161_v33, %v4843_v37  ;;  %v12094_v4 = vmul.f32 %v8161_v33, %v4844_v2 }
 0xad5   :  { %v12096_v38 = vmul.f32 %v8161_v33, %v4845_v55  ;;  %v12098_v25 = vmul.f32 %v8161_v33, %v4846_v46  ;;  %v12100_v19 = vmul.f32 %v8161_v33, %v4848_v0  ;;  %v12102_v51 = vmul.f32 %v8161_v33, %v4849_v31 }
 0xad6   :  { %v4894_v9 = vmul.f32 %v12041_v3, %v4854_v26  ;;  %v4895_v58 = vmul.f32 %v12041_v3, %v4855_v60  ;;  %v4892_v10 = vmul.f32 %v12041_v3, %v4852_v36  ;;  %v4893_v28 = vmul.f32 %v12041_v3, %v4853_v57 }
 0xad7   :  { %v4896_v52 = vmul.f32 %v12041_v3, %v4856_v59  ;;  %v4897_v23 = vmul.f32 %v12041_v3, %v4857_v39  ;;  %v4898_v61 = vmul.f32 %v12041_v3, %v4858_v21  ;;  %v4899_v37 = vmul.f32 %v12041_v3, %v4859_v47 }
 0xad8   :  { %v4914_v2 = vadd.f32 %v12044_v62, %v4894_v9  ;;  %v4915_v55 = vadd.f32 %v12044_v62, %v4895_v58  ;;  %v4912_v46 = vadd.f32 %v12044_v62, %v4892_v10  ;;  %v4913_v0 = vadd.f32 %v12044_v62, %v4893_v28 }
 0xad9   :  { %v4916_v31 = vadd.f32 %v12044_v62, %v4896_v52  ;;  %v4917_v14 = vadd.f32 %v12044_v62, %v4897_v23  ;;  %v4918_v50 = vadd.f32 %v12044_v62, %v4898_v61  ;;  %v4919_v17 = vadd.f32 %v12044_v62, %v4899_v37 }
 0xada   :  { %v4930_v33 = vmax.f32 %v4914_v2, 0.0  ;;  %v4931_v15 = vmax.f32 %v4915_v55, 0.0  ;;  %v4928_v29 = vmax.f32 %v4912_v46, 0.0  ;;  %v4929_v6 = vmax.f32 %v4913_v0, 0.0 }
 0xadb   :  { %v4932_v35 = vmax.f32 %v4916_v31, 0.0  ;;  %v4933_v36 = vmax.f32 %v4917_v14, 0.0  ;;  %v4934_v57 = vmax.f32 %v4918_v50, 0.0  ;;  %v4935_v26 = vmax.f32 %v4919_v17, 0.0 }
 0xadc   :  { %v5017_v60 = vpack.c.bf16 %v4929_v6, %v4928_v29  ;;  %v5018_v59 = vpack.c.bf16 %v4931_v15, %v4930_v33  ;;  %v4900_v39 = vmul.f32 %v12041_v3, %v4860_v43  ;;  %v4901_v21 = vmul.f32 %v12041_v3, %v4861_v44 }
 0xadd   :  { %v5019_v47 = vpack.c.bf16 %v4933_v36, %v4932_v35  ;;  %v5020_v9 = vpack.c.bf16 %v4935_v26, %v4934_v57  ;;  %v4902_v58 = vmul.f32 %v12041_v3, %v4862_v8  ;;  %v4903_v10 = vmul.f32 %v12041_v3, %v4863_v11 }
 0xade   :  { %7796 = vmatprep.mubr.bf16.mxu1 %v5017_v60  ;;  %v4920_v28 = vadd.f32 %v12044_v62, %v4900_v39  ;;  %v4921_v52 = vadd.f32 %v12044_v62, %v4901_v21  ;;  %v4904_v23 = vmul.f32 %v12041_v3, %v4864_v49  ;;  %v4905_v61 = vmul.f32 %v12041_v3, %v4865_v56 }
 0xadf   :  { %7797 = vmatmul.mubr.bf16.vlgmr.msra.gmra.mrb[112].mxu1 %v5018_v59  ;;  %v4922_v43 = vadd.f32 %v12044_v62, %v4902_v58  ;;  %v4923_v44 = vadd.f32 %v12044_v62, %v4903_v10  ;;  %v4906_v37 = vmul.f32 %v12041_v3, %v4866_v53  ;;  %v4907_v8 = vmul.f32 %v12041_v3, %v4867_v27 }
 0xae0   :  { %7800 = vmatprep.mubr.bf16.mxu1 %v5019_v47  ;;  %v4936_v11 = vmax.f32 %v4920_v28, 0.0  ;;  %v4937_v2 = vmax.f32 %v4921_v52, 0.0  ;;  %v4924_v55 = vadd.f32 %v12044_v62, %v4904_v23  ;;  %v4925_v46 = vadd.f32 %v12044_v62, %v4905_v61 }
 0xae1   :  { %v4938_v0 = vmax.f32 %v4922_v43, 0.0  ;;  %v4939_v49 = vmax.f32 %v4923_v44, 0.0  ;;  %v4926_v56 = vadd.f32 %v12044_v62, %v4906_v37  ;;  %v4927_v31 = vadd.f32 %v12044_v62, %v4907_v8 }
 0xae2   :  { %v5021_v14 = vpack.c.bf16 %v4937_v2, %v4936_v11  ;;  %v4940_v50 = vmax.f32 %v4924_v55, 0.0  ;;  %v4941_v17 = vmax.f32 %v4925_v46, 0.0  ;;  %v4948_v53 = vmul.f32 %v12051_v1, %v12074_v24 }
 0xae3   :  { %v5022_v27 = vpack.c.bf16 %v4939_v49, %v4938_v0  ;;  %v4942_v3 = vmax.f32 %v4926_v56, 0.0  ;;  %v4943_v33 = vmax.f32 %v4927_v31, 0.0  ;;  %v4949_v15 = vmul.f32 %v12051_v1, %v12076_v54 }
 0xae4   :  { %v5023_v29 = vpack.c.bf16 %v4941_v17, %v4940_v50  ;;  %v4968_v6 = vadd.f32 %v12054_v18, %v4948_v53  ;;  %v4950_v35 = vmul.f32 %v12051_v1, %v12078_v63  ;;  %v4951_v62 = vmul.f32 %v12051_v1, %v12080_v16 }
 0xae5   :  { %v5024_v36 = vpack.c.bf16 %v4943_v33, %v4942_v3  ;;  %v4969_v57 = vadd.f32 %v12054_v18, %v4949_v15  ;;  %v4952_v24 = vmul.f32 %v12051_v1, %v12082_v13  ;;  %v4953_v26 = vmul.f32 %v12051_v1, %v12084_v12 }
 0xae6   :  { %v4984_v60 = vmax.f32 %v4968_v6, 0.0  ;;  %v4970_v54 = vadd.f32 %v12054_v18, %v4950_v35  ;;  %v4971_v59 = vadd.f32 %v12054_v18, %v4951_v62  ;;  %v4954_v63 = vmul.f32 %v12051_v1, %v12086_v22 }
 0xae7   :  { %7801 = vmatmul.mubr.bf16.gmra.mrb[116].mxu1 %v5020_v9  ;;  %v4985_v39 = vmax.f32 %v4969_v57, 0.0  ;;  %v4972_v16 = vadd.f32 %v12054_v18, %v4952_v24  ;;  %v4973_v21 = vadd.f32 %v12054_v18, %v4953_v26  ;;  %v4955_v13 = vmul.f32 %v12051_v1, %v12088_v34  ;;  %v8128_v57 = vld [vmem:[#allocation2 + $0x130] sm:$0xff]   ;;  %v8129_v24 = vld [vmem:[#allocation2 + $0x138] sm:$0xff]  }
 0xae8   :  { %7804 = vmatprep.mubr.bf16.mxu1 %v5021_v14  ;;  %v4986_v47 = vmax.f32 %v4970_v54, 0.0  ;;  %v4987_v12 = vmax.f32 %v4971_v59, 0.0  ;;  %v4974_v58 = vadd.f32 %v12054_v18, %v4954_v63  ;;  %v4956_v10 = vmul.f32 %v12051_v1, %v12090_v42 }
 0xae9   :  { %v5025_v28 = vpack.c.bf16 %v4985_v39, %v4984_v60  ;;  %v4988_v52 = vmax.f32 %v4972_v16, 0.0  ;;  %v4989_v22 = vmax.f32 %v4973_v21, 0.0  ;;  %v4975_v9 = vadd.f32 %v12054_v18, %v4955_v13  ;;  %v12187_v60 = vld [vmem:[%s13508_s8 + $0x3] ss:$0 sm:$0xff] }
 0xaea   :  { %v5026_v23 = vpack.c.bf16 %v4987_v12, %v4986_v47  ;;  %v4990_v61 = vmax.f32 %v4974_v58, 0.0  ;;  %v4957_v43 = vmul.f32 %v12051_v1, %v12092_v7  ;;  %v4976_v34 = vadd.f32 %v12054_v18, %v4956_v10 }
 0xaeb   :  { %v5027_v44 = vpack.c.bf16 %v4989_v22, %v4988_v52  ;;  %v4991_v37 = vmax.f32 %v4975_v9, 0.0  ;;  %v4958_v8 = vmul.f32 %v12051_v1, %v12094_v4  ;;  %v4959_v42 = vmul.f32 %v12051_v1, %v12096_v38 }
 0xaec   :  { %v4977_v11 = vadd.f32 %v12054_v18, %v4957_v43  ;;  %v4992_v2 = vmax.f32 %v4976_v34, 0.0  ;;  %v4960_v55 = vmul.f32 %v12051_v1, %v12098_v25  ;;  %v4961_v46 = vmul.f32 %v12051_v1, %v12072_v30 }
 0xaed   :  { %v5028_v7 = vpack.c.bf16 %v4991_v37, %v4990_v61  ;;  %v4978_v0 = vadd.f32 %v12054_v18, %v4958_v8  ;;  %v4979_v49 = vadd.f32 %v12054_v18, %v4959_v42  ;;  %v4962_v4 = vmul.f32 %v12051_v1, %v12100_v19 }
 0xaee   :  { %v4993_v56 = vmax.f32 %v4977_v11, 0.0  ;;  %v4980_v38 = vadd.f32 %v12054_v18, %v4960_v55  ;;  %v4981_v31 = vadd.f32 %v12054_v18, %v4961_v46  ;;  %v4963_v14 = vmul.f32 %v12051_v1, %v12102_v51  ;;  %v8122_v1 = vld [vmem:[#allocation2 + $0x100] sm:$0xff]   ;;  %v8123_v51 = vld [vmem:[#allocation2 + $0x108] sm:$0xff]   ;;  %v13855_v11 = vld [vmem:[#allocation13_spill] sm:$0xff] }
 0xaef   :  { %7805 = vmatmul.mubr.bf16.gmra.mrb[120].mxu1 %v5022_v27  ;;  %v4994_v25 = vmax.f32 %v4978_v0, 0.0  ;;  %v4995_v50 = vmax.f32 %v4979_v49, 0.0  ;;  %v4982_v30 = vadd.f32 %v12054_v18, %v4962_v4  ;;  %7828 = vmatprep.subr.bf16.mxu0 %v8122_v1  ;;  %v8125_v27 = vld [vmem:[#allocation2 + $0x118] sm:$0xff]  }
 0xaf0   :  { %7808 = vmatprep.mubr.bf16.mxu1 %v5023_v29  ;;  %v5029_v17 = vpack.c.bf16 %v4993_v56, %v4992_v2  ;;  %v4996_v53 = vmax.f32 %v4980_v38, 0.0  ;;  %v4997_v3 = vmax.f32 %v4981_v31, 0.0  ;;  %v4983_v33 = vadd.f32 %v12054_v18, %v4963_v14  ;;  %7829 = vmatpush3.bf16.msra.mxu0 %v8122_v1  ;;  %v8124_v18 = vld [vmem:[#allocation2 + $0x110] sm:$0xff]   ;;  %v8126_v29 = vld [vmem:[#allocation2 + $0x120] sm:$0xff]   ;;  %v13857_v31 = vld [vmem:[#allocation14_spill] sm:$0xff] }
 0xaf1   :  { %v5030_v19 = vpack.c.bf16 %v4995_v50, %v4994_v25  ;;  %v4998_v15 = vmax.f32 %v4982_v30, 0.0  ;;  %7830 = vmatprep.subr.bf16.mxu0 %v8123_v51 }
 0xaf2   :  { %v5031_v6 = vpack.c.bf16 %v4997_v3, %v4996_v53  ;;  %v4999_v35 = vmax.f32 %v4983_v33, 0.0  ;;  %v13858_v53 = vld [vmem:[#allocation16_spill] sm:$0xff] }
 0xaf4   :  { %v5032_v62 = vpack.c.bf16 %v4999_v35, %v4998_v15  ;;  %7831 = vmatpush3.bf16.msra.mxu0 %v8123_v51  ;;  %v13859_v15 = vld [vmem:[#allocation15_spill] sm:$0xff] }
 0xaf5   :  { %7832 = vmatprep.subr.bf16.mxu0 %v8124_v18 }
 0xaf7   :  { %7809 = vmatmul.mubr.bf16.gmra.mrb[124].mxu1 %v5024_v36  ;;  %v8127_v36 = vld [vmem:[#allocation2 + $0x128] sm:$0xff]  }
 0xaf8   :  { %7812 = vmatprep.mubr.bf16.mxu1 %v5025_v28  ;;  %7833 = vmatpush3.bf16.msra.mxu0 %v8124_v18  ;;  %v13861_v18 = vld [vmem:[#allocation17_spill] sm:$0xff] }
 0xaf9   :  { %7834 = vmatprep.subr.bf16.mxu0 %v8125_v27 }
 0xafc   :  { %7835 = vmatpush3.bf16.msra.mxu0 %v8125_v27 }
 0xafd   :  { %7836 = vmatprep.subr.bf16.mxu0 %v8126_v29 }
 0xaff   :  { %7813 = vmatmul.mubr.bf16.gmra.mrb[128].mxu1 %v5026_v23 }
 0xb00   :  { %7816 = vmatprep.mubr.bf16.mxu1 %v5027_v44  ;;  %7837 = vmatpush3.bf16.msra.mxu0 %v8126_v29 }
 0xb01   :  { %7838 = vmatprep.subr.bf16.mxu0 %v8127_v36 }
 0xb04   :  { %7839 = vmatpush3.bf16.msra.mxu0 %v8127_v36 }
 0xb05   :  { %7840 = vmatprep.subr.bf16.mxu0 %v8128_v57 }
 0xb07   :  { %7817 = vmatmul.mubr.bf16.gmra.mrb[132].mxu1 %v5028_v7 }
 0xb08   :  { %7820 = vmatprep.mubr.bf16.mxu1 %v5029_v17  ;;  %7841 = vmatpush3.bf16.msra.mxu0 %v8128_v57 }
 0xb09   :  { %7842 = vmatprep.subr.bf16.mxu0 %v8129_v24 }
 0xb0c   :  { %7843 = vmatpush3.bf16.msra.mxu0 %v8129_v24 }
 0xb0f   :  { %7821 = vmatmul.mubr.bf16.gmra.mrb[136].mxu1 %v5030_v19 }
 0xb10   :  { %7824 = vmatprep.mubr.bf16.mxu1 %v5031_v6 }
 0xb17   :  { %7825 = vmatmul.mubr.bf16.gmra.mrb[140].mxu1 %v5032_v62 }
 0xbb2   :  { %v7798_v26 = vpop.f32.mrb[112].mxu1 }
 0xbb3   :  { %v5115_v54 = vpop.f32.mrb[113].mxu1  ;;  %v5244_v59 = vadd.f32 %v7798_v26, %v11381_v32 }
 0xbb4   :  { %v5242_v63 = vadd.f32 %v5115_v54, %v11377_v20  ;;  %v7799_v39 = vpop.f32.mrb[114].mxu1 }
 0xbb5   :  { %v5245_v16 = vadd.f32 %v7799_v39, %v11387_v45  ;;  %v5118_v21 = vpop.f32.mrb[115].mxu1  ;;  %v12197_v12 = vadd.f32 %v12187_v60, %v5244_v59 }
 0xbb6   :  { %v12193_v13 = vadd.f32 %v12187_v60, %v5242_v63  ;;  %v5243_v47 = vadd.f32 %v5118_v21, %v11384_v5  ;;  %v13865_v21 = vld [vmem:[#allocation18_spill] sm:$0xff] }
 0xbb7   :  { %v12203_v10 = vadd.f32 %v12187_v60, %v5245_v16  ;;  %v5353_v22 = vmul.f32 %v12197_v12, %v12197_v12 }
 0xbb8   :  { %v12200_v58 = vadd.f32 %v12187_v60, %v5243_v47  ;;  %v5351_v20 = vmul.f32 %v12193_v13, %v12193_v13 }
 0xbb9   :  { %v5354_v34 = vmul.f32 %v12203_v10, %v12203_v10 }
 0xbba   :  { %v5314_v32 = vadd.f32 %v12200_v58, %v12193_v13  ;;  %v5352_v45 = vmul.f32 %v12200_v58, %v12200_v58  ;;  %v7802_v28 = vpop.f32.mrb[116].mxu1 }
 0xbbb   :  { %v5248_v5 = vadd.f32 %v7802_v28, %v11409_v40  ;;  %v5131_v52 = vpop.f32.mrb[117].mxu1 }
 0xbbc   :  { %v5315_v9 = vadd.f32 %v5314_v32, %v12197_v12  ;;  %v5383_v23 = vadd.f32 %v5352_v45, %v5351_v20  ;;  %v5246_v61 = vadd.f32 %v5131_v52, %v11404_v41  ;;  %v7803_v43 = vpop.f32.mrb[118].mxu1 }
 0xbbd   :  { %v5249_v44 = vadd.f32 %v7803_v43, %v11418_v48  ;;  %v5134_v37 = vpop.f32.mrb[119].mxu1  ;;  %v12225_v55 = vadd.f32 %v12187_v60, %v5248_v5  ;;  %v13866_v5 = vld [vmem:[#allocation20_spill] sm:$0xff] }
 0xbbe   :  { %v5384_v8 = vadd.f32 %v5383_v23, %v5353_v22  ;;  %v12220_v42 = vadd.f32 %v12187_v60, %v5246_v61  ;;  %v5316_v40 = vadd.f32 %v5315_v9, %v12203_v10  ;;  %v5247_v2 = vadd.f32 %v5134_v37, %v13855_v11  ;;  %v13867_v23 = vld [vmem:[#allocation19_spill] sm:$0xff] }
 0xbbf   :  { %v12234_v0 = vadd.f32 %v12187_v60, %v5249_v44  ;;  %v5357_v50 = vmul.f32 %v12225_v55, %v12225_v55 }
 0xbc0   :  { %v5317_v41 = vadd.f32 %v5316_v40, %v12220_v42  ;;  %v5355_v46 = vmul.f32 %v12220_v42, %v12220_v42  ;;  %v5385_v7 = vadd.f32 %v5384_v8, %v5354_v34  ;;  %v12231_v48 = vadd.f32 %v12187_v60, %v5247_v2  ;;  %v13869_v8 = vld [vmem:[#allocation21_spill] sm:$0xff] }
 0xbc1   :  { %v5358_v19 = vmul.f32 %v12234_v0, %v12234_v0 }
 0xbc2   :  { %13856 = vst [vmem:[#allocation13_spill] sm:$0xff] %v12231_v48  ;;  %v5386_v49 = vadd.f32 %v5385_v7, %v5355_v46  ;;  %v5318_v4 = vadd.f32 %v5317_v41, %v12231_v48  ;;  %v5356_v56 = vmul.f32 %v12231_v48, %v12231_v48  ;;  %v7806_v38 = vpop.f32.mrb[120].mxu1 }
 0xbc3   :  { %v5252_v14 = vadd.f32 %v7806_v38, %v13857_v31  ;;  %v5147_v25 = vpop.f32.mrb[121].mxu1 }
 0xbc4   :  { %v5319_v30 = vadd.f32 %v5318_v4, %v12225_v55  ;;  %v5387_v17 = vadd.f32 %v5386_v49, %v5356_v56  ;;  %v5250_v3 = vadd.f32 %v5147_v25, %v13858_v53  ;;  %v7807_v33 = vpop.f32.mrb[122].mxu1 }
 0xbc5   :  { %v5253_v6 = vadd.f32 %v7807_v33, %v13859_v15  ;;  %v5150_v35 = vpop.f32.mrb[123].mxu1  ;;  %v12253_v29 = vadd.f32 %v12187_v60, %v5252_v14  ;;  %v13873_v14 = vld [vmem:[#allocation22_spill] sm:$0xff] }
 0xbc6   :  { %v5388_v62 = vadd.f32 %v5387_v17, %v5357_v50  ;;  %v12248_v1 = vadd.f32 %v12187_v60, %v5250_v3  ;;  %v5320_v51 = vadd.f32 %v5319_v30, %v12234_v0  ;;  %v5251_v27 = vadd.f32 %v5150_v35, %v13861_v18  ;;  %v13874_v3 = vld [vmem:[#allocation24_spill] sm:$0xff] }
 0xbc7   :  { %13862 = vst [vmem:[#allocation16_spill] sm:$0xff] %v12253_v29  ;;  %v12262_v54 = vadd.f32 %v12187_v60, %v5253_v6  ;;  %v5361_v32 = vmul.f32 %v12253_v29, %v12253_v29  ;;  %v13875_v6 = vld [vmem:[#allocation23_spill] sm:$0xff] }
 0xbc8   :  { %13860 = vst [vmem:[#allocation14_spill] sm:$0xff] %v12248_v1  ;;  %v5321_v36 = vadd.f32 %v5320_v51, %v12248_v1  ;;  %v5359_v57 = vmul.f32 %v12248_v1, %v12248_v1  ;;  %v5389_v24 = vadd.f32 %v5388_v62, %v5358_v19  ;;  %v12259_v26 = vadd.f32 %v12187_v60, %v5251_v27 }
 0xbc9   :  { %13864 = vst [vmem:[#allocation17_spill] sm:$0xff] %v12262_v54  ;;  %v5362_v9 = vmul.f32 %v12262_v54, %v12262_v54 }
 0xbca   :  { %13863 = vst [vmem:[#allocation15_spill] sm:$0xff] %v12259_v26  ;;  %v5390_v59 = vadd.f32 %v5389_v24, %v5359_v57  ;;  %v5322_v63 = vadd.f32 %v5321_v36, %v12259_v26  ;;  %v5360_v39 = vmul.f32 %v12259_v26, %v12259_v26  ;;  %v7810_v16 = vpop.f32.mrb[124].mxu1  ;;  %v13877_v36 = vld [vmem:[#allocation25_spill] sm:$0xff] }
 0xbcb   :  { %v5256_v47 = vadd.f32 %v7810_v16, %v13865_v21  ;;  %v5163_v20 = vpop.f32.mrb[125].mxu1 }
 0xbcc   :  { %v5323_v45 = vadd.f32 %v5322_v63, %v12253_v29  ;;  %v5391_v28 = vadd.f32 %v5390_v59, %v5360_v39  ;;  %v5254_v52 = vadd.f32 %v5163_v20, %v13866_v5  ;;  %v7811_v22 = vpop.f32.mrb[126].mxu1 }
 0xbcd   :  { %v5257_v61 = vadd.f32 %v7811_v22, %v13867_v23  ;;  %v5166_v43 = vpop.f32.mrb[127].mxu1  ;;  %v12281_v11 = vadd.f32 %v12187_v60, %v5256_v47 }
 0xbce   :  { %v5392_v34 = vadd.f32 %v5391_v28, %v5361_v32  ;;  %v12276_v44 = vadd.f32 %v12187_v60, %v5254_v52  ;;  %v5324_v37 = vadd.f32 %v5323_v45, %v12262_v54  ;;  %v5255_v40 = vadd.f32 %v5166_v43, %v13869_v8  ;;  %v13881_v28 = vld [vmem:[#allocation26_spill] sm:$0xff]  ;;  %v13883_v8 = vld [vmem:[#allocation27_spill] sm:$0xff] }
 0xbcf   :  { %13870 = vst [vmem:[#allocation20_spill] sm:$0xff] %v12281_v11  ;;  %v12290_v49 = vadd.f32 %v12187_v60, %v5257_v61  ;;  %v5365_v30 = vmul.f32 %v12281_v11, %v12281_v11  ;;  %v13882_v61 = vld [vmem:[#allocation28_spill] sm:$0xff] }
 0xbd0   :  { %13868 = vst [vmem:[#allocation18_spill] sm:$0xff] %v12276_v44  ;;  %v5325_v2 = vadd.f32 %v5324_v37, %v12276_v44  ;;  %v5363_v41 = vmul.f32 %v12276_v44, %v12276_v44  ;;  %v5393_v46 = vadd.f32 %v5392_v34, %v5362_v9  ;;  %v12287_v7 = vadd.f32 %v12187_v60, %v5255_v40 }
 0xbd1   :  { %13872 = vst [vmem:[#allocation21_spill] sm:$0xff] %v12290_v49  ;;  %v5366_v15 = vmul.f32 %v12290_v49, %v12290_v49 }
 0xbd2   :  { %13871 = vst [vmem:[#allocation19_spill] sm:$0xff] %v12287_v7  ;;  %v5394_v4 = vadd.f32 %v5393_v46, %v5363_v41  ;;  %v5326_v56 = vadd.f32 %v5325_v2, %v12287_v7  ;;  %v5364_v38 = vmul.f32 %v12287_v7, %v12287_v7  ;;  %v7814_v31 = vpop.f32.mrb[128].mxu1 }
 0xbd3   :  { %v5260_v25 = vadd.f32 %v7814_v31, %v13873_v14  ;;  %v5179_v50 = vpop.f32.mrb[129].mxu1 }
 0xbd4   :  { %v5327_v17 = vadd.f32 %v5326_v56, %v12281_v11  ;;  %v5395_v53 = vadd.f32 %v5394_v4, %v5364_v38  ;;  %v5258_v33 = vadd.f32 %v5179_v50, %v13874_v3  ;;  %v7815_v19 = vpop.f32.mrb[130].mxu1  ;;  %v13885_v56 = vld [vmem:[#allocation29_spill] sm:$0xff] }
 0xbd5   :  { %v5261_v35 = vadd.f32 %v7815_v19, %v13875_v6  ;;  %v5182_v62 = vpop.f32.mrb[131].mxu1  ;;  %v12309_v24 = vadd.f32 %v12187_v60, %v5260_v25 }
 0xbd6   :  { %v5396_v51 = vadd.f32 %v5395_v53, %v5365_v30  ;;  %v12304_v18 = vadd.f32 %v12187_v60, %v5258_v33  ;;  %v5328_v27 = vadd.f32 %v5327_v17, %v12290_v49  ;;  %v5259_v57 = vadd.f32 %v5182_v62, %v13877_v36  ;;  %v13890_v36 = vld [vmem:[#allocation32_spill] sm:$0xff] }
 0xbd7   :  { %13878 = vst [vmem:[#allocation24_spill] sm:$0xff] %v12309_v24  ;;  %v12318_v21 = vadd.f32 %v12187_v60, %v5261_v35  ;;  %v5369_v22 = vmul.f32 %v12309_v24, %v12309_v24 }
 0xbd8   :  { %13876 = vst [vmem:[#allocation22_spill] sm:$0xff] %v12304_v18  ;;  %v5329_v59 = vadd.f32 %v5328_v27, %v12304_v18  ;;  %v5367_v63 = vmul.f32 %v12304_v18, %v12304_v18  ;;  %v5397_v39 = vadd.f32 %v5396_v51, %v5366_v15  ;;  %v12315_v16 = vadd.f32 %v12187_v60, %v5259_v57  ;;  %v13889_v15 = vld [vmem:[#allocation30_spill] sm:$0xff] }
 0xbd9   :  { %13880 = vst [vmem:[#allocation25_spill] sm:$0xff] %v12318_v21  ;;  %v5370_v37 = vmul.f32 %v12318_v21, %v12318_v21 }
 0xbda   :  { %13879 = vst [vmem:[#allocation23_spill] sm:$0xff] %v12315_v16  ;;  %v5398_v47 = vadd.f32 %v5397_v39, %v5367_v63  ;;  %v5330_v20 = vadd.f32 %v5329_v59, %v12315_v16  ;;  %v5368_v32 = vmul.f32 %v12315_v16, %v12315_v16  ;;  %v7818_v45 = vpop.f32.mrb[132].mxu1  ;;  %v13891_v39 = vld [vmem:[#allocation31_spill] sm:$0xff] }
 0xbdb   :  { %v5264_v5 = vadd.f32 %v7818_v45, %v13881_v28  ;;  %v5195_v52 = vpop.f32.mrb[133].mxu1 }
 0xbdc   :  { %v5331_v9 = vadd.f32 %v5330_v20, %v12309_v24  ;;  %v5399_v23 = vadd.f32 %v5398_v47, %v5368_v32  ;;  %v5262_v43 = vadd.f32 %v5195_v52, %v13882_v61  ;;  %v7819_v34 = vpop.f32.mrb[134].mxu1 }
 0xbdd   :  { %v5265_v40 = vadd.f32 %v7819_v34, %v13883_v8  ;;  %v5198_v2 = vpop.f32.mrb[135].mxu1  ;;  %v12337_v31 = vadd.f32 %v12187_v60, %v5264_v5  ;;  %v13893_v5 = vld [vmem:[#allocation33_spill] sm:$0xff] }
 0xbde   :  { %v5400_v41 = vadd.f32 %v5399_v23, %v5369_v22  ;;  %v12332_v46 = vadd.f32 %v12187_v60, %v5262_v43  ;;  %v5332_v4 = vadd.f32 %v5331_v9, %v12318_v21  ;;  %v5263_v38 = vadd.f32 %v5198_v2, %v13885_v56 }
 0xbdf   :  { %13886 = vst [vmem:[#allocation28_spill] sm:$0xff] %v12337_v31  ;;  %v12346_v17 = vadd.f32 %v12187_v60, %v5265_v40  ;;  %v5373_v62 = vmul.f32 %v12337_v31, %v12337_v31 }
 0xbe0   :  { %13884 = vst [vmem:[#allocation26_spill] sm:$0xff] %v12332_v46  ;;  %v5333_v14 = vadd.f32 %v5332_v4, %v12332_v46  ;;  %v5371_v25 = vmul.f32 %v12332_v46, %v12332_v46  ;;  %v5401_v50 = vadd.f32 %v5400_v41, %v5370_v37  ;;  %v12343_v30 = vadd.f32 %v12187_v60, %v5263_v38  ;;  %v13897_v41 = vld [vmem:[#allocation34_spill] sm:$0xff] }
 0xbe1   :  { %13888 = vst [vmem:[#allocation29_spill] sm:$0xff] %v12346_v17  ;;  %v5374_v63 = vmul.f32 %v12346_v17, %v12346_v17 }
 0xbe2   :  { %13887 = vst [vmem:[#allocation27_spill] sm:$0xff] %v12343_v30  ;;  %v5402_v53 = vadd.f32 %v5401_v50, %v5371_v25  ;;  %v5334_v3 = vadd.f32 %v5333_v14, %v12343_v30  ;;  %v5372_v33 = vmul.f32 %v12343_v30, %v12343_v30  ;;  %v7822_v19 = vpop.f32.mrb[136].mxu1  ;;  %v13898_v50 = vld [vmem:[#allocation36_spill] sm:$0xff] }
 0xbe3   :  { %v5268_v6 = vadd.f32 %v7822_v19, %v13889_v15  ;;  %v5211_v35 = vpop.f32.mrb[137].mxu1  ;;  %v13899_v19 = vld [vmem:[#allocation35_spill] sm:$0xff] }
 0xbe4   :  { %v5335_v51 = vadd.f32 %v5334_v3, %v12337_v31  ;;  %v5403_v27 = vadd.f32 %v5402_v53, %v5372_v33  ;;  %v5266_v57 = vadd.f32 %v5211_v35, %v13890_v36  ;;  %v7823_v59 = vpop.f32.mrb[138].mxu1 }
 0xbe5   :  { %v5269_v47 = vadd.f32 %v7823_v59, %v13891_v39  ;;  %v5214_v20 = vpop.f32.mrb[139].mxu1  ;;  %v12365_v22 = vadd.f32 %v12187_v60, %v5268_v6 }
 0xbe6   :  { %v5404_v32 = vadd.f32 %v5403_v27, %v5373_v62  ;;  %v12360_v45 = vadd.f32 %v12187_v60, %v5266_v57  ;;  %v5336_v28 = vadd.f32 %v5335_v51, %v12346_v17  ;;  %v5267_v52 = vadd.f32 %v5214_v20, %v13893_v5  ;;  %v13901_v27 = vld [vmem:[#allocation37_spill] sm:$0xff] }
 0xbe7   :  { %13894 = vst [vmem:[#allocation32_spill] sm:$0xff] %v12365_v22  ;;  %v12374_v34 = vadd.f32 %v12187_v60, %v5269_v47  ;;  %v5377_v38 = vmul.f32 %v12365_v22, %v12365_v22 }
 0xbe8   :  { %13892 = vst [vmem:[#allocation30_spill] sm:$0xff] %v12360_v45  ;;  %v5337_v9 = vadd.f32 %v5336_v28, %v12360_v45  ;;  %v5375_v23 = vmul.f32 %v12360_v45, %v12360_v45  ;;  %v5405_v61 = vadd.f32 %v5404_v32, %v5374_v63  ;;  %v12371_v43 = vadd.f32 %v12187_v60, %v5267_v52 }
 0xbe9   :  { %13896 = vst [vmem:[#allocation33_spill] sm:$0xff] %v12374_v34  ;;  %v5378_v33 = vmul.f32 %v12374_v34, %v12374_v34 }
 0xbea   :  { %13895 = vst [vmem:[#allocation31_spill] sm:$0xff] %v12371_v43  ;;  %v5406_v37 = vadd.f32 %v5405_v61, %v5375_v23  ;;  %v5338_v8 = vadd.f32 %v5337_v9, %v12371_v43  ;;  %v5376_v40 = vmul.f32 %v12371_v43, %v12371_v43  ;;  %v7826_v2 = vpop.f32.mrb[140].mxu1 }
 0xbeb   :  { %v5272_v4 = vadd.f32 %v7826_v2, %v13897_v41  ;;  %v5227_v56 = vpop.f32.mrb[141].mxu1 }
 0xbec   :  { %v5339_v14 = vadd.f32 %v5338_v8, %v12365_v22  ;;  %v5407_v25 = vadd.f32 %v5406_v37, %v5376_v40  ;;  %v5270_v53 = vadd.f32 %v5227_v56, %v13898_v50  ;;  %v7827_v3 = vpop.f32.mrb[142].mxu1 }
 0xbed   :  { %v5273_v15 = vadd.f32 %v7827_v3, %v13899_v19  ;;  %v5230_v6 = vpop.f32.mrb[143].mxu1  ;;  %v12393_v57 = vadd.f32 %v12187_v60, %v5272_v4 }
 0xbee   :  { %v5408_v35 = vadd.f32 %v5407_v25, %v5377_v38  ;;  %v12388_v62 = vadd.f32 %v12187_v60, %v5270_v53  ;;  %v5340_v51 = vadd.f32 %v5339_v14, %v12374_v34  ;;  %v5271_v36 = vadd.f32 %v5230_v6, %v13901_v27  ;;  %v12420_v27 = vld [vmem:[%s13501_s1 + $0x10] sm:$0x3] }
 0xbef   :  { %13902 = vst [vmem:[#allocation36_spill] sm:$0xff] %v12393_v57  ;;  %v12402_v32 = vadd.f32 %v12187_v60, %v5273_v15  ;;  %v5381_v52 = vmul.f32 %v12393_v57, %v12393_v57 }
 0xbf0   :  { %13900 = vst [vmem:[#allocation34_spill] sm:$0xff] %v12388_v62  ;;  %v5341_v59 = vadd.f32 %v5340_v51, %v12388_v62  ;;  %v5379_v63 = vmul.f32 %v12388_v62, %v12388_v62  ;;  %v5409_v39 = vadd.f32 %v5408_v35, %v5378_v33  ;;  %v12399_v47 = vadd.f32 %v12187_v60, %v5271_v36  ;;  %v12425_v36 = vld [vmem:[%s13502_s2 + $0x10] sm:$0x3] }
 0xbf1   :  { %13904 = vst [vmem:[#allocation37_spill] sm:$0xff] %v12402_v32  ;;  %v5382_v61 = vmul.f32 %v12402_v32, %v12402_v32 }
 0xbf2   :  { %13903 = vst [vmem:[#allocation35_spill] sm:$0xff] %v12399_v47  ;;  %v5410_v20 = vadd.f32 %v5409_v39, %v5379_v63  ;;  %v5342_v28 = vadd.f32 %v5341_v59, %v12399_v47  ;;  %v5380_v5 = vmul.f32 %v12399_v47, %v12399_v47  ;;  %v13905_v59 = vld [vmem:[#allocation12_spill] sm:$0xff] }
 0xbf3   :  { %v12429_v63 = vrot.slane %v12420_v27, %v13905_v59 }
 0xbf4   :  { %v5343_v9 = vadd.f32 %v5342_v28, %v12393_v57  ;;  %v5411_v23 = vadd.f32 %v5410_v20, %v5380_v5  ;;  %v12439_v5 = vrot.slane %v12425_v36, %v13905_v59 }
 0xbf6   :  { %v5344_v37 = vadd.f32 %v5343_v9, %v12402_v32  ;;  %v5412_v8 = vadd.f32 %v5411_v23, %v5381_v52 }
 0xbf8   :  { %v5345_v40 = vrot.slane %v5344_v37, 4  ;;  %v5413_v60 = vadd.f32 %v5412_v8, %v5382_v61 }
 0xbfa   :  { %v5346_v2 = vadd.f32 %v5345_v40, %v5344_v37  ;;  %v5414_v41 = vrot.slane %v5413_v60, 4 }
 0xbfc   :  { %v5347_v4 = vrot.slane %v5346_v2, 2  ;;  %v5415_v56 = vadd.f32 %v5414_v41, %v5413_v60 }
 0xbfe   :  { %v5348_v38 = vadd.f32 %v5347_v4, %v5346_v2  ;;  %v5416_v14 = vrot.slane %v5415_v56, 2 }
 0xc00   :  { %v5349_v25 = vrot.slane %v5348_v38, 1  ;;  %v5417_v50 = vadd.f32 %v5416_v14, %v5415_v56 }
 0xc02   :  { %v5350_v53 = vadd.f32 %v5349_v25, %v5348_v38  ;;  %v5418_v3 = vrot.slane %v5417_v50, 1 }
 0xc04   :  { %v5419_v33 = vadd.f32 %v5418_v3, %v5417_v50  ;;  %v12413_v19 = vmul.f32 0.00390625, %v5350_v53 }
 0xc06   :  { %v5421_v15 = vmul.f32 0.00390625, %v5419_v33  ;;  %v5422_v6 = vmul.f32 %v12413_v19, %v12413_v19  ;;  %v5424_v39 = vsub.f32 %v12193_v13, %v12413_v19  ;;  %v5425_v20 = vsub.f32 %v12200_v58, %v12413_v19 }
 0xc07   :  { %v5426_v28 = vsub.f32 %v12197_v12, %v12413_v19  ;;  %v5427_v52 = vsub.f32 %v12203_v10, %v12413_v19  ;;  %v5428_v9 = vsub.f32 %v12220_v42, %v12413_v19  ;;  %v5429_v23 = vsub.f32 %v12231_v48, %v12413_v19 }
 0xc08   :  { %v5423_v35 = vsub.f32 %v5421_v15, %v5422_v6  ;;  %v5430_v61 = vsub.f32 %v12225_v55, %v12413_v19  ;;  %v5431_v8 = vsub.f32 %v12234_v0, %v12413_v19  ;;  %v5432_v40 = vsub.f32 %v12248_v1, %v12413_v19 }
 0xc09   :  { %v5433_v60 = vsub.f32 %v12259_v26, %v12413_v19  ;;  %v5434_v2 = vsub.f32 %v12253_v29, %v12413_v19 }
 0xc0a   :  { %v5456_v51 = vadd.f32 1e-05, %v5423_v35  ;;  %v5435_v35 = vsub.f32 %v12262_v54, %v12413_v19 }
 0xc0c   :  { %8162 = vrsqrt.f32 %v5456_v51 }
 0xc16   :  { %v12449_v37 = vpop.eup %8162 }
 0xc17   :  { %v5460_v41 = vmul.f32 %v12449_v37, %v5426_v28  ;;  %v5461_v4 = vmul.f32 %v12449_v37, %v5427_v52  ;;  %v5458_v56 = vmul.f32 %v12449_v37, %v5424_v39  ;;  %v5459_v38 = vmul.f32 %v12449_v37, %v5425_v20 }
 0xc18   :  { %v5462_v14 = vmul.f32 %v12449_v37, %v5428_v9  ;;  %v5463_v25 = vmul.f32 %v12449_v37, %v5429_v23  ;;  %v5464_v50 = vmul.f32 %v12449_v37, %v5430_v61  ;;  %v5465_v53 = vmul.f32 %v12449_v37, %v5431_v8 }
 0xc19   :  { %v5500_v3 = vmul.f32 %v12429_v63, %v5460_v41  ;;  %v5501_v33 = vmul.f32 %v12429_v63, %v5461_v4  ;;  %v5498_v15 = vmul.f32 %v12429_v63, %v5458_v56  ;;  %v5499_v6 = vmul.f32 %v12429_v63, %v5459_v38 }
 0xc1a   :  { %v5502_v51 = vmul.f32 %v12429_v63, %v5462_v14  ;;  %v5503_v39 = vmul.f32 %v12429_v63, %v5463_v25  ;;  %v5504_v20 = vmul.f32 %v12429_v63, %v5464_v50  ;;  %v5436_v61 = vsub.f32 %v12276_v44, %v12413_v19 }
 0xc1b   :  { %v5518_v28 = vadd.f32 %v12439_v5, %v5498_v15  ;;  %v5519_v52 = vadd.f32 %v12439_v5, %v5499_v6  ;;  %v5520_v9 = vadd.f32 %v12439_v5, %v5500_v3  ;;  %v5521_v23 = vadd.f32 %v12439_v5, %v5501_v33 }
 0xc1c   :  { %v5522_v8 = vadd.f32 %v12439_v5, %v5502_v51  ;;  %v5523_v41 = vadd.f32 %v12439_v5, %v5503_v39  ;;  %v5505_v4 = vmul.f32 %v12429_v63, %v5465_v53  ;;  %v5437_v50 = vsub.f32 %v12287_v7, %v12413_v19 }
 0xc1d   :  { %v5534_v56 = vmax.f32 %v5518_v28, 0.0  ;;  %v5535_v38 = vmax.f32 %v5519_v52, 0.0  ;;  %v5536_v14 = vmax.f32 %v5520_v9, 0.0  ;;  %v5537_v25 = vmax.f32 %v5521_v23, 0.0 }
 0xc1e   :  { %v5538_v15 = vmax.f32 %v5522_v8, 0.0  ;;  %v5539_v3 = vmax.f32 %v5523_v41, 0.0  ;;  %v5524_v33 = vadd.f32 %v12439_v5, %v5504_v20  ;;  %v5466_v44 = vmul.f32 %v12449_v37, %v5432_v40 }
 0xc1f   :  { %v5623_v6 = vpack.c.bf16 %v5535_v38, %v5534_v56  ;;  %v5624_v26 = vpack.c.bf16 %v5537_v25, %v5536_v14  ;;  %v5467_v51 = vmul.f32 %v12449_v37, %v5433_v60  ;;  %v5525_v53 = vadd.f32 %v12439_v5, %v5505_v4 }
 0xc20   :  { %v5625_v39 = vpack.c.bf16 %v5539_v3, %v5538_v15  ;;  %v5468_v28 = vmul.f32 %v12449_v37, %v5434_v2  ;;  %v5469_v52 = vmul.f32 %v12449_v37, %v5435_v35  ;;  %v5506_v9 = vmul.f32 %v12429_v63, %v5466_v44 }
 0xc21   :  { %7844 = vmatprep.mubr.bf16.mxu0 %v5623_v6  ;;  %v5507_v23 = vmul.f32 %v12429_v63, %v5467_v51  ;;  %v5470_v20 = vmul.f32 %v12449_v37, %v5436_v61  ;;  %v5471_v8 = vmul.f32 %v12449_v37, %v5437_v50  ;;  %v5438_v40 = vsub.f32 %v12281_v11, %v12413_v19 }
 0xc22   :  { %7845 = vmatmul.mubr.bf16.vlgmr.msra.gmra.mrb[112].mxu0 %v5624_v26  ;;  %v5439_v60 = vsub.f32 %v12290_v49, %v12413_v19  ;;  %v5540_v2 = vmax.f32 %v5524_v33, 0.0  ;;  %v5526_v35 = vadd.f32 %v12439_v5, %v5506_v9  ;;  %v5541_v44 = vmax.f32 %v5525_v53, 0.0  ;;  %v13906_v33 = vld [vmem:[#allocation11_spill] sm:$0xff] }
 0xc23   :  { %7848 = vmatprep.mubr.bf16.mxu0 %v5625_v39  ;;  %v5527_v41 = vadd.f32 %v12439_v5, %v5507_v23  ;;  %v5508_v4 = vmul.f32 %v12429_v63, %v5468_v28  ;;  %v5509_v61 = vmul.f32 %v12429_v63, %v5469_v52  ;;  %v5510_v56 = vmul.f32 %v12429_v63, %v5470_v20 }
 0xc24   :  { %v5542_v38 = vmax.f32 %v5526_v35, 0.0  ;;  %v5511_v26 = vmul.f32 %v12429_v63, %v5471_v8  ;;  %v5472_v25 = vmul.f32 %v12449_v37, %v5438_v40  ;;  %v5473_v50 = vmul.f32 %v12449_v37, %v5439_v60 }
 0xc25   :  { %v5543_v14 = vmax.f32 %v5527_v41, 0.0  ;;  %v5440_v15 = vsub.f32 %v12304_v18, %v12413_v19  ;;  %v5441_v3 = vsub.f32 %v12315_v16, %v12413_v19  ;;  %v12515_v6 = vrot.slane %v12420_v27, %v13906_v33 }
 0xc26   :  { %v5626_v51 = vpack.c.bf16 %v5541_v44, %v5540_v2  ;;  %v5528_v39 = vadd.f32 %v12439_v5, %v5508_v4  ;;  %v5529_v53 = vadd.f32 %v12439_v5, %v5509_v61  ;;  %v5530_v28 = vadd.f32 %v12439_v5, %v5510_v56 }
 0xc27   :  { %v5627_v52 = vpack.c.bf16 %v5543_v14, %v5542_v38  ;;  %v5531_v9 = vadd.f32 %v12439_v5, %v5511_v26  ;;  %v5474_v23 = vmul.f32 %v12449_v37, %v5440_v15  ;;  %v5475_v20 = vmul.f32 %v12449_v37, %v5441_v3 }
 0xc28   :  { %v5512_v8 = vmul.f32 %v12429_v63, %v5472_v25  ;;  %v5513_v27 = vmul.f32 %v12429_v63, %v5473_v50  ;;  %v12527_v40 = vrot.slane %v12425_v36, %v13906_v33  ;;  %v5442_v60 = vsub.f32 %v12309_v24, %v12413_v19 }
 0xc29   :  { %v5443_v2 = vsub.f32 %v12318_v21, %v12413_v19  ;;  %v5544_v35 = vmax.f32 %v5528_v39, 0.0  ;;  %v5545_v41 = vmax.f32 %v5529_v53, 0.0  ;;  %v5546_v44 = vmax.f32 %v5530_v28, 0.0 }
 0xc2a   :  { %7849 = vmatmul.mubr.bf16.gmra.mrb[116].mxu0 %v5626_v51  ;;  %v5547_v4 = vmax.f32 %v5531_v9, 0.0  ;;  %v5554_v61 = vmul.f32 %v12515_v6, %v5474_v23  ;;  %v5555_v56 = vmul.f32 %v12515_v6, %v5475_v20  ;;  %v5444_v63 = vsub.f32 %v12332_v46, %v12413_v19 }
 0xc2b   :  { %7852 = vmatprep.mubr.bf16.mxu0 %v5627_v52  ;;  %v5445_v36 = vsub.f32 %v12343_v30, %v12413_v19  ;;  %v5532_v38 = vadd.f32 %v12439_v5, %v5512_v8  ;;  %v5533_v14 = vadd.f32 %v12439_v5, %v5513_v27  ;;  %v5476_v26 = vmul.f32 %v12449_v37, %v5442_v60 }
 0xc2c   :  { %v5477_v25 = vmul.f32 %v12449_v37, %v5443_v2  ;;  %v5628_v50 = vpack.c.bf16 %v5545_v41, %v5544_v35  ;;  %v5478_v15 = vmul.f32 %v12449_v37, %v5444_v63  ;;  %v5629_v51 = vpack.c.bf16 %v5547_v4, %v5546_v44 }
 0xc2d   :  { %v5479_v3 = vmul.f32 %v12449_v37, %v5445_v36  ;;  %v5574_v39 = vadd.f32 %v12527_v40, %v5554_v61  ;;  %v5575_v53 = vadd.f32 %v12527_v40, %v5555_v56  ;;  %v5454_v28 = vsub.f32 %v12393_v57, %v12413_v19 }
 0xc2e   :  { %v5548_v52 = vmax.f32 %v5532_v38, 0.0  ;;  %v5549_v5 = vmax.f32 %v5533_v14, 0.0  ;;  %v5446_v9 = vsub.f32 %v12337_v31, %v12413_v19  ;;  %v5556_v23 = vmul.f32 %v12515_v6, %v5476_v26 }
 0xc2f   :  { %v5557_v20 = vmul.f32 %v12515_v6, %v5477_v25  ;;  %v5455_v8 = vsub.f32 %v12402_v32, %v12413_v19  ;;  %v5558_v27 = vmul.f32 %v12515_v6, %v5478_v15  ;;  %v5559_v60 = vmul.f32 %v12515_v6, %v5479_v3 }
 0xc30   :  { %v5488_v2 = vmul.f32 %v12449_v37, %v5454_v28  ;;  %v5447_v35 = vsub.f32 %v12346_v17, %v12413_v19  ;;  %v5448_v41 = vsub.f32 %v12360_v45, %v12413_v19  ;;  %v5590_v44 = vmax.f32 %v5574_v39, 0.0 }
 0xc31   :  { %v5591_v4 = vmax.f32 %v5575_v53, 0.0  ;;  %v5449_v61 = vsub.f32 %v12371_v43, %v12413_v19  ;;  %v5630_v56 = vpack.c.bf16 %v5549_v5, %v5548_v52  ;;  %v5489_v63 = vmul.f32 %v12449_v37, %v5455_v8 }
 0xc32   :  { %7853 = vmatmul.mubr.bf16.gmra.mrb[120].mxu0 %v5628_v50  ;;  %v5568_v36 = vmul.f32 %v12515_v6, %v5488_v2  ;;  %v5576_v38 = vadd.f32 %v12527_v40, %v5556_v23  ;;  %v5577_v14 = vadd.f32 %v12527_v40, %v5557_v20  ;;  %v5480_v26 = vmul.f32 %v12449_v37, %v5446_v9 }
 0xc33   :  { %7856 = vmatprep.mubr.bf16.mxu0 %v5629_v51  ;;  %v5481_v25 = vmul.f32 %v12449_v37, %v5447_v35  ;;  %v5578_v50 = vadd.f32 %v12527_v40, %v5558_v27  ;;  %v5579_v15 = vadd.f32 %v12527_v40, %v5559_v60  ;;  %v5569_v3 = vmul.f32 %v12515_v6, %v5489_v63 }
 0xc34   :  { %v5588_v51 = vadd.f32 %v12527_v40, %v5568_v36  ;;  %v5631_v39 = vpack.c.bf16 %v5591_v4, %v5590_v44  ;;  %v5482_v53 = vmul.f32 %v12449_v37, %v5448_v41  ;;  %v5483_v28 = vmul.f32 %v12449_v37, %v5449_v61 }
 0xc35   :  { %v5589_v52 = vadd.f32 %v12527_v40, %v5569_v3  ;;  %v5592_v9 = vmax.f32 %v5576_v38, 0.0  ;;  %v5560_v23 = vmul.f32 %v12515_v6, %v5480_v26  ;;  %v5561_v20 = vmul.f32 %v12515_v6, %v5481_v25 }
 0xc36   :  { %v5604_v5 = vmax.f32 %v5588_v51, 0.0  ;;  %v5593_v8 = vmax.f32 %v5577_v14, 0.0  ;;  %v5594_v27 = vmax.f32 %v5578_v50, 0.0  ;;  %v5595_v60 = vmax.f32 %v5579_v15, 0.0 }
 0xc37   :  { %v5605_v2 = vmax.f32 %v5589_v52, 0.0  ;;  %v5562_v35 = vmul.f32 %v12515_v6, %v5482_v53  ;;  %v5563_v41 = vmul.f32 %v12515_v6, %v5483_v28  ;;  %v5450_v44 = vsub.f32 %v12365_v22, %v12413_v19 }
 0xc38   :  { %v5451_v4 = vsub.f32 %v12374_v34, %v12413_v19  ;;  %v5452_v63 = vsub.f32 %v12388_v62, %v12413_v19  ;;  %v5580_v36 = vadd.f32 %v12527_v40, %v5560_v23  ;;  %v5581_v38 = vadd.f32 %v12527_v40, %v5561_v20 }
 0xc39   :  { %v5638_v61 = vpack.c.bf16 %v5605_v2, %v5604_v5  ;;  %v5632_v14 = vpack.c.bf16 %v5593_v8, %v5592_v9  ;;  %v5633_v26 = vpack.c.bf16 %v5595_v60, %v5594_v27  ;;  %v5484_v25 = vmul.f32 %v12449_v37, %v5450_v44 }
 0xc3a   :  { %7857 = vmatmul.mubr.bf16.gmra.mrb[124].mxu0 %v5630_v56  ;;  %v5453_v56 = vsub.f32 %v12399_v47, %v12413_v19  ;;  %v5485_v50 = vmul.f32 %v12449_v37, %v5451_v4  ;;  %v5582_v15 = vadd.f32 %v12527_v40, %v5562_v35  ;;  %v5583_v3 = vadd.f32 %v12527_v40, %v5563_v41 }
 0xc3b   :  { %7860 = vmatprep.mubr.bf16.mxu0 %v5631_v39  ;;  %v5486_v51 = vmul.f32 %v12449_v37, %v5452_v63  ;;  %v5596_v19 = vmax.f32 %v5580_v36, 0.0  ;;  %v5597_v53 = vmax.f32 %v5581_v38, 0.0  ;;  %v5564_v28 = vmul.f32 %v12515_v6, %v5484_v25  ;;  %v8131_v38 = vld [vmem:[#allocation5 + $0x108] sm:$0xff]  }
 0xc3c   :  { %v5487_v39 = vmul.f32 %v12449_v37, %v5453_v56  ;;  %v5565_v52 = vmul.f32 %v12515_v6, %v5485_v50  ;;  %v5598_v5 = vmax.f32 %v5582_v15, 0.0  ;;  %v5599_v9 = vmax.f32 %v5583_v3, 0.0  ;;  %v8135_v25 = vld [vmem:[#allocation5 + $0x128] sm:$0xff]   ;;  %v8136_v50 = vld [vmem:[#allocation5 + $0x130] sm:$0xff]   ;;  %v8137_v15 = vld [vmem:[#allocation5 + $0x138] sm:$0xff]  }
 0xc3d   :  { %v5566_v23 = vmul.f32 %v12515_v6, %v5486_v51  ;;  %v5634_v8 = vpack.c.bf16 %v5597_v53, %v5596_v19  ;;  %v5584_v27 = vadd.f32 %v12527_v40, %v5564_v28 }
 0xc3e   :  { %v5567_v20 = vmul.f32 %v12515_v6, %v5487_v39  ;;  %v5585_v60 = vadd.f32 %v12527_v40, %v5565_v52  ;;  %v5635_v37 = vpack.c.bf16 %v5599_v9, %v5598_v5  ;;  %v8130_v6 = vld [vmem:[#allocation5 + $0x100] sm:$0xff]  }
 0xc3f   :  { %v5586_v2 = vadd.f32 %v12527_v40, %v5566_v23  ;;  %v5600_v41 = vmax.f32 %v5584_v27, 0.0  ;;  %7876 = vmatprep.subr.bf16.mxu1 %v8130_v6 }
 0xc40   :  { %v5587_v35 = vadd.f32 %v12527_v40, %v5567_v20  ;;  %v5601_v44 = vmax.f32 %v5585_v60, 0.0  ;;  %7877 = vmatpush3.bf16.msra.mxu1 %v8130_v6  ;;  %v8134_v40 = vld [vmem:[#allocation5 + $0x120] sm:$0xff]  }
 0xc41   :  { %v5602_v4 = vmax.f32 %v5586_v2, 0.0  ;;  %7878 = vmatprep.subr.bf16.mxu1 %v8131_v38 }
 0xc42   :  { %7861 = vmatmul.mubr.bf16.gmra.mrb[128].mxu0 %v5632_v14  ;;  %v5603_v56 = vmax.f32 %v5587_v35, 0.0  ;;  %v5636_v63 = vpack.c.bf16 %v5601_v44, %v5600_v41  ;;  %v8132_v14 = vld [vmem:[#allocation5 + $0x110] sm:$0xff]  }
 0xc43   :  { %7864 = vmatprep.mubr.bf16.mxu0 %v5633_v26  ;;  %v8133_v26 = vld [vmem:[#allocation5 + $0x118] sm:$0xff]  }
 0xc44   :  { %v5637_v36 = vpack.c.bf16 %v5603_v56, %v5602_v4  ;;  %7879 = vmatpush3.bf16.msra.mxu1 %v8131_v38 }
 0xc45   :  { %7880 = vmatprep.subr.bf16.mxu1 %v8132_v14 }
 0xc48   :  { %7881 = vmatpush3.bf16.msra.mxu1 %v8132_v14 }
 0xc49   :  { %7882 = vmatprep.subr.bf16.mxu1 %v8133_v26 }
 0xc4a   :  { %7865 = vmatmul.mubr.bf16.gmra.mrb[132].mxu0 %v5634_v8 }
 0xc4b   :  { %7868 = vmatprep.mubr.bf16.mxu0 %v5635_v37 }
 0xc4c   :  { %7883 = vmatpush3.bf16.msra.mxu1 %v8133_v26 }
 0xc4d   :  { %7884 = vmatprep.subr.bf16.mxu1 %v8134_v40 }
 0xc50   :  { %7885 = vmatpush3.bf16.msra.mxu1 %v8134_v40 }
 0xc51   :  { %7886 = vmatprep.subr.bf16.mxu1 %v8135_v25 }
 0xc52   :  { %7869 = vmatmul.mubr.bf16.gmra.mrb[136].mxu0 %v5636_v63 }
 0xc53   :  { %7872 = vmatprep.mubr.bf16.mxu0 %v5637_v36 }
 0xc54   :  { %7887 = vmatpush3.bf16.msra.mxu1 %v8135_v25 }
 0xc55   :  { %7888 = vmatprep.subr.bf16.mxu1 %v8136_v50 }
 0xc58   :  { %7889 = vmatpush3.bf16.msra.mxu1 %v8136_v50 }
 0xc59   :  { %7890 = vmatprep.subr.bf16.mxu1 %v8137_v15 }
 0xc5a   :  { %7873 = vmatmul.mubr.bf16.gmra.mrb[140].mxu0 %v5638_v61  ;;  %v12608_v61 = vld [vmem:[%s13506_s6 + $0x4] ss:$0 sm:$0xff] }
 0xc5c   :  { %7891 = vmatpush3.bf16.msra.mxu1 %v8137_v15 }
 0xcf5   :  { %v7846_v3 = vpop.f32.mrb[112].mxu0 }
 0xcf6   :  { %v5729_v51 = vpop.f32.mrb[113].mxu0  ;;  %v12614_v28 = vadd.f32 %v7846_v3, %v12608_v61 }
 0xcf7   :  { %v12611_v39 = vadd.f32 %v12608_v61, %v5729_v51  ;;  %v7847_v19 = vpop.f32.mrb[114].mxu0 }
 0xcf8   :  { %v5732_v53 = vpop.f32.mrb[115].mxu0  ;;  %v12622_v9 = vadd.f32 %v7847_v19, %v12608_v61  ;;  %v5895_v8 = vmul.f32 %v12614_v28, %v12614_v28 }
 0xcf9   :  { %v12617_v52 = vadd.f32 %v12608_v61, %v5732_v53  ;;  %v5893_v5 = vmul.f32 %v12611_v39, %v12611_v39 }
 0xcfa   :  { %v5896_v35 = vmul.f32 %v12622_v9, %v12622_v9 }
 0xcfb   :  { %v5856_v23 = vadd.f32 %v12617_v52, %v12611_v39  ;;  %v5894_v20 = vmul.f32 %v12617_v52, %v12617_v52 }
 0xcfd   :  { %v5857_v27 = vadd.f32 %v5856_v23, %v12614_v28  ;;  %v5925_v60 = vadd.f32 %v5894_v20, %v5893_v5  ;;  %v7850_v37 = vpop.f32.mrb[116].mxu0 }
 0xcfe   :  { %v5745_v2 = vpop.f32.mrb[117].mxu0  ;;  %v12638_v63 = vadd.f32 %v7850_v37, %v12608_v61 }
 0xcff   :  { %v5926_v41 = vadd.f32 %v5925_v60, %v5895_v8  ;;  %v12634_v44 = vadd.f32 %v12608_v61, %v5745_v2  ;;  %v5858_v4 = vadd.f32 %v5857_v27, %v12622_v9  ;;  %v7851_v56 = vpop.f32.mrb[118].mxu0 }
 0xd00   :  { %v5748_v36 = vpop.f32.mrb[119].mxu0  ;;  %v12647_v25 = vadd.f32 %v7851_v56, %v12608_v61  ;;  %v5899_v3 = vmul.f32 %v12638_v63, %v12638_v63 }
 0xd01   :  { %v5859_v6 = vadd.f32 %v5858_v4, %v12634_v44  ;;  %v5897_v38 = vmul.f32 %v12634_v44, %v12634_v44  ;;  %v5927_v14 = vadd.f32 %v5926_v41, %v5896_v35  ;;  %v12644_v26 = vadd.f32 %v12608_v61, %v5748_v36 }
 0xd02   :  { %v5900_v23 = vmul.f32 %v12647_v25, %v12647_v25 }
 0xd03   :  { %v5928_v40 = vadd.f32 %v5927_v14, %v5897_v38  ;;  %v5860_v50 = vadd.f32 %v5859_v6, %v12644_v26  ;;  %v5898_v15 = vmul.f32 %v12644_v26, %v12644_v26 }
 0xd05   :  { %v5861_v51 = vadd.f32 %v5860_v50, %v12638_v63  ;;  %v5929_v19 = vadd.f32 %v5928_v40, %v5898_v15  ;;  %v7854_v53 = vpop.f32.mrb[120].mxu0 }
 0xd06   :  { %v5761_v5 = vpop.f32.mrb[121].mxu0  ;;  %v12662_v37 = vadd.f32 %v7854_v53, %v12608_v61 }
 0xd07   :  { %v5930_v20 = vadd.f32 %v5929_v19, %v5899_v3  ;;  %v12658_v8 = vadd.f32 %v12608_v61, %v5761_v5  ;;  %v5862_v27 = vadd.f32 %v5861_v51, %v12647_v25  ;;  %v7855_v60 = vpop.f32.mrb[122].mxu0 }
 0xd08   :  { %v5764_v2 = vpop.f32.mrb[123].mxu0  ;;  %v12671_v6 = vadd.f32 %v7855_v60, %v12608_v61  ;;  %v5903_v40 = vmul.f32 %v12662_v37, %v12662_v37 }
 0xd09   :  { %v5863_v35 = vadd.f32 %v5862_v27, %v12658_v8  ;;  %v5901_v41 = vmul.f32 %v12658_v8, %v12658_v8  ;;  %v5931_v4 = vadd.f32 %v5930_v20, %v5900_v23  ;;  %v12668_v56 = vadd.f32 %v12608_v61, %v5764_v2 }
 0xd0a   :  { %v5904_v19 = vmul.f32 %v12671_v6, %v12671_v6 }
 0xd0b   :  { %v5932_v36 = vadd.f32 %v5931_v4, %v5901_v41  ;;  %v5864_v38 = vadd.f32 %v5863_v35, %v12668_v56  ;;  %v5902_v14 = vmul.f32 %v12668_v56, %v12668_v56 }
 0xd0d   :  { %v5865_v50 = vadd.f32 %v5864_v38, %v12662_v37  ;;  %v5933_v15 = vadd.f32 %v5932_v36, %v5902_v14  ;;  %v7858_v3 = vpop.f32.mrb[124].mxu0 }
 0xd0e   :  { %v5777_v51 = vpop.f32.mrb[125].mxu0  ;;  %v12686_v27 = vadd.f32 %v7858_v3, %v12608_v61 }
 0xd0f   :  { %v5934_v53 = vadd.f32 %v5933_v15, %v5903_v40  ;;  %v12682_v5 = vadd.f32 %v12608_v61, %v5777_v51  ;;  %v5866_v23 = vadd.f32 %v5865_v50, %v12671_v6  ;;  %v7859_v20 = vpop.f32.mrb[126].mxu0 }
 0xd10   :  { %v5780_v60 = vpop.f32.mrb[127].mxu0  ;;  %v12695_v38 = vadd.f32 %v7859_v20, %v12608_v61  ;;  %v5907_v50 = vmul.f32 %v12686_v27, %v12686_v27 }
 0xd11   :  { %v5867_v2 = vadd.f32 %v5866_v23, %v12682_v5  ;;  %v5905_v35 = vmul.f32 %v12682_v5, %v12682_v5  ;;  %v5935_v41 = vadd.f32 %v5934_v53, %v5904_v19  ;;  %v12692_v4 = vadd.f32 %v12608_v61, %v5780_v60 }
 0xd12   :  { %v5908_v53 = vmul.f32 %v12695_v38, %v12695_v38 }
 0xd13   :  { %v5936_v36 = vadd.f32 %v5935_v41, %v5905_v35  ;;  %v5868_v14 = vadd.f32 %v5867_v2, %v12692_v4  ;;  %v5906_v40 = vmul.f32 %v12692_v4, %v12692_v4 }
 0xd15   :  { %v5869_v15 = vadd.f32 %v5868_v14, %v12686_v27  ;;  %v5937_v3 = vadd.f32 %v5936_v36, %v5906_v40  ;;  %v7862_v51 = vpop.f32.mrb[128].mxu0 }
 0xd16   :  { %v5793_v19 = vpop.f32.mrb[129].mxu0  ;;  %v12710_v35 = vadd.f32 %v7862_v51, %v12608_v61 }
 0xd17   :  { %v5938_v23 = vadd.f32 %v5937_v3, %v5907_v50  ;;  %v12706_v20 = vadd.f32 %v12608_v61, %v5793_v19  ;;  %v5870_v60 = vadd.f32 %v5869_v15, %v12695_v38  ;;  %v7863_v2 = vpop.f32.mrb[130].mxu0 }
 0xd18   :  { %v5796_v41 = vpop.f32.mrb[131].mxu0  ;;  %v12719_v3 = vadd.f32 %v7863_v2, %v12608_v61  ;;  %v5911_v19 = vmul.f32 %v12710_v35, %v12710_v35 }
 0xd19   :  { %v5871_v47 = vadd.f32 %v5870_v60, %v12706_v20  ;;  %v5909_v36 = vmul.f32 %v12706_v20, %v12706_v20  ;;  %v5939_v14 = vadd.f32 %v5938_v23, %v5908_v53  ;;  %v12716_v40 = vadd.f32 %v12608_v61, %v5796_v41 }
 0xd1a   :  { %v5912_v23 = vmul.f32 %v12719_v3, %v12719_v3 }
 0xd1b   :  { %v5940_v50 = vadd.f32 %v5939_v14, %v5909_v36  ;;  %v5872_v15 = vadd.f32 %v5871_v47, %v12716_v40  ;;  %v5910_v51 = vmul.f32 %v12716_v40, %v12716_v40 }
 0xd1d   :  { %v5873_v60 = vadd.f32 %v5872_v15, %v12710_v35  ;;  %v5941_v32 = vadd.f32 %v5940_v50, %v5910_v51  ;;  %v7866_v62 = vpop.f32.mrb[132].mxu0 }
 0xd1e   :  { %v5809_v53 = vpop.f32.mrb[133].mxu0  ;;  %v12734_v14 = vadd.f32 %v7866_v62, %v12608_v61 }
 0xd1f   :  { %v5942_v41 = vadd.f32 %v5941_v32, %v5911_v19  ;;  %v12730_v2 = vadd.f32 %v12608_v61, %v5809_v53  ;;  %v5874_v47 = vadd.f32 %v5873_v60, %v12719_v3  ;;  %v7867_v36 = vpop.f32.mrb[134].mxu0 }
 0xd20   :  { %v5812_v57 = vpop.f32.mrb[135].mxu0  ;;  %v12743_v19 = vadd.f32 %v7867_v36, %v12608_v61  ;;  %v5915_v53 = vmul.f32 %v12734_v14, %v12734_v14 }
 0xd21   :  { %v5875_v43 = vadd.f32 %v5874_v47, %v12730_v2  ;;  %v5913_v50 = vmul.f32 %v12730_v2, %v12730_v2  ;;  %v5943_v15 = vadd.f32 %v5942_v41, %v5912_v23  ;;  %v12740_v51 = vadd.f32 %v12608_v61, %v5812_v57 }
 0xd22   :  { %v5916_v57 = vmul.f32 %v12743_v19, %v12743_v19 }
 0xd23   :  { %v5944_v32 = vadd.f32 %v5943_v15, %v5913_v50  ;;  %v5876_v60 = vadd.f32 %v5875_v43, %v12740_v51  ;;  %v5914_v62 = vmul.f32 %v12740_v51, %v12740_v51 }
 0xd25   :  { %v5877_v47 = vadd.f32 %v5876_v60, %v12734_v14  ;;  %v5945_v34 = vadd.f32 %v5944_v32, %v5914_v62  ;;  %v7870_v45 = vpop.f32.mrb[136].mxu0 }
 0xd26   :  { %v5825_v23 = vpop.f32.mrb[137].mxu0  ;;  %v12758_v15 = vadd.f32 %v7870_v45, %v12608_v61 }
 0xd27   :  { %v5946_v41 = vadd.f32 %v5945_v34, %v5915_v53  ;;  %v12754_v36 = vadd.f32 %v12608_v61, %v5825_v23  ;;  %v5878_v43 = vadd.f32 %v5877_v47, %v12743_v19  ;;  %v7871_v50 = vpop.f32.mrb[138].mxu0 }
 0xd28   :  { %v5828_v22 = vpop.f32.mrb[139].mxu0  ;;  %v12767_v53 = vadd.f32 %v7871_v50, %v12608_v61  ;;  %v5919_v23 = vmul.f32 %v12758_v15, %v12758_v15 }
 0xd29   :  { %v5879_v30 = vadd.f32 %v5878_v43, %v12754_v36  ;;  %v5917_v32 = vmul.f32 %v12754_v36, %v12754_v36  ;;  %v5947_v60 = vadd.f32 %v5946_v41, %v5916_v57  ;;  %v12764_v62 = vadd.f32 %v12608_v61, %v5828_v22 }
 0xd2a   :  { %v5920_v22 = vmul.f32 %v12767_v53, %v12767_v53 }
 0xd2b   :  { %v5948_v34 = vadd.f32 %v5947_v60, %v5917_v32  ;;  %v5880_v47 = vadd.f32 %v5879_v30, %v12764_v62  ;;  %v5918_v45 = vmul.f32 %v12764_v62, %v12764_v62 }
 0xd2d   :  { %v5881_v43 = vadd.f32 %v5880_v47, %v12758_v15  ;;  %v5949_v17 = vadd.f32 %v5948_v34, %v5918_v45  ;;  %v7874_v46 = vpop.f32.mrb[140].mxu0 }
 0xd2e   :  { %v5841_v57 = vpop.f32.mrb[141].mxu0  ;;  %v12782_v60 = vadd.f32 %v7874_v46, %v12608_v61 }
 0xd2f   :  { %v5950_v41 = vadd.f32 %v5949_v17, %v5919_v23  ;;  %v12778_v50 = vadd.f32 %v12608_v61, %v5841_v57  ;;  %v5882_v30 = vadd.f32 %v5881_v43, %v12767_v53  ;;  %v7875_v32 = vpop.f32.mrb[142].mxu0 }
 0xd30   :  { %v5844_v31 = vpop.f32.mrb[143].mxu0  ;;  %v12791_v23 = vadd.f32 %v7875_v32, %v12608_v61  ;;  %v5923_v57 = vmul.f32 %v12782_v60, %v12782_v60 }
 0xd31   :  { %v5883_v16 = vadd.f32 %v5882_v30, %v12778_v50  ;;  %v5921_v34 = vmul.f32 %v12778_v50, %v12778_v50  ;;  %v5951_v47 = vadd.f32 %v5950_v41, %v5920_v22  ;;  %v12788_v45 = vadd.f32 %v12608_v61, %v5844_v31 }
 0xd32   :  { %v5924_v22 = vmul.f32 %v12791_v23, %v12791_v23 }
 0xd33   :  { %v5952_v17 = vadd.f32 %v5951_v47, %v5921_v34  ;;  %v5884_v43 = vadd.f32 %v5883_v16, %v12788_v45  ;;  %v5922_v46 = vmul.f32 %v12788_v45, %v12788_v45 }
 0xd35   :  { %v5885_v30 = vadd.f32 %v5884_v43, %v12782_v60  ;;  %v5953_v21 = vadd.f32 %v5952_v17, %v5922_v46 }
 0xd37   :  { %v5886_v31 = vadd.f32 %v5885_v30, %v12791_v23  ;;  %v5954_v41 = vadd.f32 %v5953_v21, %v5923_v57 }
 0xd39   :  { %v5887_v34 = vrot.slane %v5886_v31, 4  ;;  %v5955_v61 = vadd.f32 %v5954_v41, %v5924_v22 }
 0xd3b   :  { %v5888_v32 = vadd.f32 %v5887_v34, %v5886_v31  ;;  %v5956_v47 = vrot.slane %v5955_v61, 4 }
 0xd3d   :  { %v5889_v16 = vrot.slane %v5888_v32, 2  ;;  %v5957_v18 = vadd.f32 %v5956_v47, %v5955_v61 }
 0xd3f   :  { %v5890_v24 = vadd.f32 %v5889_v16, %v5888_v32  ;;  %v5958_v7 = vrot.slane %v5957_v18, 2 }
 0xd41   :  { %v5891_v49 = vrot.slane %v5890_v24, 1  ;;  %v5959_v11 = vadd.f32 %v5958_v7, %v5957_v18 }
 0xd43   :  { %v5892_v54 = vadd.f32 %v5891_v49, %v5890_v24  ;;  %v5960_v1 = vrot.slane %v5959_v11, 1 }
 0xd45   :  { %v5961_v43 = vadd.f32 %v5960_v1, %v5959_v11  ;;  %v12802_v17 = vmul.f32 0.00390625, %v5892_v54 }
 0xd47   :  { %v5963_v46 = vmul.f32 0.00390625, %v5961_v43  ;;  %v5964_v30 = vmul.f32 %v12802_v17, %v12802_v17  ;;  %v5995_v21 = vsub.f32 %v12788_v45, %v12802_v17  ;;  %v5975_v22 = vsub.f32 %v12668_v56, %v12802_v17 }
 0xd48   :  { %v5977_v31 = vsub.f32 %v12671_v6, %v12802_v17  ;;  %v5978_v1 = vsub.f32 %v12682_v5, %v12802_v17  ;;  %v5979_v54 = vsub.f32 %v12692_v4, %v12802_v17  ;;  %v5980_v11 = vsub.f32 %v12686_v27, %v12802_v17 }
 0xd49   :  { %v5965_v57 = vsub.f32 %v5963_v46, %v5964_v30  ;;  %v5981_v49 = vsub.f32 %v12695_v38, %v12802_v17  ;;  %v5982_v18 = vsub.f32 %v12706_v20, %v12802_v17  ;;  %v5983_v24 = vsub.f32 %v12716_v40, %v12802_v17 }
 0xd4a   :  { %v5984_v56 = vsub.f32 %v12710_v35, %v12802_v17  ;;  %v5985_v6 = vsub.f32 %v12719_v3, %v12802_v17  ;;  %v5986_v5 = vsub.f32 %v12730_v2, %v12802_v17  ;;  %v5987_v27 = vsub.f32 %v12740_v51, %v12802_v17 }
 0xd4b   :  { %v5998_v7 = vadd.f32 1e-05, %v5965_v57  ;;  %v5988_v4 = vsub.f32 %v12734_v14, %v12802_v17  ;;  %v5989_v38 = vsub.f32 %v12743_v19, %v12802_v17  ;;  %v5990_v20 = vsub.f32 %v12754_v36, %v12802_v17  ;;  %v7157_v19 = vld [vmem:[%s13501_s1 + $0x12] sm:$0x3] }
 0xd4c   :  { %v5991_v35 = vsub.f32 %v12764_v62, %v12802_v17  ;;  %v5992_v40 = vsub.f32 %v12758_v15, %v12802_v17  ;;  %v5993_v3 = vsub.f32 %v12767_v53, %v12802_v17  ;;  %v5994_v2 = vsub.f32 %v12778_v50, %v12802_v17  ;;  %v7158_v36 = vld [vmem:[%s13502_s2 + $0x12] sm:$0x3] }
 0xd4d   :  { %8164 = vrsqrt.f32 %v5998_v7  ;;  %v5996_v14 = vsub.f32 %v12782_v60, %v12802_v17  ;;  %v5997_v51 = vsub.f32 %v12791_v23, %v12802_v17  ;;  %v12857_v15 = vrot.slane %v7157_v19, %v13905_v59 }
 0xd4e   :  { %v12860_v62 = vrot.slane %v7158_v36, %v13905_v59  ;;  %v5966_v53 = vsub.f32 %v12611_v39, %v12802_v17  ;;  %v5967_v50 = vsub.f32 %v12617_v52, %v12802_v17  ;;  %v12867_v60 = vrot.slane %v7157_v19, %v13906_v33 }
 0xd4f   :  { %v12870_v45 = vrot.slane %v7158_v36, %v13906_v33  ;;  %v5968_v23 = vsub.f32 %v12614_v28, %v12802_v17  ;;  %v5969_v41 = vsub.f32 %v12622_v9, %v12802_v17  ;;  %v5970_v34 = vsub.f32 %v12634_v44, %v12802_v17 }
 0xd50   :  { %v5971_v39 = vsub.f32 %v12644_v26, %v12802_v17  ;;  %v5972_v52 = vsub.f32 %v12638_v63, %v12802_v17  ;;  %v5973_v32 = vsub.f32 %v12647_v25, %v12802_v17  ;;  %v5974_v47 = vsub.f32 %v12658_v8, %v12802_v17 }
 0xd51   :  { %v5976_v28 = vsub.f32 %v12662_v37, %v12802_v17 }
 0xd57   :  { %v8165_v61 = vpop.eup %8164 }
 0xd58   :  { %v12888_v9 = vmul.f32 %v8165_v61, %v5995_v21  ;;  %v6000_v16 = vmul.f32 %v8165_v61, %v5966_v53  ;;  %v6001_v44 = vmul.f32 %v8165_v61, %v5967_v50  ;;  %v6002_v43 = vmul.f32 %v8165_v61, %v5968_v23 }
 0xd59   :  { %v6003_v46 = vmul.f32 %v8165_v61, %v5969_v41  ;;  %v6004_v26 = vmul.f32 %v8165_v61, %v5970_v34  ;;  %v6005_v30 = vmul.f32 %v8165_v61, %v5971_v39  ;;  %v6006_v57 = vmul.f32 %v8165_v61, %v5972_v52 }
 0xd5a   :  { %v6007_v7 = vmul.f32 %v8165_v61, %v5973_v32  ;;  %v6008_v63 = vmul.f32 %v8165_v61, %v5974_v47  ;;  %v6009_v19 = vmul.f32 %v8165_v61, %v5975_v22  ;;  %v6010_v36 = vmul.f32 %v8165_v61, %v5976_v28 }
 0xd5b   :  { %v6011_v25 = vmul.f32 %v8165_v61, %v5977_v31  ;;  %v6012_v33 = vmul.f32 %v8165_v61, %v5978_v1  ;;  %v6013_v59 = vmul.f32 %v8165_v61, %v5979_v54  ;;  %v6014_v8 = vmul.f32 %v8165_v61, %v5980_v11 }
 0xd5c   :  { %v6015_v29 = vmul.f32 %v8165_v61, %v5981_v49  ;;  %v12890_v48 = vmul.f32 %v8165_v61, %v5982_v18  ;;  %v12892_v37 = vmul.f32 %v8165_v61, %v5983_v24  ;;  %v12894_v17 = vmul.f32 %v8165_v61, %v5984_v56 }
 0xd5d   :  { %v12896_v21 = vmul.f32 %v8165_v61, %v5985_v6  ;;  %v12898_v53 = vmul.f32 %v8165_v61, %v5986_v5  ;;  %v12900_v50 = vmul.f32 %v8165_v61, %v5987_v27  ;;  %v12902_v23 = vmul.f32 %v8165_v61, %v5988_v4 }
 0xd5e   :  { %v12904_v22 = vmul.f32 %v8165_v61, %v5989_v38  ;;  %v12906_v31 = vmul.f32 %v8165_v61, %v5990_v20  ;;  %v12908_v1 = vmul.f32 %v8165_v61, %v5991_v35  ;;  %v12910_v54 = vmul.f32 %v8165_v61, %v5992_v40 }
 0xd5f   :  { %v12912_v11 = vmul.f32 %v8165_v61, %v5993_v3  ;;  %v12914_v49 = vmul.f32 %v8165_v61, %v5994_v2  ;;  %v12916_v18 = vmul.f32 %v8165_v61, %v5996_v14  ;;  %v12918_v24 = vmul.f32 %v8165_v61, %v5997_v51 }
 0xd60   :  { %v6042_v56 = vmul.f32 %v12857_v15, %v6002_v43  ;;  %v6043_v6 = vmul.f32 %v12857_v15, %v6003_v46  ;;  %v6040_v5 = vmul.f32 %v12857_v15, %v6000_v16  ;;  %v6041_v27 = vmul.f32 %v12857_v15, %v6001_v44 }
 0xd61   :  { %v6044_v4 = vmul.f32 %v12857_v15, %v6004_v26  ;;  %v6045_v38 = vmul.f32 %v12857_v15, %v6005_v30  ;;  %v6046_v20 = vmul.f32 %v12857_v15, %v6006_v57  ;;  %v6047_v35 = vmul.f32 %v12857_v15, %v6007_v7 }
 0xd62   :  { %v6062_v40 = vadd.f32 %v12860_v62, %v6042_v56  ;;  %v6063_v3 = vadd.f32 %v12860_v62, %v6043_v6  ;;  %v6060_v2 = vadd.f32 %v12860_v62, %v6040_v5  ;;  %v6061_v14 = vadd.f32 %v12860_v62, %v6041_v27 }
 0xd63   :  { %v6064_v51 = vadd.f32 %v12860_v62, %v6044_v4  ;;  %v6065_v41 = vadd.f32 %v12860_v62, %v6045_v38  ;;  %v6066_v34 = vadd.f32 %v12860_v62, %v6046_v20  ;;  %v6067_v39 = vadd.f32 %v12860_v62, %v6047_v35 }
 0xd64   :  { %v6078_v61 = vmax.f32 %v6062_v40, 0.0  ;;  %v6079_v52 = vmax.f32 %v6063_v3, 0.0  ;;  %v6076_v32 = vmax.f32 %v6060_v2, 0.0  ;;  %v6077_v47 = vmax.f32 %v6061_v14, 0.0 }
 0xd65   :  { %v6080_v28 = vmax.f32 %v6064_v51, 0.0  ;;  %v6081_v16 = vmax.f32 %v6065_v41, 0.0  ;;  %v6082_v44 = vmax.f32 %v6066_v34, 0.0  ;;  %v6083_v43 = vmax.f32 %v6067_v39, 0.0 }
 0xd66   :  { %v6165_v46 = vpack.c.bf16 %v6077_v47, %v6076_v32  ;;  %v6166_v26 = vpack.c.bf16 %v6079_v52, %v6078_v61  ;;  %v6048_v30 = vmul.f32 %v12857_v15, %v6008_v63  ;;  %v6049_v57 = vmul.f32 %v12857_v15, %v6009_v19 }
 0xd67   :  { %v6167_v7 = vpack.c.bf16 %v6081_v16, %v6080_v28  ;;  %v6168_v56 = vpack.c.bf16 %v6083_v43, %v6082_v44  ;;  %v6050_v6 = vmul.f32 %v12857_v15, %v6010_v36  ;;  %v6051_v5 = vmul.f32 %v12857_v15, %v6011_v25 }
 0xd68   :  { %7892 = vmatprep.mubr.bf16.mxu1 %v6165_v46  ;;  %v6068_v27 = vadd.f32 %v12860_v62, %v6048_v30  ;;  %v6069_v4 = vadd.f32 %v12860_v62, %v6049_v57  ;;  %v6052_v38 = vmul.f32 %v12857_v15, %v6012_v33  ;;  %v6053_v20 = vmul.f32 %v12857_v15, %v6013_v59 }
 0xd69   :  { %7893 = vmatmul.mubr.bf16.vlgmr.msra.gmra.mrb[144].mxu1 %v6166_v26  ;;  %v6070_v63 = vadd.f32 %v12860_v62, %v6050_v6  ;;  %v6071_v19 = vadd.f32 %v12860_v62, %v6051_v5  ;;  %v6054_v35 = vmul.f32 %v12857_v15, %v6014_v8  ;;  %v6055_v36 = vmul.f32 %v12857_v15, %v6015_v29 }
 0xd6a   :  { %7896 = vmatprep.mubr.bf16.mxu1 %v6167_v7  ;;  %v6084_v25 = vmax.f32 %v6068_v27, 0.0  ;;  %v6085_v40 = vmax.f32 %v6069_v4, 0.0  ;;  %v6072_v3 = vadd.f32 %v12860_v62, %v6052_v38  ;;  %v6073_v2 = vadd.f32 %v12860_v62, %v6053_v20 }
 0xd6b   :  { %v6086_v14 = vmax.f32 %v6070_v63, 0.0  ;;  %v6087_v33 = vmax.f32 %v6071_v19, 0.0  ;;  %v6074_v59 = vadd.f32 %v12860_v62, %v6054_v35  ;;  %v6075_v51 = vadd.f32 %v12860_v62, %v6055_v36 }
 0xd6c   :  { %v6169_v41 = vpack.c.bf16 %v6085_v40, %v6084_v25  ;;  %v6088_v34 = vmax.f32 %v6072_v3, 0.0  ;;  %v6089_v39 = vmax.f32 %v6073_v2, 0.0  ;;  %v6096_v8 = vmul.f32 %v12867_v60, %v12890_v48 }
 0xd6d   :  { %v6170_v29 = vpack.c.bf16 %v6087_v33, %v6086_v14  ;;  %v6090_v15 = vmax.f32 %v6074_v59, 0.0  ;;  %v6091_v61 = vmax.f32 %v6075_v51, 0.0  ;;  %v6097_v52 = vmul.f32 %v12867_v60, %v12892_v37 }
 0xd6e   :  { %v6171_v32 = vpack.c.bf16 %v6089_v39, %v6088_v34  ;;  %v6116_v47 = vadd.f32 %v12870_v45, %v6096_v8  ;;  %v6098_v28 = vmul.f32 %v12867_v60, %v12894_v17  ;;  %v6099_v62 = vmul.f32 %v12867_v60, %v12896_v21 }
 0xd6f   :  { %v6172_v16 = vpack.c.bf16 %v6091_v61, %v6090_v15  ;;  %v6117_v44 = vadd.f32 %v12870_v45, %v6097_v52  ;;  %v6100_v48 = vmul.f32 %v12867_v60, %v12898_v53  ;;  %v6101_v43 = vmul.f32 %v12867_v60, %v12900_v50 }
 0xd70   :  { %v6132_v46 = vmax.f32 %v6116_v47, 0.0  ;;  %v6118_v37 = vadd.f32 %v12870_v45, %v6098_v28  ;;  %v6119_v26 = vadd.f32 %v12870_v45, %v6099_v62  ;;  %v6102_v17 = vmul.f32 %v12867_v60, %v12902_v23 }
 0xd71   :  { %7897 = vmatmul.mubr.bf16.gmra.mrb[148].mxu1 %v6168_v56  ;;  %v6133_v30 = vmax.f32 %v6117_v44, 0.0  ;;  %v6120_v21 = vadd.f32 %v12870_v45, %v6100_v48  ;;  %v6121_v57 = vadd.f32 %v12870_v45, %v6101_v43  ;;  %v6103_v53 = vmul.f32 %v12867_v60, %v12904_v22  ;;  %v8144_v44 = vld [vmem:[%s13509_s9 + $0x30] sm:$0xff]   ;;  %v8145_v48 = vld [vmem:[%s13509_s9 + $0x38] sm:$0xff]  }
 0xd72   :  { %7900 = vmatprep.mubr.bf16.mxu1 %v6169_v41  ;;  %v6134_v7 = vmax.f32 %v6118_v37, 0.0  ;;  %v6135_v50 = vmax.f32 %v6119_v26, 0.0  ;;  %v6122_v6 = vadd.f32 %v12870_v45, %v6102_v17  ;;  %v6104_v5 = vmul.f32 %v12867_v60, %v12906_v31 }
 0xd73   :  { %v6173_v27 = vpack.c.bf16 %v6133_v30, %v6132_v46  ;;  %v6136_v4 = vmax.f32 %v6120_v21, 0.0  ;;  %v6137_v23 = vmax.f32 %v6121_v57, 0.0  ;;  %v6123_v56 = vadd.f32 %v12870_v45, %v6103_v53  ;;  %v13027_v46 = vld [vmem:[%s13508_s8 + $0x4] ss:$0 sm:$0xff] }
 0xd74   :  { %v6174_v38 = vpack.c.bf16 %v6135_v50, %v6134_v7  ;;  %v6138_v20 = vmax.f32 %v6122_v6, 0.0  ;;  %v6105_v63 = vmul.f32 %v12867_v60, %v12908_v1  ;;  %v6124_v22 = vadd.f32 %v12870_v45, %v6104_v5 }
 0xd75   :  { %v6175_v19 = vpack.c.bf16 %v6137_v23, %v6136_v4  ;;  %v6139_v35 = vmax.f32 %v6123_v56, 0.0  ;;  %v6106_v36 = vmul.f32 %v12867_v60, %v12910_v54  ;;  %v6107_v31 = vmul.f32 %v12867_v60, %v12912_v11 }
 0xd76   :  { %v6125_v25 = vadd.f32 %v12870_v45, %v6105_v63  ;;  %v6140_v40 = vmax.f32 %v6124_v22, 0.0  ;;  %v6108_v3 = vmul.f32 %v12867_v60, %v12914_v49  ;;  %v6109_v2 = vmul.f32 %v12867_v60, %v12888_v9 }
 0xd77   :  { %v6176_v1 = vpack.c.bf16 %v6139_v35, %v6138_v20  ;;  %v6126_v14 = vadd.f32 %v12870_v45, %v6106_v36  ;;  %v6127_v33 = vadd.f32 %v12870_v45, %v6107_v31  ;;  %v6110_v54 = vmul.f32 %v12867_v60, %v12916_v18 }
 0xd78   :  { %v6141_v59 = vmax.f32 %v6125_v25, 0.0  ;;  %v6128_v11 = vadd.f32 %v12870_v45, %v6108_v3  ;;  %v6129_v51 = vadd.f32 %v12870_v45, %v6109_v2  ;;  %v6111_v41 = vmul.f32 %v12867_v60, %v12918_v24  ;;  %v8138_v60 = vld [vmem:[%s13509_s9] sm:$0xff]   ;;  %v8140_v24 = vld [vmem:[%s13509_s9 + $0x10] sm:$0xff]  }
 0xd79   :  { %7901 = vmatmul.mubr.bf16.gmra.mrb[152].mxu1 %v6170_v29  ;;  %v6142_v49 = vmax.f32 %v6126_v14, 0.0  ;;  %v6143_v34 = vmax.f32 %v6127_v33, 0.0  ;;  %v6130_v9 = vadd.f32 %v12870_v45, %v6110_v54  ;;  %7924 = vmatprep.subr.bf16.mxu0 %v8138_v60  ;;  %v8141_v29 = vld [vmem:[%s13509_s9 + $0x18] sm:$0xff]   ;;  %v13907_v25 = vld [vmem:[#allocation13_spill] sm:$0xff] }
 0xd7a   :  { %7904 = vmatprep.mubr.bf16.mxu1 %v6171_v32  ;;  %v6177_v39 = vpack.c.bf16 %v6141_v59, %v6140_v40  ;;  %v6144_v8 = vmax.f32 %v6128_v11, 0.0  ;;  %v6145_v15 = vmax.f32 %v6129_v51, 0.0  ;;  %v6131_v61 = vadd.f32 %v12870_v45, %v6111_v41  ;;  %7925 = vmatpush3.bf16.msra.mxu0 %v8138_v60  ;;  %v8139_v45 = vld [vmem:[%s13509_s9 + $0x8] sm:$0xff]   ;;  %v8142_v32 = vld [vmem:[%s13509_s9 + $0x20] sm:$0xff]   ;;  %v13908_v51 = vld [vmem:[#allocation16_spill] sm:$0xff] }
 0xd7b   :  { %v6178_v18 = vpack.c.bf16 %v6143_v34, %v6142_v49  ;;  %v6146_v52 = vmax.f32 %v6130_v9, 0.0  ;;  %7926 = vmatprep.subr.bf16.mxu0 %v8139_v45 }
 0xd7c   :  { %v6179_v47 = vpack.c.bf16 %v6145_v15, %v6144_v8  ;;  %v6147_v28 = vmax.f32 %v6131_v61, 0.0  ;;  %v13909_v8 = vld [vmem:[#allocation14_spill] sm:$0xff] }
 0xd7e   :  { %v6180_v62 = vpack.c.bf16 %v6147_v28, %v6146_v52  ;;  %7927 = vmatpush3.bf16.msra.mxu0 %v8139_v45  ;;  %v13910_v52 = vld [vmem:[#allocation17_spill] sm:$0xff] }
 0xd7f   :  { %7928 = vmatprep.subr.bf16.mxu0 %v8140_v24 }
 0xd81   :  { %7905 = vmatmul.mubr.bf16.gmra.mrb[156].mxu1 %v6172_v16  ;;  %v8143_v16 = vld [vmem:[%s13509_s9 + $0x28] sm:$0xff]  }
 0xd82   :  { %7908 = vmatprep.mubr.bf16.mxu1 %v6173_v27  ;;  %7929 = vmatpush3.bf16.msra.mxu0 %v8140_v24  ;;  %v13911_v24 = vld [vmem:[#allocation15_spill] sm:$0xff] }
 0xd83   :  { %7930 = vmatprep.subr.bf16.mxu0 %v8141_v29 }
 0xd86   :  { %7931 = vmatpush3.bf16.msra.mxu0 %v8141_v29 }
 0xd87   :  { %7932 = vmatprep.subr.bf16.mxu0 %v8142_v32 }
 0xd89   :  { %7909 = vmatmul.mubr.bf16.gmra.mrb[160].mxu1 %v6174_v38 }
 0xd8a   :  { %7912 = vmatprep.mubr.bf16.mxu1 %v6175_v19  ;;  %7933 = vmatpush3.bf16.msra.mxu0 %v8142_v32 }
 0xd8b   :  { %7934 = vmatprep.subr.bf16.mxu0 %v8143_v16 }
 0xd8e   :  { %7935 = vmatpush3.bf16.msra.mxu0 %v8143_v16 }
 0xd8f   :  { %7936 = vmatprep.subr.bf16.mxu0 %v8144_v44 }
 0xd91   :  { %7913 = vmatmul.mubr.bf16.gmra.mrb[164].mxu1 %v6176_v1 }
 0xd92   :  { %7916 = vmatprep.mubr.bf16.mxu1 %v6177_v39  ;;  %7937 = vmatpush3.bf16.msra.mxu0 %v8144_v44 }
 0xd93   :  { %7938 = vmatprep.subr.bf16.mxu0 %v8145_v48 }
 0xd96   :  { %7939 = vmatpush3.bf16.msra.mxu0 %v8145_v48 }
 0xd99   :  { %7917 = vmatmul.mubr.bf16.gmra.mrb[168].mxu1 %v6178_v18 }
 0xd9a   :  { %7920 = vmatprep.mubr.bf16.mxu1 %v6179_v47 }
 0xda1   :  { %7921 = vmatmul.mubr.bf16.gmra.mrb[172].mxu1 %v6180_v62 }
 0xe3c   :  { %v7894_v43 = vpop.f32.mrb[144].mxu1 }
 0xe3d   :  { %v6263_v37 = vpop.f32.mrb[145].mxu1  ;;  %v6392_v26 = vadd.f32 %v7894_v43, %v12197_v12 }
 0xe3e   :  { %v6390_v17 = vadd.f32 %v6263_v37, %v12193_v13  ;;  %v7895_v30 = vpop.f32.mrb[146].mxu1 }
 0xe3f   :  { %v6393_v21 = vadd.f32 %v7895_v30, %v12203_v10  ;;  %v6266_v57 = vpop.f32.mrb[147].mxu1  ;;  %v13037_v50 = vadd.f32 %v13027_v46, %v6392_v26 }
 0xe40   :  { %v13033_v53 = vadd.f32 %v13027_v46, %v6390_v17  ;;  %v6391_v7 = vadd.f32 %v6266_v57, %v12200_v58  ;;  %v13912_v57 = vld [vmem:[#allocation20_spill] sm:$0xff] }
 0xe41   :  { %v13043_v13 = vadd.f32 %v13027_v46, %v6393_v21  ;;  %v6501_v23 = vmul.f32 %v13037_v50, %v13037_v50 }
 0xe42   :  { %v13040_v6 = vadd.f32 %v13027_v46, %v6391_v7  ;;  %v6499_v12 = vmul.f32 %v13033_v53, %v13033_v53 }
 0xe43   :  { %v6502_v22 = vmul.f32 %v13043_v13, %v13043_v13 }
 0xe44   :  { %v6462_v10 = vadd.f32 %v13040_v6, %v13033_v53  ;;  %v6500_v5 = vmul.f32 %v13040_v6, %v13040_v6  ;;  %v7898_v58 = vpop.f32.mrb[148].mxu1 }
 0xe45   :  { %v6396_v27 = vadd.f32 %v7898_v58, %v12225_v55  ;;  %v6279_v4 = vpop.f32.mrb[149].mxu1 }
 0xe46   :  { %v6463_v56 = vadd.f32 %v6462_v10, %v13037_v50  ;;  %v6531_v38 = vadd.f32 %v6500_v5, %v6499_v12  ;;  %v6394_v20 = vadd.f32 %v6279_v4, %v12220_v42  ;;  %v7899_v63 = vpop.f32.mrb[150].mxu1 }
 0xe47   :  { %v6397_v19 = vadd.f32 %v7899_v63, %v12234_v0  ;;  %v6282_v35 = vpop.f32.mrb[151].mxu1  ;;  %v13065_v3 = vadd.f32 %v13027_v46, %v6396_v27  ;;  %v13913_v27 = vld [vmem:[#allocation18_spill] sm:$0xff] }
 0xe48   :  { %v6532_v36 = vadd.f32 %v6531_v38, %v6501_v23  ;;  %v13060_v31 = vadd.f32 %v13027_v46, %v6394_v20  ;;  %v6464_v55 = vadd.f32 %v6463_v56, %v13043_v13  ;;  %v6395_v40 = vadd.f32 %v6282_v35, %v13907_v25  ;;  %v13914_v38 = vld [vmem:[#allocation21_spill] sm:$0xff] }
 0xe49   :  { %v13074_v14 = vadd.f32 %v13027_v46, %v6397_v19  ;;  %v6505_v34 = vmul.f32 %v13065_v3, %v13065_v3 }
 0xe4a   :  { %v6465_v42 = vadd.f32 %v6464_v55, %v13060_v31  ;;  %v6503_v2 = vmul.f32 %v13060_v31, %v13060_v31  ;;  %v6533_v1 = vadd.f32 %v6532_v36, %v6502_v22  ;;  %v13071_v0 = vadd.f32 %v13027_v46, %v6395_v40  ;;  %v13915_v36 = vld [vmem:[#allocation19_spill] sm:$0xff] }
 0xe4b   :  { %v6506_v18 = vmul.f32 %v13074_v14, %v13074_v14 }
 0xe4c   :  { %v6534_v33 = vadd.f32 %v6533_v1, %v6503_v2  ;;  %v6466_v54 = vadd.f32 %v6465_v42, %v13071_v0  ;;  %v6504_v59 = vmul.f32 %v13071_v0, %v13071_v0  ;;  %v7902_v11 = vpop.f32.mrb[152].mxu1 }
 0xe4d   :  { %v6400_v41 = vadd.f32 %v7902_v11, %v13908_v51  ;;  %v6295_v49 = vpop.f32.mrb[153].mxu1 }
 0xe4e   :  { %v6467_v9 = vadd.f32 %v6466_v54, %v13065_v3  ;;  %v6535_v39 = vadd.f32 %v6534_v33, %v6504_v59  ;;  %v6398_v15 = vadd.f32 %v6295_v49, %v13909_v8  ;;  %v7903_v61 = vpop.f32.mrb[154].mxu1 }
 0xe4f   :  { %v6401_v47 = vadd.f32 %v7903_v61, %v13910_v52  ;;  %v6298_v28 = vpop.f32.mrb[155].mxu1  ;;  %v13093_v32 = vadd.f32 %v13027_v46, %v6400_v41  ;;  %v13916_v41 = vld [vmem:[#allocation24_spill] sm:$0xff] }
 0xe50   :  { %v6536_v62 = vadd.f32 %v6535_v39, %v6505_v34  ;;  %v13088_v60 = vadd.f32 %v13027_v46, %v6398_v15  ;;  %v6468_v45 = vadd.f32 %v6467_v9, %v13074_v14  ;;  %v6399_v29 = vadd.f32 %v6298_v28, %v13911_v24  ;;  %v13917_v15 = vld [vmem:[#allocation22_spill] sm:$0xff] }
 0xe51   :  { %v13102_v37 = vadd.f32 %v13027_v46, %v6401_v47  ;;  %v6509_v10 = vmul.f32 %v13093_v32, %v13093_v32  ;;  %v13918_v47 = vld [vmem:[#allocation25_spill] sm:$0xff] }
 0xe52   :  { %v6469_v16 = vadd.f32 %v6468_v45, %v13088_v60  ;;  %v6507_v44 = vmul.f32 %v13088_v60, %v13088_v60  ;;  %v6537_v48 = vadd.f32 %v6536_v62, %v6506_v18  ;;  %v13099_v43 = vadd.f32 %v13027_v46, %v6399_v29 }
 0xe53   :  { %v6510_v56 = vmul.f32 %v13102_v37, %v13102_v37 }
 0xe54   :  { %v6538_v26 = vadd.f32 %v6537_v48, %v6507_v44  ;;  %v6470_v17 = vadd.f32 %v6469_v16, %v13099_v43  ;;  %v6508_v30 = vmul.f32 %v13099_v43, %v13099_v43  ;;  %v7906_v21 = vpop.f32.mrb[156].mxu1  ;;  %v13919_v16 = vld [vmem:[#allocation23_spill] sm:$0xff] }
 0xe55   :  { %v6404_v7 = vadd.f32 %v7906_v21, %v13912_v57  ;;  %v6311_v12 = vpop.f32.mrb[157].mxu1 }
 0xe56   :  { %v6471_v5 = vadd.f32 %v6470_v17, %v13093_v32  ;;  %v6539_v58 = vadd.f32 %v6538_v26, %v6508_v30  ;;  %v6402_v4 = vadd.f32 %v6311_v12, %v13913_v27  ;;  %v7907_v23 = vpop.f32.mrb[158].mxu1 }
 0xe57   :  { %v6405_v20 = vadd.f32 %v7907_v23, %v13914_v38  ;;  %v6314_v63 = vpop.f32.mrb[159].mxu1  ;;  %v13121_v25 = vadd.f32 %v13027_v46, %v6404_v7 }
 0xe58   :  { %v6540_v22 = vadd.f32 %v6539_v58, %v6509_v10  ;;  %v13116_v19 = vadd.f32 %v13027_v46, %v6402_v4  ;;  %v6472_v35 = vadd.f32 %v6471_v5, %v13102_v37  ;;  %v6403_v55 = vadd.f32 %v6314_v63, %v13915_v36  ;;  %v13920_v58 = vld [vmem:[#allocation28_spill] sm:$0xff]  ;;  %v13922_v36 = vld [vmem:[#allocation29_spill] sm:$0xff] }
 0xe59   :  { %v13130_v33 = vadd.f32 %v13027_v46, %v6405_v20  ;;  %v6513_v9 = vmul.f32 %v13121_v25, %v13121_v25  ;;  %v13921_v20 = vld [vmem:[#allocation26_spill] sm:$0xff] }
 0xe5a   :  { %v6473_v40 = vadd.f32 %v6472_v35, %v13116_v19  ;;  %v6511_v42 = vmul.f32 %v13116_v19, %v13116_v19  ;;  %v6541_v2 = vadd.f32 %v6540_v22, %v6510_v56  ;;  %v13127_v1 = vadd.f32 %v13027_v46, %v6403_v55 }
 0xe5b   :  { %v6514_v52 = vmul.f32 %v13130_v33, %v13130_v33 }
 0xe5c   :  { %v6542_v54 = vadd.f32 %v6541_v2, %v6511_v42  ;;  %v6474_v59 = vadd.f32 %v6473_v40, %v13127_v1  ;;  %v6512_v11 = vmul.f32 %v13127_v1, %v13127_v1  ;;  %v7910_v51 = vpop.f32.mrb[160].mxu1 }
 0xe5d   :  { %v6408_v49 = vadd.f32 %v7910_v51, %v13916_v41  ;;  %v6327_v34 = vpop.f32.mrb[161].mxu1 }
 0xe5e   :  { %v6475_v39 = vadd.f32 %v6474_v59, %v13121_v25  ;;  %v6543_v8 = vadd.f32 %v6542_v54, %v6512_v11  ;;  %v6406_v61 = vadd.f32 %v6327_v34, %v13917_v15  ;;  %v7911_v18 = vpop.f32.mrb[162].mxu1  ;;  %v13923_v59 = vld [vmem:[#allocation27_spill] sm:$0xff] }
 0xe5f   :  { %v6409_v28 = vadd.f32 %v7911_v18, %v13918_v47  ;;  %v6330_v62 = vpop.f32.mrb[163].mxu1  ;;  %v13149_v48 = vadd.f32 %v13027_v46, %v6408_v49 }
 0xe60   :  { %v6544_v45 = vadd.f32 %v6543_v8, %v6513_v9  ;;  %v13144_v24 = vadd.f32 %v13027_v46, %v6406_v61  ;;  %v6476_v29 = vadd.f32 %v6475_v39, %v13130_v33  ;;  %v6407_v44 = vadd.f32 %v6330_v62, %v13919_v16  ;;  %v13925_v16 = vld [vmem:[#allocation30_spill] sm:$0xff] }
 0xe61   :  { %v13158_v57 = vadd.f32 %v13027_v46, %v6409_v28  ;;  %v6517_v23 = vmul.f32 %v13149_v48, %v13149_v48 }
 0xe62   :  { %v6477_v26 = vadd.f32 %v6476_v29, %v13144_v24  ;;  %v6515_v17 = vmul.f32 %v13144_v24, %v13144_v24  ;;  %v6545_v30 = vadd.f32 %v6544_v45, %v6514_v52  ;;  %v13155_v21 = vadd.f32 %v13027_v46, %v6407_v44  ;;  %v13924_v52 = vld [vmem:[#allocation32_spill] sm:$0xff] }
 0xe63   :  { %v6518_v35 = vmul.f32 %v13158_v57, %v13158_v57 }
 0xe64   :  { %v6546_v7 = vadd.f32 %v6545_v30, %v6515_v17  ;;  %v6478_v12 = vadd.f32 %v6477_v26, %v13155_v21  ;;  %v6516_v10 = vmul.f32 %v13155_v21, %v13155_v21  ;;  %v7914_v5 = vpop.f32.mrb[164].mxu1  ;;  %v13926_v30 = vld [vmem:[#allocation33_spill] sm:$0xff] }
 0xe65   :  { %v6412_v27 = vadd.f32 %v7914_v5, %v13920_v58  ;;  %v6343_v4 = vpop.f32.mrb[165].mxu1 }
 0xe66   :  { %v6479_v56 = vadd.f32 %v6478_v12, %v13149_v48  ;;  %v6547_v38 = vadd.f32 %v6546_v7, %v6516_v10  ;;  %v6410_v63 = vadd.f32 %v6343_v4, %v13921_v20  ;;  %v7915_v22 = vpop.f32.mrb[166].mxu1 }
 0xe67   :  { %v6413_v55 = vadd.f32 %v7915_v22, %v13922_v36  ;;  %v6346_v40 = vpop.f32.mrb[167].mxu1  ;;  %v13177_v51 = vadd.f32 %v13027_v46, %v6412_v27  ;;  %v13927_v27 = vld [vmem:[#allocation31_spill] sm:$0xff] }
 0xe68   :  { %v6548_v42 = vadd.f32 %v6547_v38, %v6517_v23  ;;  %v13172_v2 = vadd.f32 %v13027_v46, %v6410_v63  ;;  %v6480_v54 = vadd.f32 %v6479_v56, %v13158_v57  ;;  %v6411_v11 = vadd.f32 %v6346_v40, %v13923_v59 }
 0xe69   :  { %v13186_v39 = vadd.f32 %v13027_v46, %v6413_v55  ;;  %v6521_v62 = vmul.f32 %v13177_v51, %v13177_v51 }
 0xe6a   :  { %v6481_v41 = vadd.f32 %v6480_v54, %v13172_v2  ;;  %v6519_v49 = vmul.f32 %v13172_v2, %v13172_v2  ;;  %v6549_v34 = vadd.f32 %v6548_v42, %v6518_v35  ;;  %v13183_v9 = vadd.f32 %v13027_v46, %v6411_v11  ;;  %v13928_v42 = vld [vmem:[#allocation36_spill] sm:$0xff] }
 0xe6b   :  { %v6522_v17 = vmul.f32 %v13186_v39, %v13186_v39 }
 0xe6c   :  { %v6550_v8 = vadd.f32 %v6549_v34, %v6519_v49  ;;  %v6482_v15 = vadd.f32 %v6481_v41, %v13183_v9  ;;  %v6520_v61 = vmul.f32 %v13183_v9, %v13183_v9  ;;  %v7918_v18 = vpop.f32.mrb[168].mxu1  ;;  %v13929_v34 = vld [vmem:[#allocation34_spill] sm:$0xff] }
 0xe6d   :  { %v6416_v47 = vadd.f32 %v7918_v18, %v13924_v52  ;;  %v6359_v28 = vpop.f32.mrb[169].mxu1  ;;  %v13930_v18 = vld [vmem:[#allocation37_spill] sm:$0xff] }
 0xe6e   :  { %v6483_v45 = vadd.f32 %v6482_v15, %v13177_v51  ;;  %v6551_v29 = vadd.f32 %v6550_v8, %v6520_v61  ;;  %v6414_v44 = vadd.f32 %v6359_v28, %v13925_v16  ;;  %v7919_v26 = vpop.f32.mrb[170].mxu1 }
 0xe6f   :  { %v6417_v7 = vadd.f32 %v7919_v26, %v13926_v30  ;;  %v6362_v12 = vpop.f32.mrb[171].mxu1  ;;  %v13205_v23 = vadd.f32 %v13027_v46, %v6416_v47 }
 0xe70   :  { %v6552_v10 = vadd.f32 %v6551_v29, %v6521_v62  ;;  %v13200_v5 = vadd.f32 %v13027_v46, %v6414_v44  ;;  %v6484_v58 = vadd.f32 %v6483_v45, %v13186_v39  ;;  %v6415_v4 = vadd.f32 %v6362_v12, %v13927_v27  ;;  %v13931_v29 = vld [vmem:[#allocation35_spill] sm:$0xff] }
 0xe71   :  { %v13214_v22 = vadd.f32 %v13027_v46, %v6417_v7  ;;  %v6525_v11 = vmul.f32 %v13205_v23, %v13205_v23 }
 0xe72   :  { %v6485_v56 = vadd.f32 %v6484_v58, %v13200_v5  ;;  %v6523_v38 = vmul.f32 %v13200_v5, %v13200_v5  ;;  %v6553_v20 = vadd.f32 %v6552_v10, %v6522_v17  ;;  %v13211_v63 = vadd.f32 %v13027_v46, %v6415_v4 }
 0xe73   :  { %v6526_v61 = vmul.f32 %v13214_v22, %v13214_v22 }
 0xe74   :  { %v6554_v35 = vadd.f32 %v6553_v20, %v6523_v38  ;;  %v6486_v36 = vadd.f32 %v6485_v56, %v13211_v63  ;;  %v6524_v55 = vmul.f32 %v13211_v63, %v13211_v63  ;;  %v7922_v40 = vpop.f32.mrb[172].mxu1 }
 0xe75   :  { %v6420_v54 = vadd.f32 %v7922_v40, %v13928_v42  ;;  %v6375_v59 = vpop.f32.mrb[173].mxu1 }
 0xe76   :  { %v6487_v41 = vadd.f32 %v6486_v36, %v13205_v23  ;;  %v6555_v49 = vadd.f32 %v6554_v35, %v6524_v55  ;;  %v6418_v8 = vadd.f32 %v6375_v59, %v13929_v34  ;;  %v7923_v15 = vpop.f32.mrb[174].mxu1 }
 0xe77   :  { %v6421_v52 = vadd.f32 %v7923_v15, %v13930_v18  ;;  %v6378_v47 = vpop.f32.mrb[175].mxu1  ;;  %v13233_v44 = vadd.f32 %v13027_v46, %v6420_v54 }
 0xe78   :  { %v6556_v28 = vadd.f32 %v6555_v49, %v6525_v11  ;;  %v13228_v62 = vadd.f32 %v13027_v46, %v6418_v8  ;;  %v6488_v45 = vadd.f32 %v6487_v41, %v13214_v22  ;;  %v6419_v16 = vadd.f32 %v6378_v47, %v13931_v29 }
 0xe79   :  { %v13242_v10 = vadd.f32 %v13027_v46, %v6421_v52  ;;  %v6529_v4 = vmul.f32 %v13233_v44, %v13233_v44 }
 0xe7a   :  { %v6489_v26 = vadd.f32 %v6488_v45, %v13228_v62  ;;  %v6527_v17 = vmul.f32 %v13228_v62, %v13228_v62  ;;  %v6557_v30 = vadd.f32 %v6556_v28, %v6526_v61  ;;  %v13239_v7 = vadd.f32 %v13027_v46, %v6419_v16 }
 0xe7b   :  { %v6530_v20 = vmul.f32 %v13242_v10, %v13242_v10 }
 0xe7c   :  { %v6558_v12 = vadd.f32 %v6557_v30, %v6527_v17  ;;  %v6490_v58 = vadd.f32 %v6489_v26, %v13239_v7  ;;  %v6528_v27 = vmul.f32 %v13239_v7, %v13239_v7 }
 0xe7e   :  { %v6491_v56 = vadd.f32 %v6490_v58, %v13233_v44  ;;  %v6559_v38 = vadd.f32 %v6558_v12, %v6528_v27 }
 0xe80   :  { %v6492_v35 = vadd.f32 %v6491_v56, %v13242_v10  ;;  %v6560_v36 = vadd.f32 %v6559_v38, %v6529_v4 }
 0xe82   :  { %v6493_v55 = vrot.slane %v6492_v35, 4  ;;  %v6561_v46 = vadd.f32 %v6560_v36, %v6530_v20 }
 0xe84   :  { %v6494_v40 = vadd.f32 %v6493_v55, %v6492_v35  ;;  %v6562_v42 = vrot.slane %v6561_v46, 4 }
 0xe86   :  { %v6495_v54 = vrot.slane %v6494_v40, 2  ;;  %v6563_v59 = vadd.f32 %v6562_v42, %v6561_v46 }
 0xe88   :  { %v6496_v11 = vadd.f32 %v6495_v54, %v6494_v40  ;;  %v6564_v41 = vrot.slane %v6563_v59, 2 }
 0xe8a   :  { %v6497_v49 = vrot.slane %v6496_v11, 1  ;;  %v6565_v34 = vadd.f32 %v6564_v41, %v6563_v59 }
 0xe8c   :  { %v6498_v8 = vadd.f32 %v6497_v49, %v6496_v11  ;;  %v6566_v15 = vrot.slane %v6565_v34, 1 }
 0xe8e   :  { %v6567_v61 = vadd.f32 %v6566_v15, %v6565_v34  ;;  %v13253_v18 = vmul.f32 0.00390625, %v6498_v8 }
 0xe90   :  { %v6569_v52 = vmul.f32 0.00390625, %v6567_v61  ;;  %v6570_v47 = vmul.f32 %v13253_v18, %v13253_v18  ;;  %v6601_v28 = vsub.f32 %v13239_v7, %v13253_v18  ;;  %v6581_v29 = vsub.f32 %v13099_v43, %v13253_v18 }
 0xe91   :  { %v6583_v16 = vsub.f32 %v13102_v37, %v13253_v18  ;;  %v6584_v17 = vsub.f32 %v13116_v19, %v13253_v18  ;;  %v6585_v30 = vsub.f32 %v13127_v1, %v13253_v18  ;;  %v6586_v12 = vsub.f32 %v13121_v25, %v13253_v18 }
 0xe92   :  { %v6571_v45 = vsub.f32 %v6569_v52, %v6570_v47  ;;  %v6587_v7 = vsub.f32 %v13130_v33, %v13253_v18  ;;  %v6588_v58 = vsub.f32 %v13144_v24, %v13253_v18  ;;  %v6589_v43 = vsub.f32 %v13155_v21, %v13253_v18 }
 0xe93   :  { %v6590_v37 = vsub.f32 %v13149_v48, %v13253_v18  ;;  %v6591_v19 = vsub.f32 %v13158_v57, %v13253_v18  ;;  %v6592_v1 = vsub.f32 %v13172_v2, %v13253_v18  ;;  %v6593_v25 = vsub.f32 %v13183_v9, %v13253_v18 }
 0xe94   :  { %v6604_v26 = vadd.f32 1e-05, %v6571_v45  ;;  %v6594_v33 = vsub.f32 %v13177_v51, %v13253_v18  ;;  %v6595_v24 = vsub.f32 %v13186_v39, %v13253_v18  ;;  %v6596_v21 = vsub.f32 %v13200_v5, %v13253_v18  ;;  %v7169_v5 = vld [vmem:[%s13501_s1 + $0x14] sm:$0x3] }
 0xe95   :  { %v6597_v48 = vsub.f32 %v13211_v63, %v13253_v18  ;;  %v6598_v57 = vsub.f32 %v13205_v23, %v13253_v18  ;;  %v6599_v2 = vsub.f32 %v13214_v22, %v13253_v18  ;;  %v6600_v9 = vsub.f32 %v13228_v62, %v13253_v18  ;;  %v7170_v23 = vld [vmem:[%s13502_s2 + $0x14] sm:$0x3]  ;;  %v13932_v63 = vld [vmem:[#allocation12_spill] sm:$0xff] }
 0xe96   :  { %8166 = vrsqrt.f32 %v6604_v26  ;;  %v6602_v51 = vsub.f32 %v13233_v44, %v13253_v18  ;;  %v6603_v39 = vsub.f32 %v13242_v10, %v13253_v18  ;;  %v13308_v27 = vrot.slane %v7169_v5, %v13932_v63  ;;  %v13933_v10 = vld [vmem:[#allocation11_spill] sm:$0xff] }
 0xe97   :  { %v13311_v22 = vrot.slane %v7170_v23, %v13932_v63  ;;  %v6572_v62 = vsub.f32 %v13033_v53, %v13253_v18  ;;  %v6573_v44 = vsub.f32 %v13040_v6, %v13253_v18  ;;  %v13318_v4 = vrot.slane %v7169_v5, %v13933_v10 }
 0xe98   :  { %v13321_v56 = vrot.slane %v7170_v23, %v13933_v10  ;;  %v6574_v38 = vsub.f32 %v13037_v50, %v13253_v18  ;;  %v6575_v20 = vsub.f32 %v13043_v13, %v13253_v18  ;;  %v6576_v35 = vsub.f32 %v13060_v31, %v13253_v18 }
 0xe99   :  { %v6577_v53 = vsub.f32 %v13071_v0, %v13253_v18  ;;  %v6578_v6 = vsub.f32 %v13065_v3, %v13253_v18  ;;  %v6579_v55 = vsub.f32 %v13074_v14, %v13253_v18  ;;  %v6580_v46 = vsub.f32 %v13088_v60, %v13253_v18 }
 0xe9a   :  { %v6582_v50 = vsub.f32 %v13093_v32, %v13253_v18 }
 0xea0   :  { %v8167_v36 = vpop.eup %8166 }
 0xea1   :  { %v13339_v13 = vmul.f32 %v8167_v36, %v6601_v28  ;;  %v6606_v40 = vmul.f32 %v8167_v36, %v6572_v62  ;;  %v6607_v31 = vmul.f32 %v8167_v36, %v6573_v44  ;;  %v6608_v42 = vmul.f32 %v8167_v36, %v6574_v38 }
 0xea2   :  { %v6609_v54 = vmul.f32 %v8167_v36, %v6575_v20  ;;  %v6610_v0 = vmul.f32 %v8167_v36, %v6576_v35  ;;  %v6611_v59 = vmul.f32 %v8167_v36, %v6577_v53  ;;  %v6612_v11 = vmul.f32 %v8167_v36, %v6578_v6 }
 0xea3   :  { %v6613_v41 = vmul.f32 %v8167_v36, %v6579_v55  ;;  %v6614_v3 = vmul.f32 %v8167_v36, %v6580_v46  ;;  %v6615_v49 = vmul.f32 %v8167_v36, %v6581_v29  ;;  %v6616_v34 = vmul.f32 %v8167_v36, %v6582_v50 }
 0xea4   :  { %v6617_v14 = vmul.f32 %v8167_v36, %v6583_v16  ;;  %v6618_v8 = vmul.f32 %v8167_v36, %v6584_v17  ;;  %v6619_v15 = vmul.f32 %v8167_v36, %v6585_v30  ;;  %v6620_v60 = vmul.f32 %v8167_v36, %v6586_v12 }
 0xea5   :  { %v6621_v61 = vmul.f32 %v8167_v36, %v6587_v7  ;;  %v13341_v52 = vmul.f32 %v8167_v36, %v6588_v58  ;;  %v13343_v32 = vmul.f32 %v8167_v36, %v6589_v43  ;;  %v13345_v18 = vmul.f32 %v8167_v36, %v6590_v37 }
 0xea6   :  { %v13347_v47 = vmul.f32 %v8167_v36, %v6591_v19  ;;  %v13349_v28 = vmul.f32 %v8167_v36, %v6592_v1  ;;  %v13351_v45 = vmul.f32 %v8167_v36, %v6593_v25  ;;  %v13353_v26 = vmul.f32 %v8167_v36, %v6594_v33 }
 0xea7   :  { %v13355_v29 = vmul.f32 %v8167_v36, %v6595_v24  ;;  %v13357_v16 = vmul.f32 %v8167_v36, %v6596_v21  ;;  %v13359_v17 = vmul.f32 %v8167_v36, %v6597_v48  ;;  %v13361_v30 = vmul.f32 %v8167_v36, %v6598_v57 }
 0xea8   :  { %v13363_v12 = vmul.f32 %v8167_v36, %v6599_v2  ;;  %v13365_v7 = vmul.f32 %v8167_v36, %v6600_v9  ;;  %v13367_v58 = vmul.f32 %v8167_v36, %v6602_v51  ;;  %v13369_v43 = vmul.f32 %v8167_v36, %v6603_v39 }
 0xea9   :  { %v6648_v37 = vmul.f32 %v13308_v27, %v6608_v42  ;;  %v6649_v19 = vmul.f32 %v13308_v27, %v6609_v54  ;;  %v6646_v1 = vmul.f32 %v13308_v27, %v6606_v40  ;;  %v6647_v25 = vmul.f32 %v13308_v27, %v6607_v31 }
 0xeaa   :  { %v6650_v33 = vmul.f32 %v13308_v27, %v6610_v0  ;;  %v6651_v24 = vmul.f32 %v13308_v27, %v6611_v59  ;;  %v6652_v21 = vmul.f32 %v13308_v27, %v6612_v11  ;;  %v6653_v48 = vmul.f32 %v13308_v27, %v6613_v41 }
 0xeab   :  { %v6668_v57 = vadd.f32 %v13311_v22, %v6648_v37  ;;  %v6669_v2 = vadd.f32 %v13311_v22, %v6649_v19  ;;  %v6666_v9 = vadd.f32 %v13311_v22, %v6646_v1  ;;  %v6667_v51 = vadd.f32 %v13311_v22, %v6647_v25 }
 0xeac   :  { %v6670_v39 = vadd.f32 %v13311_v22, %v6650_v33  ;;  %v6671_v5 = vadd.f32 %v13311_v22, %v6651_v24  ;;  %v6672_v23 = vadd.f32 %v13311_v22, %v6652_v21  ;;  %v6673_v63 = vadd.f32 %v13311_v22, %v6653_v48 }
 0xead   :  { %v6684_v62 = vmax.f32 %v6668_v57, 0.0  ;;  %v6685_v44 = vmax.f32 %v6669_v2, 0.0  ;;  %v6682_v10 = vmax.f32 %v6666_v9, 0.0  ;;  %v6683_v38 = vmax.f32 %v6667_v51, 0.0 }
 0xeae   :  { %v6686_v20 = vmax.f32 %v6670_v39, 0.0  ;;  %v6687_v35 = vmax.f32 %v6671_v5, 0.0  ;;  %v6688_v53 = vmax.f32 %v6672_v23, 0.0  ;;  %v6689_v36 = vmax.f32 %v6673_v63, 0.0 }
 0xeaf   :  { %v6770_v6 = vpack.c.bf16 %v6683_v38, %v6682_v10  ;;  %v6771_v55 = vpack.c.bf16 %v6685_v44, %v6684_v62  ;;  %v6654_v46 = vmul.f32 %v13308_v27, %v6614_v3  ;;  %v6655_v50 = vmul.f32 %v13308_v27, %v6615_v49 }
 0xeb0   :  { %v6772_v40 = vpack.c.bf16 %v6687_v35, %v6686_v20  ;;  %v6773_v31 = vpack.c.bf16 %v6689_v36, %v6688_v53  ;;  %v6656_v42 = vmul.f32 %v13308_v27, %v6616_v34  ;;  %v6657_v54 = vmul.f32 %v13308_v27, %v6617_v14 }
 0xeb1   :  { %7940 = vmatprep.mubr.bf16.mxu0 %v6770_v6  ;;  %v6674_v0 = vadd.f32 %v13311_v22, %v6654_v46  ;;  %v6675_v59 = vadd.f32 %v13311_v22, %v6655_v50  ;;  %v6658_v11 = vmul.f32 %v13308_v27, %v6618_v8  ;;  %v6659_v41 = vmul.f32 %v13308_v27, %v6619_v15 }
 0xeb2   :  { %7941 = vmatmul.mubr.bf16.vlgmr.msra.gmra.mrb[144].mxu0 %v6771_v55  ;;  %v6676_v3 = vadd.f32 %v13311_v22, %v6656_v42  ;;  %v6677_v49 = vadd.f32 %v13311_v22, %v6657_v54  ;;  %v6660_v37 = vmul.f32 %v13308_v27, %v6620_v60  ;;  %v6661_v34 = vmul.f32 %v13308_v27, %v6621_v61 }
 0xeb3   :  { %7944 = vmatprep.mubr.bf16.mxu0 %v6772_v40  ;;  %v6690_v14 = vmax.f32 %v6674_v0, 0.0  ;;  %v6691_v19 = vmax.f32 %v6675_v59, 0.0  ;;  %v6678_v1 = vadd.f32 %v13311_v22, %v6658_v11  ;;  %v6679_v25 = vadd.f32 %v13311_v22, %v6659_v41 }
 0xeb4   :  { %v6692_v33 = vmax.f32 %v6676_v3, 0.0  ;;  %v6693_v8 = vmax.f32 %v6677_v49, 0.0  ;;  %v6680_v15 = vadd.f32 %v13311_v22, %v6660_v37  ;;  %v6681_v24 = vadd.f32 %v13311_v22, %v6661_v34 }
 0xeb5   :  { %v6774_v21 = vpack.c.bf16 %v6691_v19, %v6690_v14  ;;  %v6694_v48 = vmax.f32 %v6678_v1, 0.0  ;;  %v6695_v57 = vmax.f32 %v6679_v25, 0.0  ;;  %v6702_v60 = vmul.f32 %v13318_v4, %v13341_v52 }
 0xeb6   :  { %v6775_v27 = vpack.c.bf16 %v6693_v8, %v6692_v33  ;;  %v6696_v61 = vmax.f32 %v6680_v15, 0.0  ;;  %v6697_v2 = vmax.f32 %v6681_v24, 0.0  ;;  %v6703_v9 = vmul.f32 %v13318_v4, %v13343_v32 }
 0xeb7   :  { %v6776_v51 = vpack.c.bf16 %v6695_v57, %v6694_v48  ;;  %v6722_v39 = vadd.f32 %v13321_v56, %v6702_v60  ;;  %v6704_v5 = vmul.f32 %v13318_v4, %v13345_v18  ;;  %v6705_v22 = vmul.f32 %v13318_v4, %v13347_v47 }
 0xeb8   :  { %v6777_v23 = vpack.c.bf16 %v6697_v2, %v6696_v61  ;;  %v6723_v63 = vadd.f32 %v13321_v56, %v6703_v9  ;;  %v6706_v52 = vmul.f32 %v13318_v4, %v13349_v28  ;;  %v6707_v62 = vmul.f32 %v13318_v4, %v13351_v45 }
 0xeb9   :  { %v6738_v44 = vmax.f32 %v6722_v39, 0.0  ;;  %v6724_v32 = vadd.f32 %v13321_v56, %v6704_v5  ;;  %v6725_v10 = vadd.f32 %v13321_v56, %v6705_v22  ;;  %v6708_v18 = vmul.f32 %v13318_v4, %v13353_v26 }
 0xeba   :  { %7945 = vmatmul.mubr.bf16.gmra.mrb[148].mxu0 %v6773_v31  ;;  %v6739_v38 = vmax.f32 %v6723_v63, 0.0  ;;  %v6726_v47 = vadd.f32 %v13321_v56, %v6706_v52  ;;  %v6727_v20 = vadd.f32 %v13321_v56, %v6707_v62  ;;  %v6709_v28 = vmul.f32 %v13318_v4, %v13355_v29 }
 0xebb   :  { %7948 = vmatprep.mubr.bf16.mxu0 %v6774_v21  ;;  %v6740_v35 = vmax.f32 %v6724_v32, 0.0  ;;  %v6741_v45 = vmax.f32 %v6725_v10, 0.0  ;;  %v6728_v53 = vadd.f32 %v13321_v56, %v6708_v18  ;;  %v6710_v36 = vmul.f32 %v13318_v4, %v13357_v16 }
 0xebc   :  { %v6778_v6 = vpack.c.bf16 %v6739_v38, %v6738_v44  ;;  %v6742_v55 = vmax.f32 %v6726_v47, 0.0  ;;  %v6743_v26 = vmax.f32 %v6727_v20, 0.0  ;;  %v6729_v46 = vadd.f32 %v13321_v56, %v6709_v28 }
 0xebd   :  { %v6779_v50 = vpack.c.bf16 %v6741_v45, %v6740_v35  ;;  %v6744_v40 = vmax.f32 %v6728_v53, 0.0  ;;  %v6711_v31 = vmul.f32 %v13318_v4, %v13359_v17  ;;  %v6730_v29 = vadd.f32 %v13321_v56, %v6710_v36 }
 0xebe   :  { %v6780_v42 = vpack.c.bf16 %v6743_v26, %v6742_v55  ;;  %v6745_v54 = vmax.f32 %v6729_v46, 0.0  ;;  %v6712_v0 = vmul.f32 %v13318_v4, %v13361_v30  ;;  %v6713_v16 = vmul.f32 %v13318_v4, %v13363_v12 }
 0xebf   :  { %v6731_v59 = vadd.f32 %v13321_v56, %v6711_v31  ;;  %v6746_v11 = vmax.f32 %v6730_v29, 0.0  ;;  %v6714_v41 = vmul.f32 %v13318_v4, %v13365_v7  ;;  %v6715_v3 = vmul.f32 %v13318_v4, %v13339_v13 }
 0xec0   :  { %v6781_v17 = vpack.c.bf16 %v6745_v54, %v6744_v40  ;;  %v6732_v49 = vadd.f32 %v13321_v56, %v6712_v0  ;;  %v6733_v37 = vadd.f32 %v13321_v56, %v6713_v16  ;;  %v6716_v30 = vmul.f32 %v13318_v4, %v13367_v58 }
 0xec1   :  { %v6747_v34 = vmax.f32 %v6731_v59, 0.0  ;;  %v6734_v12 = vadd.f32 %v13321_v56, %v6714_v41  ;;  %v6735_v14 = vadd.f32 %v13321_v56, %v6715_v3  ;;  %v6717_v19 = vmul.f32 %v13318_v4, %v13369_v43  ;;  %v13454_v4 = vld [vmem:[%s13510_s10] ss:$0 sm:$0xff]  ;;  %s8247_s10 = smov [#allocation7]  }
 0xec2   :  { %7949 = vmatmul.mubr.bf16.gmra.mrb[152].mxu0 %v6775_v27  ;;  %v6748_v7 = vmax.f32 %v6732_v49, 0.0  ;;  %v6749_v1 = vmax.f32 %v6733_v37, 0.0  ;;  %v6736_v13 = vadd.f32 %v13321_v56, %v6716_v30  ;;  %s7039_s29 = sshll.u32 %s8247_s10, 4  ;;  %s7040_s29 = int_to_ptr.vmem [resolvable:$true] %s7039_s29 }
 0xec3   :  { %7952 = vmatprep.mubr.bf16.mxu0 %v6776_v51  ;;  %v6782_v25 = vpack.c.bf16 %v6747_v34, %v6746_v11  ;;  %v6750_v33 = vmax.f32 %v6734_v12, 0.0  ;;  %v6751_v8 = vmax.f32 %v6735_v14, 0.0  ;;  %v6737_v15 = vadd.f32 %v13321_v56, %v6717_v19  ;;  %s8212_s6 = scalar_lea.vmem %s7040_s29, 4096  ;;  %p8217_p3 = scmp.lt.s32.totalorder %s7040_s29, %s7040_s29 }
 0xec4   :  { %v6783_v58 = vpack.c.bf16 %v6749_v1, %v6748_v7  ;;  %v6752_v24 = vmax.f32 %v6736_v13, 0.0  ;;  %p8213_p2 = scmp.ne.s32.totalorder %s7040_s29, %s8212_s6  ;;  %p8218_p4 = scmp.lt.s32.totalorder %s8212_s6, %s8212_s6 }
 0xec5   :  { %v6784_v21 = vpack.c.bf16 %v6751_v8, %v6750_v33  ;;  %v6753_v48 = vmax.f32 %v6737_v15, 0.0 }
 0xec6   :  { %p8219_p5 = por %p8218_p4, %p8217_p3 }
 0xec7   :  { %v6785_v57 = vpack.c.bf16 %v6753_v48, %v6752_v24 }
 0xec8   :  { %p8220_p6 = pnand %p8219_p5, %p8213_p2 }
 0xeca   :  { %7953 = vmatmul.mubr.bf16.gmra.mrb[156].mxu0 %v6777_v23 }
 0xecb   :  { %7956 = vmatprep.mubr.bf16.mxu0 %v6778_v6 }
 0xed2   :  { %7957 = vmatmul.mubr.bf16.gmra.mrb[160].mxu0 %v6779_v50 }
 0xed3   :  { %7960 = vmatprep.mubr.bf16.mxu0 %v6780_v42 }
 0xeda   :  { %7961 = vmatmul.mubr.bf16.gmra.mrb[164].mxu0 %v6781_v17 }
 0xedb   :  { %7964 = vmatprep.mubr.bf16.mxu0 %v6782_v25 }
 0xee2   :  { %7965 = vmatmul.mubr.bf16.gmra.mrb[168].mxu0 %v6783_v58 }
 0xee3   :  { %7968 = vmatprep.mubr.bf16.mxu0 %v6784_v21 }
 0xeea   :  { %7969 = vmatmul.mubr.bf16.gmra.mrb[172].mxu0 %v6785_v57 }
 0xf85   :  { %v7942_v56 = vpop.f32.mrb[144].mxu0 }
 0xf86   :  { %v6884_v43 = vadd.f32 %v7942_v56, %v13454_v4  ;;  %v6875_v60 = vpop.f32.mrb[145].mxu0 }
 0xf87   :  { %v6876_v27 = vadd.f32 %v13454_v4, %v6875_v60  ;;  %v7943_v61 = vpop.f32.mrb[146].mxu0 }
 0xf88   :  { %7004 = vst [vmem:[#allocation7 + $0x10] sm:$0xff] %v6884_v43  ;;  %v6887_v2 = vadd.f32 %v7943_v61, %v13454_v4  ;;  %v6878_v9 = vpop.f32.mrb[147].mxu0 }
 0xf89   :  { %7002 = vst [vmem:[#allocation7] sm:$0xff] %v6876_v27  ;;  %v6879_v51 = vadd.f32 %v13454_v4, %v6878_v9 }
 0xf8a   :  { %7005 = vst [vmem:[#allocation7 + $0x18] sm:$0xff] %v6887_v2 }
 0xf8b   :  { %7003 = vst [vmem:[#allocation7 + $0x8] sm:$0xff] %v6879_v51 }
 0xf8d   :  { %v7946_v39 = vpop.f32.mrb[148].mxu0 }
 0xf8e   :  { %v6900_v5 = vadd.f32 %v7946_v39, %v13454_v4  ;;  %v6891_v22 = vpop.f32.mrb[149].mxu0 }
 0xf8f   :  { %v6892_v23 = vadd.f32 %v13454_v4, %v6891_v22  ;;  %v7947_v63 = vpop.f32.mrb[150].mxu0 }
 0xf90   :  { %7008 = vst [vmem:[#allocation7 + $0x30] sm:$0xff] %v6900_v5  ;;  %v6903_v52 = vadd.f32 %v7947_v63, %v13454_v4  ;;  %v6894_v62 = vpop.f32.mrb[151].mxu0 }
 0xf91   :  { %7006 = vst [vmem:[#allocation7 + $0x20] sm:$0xff] %v6892_v23  ;;  %v6895_v44 = vadd.f32 %v13454_v4, %v6894_v62 }
 0xf92   :  { %7009 = vst [vmem:[#allocation7 + $0x38] sm:$0xff] %v6903_v52 }
 0xf93   :  { %7007 = vst [vmem:[#allocation7 + $0x28] sm:$0xff] %v6895_v44 }
 0xf95   :  { %v7950_v32 = vpop.f32.mrb[152].mxu0 }
 0xf96   :  { %v6916_v10 = vadd.f32 %v7950_v32, %v13454_v4  ;;  %v6907_v18 = vpop.f32.mrb[153].mxu0 }
 0xf97   :  { %v6908_v38 = vadd.f32 %v13454_v4, %v6907_v18  ;;  %v7951_v47 = vpop.f32.mrb[154].mxu0 }
 0xf98   :  { %7012 = vst [vmem:[#allocation7 + $0x50] sm:$0xff] %v6916_v10  ;;  %v6919_v20 = vadd.f32 %v7951_v47, %v13454_v4  ;;  %v6910_v28 = vpop.f32.mrb[155].mxu0 }
 0xf99   :  { %7010 = vst [vmem:[#allocation7 + $0x40] sm:$0xff] %v6908_v38  ;;  %v6911_v35 = vadd.f32 %v13454_v4, %v6910_v28 }
 0xf9a   :  { %7013 = vst [vmem:[#allocation7 + $0x58] sm:$0xff] %v6919_v20 }
 0xf9b   :  { %7011 = vst [vmem:[#allocation7 + $0x48] sm:$0xff] %v6911_v35 }
 0xf9d   :  { %v7954_v45 = vpop.f32.mrb[156].mxu0 }
 0xf9e   :  { %v6932_v53 = vadd.f32 %v7954_v45, %v13454_v4  ;;  %v6923_v36 = vpop.f32.mrb[157].mxu0 }
 0xf9f   :  { %v6924_v6 = vadd.f32 %v13454_v4, %v6923_v36  ;;  %v7955_v55 = vpop.f32.mrb[158].mxu0 }
 0xfa0   :  { %7016 = vst [vmem:[#allocation7 + $0x70] sm:$0xff] %v6932_v53  ;;  %v6935_v26 = vadd.f32 %v7955_v55, %v13454_v4  ;;  %v6926_v46 = vpop.f32.mrb[159].mxu0 }
 0xfa1   :  { %7014 = vst [vmem:[#allocation7 + $0x60] sm:$0xff] %v6924_v6  ;;  %v6927_v50 = vadd.f32 %v13454_v4, %v6926_v46 }
 0xfa2   :  { %7017 = vst [vmem:[#allocation7 + $0x78] sm:$0xff] %v6935_v26 }
 0xfa3   :  { %7015 = vst [vmem:[#allocation7 + $0x68] sm:$0xff] %v6927_v50 }
 0xfa5   :  { %v7958_v40 = vpop.f32.mrb[160].mxu0 }
 0xfa6   :  { %v6948_v31 = vadd.f32 %v7958_v40, %v13454_v4  ;;  %v6939_v29 = vpop.f32.mrb[161].mxu0 }
 0xfa7   :  { %v6940_v42 = vadd.f32 %v13454_v4, %v6939_v29  ;;  %v7959_v54 = vpop.f32.mrb[162].mxu0 }
 0xfa8   :  { %7020 = vst [vmem:[#allocation7 + $0x90] sm:$0xff] %v6948_v31  ;;  %v6951_v0 = vadd.f32 %v7959_v54, %v13454_v4  ;;  %v6942_v16 = vpop.f32.mrb[163].mxu0 }
 0xfa9   :  { %7018 = vst [vmem:[#allocation7 + $0x80] sm:$0xff] %v6940_v42  ;;  %v6943_v59 = vadd.f32 %v13454_v4, %v6942_v16 }
 0xfaa   :  { %7021 = vst [vmem:[#allocation7 + $0x98] sm:$0xff] %v6951_v0 }
 0xfab   :  { %7019 = vst [vmem:[#allocation7 + $0x88] sm:$0xff] %v6943_v59 }
 0xfad   :  { %v7962_v11 = vpop.f32.mrb[164].mxu0 }
 0xfae   :  { %v6964_v41 = vadd.f32 %v7962_v11, %v13454_v4  ;;  %v6955_v3 = vpop.f32.mrb[165].mxu0 }
 0xfaf   :  { %v6956_v17 = vadd.f32 %v13454_v4, %v6955_v3  ;;  %v7963_v49 = vpop.f32.mrb[166].mxu0 }
 0xfb0   :  { %7024 = vst [vmem:[#allocation7 + $0xb0] sm:$0xff] %v6964_v41  ;;  %v6967_v37 = vadd.f32 %v7963_v49, %v13454_v4  ;;  %v6958_v30 = vpop.f32.mrb[167].mxu0 }
 0xfb1   :  { %7022 = vst [vmem:[#allocation7 + $0xa0] sm:$0xff] %v6956_v17  ;;  %v6959_v34 = vadd.f32 %v13454_v4, %v6958_v30 }
 0xfb2   :  { %7025 = vst [vmem:[#allocation7 + $0xb8] sm:$0xff] %v6967_v37 }
 0xfb3   :  { %7023 = vst [vmem:[#allocation7 + $0xa8] sm:$0xff] %v6959_v34 }
 0xfb5   :  { %v7966_v12 = vpop.f32.mrb[168].mxu0 }
 0xfb6   :  { %v6980_v14 = vadd.f32 %v7966_v12, %v13454_v4  ;;  %v6971_v19 = vpop.f32.mrb[169].mxu0 }
 0xfb7   :  { %v6972_v7 = vadd.f32 %v13454_v4, %v6971_v19  ;;  %v7967_v1 = vpop.f32.mrb[170].mxu0 }
 0xfb8   :  { %7028 = vst [vmem:[#allocation7 + $0xd0] sm:$0xff] %v6980_v14  ;;  %v6983_v13 = vadd.f32 %v7967_v1, %v13454_v4  ;;  %v6974_v25 = vpop.f32.mrb[171].mxu0 }
 0xfb9   :  { %7026 = vst [vmem:[#allocation7 + $0xc0] sm:$0xff] %v6972_v7  ;;  %v6975_v33 = vadd.f32 %v13454_v4, %v6974_v25 }
 0xfba   :  { %7029 = vst [vmem:[#allocation7 + $0xd8] sm:$0xff] %v6983_v13 }
 0xfbb   :  { %7027 = vst [vmem:[#allocation7 + $0xc8] sm:$0xff] %v6975_v33 }
 0xfbd   :  { %v7970_v8 = vpop.f32.mrb[172].mxu0 }
 0xfbe   :  { %v6996_v15 = vadd.f32 %v7970_v8, %v13454_v4  ;;  %v6987_v58 = vpop.f32.mrb[173].mxu0 }
 0xfbf   :  { %v6988_v24 = vadd.f32 %v13454_v4, %v6987_v58  ;;  %v7971_v21 = vpop.f32.mrb[174].mxu0 }
 0xfc0   :  { %7032 = vst [vmem:[#allocation7 + $0xf0] sm:$0xff] %v6996_v15  ;;  %v6999_v48 = vadd.f32 %v7971_v21, %v13454_v4  ;;  %v6990_v57 = vpop.f32.mrb[175].mxu0 }
 0xfc1   :  { %7030 = vst [vmem:[#allocation7 + $0xe0] sm:$0xff] %v6988_v24  ;;  %v6991_v56 = vadd.f32 %v13454_v4, %v6990_v57 }
 0xfc2   :  { %7033 = vst [vmem:[#allocation7 + $0xf8] sm:$0xff] %v6999_v48 }
 0xfc3   :  { %7031 = vst [vmem:[#allocation7 + $0xe8] sm:$0xff] %v6991_v56 }
 0xfc4   :  { %8223 = shalt.err (!%p8220_p6)
}
 0xfc5   :  { %s8224_s13 = scalar_lea.hbm %s13511_s11, 4096 }
 0xfc6   :  { %p8225_p7 = scmp.ne.s32.totalorder %s13511_s11, %s8224_s13  ;;  %p8228_p8 = scmp.lt.u32.totalorder %s8224_s13, %s13511_s11 }
 0xfc8   :  { %p8230_p9 = pnand %p8228_p8, %p8225_p7 }
 0xfca   :  { %8233 = shalt.err (!%p8230_p9)
}
 0xfcb   :  { %s8248_s19 = smov 128   ;;  %s8249_s3 = smov 8  }
 0xfcc   :  { %7045 = dma.vmem_to_hbm [thread:$0]  %s7040_s29, 4096, %s13511_s11, [#allocation4], %s8248_s19, %s8248_s19, %s8249_s3  }
 0xfcd   :  { %8238 = dma.done.wait [#allocation4], 4096  }
 0xfce   :  { %8239 = vsyncadd [#allocation4], 4294963200 }
 0xfcf   :  { %7049 = vsyncpa [#allocation3], 1 }
 0xfd0   :  { %7050 = vsyncpa [#allocation6], 1 }
 0xfd1   :  { %7051 = vsyncpa [#allocation4], 1 }

</bundles_post_ra>
